<compile_context>
chip_gen: v6e
topology: v6e:2x2x1
jax: 0.10.0
libtpu: 0.0.40
codegen_flags: <defaults>
</compile_context>

<pallas_src>
import functools

import jax
import jax.numpy as jnp
from jax import lax
from jax.experimental import pallas as pl
from jax.experimental.pallas import tpu as pltpu

BN_EPS = 1e-5


# ------------------------------ Pallas kernel -------------------------------

def _decoder_kernel(x_ref, mh_ref, mw_ref,
                    wd1_ref, bd1_ref, wp1_ref, bp1_ref,
                    wd2_ref, bd2_ref, wp2_ref, bp2_ref,
                    wc_ref, o_ref,
                    *, th, win, hout, wout, w1, c0, c1, c2):
    th4 = th + 4          # upsample slab rows   (2-row halo each side)
    th2 = th + 2          # sep1-output slab rows (1-row halo each side)
    w0 = w1 + 2           # upsample slab width

    r = pl.program_id(1)
    row0 = r * th         # first final-output row covered by this tile

    mh = mh_ref[0]        # (th4, hin); zero rows encode halo / zero padding rows
    xcols = x_ref[0]      # (win, hin, c0)

    # ---- 1. bilinear x8 upsample (align_corners=True) of the haloed row slab ----
    # H interpolation: one small MXU dot per pre-upsample input column.
    # W interpolation: VPU outer-product accumulation (mw column x interpolated column).
    up = jnp.zeros((th4, w0, c0), jnp.float32)
    for w in range(win):
        col = jnp.dot(mh, xcols[w], preferred_element_type=jnp.float32)   # (th4, c0)
        up = up + mw_ref[w] * col[:, None, :]                             # (th4, w0, c0)

    # ---- 2. sep1: depthwise 3x3 (BN scale folded) + bias + ReLU ----
    acc1 = jnp.zeros((th2, w1, c0), jnp.float32)
    for dy in range(3):
        for dx in range(3):
            acc1 = acc1 + up[dy:dy + th2, dx:dx + w1, :] * wd1_ref[dy * 3 + dx]
    y1 = jnp.maximum(acc1 + bd1_ref[0], 0.0)
    # pointwise 1x1 (BN scale folded) on the MXU: bf16 operands, f32 accumulate
    z1 = jnp.dot(y1.reshape(th2 * w1, c0).astype(jnp.bfloat16), wp1_ref[...],
                 preferred_element_type=jnp.float32)
    z1 = jnp.maximum(z1 + bp1_ref[0], 0.0).reshape(th2, w1, c1)

    # Halo rows / columns of the z1 slab are sep2's zero padding, not sep1 output.
    rows = row0 - 1 + lax.broadcasted_iota(jnp.int32, (th2, 1, 1), 0)
    cols = -1 + lax.broadcasted_iota(jnp.int32, (1, w1, 1), 1)
    keep = (rows >= 0) & (rows < hout) & (cols >= 0) & (cols < wout)
    z1 = jnp.where(keep, z1, 0.0)

    # ---- 3. sep2: depthwise 3x3 + bias + ReLU, pointwise 1x1 + bias + ReLU ----
    acc2 = jnp.zeros((th, wout, c1), jnp.float32)
    for dy in range(3):
        for dx in range(3):
            acc2 = acc2 + z1[dy:dy + th, dx:dx + wout, :] * wd2_ref[dy * 3 + dx]
    y2 = jnp.maximum(acc2 + bd2_ref[0], 0.0)
    z2 = jnp.dot(y2.reshape(th * wout, c1).astype(jnp.bfloat16), wp2_ref[...],
                 preferred_element_type=jnp.float32)
    z2 = jnp.maximum(z2 + bp2_ref[0], 0.0).reshape(th, wout, c2)

    # ---- 4. final 1x1 conv (40 -> 1) + ReLU as a weighted channel sum;
    #         lane-dense (th, wout) store ----
    o_ref[0] = jnp.maximum(jnp.sum(z2 * wc_ref[0], axis=-1), 0.0)


# -------------------------------- JAX glue ----------------------------------

def _interp_matrix(out_size, in_size):
    """Row-stochastic matrix for 1-D bilinear resize with align_corners=True."""
    o = jnp.arange(out_size, dtype=jnp.float32)
    s = o * (in_size - 1) / (out_size - 1) if out_size > 1 else jnp.zeros_like(o)
    i0 = jnp.clip(jnp.floor(s), 0, in_size - 1).astype(jnp.int32)
    i1 = jnp.minimum(i0 + 1, in_size - 1)
    f = s - i0.astype(jnp.float32)
    return (jax.nn.one_hot(i0, in_size, dtype=jnp.float32) * (1.0 - f)[:, None]
            + jax.nn.one_hot(i1, in_size, dtype=jnp.float32) * f[:, None])


def _round_up(v, m):
    return ((v + m - 1) // m) * m


def decoder_spp_forward(x_nchw, kp, tile_h=None):
    """x_nchw: (N, 96, H, W) -> (N, 1, 8H, 8W), matching DecoderSPP.forward."""
    n, c0, hin, win = x_nchw.shape
    hout, wout = 8 * hin, 8 * win
    c1 = kp["sep1"]["wp"].shape[1]
    c2 = kp["sep2"]["wp"].shape[1]

    if tile_h is None:
        tile_h = 32
    th = tile_h if (hout % tile_h == 0 and tile_h % 8 == 0 and tile_h <= hout) else hout
    nt = hout // th
    w1 = _round_up(wout + 2, 8)     # sep1-output slab width (8-aligned)
    w0 = w1 + 2                     # upsample slab width

    # NCHW -> (N, Win, Hin, C): the kernel H-interpolates one input column at a time.
    xt = jnp.transpose(x_nchw, (0, 3, 2, 1)).astype(jnp.float32)

    # Per-tile H-interpolation rows; zero rows encode both the out-of-range halo rows
    # and the depthwise zero padding at the image border.
    mh = _interp_matrix(hout, hin)                                  # (hout, hin)
    ridx = jnp.arange(nt)[:, None] * th - 2 + jnp.arange(th + 4)[None, :]
    mh_tiles = jnp.where((ridx >= 0)[..., None] & (ridx < hout)[..., None],
                         mh[jnp.clip(ridx, 0, hout - 1)], 0.0)      # (nt, th+4, hin)

    # W-interpolation weights as per-input-column vectors, with zero entries for the
    # left halo and the right padding of the slab.
    mw = _interp_matrix(wout, win)                                  # (wout, win)
    mw_pad = jnp.zeros((w0, win), jnp.float32).at[2:2 + wout, :].set(mw)
    mw_cols = jnp.transpose(mw_pad)[:, :, None]                     # (win, w0, 1)

    kernel = functools.partial(
        _decoder_kernel, th=th, win=win, hout=hout, wout=wout,
        w1=w1, c0=c0, c1=c1, c2=c2)

    p1, p2 = kp["sep1"], kp["sep2"]
    out = pl.pallas_call(
        kernel,
        out_shape=jax.ShapeDtypeStruct((n, hout, wout), jnp.float32),
        grid_spec=pltpu.PrefetchScalarGridSpec(
            num_scalar_prefetch=0,
            grid=(n, nt),
            in_specs=[
                pl.BlockSpec((1, win, hin, c0), lambda b, r: (b, 0, 0, 0)),
                pl.BlockSpec((1, th + 4, hin), lambda b, r: (r, 0, 0)),
                pl.BlockSpec((win, w0, 1), lambda b, r: (0, 0, 0)),
                pl.BlockSpec((9, c0), lambda b, r: (0, 0)),
                pl.BlockSpec((1, c0), lambda b, r: (0, 0)),
                pl.BlockSpec((c0, c1), lambda b, r: (0, 0)),
                pl.BlockSpec((1, c1), lambda b, r: (0, 0)),
                pl.BlockSpec((9, c1), lambda b, r: (0, 0)),
                pl.BlockSpec((1, c1), lambda b, r: (0, 0)),
                pl.BlockSpec((c1, c2), lambda b, r: (0, 0)),
                pl.BlockSpec((1, c2), lambda b, r: (0, 0)),
                pl.BlockSpec((1, c2), lambda b, r: (0, 0)),
            ],
            out_specs=pl.BlockSpec((1, th, wout), lambda b, r: (b, r, 0)),
        ),
        compiler_params=pltpu.CompilerParams(
            dimension_semantics=("parallel", "parallel"),
            vmem_limit_bytes=48 * 1024 * 1024),
    )(xt, mh_tiles, mw_cols,
      p1["wd"], p1["bd"], p1["wp"], p1["bp"],
      p2["wd"], p2["bd"], p2["wp"], p2["bp"],
      kp["wc"])

    return out[:, None, :, :]      # back to NCHW: (N, 1, Hout, Wout)


# ------------------------------ parameters ----------------------------------

def _make_raw_sep(key, cin, cout):
    ks = jax.random.split(key, 10)
    return {
        "wdw": jax.random.normal(ks[0], (9, cin), jnp.float32) * 0.1,
        "gd": 1.0 + 0.1 * jax.random.normal(ks[1], (cin,), jnp.float32),
        "betad": 0.1 * jax.random.normal(ks[2], (cin,), jnp.float32),
        "md": 0.1 * jax.random.normal(ks[3], (cin,), jnp.float32),
        "vd": 0.5 + jax.random.uniform(ks[4], (cin,), jnp.float32),
        "wpw": jax.random.normal(ks[5], (cin, cout), jnp.float32) * 0.1,
        "gp": 1.0 + 0.1 * jax.random.normal(ks[6], (cout,), jnp.float32),
        "betap": 0.1 * jax.random.normal(ks[7], (cout,), jnp.float32),
        "mp": 0.1 * jax.random.normal(ks[8], (cout,), jnp.float32),
        "vp": 0.5 + jax.random.uniform(ks[9], (cout,), jnp.float32),
    }


def _fold_params(raw):
    """Fold eval-mode BatchNorm scales into the conv weights (bias-only remains)."""
    def fold(p):
        sd = p["gd"] / jnp.sqrt(p["vd"] + BN_EPS)
        bd = p["betad"] - p["md"] * sd
        sp = p["gp"] / jnp.sqrt(p["vp"] + BN_EPS)
        bp = p["betap"] - p["mp"] * sp
        return {"wd": p["wdw"] * sd[None, :],
                "bd": bd[None, :],
                "wp": (p["wpw"] * sp[None, :]).astype(jnp.bfloat16),
                "bp": bp[None, :]}
    return {"sep1": fold(raw["sep1"]),
            "sep2": fold(raw["sep2"]),
            "wc": raw["conv_w"].reshape(1, -1)}


# ------------------------------ XLA reference --------------------------------

def _ref_forward(x_nchw, raw):
    x = jnp.transpose(x_nchw, (0, 2, 3, 1)).astype(jnp.float32)
    _, hin, win, _ = x.shape
    hout, wout = 8 * hin, 8 * win
    mh = _interp_matrix(hout, hin)
    mw = _interp_matrix(wout, win)
    up = jnp.einsum("oh,nhwc->nowc", mh, x)
    up = jnp.einsum("pw,nowc->nopc", mw, up)

    def bn(v, g, b, m, var):
        return (v - m) * g / jnp.sqrt(var + BN_EPS) + b

    def sep(xx, p):
        cin = xx.shape[-1]
        w = p["wdw"].reshape(3, 3, cin)[:, :, None, :]
        yy = lax.conv_general_dilated(
            xx, w, (1, 1), "SAME",
            dimension_numbers=("NHWC", "HWIO", "NHWC"),
            feature_group_count=cin)
        yy = jnp.maximum(bn(yy, p["gd"], p["betad"], p["md"], p["vd"]), 0.0)
        zz = jnp.einsum("nhwc,cd->nhwd", yy, p["wpw"])
        return jnp.maximum(bn(zz, p["gp"], p["betap"], p["mp"], p["vp"]), 0.0)

    y = sep(up, raw["sep1"])
    y = sep(y, raw["sep2"])
    z = jnp.maximum(jnp.einsum("nhwc,cd->nhwd", y, raw["conv_w"]), 0.0)
    return jnp.transpose(z, (0, 3, 1, 2))


# ---------------------------------- main -------------------------------------

if __name__ == "__main__":
    key = jax.random.PRNGKey(0)
    kx, k1, k2, k3 = jax.random.split(key, 4)
    # small input consistent with the module: 96 input channels, NCHW
    x = jax.random.normal(kx, (2, 96, 4, 4), jnp.float32)
    raw = {
        "sep1": _make_raw_sep(k1, 96, 80),
        "sep2": _make_raw_sep(k2, 80, 40),
        "conv_w": jax.random.normal(k3, (40, 1), jnp.float32) * 0.1,
    }
    kparams = _fold_params(raw)

    # tile_h=8 -> 4 row tiles of the 32-row output: exercises inter-tile halos.
    fwd = jax.jit(functools.partial(decoder_spp_forward, tile_h=8))
    out = jax.block_until_ready(fwd(x, kparams))

    assert out.shape == (2, 1, 32, 32), out.shape
    assert bool(jnp.all(jnp.isfinite(out)))

    ref = _ref_forward(x, raw)
    err = float(jnp.max(jnp.abs(out - ref)))
    assert bool(jnp.allclose(out, ref, rtol=2e-2, atol=2e-2)), (
        "mismatch vs JAX reference: max abs diff = " + str(err))

    print("KERNEL_OK")
</pallas_src>

<mosaic_0001>
module attributes {stable_mosaic.version = 11 : i64} {
  func.func @_decoder_kernel(%arg0: i32, %arg1: i32, %arg2: memref<1x4x4x96xf32, #tpu.memory_space<vmem>>, %arg3: memref<1x12x4xf32, #tpu.memory_space<vmem>>, %arg4: memref<4x42x1xf32, #tpu.memory_space<vmem>>, %arg5: memref<9x96xf32, #tpu.memory_space<vmem>>, %arg6: memref<1x96xf32, #tpu.memory_space<vmem>>, %arg7: memref<96x80xbf16, #tpu.memory_space<vmem>>, %arg8: memref<1x80xf32, #tpu.memory_space<vmem>>, %arg9: memref<9x80xf32, #tpu.memory_space<vmem>>, %arg10: memref<1x80xf32, #tpu.memory_space<vmem>>, %arg11: memref<80x40xbf16, #tpu.memory_space<vmem>>, %arg12: memref<1x40xf32, #tpu.memory_space<vmem>>, %arg13: memref<1x40xf32, #tpu.memory_space<vmem>>, %arg14: memref<1x8x32xf32, #tpu.memory_space<vmem>>) attributes {dimension_semantics = [#tpu.dimension_semantics<parallel>, #tpu.dimension_semantics<parallel>], iteration_bounds = array<i64: 2, 4>, scalar_prefetch = 0 : i64, scratch_operands = 0 : i64, tpu.core_type = #tpu.core_type<tc>, window_params = [{transform_indices = @transform_0, window_bounds = array<i64: 1, 4, 4, 96>}, {transform_indices = @transform_1, window_bounds = array<i64: 1, 12, 4>}, {pipeline_mode = #tpu.pipeline_mode<synchronous>, transform_indices = @transform_2, window_bounds = array<i64: 4, 42, 1>}, {pipeline_mode = #tpu.pipeline_mode<synchronous>, transform_indices = @transform_3, window_bounds = array<i64: 9, 96>}, {pipeline_mode = #tpu.pipeline_mode<synchronous>, transform_indices = @transform_4, window_bounds = array<i64: 1, 96>}, {pipeline_mode = #tpu.pipeline_mode<synchronous>, transform_indices = @transform_5, window_bounds = array<i64: 96, 80>}, {pipeline_mode = #tpu.pipeline_mode<synchronous>, transform_indices = @transform_6, window_bounds = array<i64: 1, 80>}, {pipeline_mode = #tpu.pipeline_mode<synchronous>, transform_indices = @transform_7, window_bounds = array<i64: 9, 80>}, {pipeline_mode = #tpu.pipeline_mode<synchronous>, transform_indices = @transform_8, window_bounds = array<i64: 1, 80>}, {pipeline_mode = #tpu.pipeline_mode<synchronous>, transform_indices = @transform_9, window_bounds = array<i64: 80, 40>}, {pipeline_mode = #tpu.pipeline_mode<synchronous>, transform_indices = @transform_10, window_bounds = array<i64: 1, 40>}, {pipeline_mode = #tpu.pipeline_mode<synchronous>, transform_indices = @transform_11, window_bounds = array<i64: 1, 40>}, {transform_indices = @transform_12, window_bounds = array<i64: 1, 8, 32>}]} {
    %c8_i32 = arith.constant 8 : i32
    %0 = arith.muli %arg1, %c8_i32 : i32
    %c0 = arith.constant 0 : index
    %c0_0 = arith.constant 0 : index
    %c0_1 = arith.constant 0 : index
    %1 = vector.load %arg3[%c0, %c0_0, %c0_1] : memref<1x12x4xf32, #tpu.memory_space<vmem>>, vector<1x12x4xf32>
    %2 = vector.shape_cast %1 : vector<1x12x4xf32> to vector<12x4xf32>
    %c0_2 = arith.constant 0 : index
    %c0_3 = arith.constant 0 : index
    %c0_4 = arith.constant 0 : index
    %c0_5 = arith.constant 0 : index
    %3 = vector.load %arg2[%c0_2, %c0_3, %c0_4, %c0_5] : memref<1x4x4x96xf32, #tpu.memory_space<vmem>>, vector<1x4x4x96xf32>
    %4 = vector.shape_cast %3 : vector<1x4x4x96xf32> to vector<4x4x96xf32>
    %cst = arith.constant 0.000000e+00 : f32
    %5 = vector.broadcast %cst : f32 to vector<12x42x96xf32>
    %6 = vector.extract_strided_slice %4 {offsets = [0, 0, 0], sizes = [1, 4, 96], strides = [1, 1, 1]} : vector<4x4x96xf32> to vector<1x4x96xf32>
    %7 = vector.shape_cast %6 : vector<1x4x96xf32> to vector<4x96xf32>
    %cst_6 = arith.constant dense<0.000000e+00> : vector<12x96xf32>
    %8 = tpu.matmul %2, %7, %cst_6 {dimension_numbers = #tpu.dot_dimension_numbers<[1], [0], [0], [1], [0, 0, 1, 1], [], []>} : vector<12x4xf32>, vector<4x96xf32>, vector<12x96xf32> -> vector<12x96xf32>
    %c0_7 = arith.constant 0 : index
    %c0_8 = arith.constant 0 : index
    %c0_9 = arith.constant 0 : index
    %9 = vector.load %arg4[%c0_7, %c0_8, %c0_9] : memref<4x42x1xf32, #tpu.memory_space<vmem>>, vector<1x42x1xf32>
    %10 = vector.shape_cast %9 : vector<1x42x1xf32> to vector<42x1xf32>
    %11 = vector.shape_cast %8 : vector<12x96xf32> to vector<12x1x96xf32>
    %12 = vector.shape_cast %10 : vector<42x1xf32> to vector<1x42x1xf32>
    %13 = vector.broadcast %12 : vector<1x42x1xf32> to vector<12x42x96xf32>
    %14 = vector.broadcast %11 : vector<12x1x96xf32> to vector<12x42x96xf32>
    %15 = arith.mulf %13, %14 : vector<12x42x96xf32>
    %16 = arith.addf %5, %15 : vector<12x42x96xf32>
    %17 = vector.extract_strided_slice %4 {offsets = [1, 0, 0], sizes = [1, 4, 96], strides = [1, 1, 1]} : vector<4x4x96xf32> to vector<1x4x96xf32>
    %18 = vector.shape_cast %17 : vector<1x4x96xf32> to vector<4x96xf32>
    %cst_10 = arith.constant dense<0.000000e+00> : vector<12x96xf32>
    %19 = tpu.matmul %2, %18, %cst_10 {dimension_numbers = #tpu.dot_dimension_numbers<[1], [0], [0], [1], [0, 0, 1, 1], [], []>} : vector<12x4xf32>, vector<4x96xf32>, vector<12x96xf32> -> vector<12x96xf32>
    %c1 = arith.constant 1 : index
    %c0_11 = arith.constant 0 : index
    %c0_12 = arith.constant 0 : index
    %20 = vector.load %arg4[%c1, %c0_11, %c0_12] : memref<4x42x1xf32, #tpu.memory_space<vmem>>, vector<1x42x1xf32>
    %21 = vector.shape_cast %20 : vector<1x42x1xf32> to vector<42x1xf32>
    %22 = vector.shape_cast %19 : vector<12x96xf32> to vector<12x1x96xf32>
    %23 = vector.shape_cast %21 : vector<42x1xf32> to vector<1x42x1xf32>
    %24 = vector.broadcast %23 : vector<1x42x1xf32> to vector<12x42x96xf32>
    %25 = vector.broadcast %22 : vector<12x1x96xf32> to vector<12x42x96xf32>
    %26 = arith.mulf %24, %25 : vector<12x42x96xf32>
    %27 = arith.addf %16, %26 : vector<12x42x96xf32>
    %28 = vector.extract_strided_slice %4 {offsets = [2, 0, 0], sizes = [1, 4, 96], strides = [1, 1, 1]} : vector<4x4x96xf32> to vector<1x4x96xf32>
    %29 = vector.shape_cast %28 : vector<1x4x96xf32> to vector<4x96xf32>
    %cst_13 = arith.constant dense<0.000000e+00> : vector<12x96xf32>
    %30 = tpu.matmul %2, %29, %cst_13 {dimension_numbers = #tpu.dot_dimension_numbers<[1], [0], [0], [1], [0, 0, 1, 1], [], []>} : vector<12x4xf32>, vector<4x96xf32>, vector<12x96xf32> -> vector<12x96xf32>
    %c2 = arith.constant 2 : index
    %c0_14 = arith.constant 0 : index
    %c0_15 = arith.constant 0 : index
    %31 = vector.load %arg4[%c2, %c0_14, %c0_15] : memref<4x42x1xf32, #tpu.memory_space<vmem>>, vector<1x42x1xf32>
    %32 = vector.shape_cast %31 : vector<1x42x1xf32> to vector<42x1xf32>
    %33 = vector.shape_cast %30 : vector<12x96xf32> to vector<12x1x96xf32>
    %34 = vector.shape_cast %32 : vector<42x1xf32> to vector<1x42x1xf32>
    %35 = vector.broadcast %34 : vector<1x42x1xf32> to vector<12x42x96xf32>
    %36 = vector.broadcast %33 : vector<12x1x96xf32> to vector<12x42x96xf32>
    %37 = arith.mulf %35, %36 : vector<12x42x96xf32>
    %38 = arith.addf %27, %37 : vector<12x42x96xf32>
    %39 = vector.extract_strided_slice %4 {offsets = [3, 0, 0], sizes = [1, 4, 96], strides = [1, 1, 1]} : vector<4x4x96xf32> to vector<1x4x96xf32>
    %40 = vector.shape_cast %39 : vector<1x4x96xf32> to vector<4x96xf32>
    %cst_16 = arith.constant dense<0.000000e+00> : vector<12x96xf32>
    %41 = tpu.matmul %2, %40, %cst_16 {dimension_numbers = #tpu.dot_dimension_numbers<[1], [0], [0], [1], [0, 0, 1, 1], [], []>} : vector<12x4xf32>, vector<4x96xf32>, vector<12x96xf32> -> vector<12x96xf32>
    %c3 = arith.constant 3 : index
    %c0_17 = arith.constant 0 : index
    %c0_18 = arith.constant 0 : index
    %42 = vector.load %arg4[%c3, %c0_17, %c0_18] : memref<4x42x1xf32, #tpu.memory_space<vmem>>, vector<1x42x1xf32>
    %43 = vector.shape_cast %42 : vector<1x42x1xf32> to vector<42x1xf32>
    %44 = vector.shape_cast %41 : vector<12x96xf32> to vector<12x1x96xf32>
    %45 = vector.shape_cast %43 : vector<42x1xf32> to vector<1x42x1xf32>
    %46 = vector.broadcast %45 : vector<1x42x1xf32> to vector<12x42x96xf32>
    %47 = vector.broadcast %44 : vector<12x1x96xf32> to vector<12x42x96xf32>
    %48 = arith.mulf %46, %47 : vector<12x42x96xf32>
    %49 = arith.addf %38, %48 : vector<12x42x96xf32>
    %cst_19 = arith.constant 0.000000e+00 : f32
    %50 = vector.broadcast %cst_19 : f32 to vector<10x40x96xf32>
    %51 = vector.extract_strided_slice %49 {offsets = [0, 0, 0], sizes = [10, 40, 96], strides = [1, 1, 1]} : vector<12x42x96xf32> to vector<10x40x96xf32>
    %c0_20 = arith.constant 0 : index
    %c0_21 = arith.constant 0 : index
    %52 = vector.load %arg5[%c0_20, %c0_21] : memref<9x96xf32, #tpu.memory_space<vmem>>, vector<1x96xf32>
    %53 = vector.shape_cast %52 : vector<1x96xf32> to vector<96xf32>
    %54 = vector.shape_cast %53 : vector<96xf32> to vector<1x1x96xf32>
    %55 = vector.broadcast %54 : vector<1x1x96xf32> to vector<10x40x96xf32>
    %56 = arith.mulf %51, %55 : vector<10x40x96xf32>
    %57 = arith.addf %50, %56 : vector<10x40x96xf32>
    %58 = vector.extract_strided_slice %49 {offsets = [0, 1, 0], sizes = [10, 40, 96], strides = [1, 1, 1]} : vector<12x42x96xf32> to vector<10x40x96xf32>
    %c1_22 = arith.constant 1 : index
    %c0_23 = arith.constant 0 : index
    %59 = vector.load %arg5[%c1_22, %c0_23] : memref<9x96xf32, #tpu.memory_space<vmem>>, vector<1x96xf32>
    %60 = vector.shape_cast %59 : vector<1x96xf32> to vector<96xf32>
    %61 = vector.shape_cast %60 : vector<96xf32> to vector<1x1x96xf32>
    %62 = vector.broadcast %61 : vector<1x1x96xf32> to vector<10x40x96xf32>
    %63 = arith.mulf %58, %62 : vector<10x40x96xf32>
    %64 = arith.addf %57, %63 : vector<10x40x96xf32>
    %65 = vector.extract_strided_slice %49 {offsets = [0, 2, 0], sizes = [10, 40, 96], strides = [1, 1, 1]} : vector<12x42x96xf32> to vector<10x40x96xf32>
    %c2_24 = arith.constant 2 : index
    %c0_25 = arith.constant 0 : index
    %66 = vector.load %arg5[%c2_24, %c0_25] : memref<9x96xf32, #tpu.memory_space<vmem>>, vector<1x96xf32>
    %67 = vector.shape_cast %66 : vector<1x96xf32> to vector<96xf32>
    %68 = vector.shape_cast %67 : vector<96xf32> to vector<1x1x96xf32>
    %69 = vector.broadcast %68 : vector<1x1x96xf32> to vector<10x40x96xf32>
    %70 = arith.mulf %65, %69 : vector<10x40x96xf32>
    %71 = arith.addf %64, %70 : vector<10x40x96xf32>
    %72 = vector.extract_strided_slice %49 {offsets = [1, 0, 0], sizes = [10, 40, 96], strides = [1, 1, 1]} : vector<12x42x96xf32> to vector<10x40x96xf32>
    %c3_26 = arith.constant 3 : index
    %c0_27 = arith.constant 0 : index
    %73 = vector.load %arg5[%c3_26, %c0_27] : memref<9x96xf32, #tpu.memory_space<vmem>>, vector<1x96xf32>
    %74 = vector.shape_cast %73 : vector<1x96xf32> to vector<96xf32>
    %75 = vector.shape_cast %74 : vector<96xf32> to vector<1x1x96xf32>
    %76 = vector.broadcast %75 : vector<1x1x96xf32> to vector<10x40x96xf32>
    %77 = arith.mulf %72, %76 : vector<10x40x96xf32>
    %78 = arith.addf %71, %77 : vector<10x40x96xf32>
    %79 = vector.extract_strided_slice %49 {offsets = [1, 1, 0], sizes = [10, 40, 96], strides = [1, 1, 1]} : vector<12x42x96xf32> to vector<10x40x96xf32>
    %c4 = arith.constant 4 : index
    %c0_28 = arith.constant 0 : index
    %80 = vector.load %arg5[%c4, %c0_28] : memref<9x96xf32, #tpu.memory_space<vmem>>, vector<1x96xf32>
    %81 = vector.shape_cast %80 : vector<1x96xf32> to vector<96xf32>
    %82 = vector.shape_cast %81 : vector<96xf32> to vector<1x1x96xf32>
    %83 = vector.broadcast %82 : vector<1x1x96xf32> to vector<10x40x96xf32>
    %84 = arith.mulf %79, %83 : vector<10x40x96xf32>
    %85 = arith.addf %78, %84 : vector<10x40x96xf32>
    %86 = vector.extract_strided_slice %49 {offsets = [1, 2, 0], sizes = [10, 40, 96], strides = [1, 1, 1]} : vector<12x42x96xf32> to vector<10x40x96xf32>
    %c5 = arith.constant 5 : index
    %c0_29 = arith.constant 0 : index
    %87 = vector.load %arg5[%c5, %c0_29] : memref<9x96xf32, #tpu.memory_space<vmem>>, vector<1x96xf32>
    %88 = vector.shape_cast %87 : vector<1x96xf32> to vector<96xf32>
    %89 = vector.shape_cast %88 : vector<96xf32> to vector<1x1x96xf32>
    %90 = vector.broadcast %89 : vector<1x1x96xf32> to vector<10x40x96xf32>
    %91 = arith.mulf %86, %90 : vector<10x40x96xf32>
    %92 = arith.addf %85, %91 : vector<10x40x96xf32>
    %93 = vector.extract_strided_slice %49 {offsets = [2, 0, 0], sizes = [10, 40, 96], strides = [1, 1, 1]} : vector<12x42x96xf32> to vector<10x40x96xf32>
    %c6 = arith.constant 6 : index
    %c0_30 = arith.constant 0 : index
    %94 = vector.load %arg5[%c6, %c0_30] : memref<9x96xf32, #tpu.memory_space<vmem>>, vector<1x96xf32>
    %95 = vector.shape_cast %94 : vector<1x96xf32> to vector<96xf32>
    %96 = vector.shape_cast %95 : vector<96xf32> to vector<1x1x96xf32>
    %97 = vector.broadcast %96 : vector<1x1x96xf32> to vector<10x40x96xf32>
    %98 = arith.mulf %93, %97 : vector<10x40x96xf32>
    %99 = arith.addf %92, %98 : vector<10x40x96xf32>
    %100 = vector.extract_strided_slice %49 {offsets = [2, 1, 0], sizes = [10, 40, 96], strides = [1, 1, 1]} : vector<12x42x96xf32> to vector<10x40x96xf32>
    %c7 = arith.constant 7 : index
    %c0_31 = arith.constant 0 : index
    %101 = vector.load %arg5[%c7, %c0_31] : memref<9x96xf32, #tpu.memory_space<vmem>>, vector<1x96xf32>
    %102 = vector.shape_cast %101 : vector<1x96xf32> to vector<96xf32>
    %103 = vector.shape_cast %102 : vector<96xf32> to vector<1x1x96xf32>
    %104 = vector.broadcast %103 : vector<1x1x96xf32> to vector<10x40x96xf32>
    %105 = arith.mulf %100, %104 : vector<10x40x96xf32>
    %106 = arith.addf %99, %105 : vector<10x40x96xf32>
    %107 = vector.extract_strided_slice %49 {offsets = [2, 2, 0], sizes = [10, 40, 96], strides = [1, 1, 1]} : vector<12x42x96xf32> to vector<10x40x96xf32>
    %c8 = arith.constant 8 : index
    %c0_32 = arith.constant 0 : index
    %108 = vector.load %arg5[%c8, %c0_32] : memref<9x96xf32, #tpu.memory_space<vmem>>, vector<1x96xf32>
    %109 = vector.shape_cast %108 : vector<1x96xf32> to vector<96xf32>
    %110 = vector.shape_cast %109 : vector<96xf32> to vector<1x1x96xf32>
    %111 = vector.broadcast %110 : vector<1x1x96xf32> to vector<10x40x96xf32>
    %112 = arith.mulf %107, %111 : vector<10x40x96xf32>
    %113 = arith.addf %106, %112 : vector<10x40x96xf32>
    %c0_33 = arith.constant 0 : index
    %c0_34 = arith.constant 0 : index
    %114 = vector.load %arg6[%c0_33, %c0_34] : memref<1x96xf32, #tpu.memory_space<vmem>>, vector<1x96xf32>
    %115 = vector.shape_cast %114 : vector<1x96xf32> to vector<96xf32>
    %116 = vector.shape_cast %115 : vector<96xf32> to vector<1x1x96xf32>
    %117 = vector.broadcast %116 : vector<1x1x96xf32> to vector<10x40x96xf32>
    %118 = arith.addf %113, %117 : vector<10x40x96xf32>
    %cst_35 = arith.constant 0.000000e+00 : f32
    %119 = vector.broadcast %cst_35 : f32 to vector<10x40x96xf32>
    %120 = arith.maximumf %118, %119 : vector<10x40x96xf32>
    %121 = vector.shape_cast %120 : vector<10x40x96xf32> to vector<400x96xf32>
    %122 = arith.truncf %121 : vector<400x96xf32> to vector<400x96xbf16>
    %c0_36 = arith.constant 0 : index
    %c0_37 = arith.constant 0 : index
    %123 = vector.load %arg7[%c0_36, %c0_37] : memref<96x80xbf16, #tpu.memory_space<vmem>>, vector<96x80xbf16>
    %cst_38 = arith.constant dense<0.000000e+00> : vector<400x80xf32>
    %124 = tpu.matmul %122, %123, %cst_38 {dimension_numbers = #tpu.dot_dimension_numbers<[1], [0], [0], [1], [0, 0, 1, 1], [], []>} : vector<400x96xbf16>, vector<96x80xbf16>, vector<400x80xf32> -> vector<400x80xf32>
    %c0_39 = arith.constant 0 : index
    %c0_40 = arith.constant 0 : index
    %125 = vector.load %arg8[%c0_39, %c0_40] : memref<1x80xf32, #tpu.memory_space<vmem>>, vector<1x80xf32>
    %126 = vector.shape_cast %125 : vector<1x80xf32> to vector<80xf32>
    %127 = vector.shape_cast %126 : vector<80xf32> to vector<1x80xf32>
    %128 = vector.broadcast %127 : vector<1x80xf32> to vector<400x80xf32>
    %129 = arith.addf %124, %128 : vector<400x80xf32>
    %cst_41 = arith.constant 0.000000e+00 : f32
    %130 = vector.broadcast %cst_41 : f32 to vector<400x80xf32>
    %131 = arith.maximumf %129, %130 : vector<400x80xf32>
    %132 = vector.shape_cast %131 : vector<400x80xf32> to vector<10x40x80xf32>
    %c1_i32 = arith.constant 1 : i32
    %133 = arith.subi %0, %c1_i32 : i32
    %134 = tpu.iota {dimensions = array<i32: 0>} : vector<10x1x1xi32>
    %135 = vector.broadcast %133 : i32 to vector<10x1x1xi32>
    %136 = arith.addi %135, %134 : vector<10x1x1xi32>
    %137 = tpu.iota {dimensions = array<i32: 1>} : vector<1x40x1xi32>
    %c-1_i32 = arith.constant -1 : i32
    %138 = vector.broadcast %c-1_i32 : i32 to vector<1x40x1xi32>
    %139 = arith.addi %138, %137 : vector<1x40x1xi32>
    %c0_i32 = arith.constant 0 : i32
    %140 = vector.broadcast %c0_i32 : i32 to vector<10x1x1xi32>
    %141 = arith.cmpi sge, %136, %140 : vector<10x1x1xi32>
    %c32_i32 = arith.constant 32 : i32
    %142 = vector.broadcast %c32_i32 : i32 to vector<10x1x1xi32>
    %143 = arith.cmpi slt, %136, %142 : vector<10x1x1xi32>
    %144 = arith.andi %141, %143 : vector<10x1x1xi1>
    %c0_i32_42 = arith.constant 0 : i32
    %145 = vector.broadcast %c0_i32_42 : i32 to vector<1x40x1xi32>
    %146 = arith.cmpi sge, %139, %145 : vector<1x40x1xi32>
    %147 = vector.broadcast %144 : vector<10x1x1xi1> to vector<10x40x1xi1>
    %148 = vector.broadcast %146 : vector<1x40x1xi1> to vector<10x40x1xi1>
    %149 = arith.andi %147, %148 : vector<10x40x1xi1>
    %c32_i32_43 = arith.constant 32 : i32
    %150 = vector.broadcast %c32_i32_43 : i32 to vector<1x40x1xi32>
    %151 = arith.cmpi slt, %139, %150 : vector<1x40x1xi32>
    %152 = vector.broadcast %151 : vector<1x40x1xi1> to vector<10x40x1xi1>
    %153 = arith.andi %149, %152 : vector<10x40x1xi1>
    %cst_44 = arith.constant 0.000000e+00 : f32
    %154 = vector.shape_cast %153 : vector<10x40x1xi1> to vector<10x40x1xi1>
    %155 = vector.broadcast %154 : vector<10x40x1xi1> to vector<10x40x80xi1>
    %156 = vector.broadcast %cst_44 : f32 to vector<10x40x80xf32>
    %157 = arith.select %155, %132, %156 : vector<10x40x80xi1>, vector<10x40x80xf32>
    %cst_45 = arith.constant 0.000000e+00 : f32
    %158 = vector.broadcast %cst_45 : f32 to vector<8x32x80xf32>
    %159 = vector.extract_strided_slice %157 {offsets = [0, 0, 0], sizes = [8, 32, 80], strides = [1, 1, 1]} : vector<10x40x80xf32> to vector<8x32x80xf32>
    %c0_46 = arith.constant 0 : index
    %c0_47 = arith.constant 0 : index
    %160 = vector.load %arg9[%c0_46, %c0_47] : memref<9x80xf32, #tpu.memory_space<vmem>>, vector<1x80xf32>
    %161 = vector.shape_cast %160 : vector<1x80xf32> to vector<80xf32>
    %162 = vector.shape_cast %161 : vector<80xf32> to vector<1x1x80xf32>
    %163 = vector.broadcast %162 : vector<1x1x80xf32> to vector<8x32x80xf32>
    %164 = arith.mulf %159, %163 : vector<8x32x80xf32>
    %165 = arith.addf %158, %164 : vector<8x32x80xf32>
    %166 = vector.extract_strided_slice %157 {offsets = [0, 1, 0], sizes = [8, 32, 80], strides = [1, 1, 1]} : vector<10x40x80xf32> to vector<8x32x80xf32>
    %c1_48 = arith.constant 1 : index
    %c0_49 = arith.constant 0 : index
    %167 = vector.load %arg9[%c1_48, %c0_49] : memref<9x80xf32, #tpu.memory_space<vmem>>, vector<1x80xf32>
    %168 = vector.shape_cast %167 : vector<1x80xf32> to vector<80xf32>
    %169 = vector.shape_cast %168 : vector<80xf32> to vector<1x1x80xf32>
    %170 = vector.broadcast %169 : vector<1x1x80xf32> to vector<8x32x80xf32>
    %171 = arith.mulf %166, %170 : vector<8x32x80xf32>
    %172 = arith.addf %165, %171 : vector<8x32x80xf32>
    %173 = vector.extract_strided_slice %157 {offsets = [0, 2, 0], sizes = [8, 32, 80], strides = [1, 1, 1]} : vector<10x40x80xf32> to vector<8x32x80xf32>
    %c2_50 = arith.constant 2 : index
    %c0_51 = arith.constant 0 : index
    %174 = vector.load %arg9[%c2_50, %c0_51] : memref<9x80xf32, #tpu.memory_space<vmem>>, vector<1x80xf32>
    %175 = vector.shape_cast %174 : vector<1x80xf32> to vector<80xf32>
    %176 = vector.shape_cast %175 : vector<80xf32> to vector<1x1x80xf32>
    %177 = vector.broadcast %176 : vector<1x1x80xf32> to vector<8x32x80xf32>
    %178 = arith.mulf %173, %177 : vector<8x32x80xf32>
    %179 = arith.addf %172, %178 : vector<8x32x80xf32>
    %180 = vector.extract_strided_slice %157 {offsets = [1, 0, 0], sizes = [8, 32, 80], strides = [1, 1, 1]} : vector<10x40x80xf32> to vector<8x32x80xf32>
    %c3_52 = arith.constant 3 : index
    %c0_53 = arith.constant 0 : index
    %181 = vector.load %arg9[%c3_52, %c0_53] : memref<9x80xf32, #tpu.memory_space<vmem>>, vector<1x80xf32>
    %182 = vector.shape_cast %181 : vector<1x80xf32> to vector<80xf32>
    %183 = vector.shape_cast %182 : vector<80xf32> to vector<1x1x80xf32>
    %184 = vector.broadcast %183 : vector<1x1x80xf32> to vector<8x32x80xf32>
    %185 = arith.mulf %180, %184 : vector<8x32x80xf32>
    %186 = arith.addf %179, %185 : vector<8x32x80xf32>
    %187 = vector.extract_strided_slice %157 {offsets = [1, 1, 0], sizes = [8, 32, 80], strides = [1, 1, 1]} : vector<10x40x80xf32> to vector<8x32x80xf32>
    %c4_54 = arith.constant 4 : index
    %c0_55 = arith.constant 0 : index
    %188 = vector.load %arg9[%c4_54, %c0_55] : memref<9x80xf32, #tpu.memory_space<vmem>>, vector<1x80xf32>
    %189 = vector.shape_cast %188 : vector<1x80xf32> to vector<80xf32>
    %190 = vector.shape_cast %189 : vector<80xf32> to vector<1x1x80xf32>
    %191 = vector.broadcast %190 : vector<1x1x80xf32> to vector<8x32x80xf32>
    %192 = arith.mulf %187, %191 : vector<8x32x80xf32>
    %193 = arith.addf %186, %192 : vector<8x32x80xf32>
    %194 = vector.extract_strided_slice %157 {offsets = [1, 2, 0], sizes = [8, 32, 80], strides = [1, 1, 1]} : vector<10x40x80xf32> to vector<8x32x80xf32>
    %c5_56 = arith.constant 5 : index
    %c0_57 = arith.constant 0 : index
    %195 = vector.load %arg9[%c5_56, %c0_57] : memref<9x80xf32, #tpu.memory_space<vmem>>, vector<1x80xf32>
    %196 = vector.shape_cast %195 : vector<1x80xf32> to vector<80xf32>
    %197 = vector.shape_cast %196 : vector<80xf32> to vector<1x1x80xf32>
    %198 = vector.broadcast %197 : vector<1x1x80xf32> to vector<8x32x80xf32>
    %199 = arith.mulf %194, %198 : vector<8x32x80xf32>
    %200 = arith.addf %193, %199 : vector<8x32x80xf32>
    %201 = vector.extract_strided_slice %157 {offsets = [2, 0, 0], sizes = [8, 32, 80], strides = [1, 1, 1]} : vector<10x40x80xf32> to vector<8x32x80xf32>
    %c6_58 = arith.constant 6 : index
    %c0_59 = arith.constant 0 : index
    %202 = vector.load %arg9[%c6_58, %c0_59] : memref<9x80xf32, #tpu.memory_space<vmem>>, vector<1x80xf32>
    %203 = vector.shape_cast %202 : vector<1x80xf32> to vector<80xf32>
    %204 = vector.shape_cast %203 : vector<80xf32> to vector<1x1x80xf32>
    %205 = vector.broadcast %204 : vector<1x1x80xf32> to vector<8x32x80xf32>
    %206 = arith.mulf %201, %205 : vector<8x32x80xf32>
    %207 = arith.addf %200, %206 : vector<8x32x80xf32>
    %208 = vector.extract_strided_slice %157 {offsets = [2, 1, 0], sizes = [8, 32, 80], strides = [1, 1, 1]} : vector<10x40x80xf32> to vector<8x32x80xf32>
    %c7_60 = arith.constant 7 : index
    %c0_61 = arith.constant 0 : index
    %209 = vector.load %arg9[%c7_60, %c0_61] : memref<9x80xf32, #tpu.memory_space<vmem>>, vector<1x80xf32>
    %210 = vector.shape_cast %209 : vector<1x80xf32> to vector<80xf32>
    %211 = vector.shape_cast %210 : vector<80xf32> to vector<1x1x80xf32>
    %212 = vector.broadcast %211 : vector<1x1x80xf32> to vector<8x32x80xf32>
    %213 = arith.mulf %208, %212 : vector<8x32x80xf32>
    %214 = arith.addf %207, %213 : vector<8x32x80xf32>
    %215 = vector.extract_strided_slice %157 {offsets = [2, 2, 0], sizes = [8, 32, 80], strides = [1, 1, 1]} : vector<10x40x80xf32> to vector<8x32x80xf32>
    %c8_62 = arith.constant 8 : index
    %c0_63 = arith.constant 0 : index
    %216 = vector.load %arg9[%c8_62, %c0_63] : memref<9x80xf32, #tpu.memory_space<vmem>>, vector<1x80xf32>
    %217 = vector.shape_cast %216 : vector<1x80xf32> to vector<80xf32>
    %218 = vector.shape_cast %217 : vector<80xf32> to vector<1x1x80xf32>
    %219 = vector.broadcast %218 : vector<1x1x80xf32> to vector<8x32x80xf32>
    %220 = arith.mulf %215, %219 : vector<8x32x80xf32>
    %221 = arith.addf %214, %220 : vector<8x32x80xf32>
    %c0_64 = arith.constant 0 : index
    %c0_65 = arith.constant 0 : index
    %222 = vector.load %arg10[%c0_64, %c0_65] : memref<1x80xf32, #tpu.memory_space<vmem>>, vector<1x80xf32>
    %223 = vector.shape_cast %222 : vector<1x80xf32> to vector<80xf32>
    %224 = vector.shape_cast %223 : vector<80xf32> to vector<1x1x80xf32>
    %225 = vector.broadcast %224 : vector<1x1x80xf32> to vector<8x32x80xf32>
    %226 = arith.addf %221, %225 : vector<8x32x80xf32>
    %cst_66 = arith.constant 0.000000e+00 : f32
    %227 = vector.broadcast %cst_66 : f32 to vector<8x32x80xf32>
    %228 = arith.maximumf %226, %227 : vector<8x32x80xf32>
    %229 = vector.shape_cast %228 : vector<8x32x80xf32> to vector<256x80xf32>
    %230 = arith.truncf %229 : vector<256x80xf32> to vector<256x80xbf16>
    %c0_67 = arith.constant 0 : index
    %c0_68 = arith.constant 0 : index
    %231 = vector.load %arg11[%c0_67, %c0_68] : memref<80x40xbf16, #tpu.memory_space<vmem>>, vector<80x40xbf16>
    %cst_69 = arith.constant dense<0.000000e+00> : vector<256x40xf32>
    %232 = tpu.matmul %230, %231, %cst_69 {dimension_numbers = #tpu.dot_dimension_numbers<[1], [0], [0], [1], [0, 0, 1, 1], [], []>} : vector<256x80xbf16>, vector<80x40xbf16>, vector<256x40xf32> -> vector<256x40xf32>
    %c0_70 = arith.constant 0 : index
    %c0_71 = arith.constant 0 : index
    %233 = vector.load %arg12[%c0_70, %c0_71] : memref<1x40xf32, #tpu.memory_space<vmem>>, vector<1x40xf32>
    %234 = vector.shape_cast %233 : vector<1x40xf32> to vector<40xf32>
    %235 = vector.shape_cast %234 : vector<40xf32> to vector<1x40xf32>
    %236 = vector.broadcast %235 : vector<1x40xf32> to vector<256x40xf32>
    %237 = arith.addf %232, %236 : vector<256x40xf32>
    %cst_72 = arith.constant 0.000000e+00 : f32
    %238 = vector.broadcast %cst_72 : f32 to vector<256x40xf32>
    %239 = arith.maximumf %237, %238 : vector<256x40xf32>
    %240 = vector.shape_cast %239 : vector<256x40xf32> to vector<8x32x40xf32>
    %c0_73 = arith.constant 0 : index
    %c0_74 = arith.constant 0 : index
    %241 = vector.load %arg13[%c0_73, %c0_74] : memref<1x40xf32, #tpu.memory_space<vmem>>, vector<1x40xf32>
    %242 = vector.shape_cast %241 : vector<1x40xf32> to vector<40xf32>
    %243 = vector.shape_cast %242 : vector<40xf32> to vector<1x1x40xf32>
    %244 = vector.broadcast %243 : vector<1x1x40xf32> to vector<8x32x40xf32>
    %245 = arith.mulf %240, %244 : vector<8x32x40xf32>
    %cst_75 = arith.constant dense<0.000000e+00> : vector<8x32xf32>
    %246 = vector.multi_reduction <add>, %245, %cst_75 [2] : vector<8x32x40xf32> to vector<8x32xf32>
    %cst_76 = arith.constant 0.000000e+00 : f32
    %247 = vector.broadcast %cst_76 : f32 to vector<8x32xf32>
    %248 = arith.maximumf %246, %247 : vector<8x32xf32>
    %c0_77 = arith.constant 0 : index
    %c0_78 = arith.constant 0 : index
    %c0_79 = arith.constant 0 : index
    %249 = vector.load %arg14[%c0_77, %c0_78, %c0_79] : memref<1x8x32xf32, #tpu.memory_space<vmem>>, vector<1x8x32xf32>
    %250 = vector.shape_cast %249 : vector<1x8x32xf32> to vector<8x32xf32>
    %251 = vector.shape_cast %248 : vector<8x32xf32> to vector<1x8x32xf32>
    tpu.vector_store %arg14[%c0_77, %c0_78, %c0_79], %251 {strides = array<i32>} : memref<1x8x32xf32, #tpu.memory_space<vmem>>, vector<1x8x32xf32>,
    return
  }
  func.func @transform_0(%arg0: i32, %arg1: i32) -> (i32, i32, i32, i32) {
    %c0_i32 = arith.constant 0 : i32
    %c0_i32_0 = arith.constant 0 : i32
    %c0_i32_1 = arith.constant 0 : i32
    %c0_i32_2 = arith.constant 0 : i32
    return %arg0, %c0_i32, %c0_i32_0, %c0_i32_1 : i32, i32, i32, i32
  }
  func.func @transform_1(%arg0: i32, %arg1: i32) -> (i32, i32, i32) {
    %c0_i32 = arith.constant 0 : i32
    %c0_i32_0 = arith.constant 0 : i32
    %c0_i32_1 = arith.constant 0 : i32
    return %arg1, %c0_i32, %c0_i32_0 : i32, i32, i32
  }
  func.func @transform_2(%arg0: i32, %arg1: i32) -> (i32, i32, i32) {
    %c0_i32 = arith.constant 0 : i32
    %c0_i32_0 = arith.constant 0 : i32
    %c0_i32_1 = arith.constant 0 : i32
    %c0_i32_2 = arith.constant 0 : i32
    return %c0_i32, %c0_i32_0, %c0_i32_1 : i32, i32, i32
  }
  func.func @transform_3(%arg0: i32, %arg1: i32) -> (i32, i32) {
    %c0_i32 = arith.constant 0 : i32
    %c0_i32_0 = arith.constant 0 : i32
    %c0_i32_1 = arith.constant 0 : i32
    return %c0_i32, %c0_i32_0 : i32, i32
  }
  func.func @transform_4(%arg0: i32, %arg1: i32) -> (i32, i32) {
    %c0_i32 = arith.constant 0 : i32
    %c0_i32_0 = arith.constant 0 : i32
    %c0_i32_1 = arith.constant 0 : i32
    return %c0_i32, %c0_i32_0 : i32, i32
  }
  func.func @transform_5(%arg0: i32, %arg1: i32) -> (i32, i32) {
    %c0_i32 = arith.constant 0 : i32
    %c0_i32_0 = arith.constant 0 : i32
    %c0_i32_1 = arith.constant 0 : i32
    return %c0_i32, %c0_i32_0 : i32, i32
  }
  func.func @transform_6(%arg0: i32, %arg1: i32) -> (i32, i32) {
    %c0_i32 = arith.constant 0 : i32
    %c0_i32_0 = arith.constant 0 : i32
    %c0_i32_1 = arith.constant 0 : i32
    return %c0_i32, %c0_i32_0 : i32, i32
  }
  func.func @transform_7(%arg0: i32, %arg1: i32) -> (i32, i32) {
    %c0_i32 = arith.constant 0 : i32
    %c0_i32_0 = arith.constant 0 : i32
    %c0_i32_1 = arith.constant 0 : i32
    return %c0_i32, %c0_i32_0 : i32, i32
  }
  func.func @transform_8(%arg0: i32, %arg1: i32) -> (i32, i32) {
    %c0_i32 = arith.constant 0 : i32
    %c0_i32_0 = arith.constant 0 : i32
    %c0_i32_1 = arith.constant 0 : i32
    return %c0_i32, %c0_i32_0 : i32, i32
  }
  func.func @transform_9(%arg0: i32, %arg1: i32) -> (i32, i32) {
    %c0_i32 = arith.constant 0 : i32
    %c0_i32_0 = arith.constant 0 : i32
    %c0_i32_1 = arith.constant 0 : i32
    return %c0_i32, %c0_i32_0 : i32, i32
  }
  func.func @transform_10(%arg0: i32, %arg1: i32) -> (i32, i32) {
    %c0_i32 = arith.constant 0 : i32
    %c0_i32_0 = arith.constant 0 : i32
    %c0_i32_1 = arith.constant 0 : i32
    return %c0_i32, %c0_i32_0 : i32, i32
  }
  func.func @transform_11(%arg0: i32, %arg1: i32) -> (i32, i32) {
    %c0_i32 = arith.constant 0 : i32
    %c0_i32_0 = arith.constant 0 : i32
    %c0_i32_1 = arith.constant 0 : i32
    return %c0_i32, %c0_i32_0 : i32, i32
  }
  func.func @transform_12(%arg0: i32, %arg1: i32) -> (i32, i32, i32) {
    %c0_i32 = arith.constant 0 : i32
    %c0_i32_0 = arith.constant 0 : i32
    return %arg0, %arg1, %c0_i32 : i32, i32, i32
  }
}

</mosaic_0001>

<bundles_post_ra>
// kernel: decoder_spp_forward.1
= control target key start
LH: loop header
LB: loop body
LE: loop exit
PB: predicated region body
PF: predicated region fallthrough
CT: control target
= control target key end

     0   :  { %17 = vsyncpa [#allocation3], 0  ;;  %s15375_s0 = inlined_call_operand.vmem [shape: f32[2,4,4,96], index: 0, kind: input, shape index: {}]   ;;  %s15376_s1 = inlined_call_operand.vmem [shape: f32[4,12,4], index: 1, kind: input, shape index: {}]   ;;  %s15377_s2 = inlined_call_operand.vmem [shape: f32[4,42,1], index: 2, kind: input, shape index: {}]   ;;  %s15378_s3 = inlined_call_operand.vmem [shape: f32[9,96], index: 3, kind: input, shape index: {}]   ;;  %s15379_s4 = inlined_call_operand.vmem [shape: f32[1,96], index: 4, kind: input, shape index: {}]   ;;  %s15380_s5 = inlined_call_operand.vmem [shape: bf16[96,80], index: 5, kind: input, shape index: {}]   ;;  %s15381_s6 = inlined_call_operand.vmem [shape: f32[1,80], index: 6, kind: input, shape index: {}]   ;;  %s15382_s7 = inlined_call_operand.vmem [shape: f32[9,80], index: 7, kind: input, shape index: {}]   ;;  %s15383_s8 = inlined_call_operand.vmem [shape: f32[1,80], index: 8, kind: input, shape index: {}]   ;;  %s15384_s9 = inlined_call_operand.vmem [shape: bf16[80,40], index: 9, kind: input, shape index: {}]   ;;  %s15385_s10 = inlined_call_operand.vmem [shape: f32[1,40], index: 10, kind: input, shape index: {}]   ;;  %s15386_s11 = inlined_call_operand.vmem [shape: f32[1,40], index: 11, kind: input, shape index: {}]   ;;  %s15387_s12 = inlined_call_operand.hbm [shape: f32[2,32,32], index: 12, kind: output, shape index: {}]  }
   0x1   :  { %19 = vsyncpa [#allocation3 + $0x1], 0  ;;  %s8323_s21 = smov 0   ;;  %s8325_s22 = smov 0  }
   0x2   :  { %s8327_s23 = smov 0   ;;  %s8329_s24 = smov 0  }
   0x3   :  { %s8331_s25 = smov 0   ;;  %s8333_s26 = smov 0  }
   0x4   :  { %s8335_s27 = smov 0   ;;  %s8337_s28 = smov 0  }
   0x5 LB: > { %15754 = sst [smem:[#allocation5_spill]] %s8223_s21  ;;  %s7648_s29 = sadd.s32 4294967295, %s8251_s28   ;;  %s8251_s28 = sphi %s8337_s28, %s25_s28   ;;  %s8247_s27 = sphi %s8335_s27, %s16982_s27   ;;  %s8243_s26 = sphi %s8333_s26, %s16981_s26   ;;  %s8239_s25 = sphi %s8331_s25, %s16980_s25   ;;  %s8235_s24 = sphi %s8329_s24, %s16979_s24   ;;  %s8231_s23 = sphi %s8327_s23, %s16978_s23   ;;  %s8227_s22 = sphi %s8325_s22, %s16984_s22   ;;  %s8223_s21 = sphi %s8323_s21, %s16983_s21  }
   0x6   : > { %15755 = sst [smem:[#allocation6_spill]] %s8231_s23  ;;  %s7649_s30 = sadd.s32 4294967294, %s8251_s28  }
   0x7   : > { %15756 = sst [smem:[#allocation7_spill]] %s8243_s26  ;;  %s34_s13 = sadd.s32 1, %s8243_s26 }
   0x8   : > { %15757 = sst [smem:[#allocation8_spill]] %s8247_s27  ;;  %p35_p0 = scmp.ge.s32.totalorder %s34_s13, 4 }
   0x9   : > { %15758 = sst [smem:[#allocation9_spill]] %s8251_s28  ;;  %s37_s14 = sadd.s32 1, %s8247_s27 }
   0xa   : > { %p318_p1 = scmp.ne.s32.totalorder %s8231_s23, %s8227_s22  ;;  %p319_p2 = scmp.eq.s32.totalorder %s7648_s29, 7 }
   0xb   : > { %s16986_s13 = smov (%p35_p0, %s34_s13), 0  ;;  %s16988_s14 = smov (!%p35_p0, %s37_s14), %s8247_s27 }
   0xc   : > { %15759 = sst [smem:[#allocation10_spill]] %s16986_s13  ;;  %s304_s15 = ssub.s32 %s8243_s26, %s16986_s13 }
   0xd   : > { %p8374_p3 = por %p319_p2, %p318_p1  ;;  %p39_p4 = scmp.ge.s32.totalorder %s16988_s14, 2 }
   0xe   : > { %p324_p5 = scmp.ne.s32.totalorder %s8227_s22, %s8223_s21  ;;  %p325_p6 = scmp.eq.s32.totalorder %s7649_s30, 7 }
   0xf   : > { %p7652_p7 = scmp.ge.s32.totalorder %s8251_s28, 1  ;;  %s16990_s14 = smov (%p39_p4, %s16988_s14), 0 }
  0x10   : > { %15761 = sst [smem:[#allocation11_spill]] %s16990_s14  ;;  %p8383_p8 = por %p325_p6, %p324_p5 }
  0x11   : > { %p389_p9 = scmp.lt.s32.totalorder %s8251_s28, 9  ;;  %s303_s18 = ssub.s32 %s8247_s27, %s16990_s14 }
  0x12   : > { %s15762_s17 = scalar_select %p8383_p8, 1, 0 }
  0x13   : > { %s308_s19 = sadd.s32 1, %s8231_s23  ;;  %s305_s20 = sor.u32 %s304_s15, %s303_s18 }
  0x14   : > { %15763 = sst [smem:[#allocation12_spill]] %s15762_s17  ;;  %p390_p10 = pnand %p7652_p7, %p389_p9 }
  0x15   : > { %p306_p11 = scmp.eq.s32.totalorder %s305_s20, 0 }
  0x16   : > { %393 = sbr.rel (%p390_p10) target bundleno = 1628 (0x65c), region = 68 }
  0x17   : > { %s8392_s29 = scalar_select %p306_p11, %s8231_s23, %s308_s19  }
  0x19   : > { %15764 = sst [smem:[#allocation13_spill]] %s8392_s29 }
  0x1b   : > { %p436_p12 = scmp.lt.s32.totalorder %s8239_s25, 1  ;;  %p441_p13 = scmp.lt.s32.totalorder %s8235_s24, 3  ;;  %v540_v0 = vld [vmem:[%s15377_s2] sm:$0xff]  ;;  %v8253_v1 = vmov 0   ;;  %v542_v2 = vld [vmem:[%s15377_s2 + $0x10] sm:$0xff]  ;;  %v541_v3 = vld [vmem:[%s15377_s2 + $0x8] sm:$0xff]  ;;  %v15397_v44 = vlaneseq }
  0x1c   : > { %8097 = vset.pattern.permute.xlu0 %v8253_v1  ;;  %8098 = vset.pattern.permute.xlu1 %v8253_v1  ;;  %v7665_v4 = vld [vmem:[%s15377_s2 + $0x30] sm:$0xff]  ;;  %vm461_vm0 = vcmask 1043456   ;;  %vm454_vm1 = vcmask 31744   ;;  %v7666_v11 = vld [vmem:[%s15377_s2 + $0x38] sm:$0xff]  ;;  %v7667_v12 = vld [vmem:[%s15377_s2 + $0x40] sm:$0xff]  ;;  %vm8256_vm2 = vmmov 0  }
  0x1d   : > { %s437_s18 = scalar_select %p436_p12, %s8239_s25, 1  ;;  %623 = vperm.xlu0 %8097, %v540_v0   ;;  %633 = vperm.xlu1 %8098, %v542_v2   ;;  %v7674_v13 = vld [vmem:[%s15377_s2 + $0x60] sm:$0xff]  ;;  %v7675_v14 = vld [vmem:[%s15377_s2 + $0x68] sm:$0xff]  ;;  %v7676_v15 = vld [vmem:[%s15377_s2 + $0x70] sm:$0xff]  ;;  %v8254_v42 = vmov 1966171168  }
  0x1e   : > { %s442_s19 = scalar_select %p441_p13, %s8235_s24, 3  ;;  %v7683_v16 = vld [vmem:[%s15377_s2 + $0x90] sm:$0xff]  ;;  %v7684_v17 = vld [vmem:[%s15377_s2 + $0x98] sm:$0xff]  ;;  %v7685_v18 = vld [vmem:[%s15377_s2 + $0xa0] sm:$0xff]  ;;  %v550_v43 = vunpack.c.l.s4 %v8254_v42  ;;  %v8519_v48 = vshrl.u32 %v15397_v44, 7  ;;  %vm2267_vm3 = vcmask 1046528  }
  0x1f   : > { %s7770_s13 = sshll.u32 %s437_s18, 4  ;;  %v543_v19 = vld [vmem:[%s15377_s2 + $0x18] sm:$0xff]  ;;  %v544_v20 = vld [vmem:[%s15377_s2 + $0x20] sm:$0xff]  ;;  %v7668_v21 = vld [vmem:[%s15377_s2 + $0x48] sm:$0xff]  ;;  %vm2603_vm4 = vcmask 1045504   ;;  %vm4551_vm5 = vcmask 785408  }
  0x20   : > { %s440_s17 = scalar_lea.vmem %s15375_s0, %s7770_s13  ;;  %s7771_s14 = sshll.u32 %s442_s19, 4  ;;  %v7669_v22 = vld [vmem:[%s15377_s2 + $0x50] sm:$0xff]  ;;  %v7677_v23 = vld [vmem:[%s15377_s2 + $0x78] sm:$0xff]  ;;  %v7678_v24 = vld [vmem:[%s15377_s2 + $0x80] sm:$0xff]  ;;  %v551_v47 = vunpack.c.0.s8 %v550_v43  ;;  %15770 = vst [vmem:[#allocation19_spill] sm:$0xff] %v8519_v48  ;;  %v8530_v54 = vsub.s32 0, %v8519_v48 }
  0x21   : > { %v450_v5 = vld [vmem:[%s440_s17] sm:$0xf]  ;;  %v452_v6 = vld [vmem:[%s440_s17 + $0x8] sm:$0xf]  ;;  %s445_s28 = scalar_lea.vmem %s15376_s1, %s7771_s14  ;;  %628 = vperm.xlu0 %8097, %v541_v3   ;;  %1017 = vperm.xlu1 %8098, %v7665_v4   ;;  %v451_v9 = vld [vmem:[%s440_s17 + $0x4] sm:$0xf] }
  0x22   : > { %7836 = vmatprep.subr.msk.mxu1 %vm461_vm0, %v450_v5  ;;  %7846 = vmatprep.subr.msk.mxu0 %vm461_vm0, %v452_v6  ;;  %v448_v7 = vld [vmem:[%s445_s28] sm:$0xff]  ;;  %v449_v8 = vld [vmem:[%s445_s28 + $0x8] sm:$0xf]  ;;  %v453_v10 = vld [vmem:[%s440_s17 + $0xc] sm:$0xf]  ;;  %v8526_v51 = vsub.s32 %v551_v47, %v8519_v48  ;;  %15774 = vst [vmem:[#allocation23_spill] sm:$0xff] %v8530_v54 }
  0x23   : > { %7837 = vmatpush3.msk.msra.mxu1 %vm461_vm0, %v450_v5  ;;  %7838 = vmatprep.mubr.msk.f32.mxu1 %vm454_vm1, %v448_v7  ;;  %v7686_v25 = vld [vmem:[%s15377_s2 + $0xa8] sm:$0xff]  ;;  %v7687_v26 = vld [vmem:[%s15377_s2 + $0xb0] sm:$0xff]  ;;  %v7670_v28 = vld [vmem:[%s15377_s2 + $0x58] sm:$0x3]  ;;  %s7658_s19 = sshll.u32 %s8235_s24, 3  ;;  %s433_s14 = sand.u32 1, %s8227_s22  }
  0x24   : > { %7847 = vmatpush3.msk.msra.mxu0 %vm461_vm0, %v452_v6  ;;  %7848 = vmatprep.mubr.msk.f32.mxu0 %vm454_vm1, %v448_v7  ;;  %v545_v27 = vld [vmem:[%s15377_s2 + $0x28] sm:$0x3]  ;;  %v7688_v30 = vld [vmem:[%s15377_s2 + $0xb8] sm:$0x3]  ;;  %15773 = vst [vmem:[#allocation22_spill] sm:$0xff] %v8526_v51  ;;  %s7731_s30 = sadd.s32 4294967295, %s7658_s19 }
  0x25   : > { %7839 = vmatmul.mubr.msk.f32.vlgmr.msra.gmra.mxu1 %vm454_vm1, %v449_v8  ;;  %7841 = vmatprep.subr.msk.mxu1 %vm461_vm0, %v451_v9  ;;  %v7679_v29 = vld [vmem:[%s15377_s2 + $0x88] sm:$0x3]  ;;  %s15294_s15 = sshll.u32 %s433_s14, 3  ;;  %s7766_s21 = sshll.u32 %s8239_s25, 2 }
  0x26   : > { %7849 = vmatmul.mubr.msk.f32.vlgmr.msra.gmra.mxu0 %vm454_vm1, %v449_v8  ;;  %7842 = vmatpush3.msk.msra.mxu1 %vm461_vm0, %v451_v9  ;;  %s7560_s25 = sadd.s32 %s8235_s24, %s7766_s21  ;;  %s435_s23 = scalar_lea.vmem [#allocation2], %s15294_s15 }
  0x27   : > { %7843 = vmatprep.mubr.msk.f32.mxu1 %vm454_vm1, %v448_v7  ;;  %7851 = vmatprep.subr.msk.mxu1 %vm461_vm0, %v453_v10  ;;  %s7767_s24 = sshll.u32 %s7560_s25, 7  ;;  %s7564_s26 = sshll.u32 %s435_s23, 4  ;;  %s7565_s26 = int_to_ptr.vmem [resolvable:$true] %s7564_s26 }
  0x28   : > { %1022 = vperm.xlu0 %8097, %v7666_v11   ;;  %1027 = vperm.xlu1 %8098, %v7667_v12   ;;  %s15327_s17 = scalar_lea.hbm %s15387_s12, %s7767_s24  ;;  %s7549_s29 = scalar_lea.sflag [#allocation3], %s433_s14 }
  0x29   : > { %7844 = vmatmul.mubr.msk.f32.vlgmr.msra.gmra.mxu1 %vm454_vm1, %v449_v8  ;;  %s8159_s18 = scalar_lea.vmem %s7565_s26, 128  ;;  %s8257_s19 = smov [#allocation2]  }
  0x2a   : > { %7852 = vmatpush3.msk.msra.mxu1 %vm461_vm0, %v453_v10  ;;  %7853 = vmatprep.mubr.msk.f32.mxu1 %vm454_vm1, %v448_v7  ;;  %p8160_p0 = scmp.ne.s32.totalorder %s7565_s26, %s8159_s18  ;;  %s8163_s20 = sshll.u32 %s8257_s19, 4  ;;  %s8164_s20 = int_to_ptr.vmem [resolvable:$false] %s8163_s20 }
  0x2b   : > { %s8165_s13 = scalar_lea.vmem %s8164_s20, 256  ;;  %p8166_p4 = scmp.lt.s32.totalorder %s7565_s26, %s8164_s20 }
  0x2c   : > { %1411 = vperm.xlu0 %8097, %v7674_v13   ;;  %1416 = vperm.xlu1 %8098, %v7675_v14   ;;  %p8161_p1 = pnand %p8160_p0, %p8374_p3  ;;  %p8167_p5 = scmp.lt.s32.totalorder %s8165_s13, %s8159_s18 }
  0x2d   : > { %7854 = vmatmul.mubr.msk.f32.vlgmr.msra.gmra.mxu1 %vm454_vm1, %v449_v8 }
  0x2e   : > { %p8162_p2 = pneg %p8161_p1  ;;  %p8168_p6 = por %p8167_p5, %p8166_p4 }
  0x30   : > { %1421 = vperm.xlu0 %8097, %v7676_v15   ;;  %1805 = vperm.xlu1 %8098, %v7683_v16   ;;  %p8169_p7 = pnand %p8168_p6, %p8162_p2 }
  0x34   : > { %1810 = vperm.xlu0 %8097, %v7684_v17   ;;  %1815 = vperm.xlu1 %8098, %v7685_v18  }
  0x38   : > { %638 = vperm.xlu0 %8097, %v543_v19   ;;  %643 = vperm.xlu1 %8098, %v544_v20  }
  0x3c   : > { %1032 = vperm.xlu0 %8097, %v7668_v21   ;;  %1037 = vperm.xlu1 %8098, %v7669_v22  }
  0x40   : > { %1426 = vperm.xlu0 %8097, %v7677_v23   ;;  %1431 = vperm.xlu1 %8098, %v7678_v24  }
  0x44   : > { %1820 = vperm.xlu0 %8097, %v7686_v25   ;;  %1825 = vperm.xlu1 %8098, %v7687_v26  }
  0x48   : > { %648 = vperm.xlu0 %8097, %v545_v27   ;;  %1042 = vperm.xlu1 %8098, %v7670_v28  }
  0x4c   : > { %1436 = vperm.xlu0 %8097, %v7679_v29   ;;  %1830 = vperm.xlu1 %8098, %v7688_v30  }
  0x98   : > { %v8492_v31 = vpop.permute.xlu0 %623  ;;  %v8498_v34 = vpop.permute.xlu1 %633 }
  0x9c   : > { %v8494_v32 = vpop.permute.xlu0 %628  ;;  %v8502_v36 = vpop.permute.xlu1 %1017 }
  0xa3   : > { %v8496_v33 = vpop.permute.xlu0 %1022  ;;  %v8506_v38 = vpop.permute.xlu1 %1027 }
  0xa7   : > { %v8500_v35 = vpop.permute.xlu0 %1411  ;;  %v8510_v40 = vpop.permute.xlu1 %1416 }
  0xa8   : > { %15765 = vst [vmem:[#allocation14_spill] sm:$0xff] %v8500_v35  ;;  %15768 = vst [vmem:[#allocation17_spill] sm:$0xff] %v8510_v40 }
  0xab   : > { %v8504_v37 = vpop.permute.xlu0 %1421  ;;  %v8514_v45 = vpop.permute.xlu1 %1805 }
  0xac   : > { %15766 = vst [vmem:[#allocation15_spill] sm:$0xff] %v8504_v37  ;;  %15769 = vst [vmem:[#allocation18_spill] sm:$0xff] %v8514_v45 }
  0xaf   : > { %v8508_v39 = vpop.permute.xlu0 %1810  ;;  %v8521_v49 = vpop.permute.xlu1 %1815 }
  0xb0   : > { %15767 = vst [vmem:[#allocation16_spill] sm:$0xff] %v8508_v39  ;;  %15771 = vst [vmem:[#allocation20_spill] sm:$0xff] %v8521_v49 }
  0xb3   : > { %v8512_v41 = vpop.permute.xlu0 %638  ;;  %v8532_v56 = vpop.permute.xlu1 %643 }
  0xb7   : > { %v8516_v46 = vpop.permute.xlu0 %1032  ;;  %v8567_v18 = vpop.permute.xlu1 %1037 }
  0xbb   : > { %v8523_v50 = vpop.permute.xlu0 %1426 }
  0xbc   : > { %15772 = vst [vmem:[#allocation21_spill] sm:$0xff] %v8523_v50 }
  0xbf   : > { %v8535_v59 = vpop.permute.xlu0 %1820 }
  0xc0   : > { %15775 = vst [vmem:[#allocation24_spill] sm:$0xff] %v8535_v59 }
  0xc3   : > { %v8569_v19 = vpop.permute.xlu0 %648 }
  0xc4   : > { %15776 = vst [vmem:[#allocation25_spill] sm:$0xff] %v8569_v19 }
  0xe5   : > { %v7840_v52 = vpop.f32.mrf.mxu1 }
  0xe6   : > { %v603_v53 = vrot.slane %v7840_v52, %v8526_v51  ;;  %v7850_v55 = vpop.f32.mrf.mxu0 }
  0xe7   : > { %v1391_v57 = vrot.slane %v7850_v55, %v8526_v51  ;;  %v531_v58 = vpop.f32.mrf.mxu1 }
  0xe8   : > { %v604_v60 = vcombine.high %v603_v53, %v603_v53  ;;  %v611_v61 = vrot.slane %v603_v53, %v8526_v51  ;;  %v548_v62 = vcombine.high %v531_v58, %v531_v58  ;;  %v8538_v63 = vpop.f32.mrf.mxu0  ;;  %v8542_v2 = vrot.slane %v531_v58, %v8526_v51 }
  0xe9   : > { %v1392_v0 = vcombine.high %v1391_v57, %v1391_v57  ;;  %v1399_v1 = vrot.slane %v1391_v57, %v8526_v51  ;;  %v1336_v8 = vcombine.high %v8538_v63, %v8538_v63  ;;  %v8554_v9 = vrot.slane %v8538_v63, %v8526_v51 }
  0xea   : > { %v618_v3 = vrot.slane %v604_v60, %v8526_v51  ;;  %v619_v4 = vcombine.high %v611_v61, %v611_v61  ;;  %v686_v5 = vrot.slane %v611_v61, %v8530_v54  ;;  %v8548_v7 = vrot.slane %v548_v62, %v8526_v51 }
  0xeb   : > { %v1406_v6 = vrot.slane %v1392_v0, %v8526_v51  ;;  %v1407_v13 = vcombine.high %v1399_v1, %v1399_v1  ;;  %v1474_v16 = vrot.slane %v1399_v1, %v8530_v54  ;;  %v563_v17 = vcombine.high %v8542_v2, %v8542_v2  ;;  %v8640_v1 = vpop.permute.xlu1 %1431 }
  0xec   : > { %v620_v10 = vcombine.high %v618_v3, %v618_v3  ;;  %v690_v11 = vrot.slane %v618_v3, %v8530_v54  ;;  %v694_v12 = vrot.slane %v619_v4, %v8530_v54  ;;  %v8559_v14 = vmul.f32 %v686_v5, %v8492_v31  ;;  %15782 = vst [vmem:[#allocation31_spill] sm:$0xff] %v8640_v1  ;;  %v8642_v3 = vpop.permute.xlu0 %1436 }
  0xed   : > { %v8562_v15 = vmul.f32 %v686_v5, %v8494_v32  ;;  %v8575_v21 = vmul.f32 %v686_v5, %v8498_v34  ;;  %v8578_v22 = vmul.f32 %v686_v5, %v8512_v41  ;;  %v8581_v23 = vmul.f32 %v686_v5, %v8532_v56  ;;  %15783 = vst [vmem:[#allocation32_spill] sm:$0xff] %v8642_v3 }
  0xee   : > { %v8572_v20 = vrot.slane %v620_v10, %v8530_v54  ;;  %v8584_v24 = vmul.f32 %v686_v5, %v8569_v19  ;;  %v8587_v25 = vmul.f32 %v690_v11, %v8492_v31  ;;  %v8590_v26 = vmul.f32 %v690_v11, %v8494_v32 }
  0xef   : > { %v8593_v27 = vmul.f32 %v690_v11, %v8498_v34  ;;  %v8596_v28 = vmul.f32 %v690_v11, %v8512_v41  ;;  %v8599_v29 = vmul.f32 %v690_v11, %v8532_v56  ;;  %v8602_v30 = vmul.f32 %v690_v11, %v8569_v19 }
  0xf0   : > { %15777 = vst [vmem:[#allocation26_spill] sm:$0xff] %v8572_v20  ;;  %v8605_v42 = vmul.f32 %v694_v12, %v8492_v31  ;;  %v8608_v43 = vmul.f32 %v694_v12, %v8494_v32  ;;  %v8611_v47 = vmul.f32 %v694_v12, %v8498_v34  ;;  %v8614_v52 = vmul.f32 %v694_v12, %v8512_v41 }
  0xf1   : > { %v8617_v53 = vmul.f32 %v694_v12, %v8532_v56  ;;  %v8620_v55 = vmul.f32 %v694_v12, %v8569_v19  ;;  %v8624_v57 = vmul.f32 %v8572_v20, %v8492_v31  ;;  %v8628_v58 = vmul.f32 %v8572_v20, %v8494_v32 }
  0xf2   : > { %v1408_v60 = vcombine.high %v1406_v6, %v1406_v6  ;;  %v8632_v61 = vmul.f32 %v8572_v20, %v8498_v34  ;;  %v8636_v62 = vmul.f32 %v8572_v20, %v8512_v41  ;;  %v1478_v63 = vrot.slane %v1406_v6, %v8530_v54 }
  0xf3   : > { %15778 = vst [vmem:[#allocation27_spill] sm:$0xff] %v8624_v57  ;;  %15779 = vst [vmem:[#allocation28_spill] sm:$0xff] %v8628_v58  ;;  %v1482_v0 = vrot.slane %v1407_v13, %v8530_v54  ;;  %v8646_v4 = vmul.f32 %v8572_v20, %v8532_v56  ;;  %v8652_v10 = vmul.f32 %v1474_v16, %v8500_v35 }
  0xf4   : > { %15780 = vst [vmem:[#allocation29_spill] sm:$0xff] %v8632_v61  ;;  %15781 = vst [vmem:[#allocation30_spill] sm:$0xff] %v8636_v62  ;;  %v8649_v5 = vrot.slane %v1408_v60, %v8530_v54  ;;  %v8655_v11 = vmul.f32 %v1474_v16, %v8510_v40  ;;  %v8658_v6 = vmul.f32 %v1474_v16, %v8504_v37 }
  0xf5   : > { %15784 = vst [vmem:[#allocation33_spill] sm:$0xff] %v8646_v4  ;;  %v8661_v12 = vmul.f32 %v1474_v16, %v8523_v50  ;;  %v8664_v13 = vmul.f32 %v1474_v16, %v8640_v1  ;;  %v8667_v44 = vmul.f32 %v1474_v16, %v8642_v3  ;;  %v8670_v60 = vmul.f32 %v1478_v63, %v8500_v35 }
  0xf6   : > { %15785 = vst [vmem:[#allocation34_spill] sm:$0xff] %v8649_v5  ;;  %15786 = vst [vmem:[#allocation35_spill] sm:$0xff] %v8658_v6  ;;  %v8673_v48 = vmul.f32 %v1478_v63, %v8510_v40  ;;  %v8676_v4 = vmul.f32 %v1478_v63, %v8504_v37  ;;  %v8679_v20 = vmul.f32 %v1478_v63, %v8523_v50 }
  0xf7   : > { %15787 = vst [vmem:[#allocation36_spill] sm:$0xff] %v8661_v12  ;;  %15788 = vst [vmem:[#allocation37_spill] sm:$0xff] %v8664_v13  ;;  %v8682_v62 = vmul.f32 %v1478_v63, %v8640_v1  ;;  %v8685_v61 = vmul.f32 %v1478_v63, %v8642_v3  ;;  %v8688_v16 = vmul.f32 %v1482_v0, %v8500_v35 }
  0xf8   : > { %15789 = vst [vmem:[#allocation38_spill] sm:$0xff] %v8667_v44  ;;  %15790 = vst [vmem:[#allocation39_spill] sm:$0xff] %v8670_v60  ;;  %v8691_v5 = vmul.f32 %v1482_v0, %v8510_v40  ;;  %v8694_v58 = vmul.f32 %v1482_v0, %v8504_v37  ;;  %v564_v57 = vcombine.high %v8548_v7, %v8548_v7 }
  0xf9   : > { %15791 = vst [vmem:[#allocation40_spill] sm:$0xff] %v8673_v48  ;;  %15792 = vst [vmem:[#allocation41_spill] sm:$0xff] %v8676_v4  ;;  %v571_v59 = vrot.slane %v8542_v2, %v8526_v51  ;;  %v578_v49 = vrot.slane %v8548_v7, %v8526_v51  ;;  %v8703_v63 = vmul.f32 %v1482_v0, %v8523_v50 }
  0xfa   : > { %15793 = vst [vmem:[#allocation42_spill] sm:$0xff] %v8679_v20  ;;  %15794 = vst [vmem:[#allocation43_spill] sm:$0xff] %v8682_v62  ;;  %v8706_v39 = vmul.f32 %v1482_v0, %v8640_v1  ;;  %v585_v45 = vrot.slane %v563_v17, %v8526_v51  ;;  %v8710_v20 = vrot.slane %v1336_v8, %v8526_v51 }
  0xfb   : > { %15795 = vst [vmem:[#allocation44_spill] sm:$0xff] %v8685_v61  ;;  %15796 = vst [vmem:[#allocation45_spill] sm:$0xff] %v8688_v16  ;;  %v592_v4 = vrot.slane %v564_v57, %v8526_v51  ;;  %v593_v48 = vcombine.high %v571_v59, %v571_v59  ;;  %v654_v2 = vrot.slane %v571_v59, %v8530_v54 }
  0xfc   : > { %15797 = vst [vmem:[#allocation46_spill] sm:$0xff] %v8691_v5  ;;  %15798 = vst [vmem:[#allocation47_spill] sm:$0xff] %v8694_v58  ;;  %v594_v58 = vcombine.high %v578_v49, %v578_v49  ;;  %v8715_v5 = vmul.f32 %v1482_v0, %v8642_v3  ;;  %v595_v7 = vcombine.high %v585_v45, %v585_v45 }
  0xfd   : > { %15799 = vst [vmem:[#allocation48_spill] sm:$0xff] %v8703_v63  ;;  %15800 = vst [vmem:[#allocation49_spill] sm:$0xff] %v8706_v39  ;;  %v658_v63 = vrot.slane %v585_v45, %v8530_v54  ;;  %v1351_v39 = vcombine.high %v8554_v9, %v8554_v9  ;;  %v596_v16 = vcombine.high %v592_v4, %v592_v4 }
  0xfe   : > { %15801 = vst [vmem:[#allocation50_spill] sm:$0xff] %v8715_v5  ;;  %v670_v17 = vrot.slane %v578_v49, %v8530_v54  ;;  %v1352_v8 = vcombine.high %v8710_v20, %v8710_v20  ;;  %v8725_v57 = vrot.slane %v8554_v9, %v8526_v51  ;;  %v662_v59 = vrot.slane %v593_v48, %v8530_v54 }
  0xff   : > { %v666_v0 = vrot.slane %v595_v7, %v8530_v54  ;;  %v674_v5 = vrot.slane %v592_v4, %v8530_v54  ;;  %v678_v45 = vrot.slane %v594_v58, %v8530_v54  ;;  %v682_v61 = vrot.slane %v596_v16, %v8530_v54 }
 0x100   : > { %v8733_v62 = vmul.f32 %v654_v2, %v8492_v31  ;;  %v8736_v49 = vmul.f32 %v654_v2, %v8494_v32  ;;  %v8739_v60 = vmul.f32 %v654_v2, %v8498_v34  ;;  %v8742_v9 = vmul.f32 %v654_v2, %v8512_v41 }
 0x101   : > { %v8745_v48 = vmul.f32 %v654_v2, %v8532_v56  ;;  %v8748_v4 = vmul.f32 %v654_v2, %v8569_v19  ;;  %v8751_v58 = vmul.f32 %v658_v63, %v8492_v31  ;;  %v8754_v16 = vmul.f32 %v658_v63, %v8494_v32 }
 0x102   : > { %v8757_v7 = vmul.f32 %v658_v63, %v8498_v34  ;;  %v8760_v44 = vmul.f32 %v658_v63, %v8512_v41  ;;  %v8763_v13 = vmul.f32 %v658_v63, %v8532_v56  ;;  %v8766_v12 = vmul.f32 %v658_v63, %v8569_v19 }
 0x103   : > { %15802 = vst [vmem:[#allocation51_spill] sm:$0xff] %v8751_v58  ;;  %15803 = vst [vmem:[#allocation52_spill] sm:$0xff] %v8754_v16  ;;  %v8769_v2 = vmul.f32 %v662_v59, %v8492_v31  ;;  %v8772_v6 = vmul.f32 %v662_v59, %v8494_v32  ;;  %v8775_v16 = vmul.f32 %v662_v59, %v8498_v34 }
 0x104   : > { %15804 = vst [vmem:[#allocation53_spill] sm:$0xff] %v8757_v7  ;;  %15805 = vst [vmem:[#allocation54_spill] sm:$0xff] %v8760_v44  ;;  %v8778_v7 = vmul.f32 %v662_v59, %v8512_v41  ;;  %v8781_v44 = vmul.f32 %v662_v59, %v8532_v56  ;;  %v8787_v63 = vmul.f32 %v666_v0, %v8492_v31 }
 0x105   : > { %15806 = vst [vmem:[#allocation55_spill] sm:$0xff] %v8763_v13  ;;  %15807 = vst [vmem:[#allocation56_spill] sm:$0xff] %v8766_v12  ;;  %v8784_v13 = vmul.f32 %v662_v59, %v8569_v19  ;;  %v8805_v59 = vmul.f32 %v670_v17, %v8492_v31 }
 0x106   : > { %15808 = vst [vmem:[#allocation57_spill] sm:$0xff] %v8769_v2  ;;  %15809 = vst [vmem:[#allocation58_spill] sm:$0xff] %v8772_v6  ;;  %v8790_v2 = vmul.f32 %v666_v0, %v8494_v32  ;;  %v8793_v6 = vmul.f32 %v666_v0, %v8498_v34 }
 0x107   : > { %15810 = vst [vmem:[#allocation59_spill] sm:$0xff] %v8775_v16  ;;  %15811 = vst [vmem:[#allocation60_spill] sm:$0xff] %v8778_v7  ;;  %v8796_v16 = vmul.f32 %v666_v0, %v8512_v41  ;;  %v8799_v7 = vmul.f32 %v666_v0, %v8532_v56 }
 0x108   : > { %15812 = vst [vmem:[#allocation61_spill] sm:$0xff] %v8781_v44  ;;  %15813 = vst [vmem:[#allocation62_spill] sm:$0xff] %v8784_v13  ;;  %v8802_v44 = vmul.f32 %v666_v0, %v8569_v19  ;;  %v8823_v0 = vmul.f32 %v674_v5, %v8492_v31 }
 0x109   : > { %15814 = vst [vmem:[#allocation63_spill] sm:$0xff] %v8787_v63  ;;  %15815 = vst [vmem:[#allocation64_spill] sm:$0xff] %v8790_v2  ;;  %v8808_v63 = vmul.f32 %v670_v17, %v8494_v32  ;;  %v8811_v2 = vmul.f32 %v670_v17, %v8498_v34 }
 0x10a   : > { %15816 = vst [vmem:[#allocation65_spill] sm:$0xff] %v8793_v6  ;;  %15817 = vst [vmem:[#allocation66_spill] sm:$0xff] %v8796_v16  ;;  %v8814_v6 = vmul.f32 %v670_v17, %v8512_v41  ;;  %v8817_v16 = vmul.f32 %v670_v17, %v8532_v56 }
 0x10b   : > { %15818 = vst [vmem:[#allocation67_spill] sm:$0xff] %v8799_v7  ;;  %15819 = vst [vmem:[#allocation68_spill] sm:$0xff] %v8802_v44  ;;  %v8820_v7 = vmul.f32 %v670_v17, %v8569_v19  ;;  %v8841_v17 = vmul.f32 %v678_v45, %v8492_v31 }
 0x10c   : > { %15820 = vst [vmem:[#allocation69_spill] sm:$0xff] %v8805_v59  ;;  %15821 = vst [vmem:[#allocation70_spill] sm:$0xff] %v8808_v63  ;;  %v8826_v59 = vmul.f32 %v674_v5, %v8494_v32  ;;  %v8829_v63 = vmul.f32 %v674_v5, %v8498_v34 }
 0x10d   : > { %15822 = vst [vmem:[#allocation71_spill] sm:$0xff] %v8811_v2  ;;  %15823 = vst [vmem:[#allocation72_spill] sm:$0xff] %v8814_v6  ;;  %v8832_v2 = vmul.f32 %v674_v5, %v8512_v41  ;;  %v8835_v6 = vmul.f32 %v674_v5, %v8532_v56 }
 0x10e   : > { %15824 = vst [vmem:[#allocation73_spill] sm:$0xff] %v8817_v16  ;;  %15825 = vst [vmem:[#allocation74_spill] sm:$0xff] %v8820_v7  ;;  %v8838_v16 = vmul.f32 %v674_v5, %v8569_v19  ;;  %v8859_v5 = vmul.f32 %v682_v61, %v8492_v31  ;;  %v1381_v31 = vcombine.high %v8725_v57, %v8725_v57 }
 0x10f   : > { %15826 = vst [vmem:[#allocation75_spill] sm:$0xff] %v8823_v0  ;;  %15827 = vst [vmem:[#allocation76_spill] sm:$0xff] %v8826_v59  ;;  %v8844_v0 = vmul.f32 %v678_v45, %v8494_v32  ;;  %v8847_v59 = vmul.f32 %v678_v45, %v8498_v34 }
 0x110   : > { %15828 = vst [vmem:[#allocation77_spill] sm:$0xff] %v8829_v63  ;;  %15829 = vst [vmem:[#allocation78_spill] sm:$0xff] %v8832_v2  ;;  %v8850_v63 = vmul.f32 %v678_v45, %v8512_v41  ;;  %v8853_v2 = vmul.f32 %v678_v45, %v8532_v56 }
 0x111   : > { %15830 = vst [vmem:[#allocation79_spill] sm:$0xff] %v8835_v6  ;;  %15831 = vst [vmem:[#allocation80_spill] sm:$0xff] %v8838_v16  ;;  %v8856_v6 = vmul.f32 %v678_v45, %v8569_v19  ;;  %v7845_v16 = vpop.f32.mrf.mxu1  ;;  %v1380_v45 = vrot.slane %v1352_v8, %v8526_v51 }
 0x112   : > { %15832 = vst [vmem:[#allocation81_spill] sm:$0xff] %v8841_v17  ;;  %15833 = vst [vmem:[#allocation82_spill] sm:$0xff] %v8844_v0  ;;  %v8862_v17 = vmul.f32 %v682_v61, %v8494_v32  ;;  %v8865_v0 = vmul.f32 %v682_v61, %v8498_v34  ;;  %v1442_v32 = vrot.slane %v8725_v57, %v8530_v54 }
 0x113   : > { %15834 = vst [vmem:[#allocation83_spill] sm:$0xff] %v8847_v59  ;;  %15835 = vst [vmem:[#allocation84_spill] sm:$0xff] %v8850_v63  ;;  %v1366_v59 = vrot.slane %v8710_v20, %v8526_v51  ;;  %v1373_v63 = vrot.slane %v1351_v39, %v8526_v51  ;;  %v8879_v34 = vmul.f32 %v682_v61, %v8532_v56 }
 0x114   : > { %15836 = vst [vmem:[#allocation85_spill] sm:$0xff] %v8853_v2  ;;  %15837 = vst [vmem:[#allocation86_spill] sm:$0xff] %v8856_v6  ;;  %v8871_v2 = vmul.f32 %v682_v61, %v8512_v41  ;;  %v8883_v39 = vmul.f32 %v682_v61, %v8569_v19  ;;  %v1384_v41 = vcombine.high %v1380_v45, %v1380_v45 }
 0x115   : > { %15838 = vst [vmem:[#allocation87_spill] sm:$0xff] %v8859_v5  ;;  %15839 = vst [vmem:[#allocation88_spill] sm:$0xff] %v8862_v17  ;;  %v1383_v17 = vcombine.high %v1373_v63, %v1373_v63  ;;  %v1446_v20 = vrot.slane %v1373_v63, %v8530_v54  ;;  %v8887_v8 = vrot.slane %v7845_v16, %v8526_v51 }
 0x116   : > { %15840 = vst [vmem:[#allocation89_spill] sm:$0xff] %v8865_v0  ;;  %15841 = vst [vmem:[#allocation90_spill] sm:$0xff] %v8871_v2  ;;  %v1382_v0 = vcombine.high %v1366_v59, %v1366_v59  ;;  %v1458_v2 = vrot.slane %v1366_v59, %v8530_v54  ;;  %v1450_v5 = vrot.slane %v1381_v31, %v8530_v54 }
 0x117   : > { %15842 = vst [vmem:[#allocation91_spill] sm:$0xff] %v8879_v34  ;;  %15843 = vst [vmem:[#allocation92_spill] sm:$0xff] %v8883_v39  ;;  %v1454_v57 = vrot.slane %v1383_v17, %v8530_v54  ;;  %v1462_v56 = vrot.slane %v1380_v45, %v8530_v54  ;;  %v8893_v34 = vmul.f32 %v1442_v32, %v8500_v35 }
 0x118   : > { %v1466_v63 = vrot.slane %v1382_v0, %v8530_v54  ;;  %v1470_v61 = vrot.slane %v1384_v41, %v8530_v54  ;;  %v8898_v19 = vmul.f32 %v1442_v32, %v8510_v40  ;;  %v8901_v59 = vmul.f32 %v1442_v32, %v8504_v37 }
 0x119   : > { %15844 = vst [vmem:[#allocation93_spill] sm:$0xff] %v8893_v34  ;;  %v8904_v16 = vmul.f32 %v1442_v32, %v8523_v50  ;;  %v8907_v17 = vmul.f32 %v1442_v32, %v8640_v1  ;;  %v8910_v45 = vmul.f32 %v1442_v32, %v8642_v3  ;;  %v8913_v31 = vmul.f32 %v1446_v20, %v8500_v35 }
 0x11a   : > { %15845 = vst [vmem:[#allocation94_spill] sm:$0xff] %v8898_v19  ;;  %15846 = vst [vmem:[#allocation95_spill] sm:$0xff] %v8901_v59  ;;  %v8916_v0 = vmul.f32 %v1446_v20, %v8510_v40  ;;  %v8919_v41 = vmul.f32 %v1446_v20, %v8504_v37  ;;  %v8922_v59 = vmul.f32 %v1446_v20, %v8523_v50 }
 0x11b   : > { %15847 = vst [vmem:[#allocation96_spill] sm:$0xff] %v8904_v16  ;;  %15848 = vst [vmem:[#allocation97_spill] sm:$0xff] %v8907_v17  ;;  %v8925_v16 = vmul.f32 %v1446_v20, %v8640_v1  ;;  %v8928_v17 = vmul.f32 %v1446_v20, %v8642_v3  ;;  %v8931_v32 = vmul.f32 %v1450_v5, %v8500_v35 }
 0x11c   : > { %15849 = vst [vmem:[#allocation98_spill] sm:$0xff] %v8910_v45  ;;  %15850 = vst [vmem:[#allocation99_spill] sm:$0xff] %v8913_v31  ;;  %v8934_v31 = vmul.f32 %v1450_v5, %v8510_v40  ;;  %v924_v45 = vpop.f32.mrf.mxu1  ;;  %v8949_v20 = vmul.f32 %v1454_v57, %v8500_v35 }
 0x11d   : > { %15851 = vst [vmem:[#allocation100_spill] sm:$0xff] %v8916_v0  ;;  %15852 = vst [vmem:[#allocation101_spill] sm:$0xff] %v8919_v41  ;;  %v8937_v0 = vmul.f32 %v1450_v5, %v8504_v37  ;;  %v8940_v41 = vmul.f32 %v1450_v5, %v8523_v50 }
 0x11e   : > { %15853 = vst [vmem:[#allocation102_spill] sm:$0xff] %v8922_v59  ;;  %15854 = vst [vmem:[#allocation103_spill] sm:$0xff] %v8925_v16  ;;  %v8943_v59 = vmul.f32 %v1450_v5, %v8640_v1  ;;  %v8946_v16 = vmul.f32 %v1450_v5, %v8642_v3  ;;  %v8967_v5 = vmul.f32 %v1458_v2, %v8500_v35 }
 0x11f   : > { %15855 = vst [vmem:[#allocation104_spill] sm:$0xff] %v8928_v17  ;;  %15856 = vst [vmem:[#allocation105_spill] sm:$0xff] %v8931_v32  ;;  %v8952_v32 = vmul.f32 %v1454_v57, %v8510_v40 }
 0x120   : > { %15857 = vst [vmem:[#allocation106_spill] sm:$0xff] %v8934_v31  ;;  %15858 = vst [vmem:[#allocation107_spill] sm:$0xff] %v8937_v0  ;;  %v8955_v31 = vmul.f32 %v1454_v57, %v8504_v37  ;;  %v8958_v0 = vmul.f32 %v1454_v57, %v8523_v50 }
 0x121   : > { %15859 = vst [vmem:[#allocation108_spill] sm:$0xff] %v8940_v41  ;;  %15860 = vst [vmem:[#allocation109_spill] sm:$0xff] %v8943_v59  ;;  %v8961_v41 = vmul.f32 %v1454_v57, %v8640_v1  ;;  %v8964_v59 = vmul.f32 %v1454_v57, %v8642_v3  ;;  %v8985_v57 = vmul.f32 %v1462_v56, %v8500_v35 }
 0x122   : > { %15861 = vst [vmem:[#allocation110_spill] sm:$0xff] %v8946_v16  ;;  %15862 = vst [vmem:[#allocation111_spill] sm:$0xff] %v8949_v20  ;;  %v8970_v20 = vmul.f32 %v1458_v2, %v8510_v40 }
 0x123   : > { %15863 = vst [vmem:[#allocation112_spill] sm:$0xff] %v8952_v32  ;;  %15864 = vst [vmem:[#allocation113_spill] sm:$0xff] %v8955_v31  ;;  %v8973_v32 = vmul.f32 %v1458_v2, %v8504_v37  ;;  %v8976_v31 = vmul.f32 %v1458_v2, %v8523_v50 }
 0x124   : > { %15865 = vst [vmem:[#allocation114_spill] sm:$0xff] %v8958_v0  ;;  %15866 = vst [vmem:[#allocation115_spill] sm:$0xff] %v8961_v41  ;;  %v8979_v0 = vmul.f32 %v1458_v2, %v8640_v1  ;;  %v8982_v41 = vmul.f32 %v1458_v2, %v8642_v3  ;;  %v9003_v2 = vmul.f32 %v1466_v63, %v8500_v35 }
 0x125   : > { %15867 = vst [vmem:[#allocation116_spill] sm:$0xff] %v8964_v59  ;;  %15868 = vst [vmem:[#allocation117_spill] sm:$0xff] %v8967_v5  ;;  %v7855_v59 = vpop.f32.mrf.mxu1  ;;  %v8988_v5 = vmul.f32 %v1462_v56, %v8510_v40 }
 0x126   : > { %15869 = vst [vmem:[#allocation118_spill] sm:$0xff] %v8970_v20  ;;  %15870 = vst [vmem:[#allocation119_spill] sm:$0xff] %v8973_v32  ;;  %v8991_v20 = vmul.f32 %v1462_v56, %v8504_v37  ;;  %v8994_v32 = vmul.f32 %v1462_v56, %v8523_v50 }
 0x127   : > { %15871 = vst [vmem:[#allocation120_spill] sm:$0xff] %v8976_v31  ;;  %15872 = vst [vmem:[#allocation121_spill] sm:$0xff] %v8979_v0  ;;  %v8997_v31 = vmul.f32 %v1462_v56, %v8640_v1  ;;  %v9000_v0 = vmul.f32 %v1462_v56, %v8642_v3  ;;  %v9021_v56 = vmul.f32 %v1470_v61, %v8500_v35 }
 0x128   : > { %15873 = vst [vmem:[#allocation122_spill] sm:$0xff] %v8982_v41  ;;  %15874 = vst [vmem:[#allocation123_spill] sm:$0xff] %v8985_v57  ;;  %v9006_v57 = vmul.f32 %v1466_v63, %v8510_v40  ;;  %v942_v35 = vcombine.high %v924_v45, %v924_v45 }
 0x129   : > { %15875 = vst [vmem:[#allocation124_spill] sm:$0xff] %v8988_v5  ;;  %15876 = vst [vmem:[#allocation125_spill] sm:$0xff] %v8991_v20  ;;  %v9009_v5 = vmul.f32 %v1466_v63, %v8504_v37  ;;  %v9012_v20 = vmul.f32 %v1466_v63, %v8523_v50 }
 0x12a   : > { %15877 = vst [vmem:[#allocation126_spill] sm:$0xff] %v8994_v32  ;;  %15878 = vst [vmem:[#allocation127_spill] sm:$0xff] %v8997_v31  ;;  %v9015_v32 = vmul.f32 %v1466_v63, %v8640_v1  ;;  %v9018_v31 = vmul.f32 %v1466_v63, %v8642_v3  ;;  %v9038_v63 = vmul.f32 %v1470_v61, %v8523_v50 }
 0x12b   : > { %15879 = vst [vmem:[#allocation128_spill] sm:$0xff] %v9000_v0  ;;  %15880 = vst [vmem:[#allocation129_spill] sm:$0xff] %v9003_v2  ;;  %v9023_v0 = vpop.permute.xlu1 %1825  ;;  %v9026_v2 = vmul.f32 %v1470_v61, %v8510_v40  ;;  %v9042_v40 = vrot.slane %v7855_v59, %v8526_v51  ;;  %v956_v50 = vrot.slane %v942_v35, %v8526_v51 }
 0x12c   : > { %15881 = vst [vmem:[#allocation130_spill] sm:$0xff] %v9006_v57  ;;  %15882 = vst [vmem:[#allocation131_spill] sm:$0xff] %v9009_v5  ;;  %v9029_v57 = vmul.f32 %v1470_v61, %v8504_v37  ;;  %v9035_v5 = vpop.f32.mrf.mxu1  ;;  %v9045_v37 = vmul.f32 %v1470_v61, %v8640_v1 }
 0x12d   : > { %15883 = vst [vmem:[#allocation132_spill] sm:$0xff] %v9012_v20  ;;  %15884 = vst [vmem:[#allocation133_spill] sm:$0xff] %v9015_v32  ;;  %v998_v20 = vcombine.high %v8887_v8, %v8887_v8  ;;  %v1005_v32 = vrot.slane %v8887_v8, %v8526_v51  ;;  %v9050_v8 = vmul.f32 %v1470_v61, %v8642_v3 }
 0x12e   : > { %15885 = vst [vmem:[#allocation134_spill] sm:$0xff] %v9018_v31  ;;  %15886 = vst [vmem:[#allocation135_spill] sm:$0xff] %v9021_v56  ;;  %v949_v56 = vrot.slane %v924_v45, %v8526_v51  ;;  %v9057_v59 = vrot.slane %v9035_v5, %v8526_v51 }
 0x12f   : > { %15887 = vst [vmem:[#allocation136_spill] sm:$0xff] %v9023_v0  ;;  %15888 = vst [vmem:[#allocation137_spill] sm:$0xff] %v9026_v2  ;;  %v1013_v2 = vcombine.high %v1005_v32, %v1005_v32  ;;  %v1080_v31 = vrot.slane %v1005_v32, %v8530_v54 }
 0x130   : > { %15889 = vst [vmem:[#allocation138_spill] sm:$0xff] %v9029_v57  ;;  %15890 = vst [vmem:[#allocation139_spill] sm:$0xff] %v9035_v5  ;;  %v1012_v57 = vrot.slane %v998_v20, %v8526_v51  ;;  %v965_v3 = vrot.slane %v949_v56, %v8526_v51 }
 0x131   : > { %15891 = vst [vmem:[#allocation140_spill] sm:$0xff] %v9038_v63  ;;  %15892 = vst [vmem:[#allocation141_spill] sm:$0xff] %v9042_v40  ;;  %v1088_v20 = vrot.slane %v1013_v2, %v8530_v54  ;;  %v1153_v32 = vmul.f32 %v1080_v31, %v8502_v36  ;;  %v1154_v61 = vmul.f32 %v1080_v31, %v8496_v33  ;;  %v9066_v63 = vpop.permute.xlu1 %1042 }
 0x132   : > { %15893 = vst [vmem:[#allocation142_spill] sm:$0xff] %v9045_v37  ;;  %15894 = vst [vmem:[#allocation143_spill] sm:$0xff] %v9050_v8  ;;  %v1014_v45 = vcombine.high %v1012_v57, %v1012_v57  ;;  %v1084_v1 = vrot.slane %v1012_v57, %v8530_v54  ;;  %v957_v37 = vcombine.high %v949_v56, %v949_v56 }
 0x133   : > { %15895 = vst [vmem:[#allocation144_spill] sm:$0xff] %v9057_v59  ;;  %15896 = vst [vmem:[#allocation145_spill] sm:$0xff] %v9066_v63  ;;  %v1155_v59 = vmul.f32 %v1080_v31, %v8506_v38  ;;  %v1156_v57 = vmul.f32 %v1080_v31, %v8516_v46  ;;  %v1157_v2 = vmul.f32 %v1080_v31, %v8567_v18 }
 0x134   : > { %v9069_v8 = vrot.slane %v1014_v45, %v8530_v54  ;;  %v1158_v5 = vmul.f32 %v1080_v31, %v9066_v63  ;;  %v1159_v41 = vmul.f32 %v1084_v1, %v8502_v36  ;;  %v1160_v56 = vmul.f32 %v1084_v1, %v8496_v33 }
 0x135   : > { %v1161_v16 = vmul.f32 %v1084_v1, %v8506_v38  ;;  %v1162_v35 = vmul.f32 %v1084_v1, %v8516_v46  ;;  %v1163_v17 = vmul.f32 %v1084_v1, %v8567_v18  ;;  %v1164_v45 = vmul.f32 %v1084_v1, %v9066_v63 }
 0x136   : > { %15897 = vst [vmem:[#allocation146_spill] sm:$0xff] %v9069_v8  ;;  %v1165_v0 = vmul.f32 %v1088_v20, %v8502_v36  ;;  %v1166_v19 = vmul.f32 %v1088_v20, %v8496_v33  ;;  %v1167_v34 = vmul.f32 %v1088_v20, %v8506_v38  ;;  %v1168_v31 = vmul.f32 %v1088_v20, %v8516_v46 }
 0x137   : > { %v1169_v40 = vmul.f32 %v1088_v20, %v8567_v18  ;;  %v1170_v39 = vmul.f32 %v1088_v20, %v9066_v63  ;;  %v9089_v6 = vmul.f32 %v9069_v8, %v8502_v36  ;;  %v9093_v7 = vmul.f32 %v9069_v8, %v8496_v33 }
 0x138   : > { %v9097_v1 = vmul.f32 %v9069_v8, %v8506_v38  ;;  %v9101_v44 = vmul.f32 %v9069_v8, %v8516_v46  ;;  %v9105_v13 = vmul.f32 %v9069_v8, %v8567_v18  ;;  %v1225_v20 = vadd.f32 %v1153_v32, %v8559_v14 }
 0x139   : > { %15898 = vst [vmem:[#allocation147_spill] sm:$0xff] %v9089_v6  ;;  %15899 = vst [vmem:[#allocation148_spill] sm:$0xff] %v9093_v7  ;;  %v1226_v6 = vadd.f32 %v1154_v61, %v8562_v15  ;;  %v9110_v12 = vadd.f32 %v1155_v59, %v8575_v21  ;;  %v9113_v7 = vadd.f32 %v1156_v57, %v8578_v22 }
 0x13a   : > { %15900 = vst [vmem:[#allocation149_spill] sm:$0xff] %v9097_v1  ;;  %15901 = vst [vmem:[#allocation150_spill] sm:$0xff] %v9101_v44  ;;  %v9116_v1 = vadd.f32 %v1157_v2, %v8581_v23  ;;  %v9119_v58 = vadd.f32 %v1158_v5, %v8584_v24  ;;  %v9122_v44 = vadd.f32 %v1159_v41, %v8587_v25 }
 0x13b   : > { %15902 = vst [vmem:[#allocation151_spill] sm:$0xff] %v9105_v13  ;;  %15903 = vst [vmem:[#allocation152_spill] sm:$0xff] %v9110_v12  ;;  %v9125_v13 = vadd.f32 %v1163_v17, %v8599_v29  ;;  %v9128_v14 = vadd.f32 %v1164_v45, %v8602_v30  ;;  %v9131_v15 = vadd.f32 %v1165_v0, %v8605_v42 }
 0x13c   : > { %15904 = vst [vmem:[#allocation153_spill] sm:$0xff] %v9113_v7  ;;  %15905 = vst [vmem:[#allocation154_spill] sm:$0xff] %v9116_v1  ;;  %v9134_v21 = vadd.f32 %v1166_v19, %v8608_v43  ;;  %v9137_v22 = vadd.f32 %v1167_v34, %v8611_v47  ;;  %v9140_v23 = vadd.f32 %v1168_v31, %v8614_v52 }
 0x13d   : > { %15906 = vst [vmem:[#allocation155_spill] sm:$0xff] %v9119_v58  ;;  %15907 = vst [vmem:[#allocation156_spill] sm:$0xff] %v9122_v44  ;;  %v9143_v24 = vadd.f32 %v1169_v40, %v8617_v53  ;;  %v9146_v25 = vadd.f32 %v1170_v39, %v8620_v55  ;;  %v958_v29 = vcombine.high %v956_v50, %v956_v50 }
 0x13e   : > { %15908 = vst [vmem:[#allocation157_spill] sm:$0xff] %v9125_v13  ;;  %15909 = vst [vmem:[#allocation158_spill] sm:$0xff] %v9128_v14  ;;  %v972_v30 = vrot.slane %v956_v50, %v8526_v51  ;;  %v979_v42 = vrot.slane %v957_v37, %v8526_v51  ;;  %v9151_v19 = vadd.f32 %v1160_v56, %v8590_v26 }
 0x13f   : > { %15910 = vst [vmem:[#allocation159_spill] sm:$0xff] %v9131_v15  ;;  %15911 = vst [vmem:[#allocation160_spill] sm:$0xff] %v9134_v21  ;;  %v9154_v43 = vadd.f32 %v1161_v16, %v8593_v27  ;;  %v987_v47 = vcombine.high %v965_v3, %v965_v3  ;;  %v1048_v52 = vrot.slane %v965_v3, %v8530_v54 }
 0x140   : > { %15912 = vst [vmem:[#allocation161_spill] sm:$0xff] %v9137_v22  ;;  %15913 = vst [vmem:[#allocation162_spill] sm:$0xff] %v9140_v23  ;;  %v9158_v40 = vadd.f32 %v1162_v35, %v8596_v28  ;;  %v986_v53 = vrot.slane %v958_v29, %v8526_v51  ;;  %v988_v55 = vcombine.high %v972_v30, %v972_v30 }
 0x141   : > { %15914 = vst [vmem:[#allocation163_spill] sm:$0xff] %v9143_v24  ;;  %15915 = vst [vmem:[#allocation164_spill] sm:$0xff] %v9146_v25  ;;  %v989_v34 = vcombine.high %v979_v42, %v979_v42  ;;  %v1052_v50 = vrot.slane %v979_v42, %v8530_v54  ;;  %v1056_v37 = vrot.slane %v987_v47, %v8530_v54 }
 0x142   : > { %15916 = vst [vmem:[#allocation165_spill] sm:$0xff] %v9151_v19  ;;  %15917 = vst [vmem:[#allocation166_spill] sm:$0xff] %v9154_v43  ;;  %v9164_v26 = vadd.f32 %v8652_v10, %v1225_v20  ;;  %v9167_v27 = vadd.f32 %v8655_v11, %v1226_v6  ;;  %v990_v39 = vcombine.high %v986_v53, %v986_v53 }
 0x143   : > { %15918 = vst [vmem:[#allocation167_spill] sm:$0xff] %v9158_v40  ;;  %v1064_v3 = vrot.slane %v972_v30, %v8530_v54  ;;  %v1105_v28 = vmul.f32 %v1048_v52, %v8502_v36  ;;  %v1106_v16 = vmul.f32 %v1048_v52, %v8496_v33  ;;  %v1060_v17 = vrot.slane %v989_v34, %v8530_v54 }
 0x144   : > { %15919 = vst [vmem:[#allocation168_spill] sm:$0xff] %v9164_v26  ;;  %15920 = vst [vmem:[#allocation169_spill] sm:$0xff] %v9167_v27  ;;  %v1068_v0 = vrot.slane %v986_v53, %v8530_v54  ;;  %v1072_v41 = vrot.slane %v988_v55, %v8530_v54  ;;  %v1107_v5 = vmul.f32 %v1048_v52, %v8506_v38 }
 0x145   : > { %v1076_v10 = vrot.slane %v990_v39, %v8530_v54  ;;  %v1108_v11 = vmul.f32 %v1048_v52, %v8516_v46  ;;  %v1109_v6 = vmul.f32 %v1048_v52, %v8567_v18  ;;  %v1110_v59 = vmul.f32 %v1048_v52, %v9066_v63 }
 0x146   : > { %v1111_v32 = vmul.f32 %v1052_v50, %v8502_v36  ;;  %v1112_v61 = vmul.f32 %v1052_v50, %v8496_v33  ;;  %v1113_v35 = vmul.f32 %v1052_v50, %v8506_v38  ;;  %v1114_v57 = vmul.f32 %v1052_v50, %v8516_v46 }
 0x147   : > { %v1115_v2 = vmul.f32 %v1052_v50, %v8567_v18  ;;  %v1116_v56 = vmul.f32 %v1052_v50, %v9066_v63  ;;  %v1117_v45 = vmul.f32 %v1056_v37, %v8502_v36  ;;  %v1118_v31 = vmul.f32 %v1056_v37, %v8496_v33 }
 0x148   : > { %v9189_v20 = vmul.f32 %v1056_v37, %v8506_v38  ;;  %v9192_v29 = vmul.f32 %v1056_v37, %v8516_v46  ;;  %v9195_v30 = vmul.f32 %v1056_v37, %v8567_v18  ;;  %v1122_v42 = vmul.f32 %v1056_v37, %v9066_v63 }
 0x149   : > { %v1123_v47 = vmul.f32 %v1060_v17, %v8502_v36  ;;  %v1124_v52 = vmul.f32 %v1060_v17, %v8496_v33  ;;  %v1125_v53 = vmul.f32 %v1060_v17, %v8506_v38  ;;  %v1126_v55 = vmul.f32 %v1060_v17, %v8516_v46 }
 0x14a   : > { %v1127_v34 = vmul.f32 %v1060_v17, %v8567_v18  ;;  %v1128_v50 = vmul.f32 %v1060_v17, %v9066_v63  ;;  %v1129_v39 = vmul.f32 %v1064_v3, %v8502_v36  ;;  %v1130_v8 = vmul.f32 %v1064_v3, %v8496_v33 }
 0x14b   : > { %v1131_v25 = vmul.f32 %v1064_v3, %v8506_v38  ;;  %v1132_v37 = vmul.f32 %v1064_v3, %v8516_v46  ;;  %v1133_v27 = vmul.f32 %v1064_v3, %v8567_v18  ;;  %v1134_v26 = vmul.f32 %v1064_v3, %v9066_v63 }
 0x14c   : > { %v1135_v54 = vmul.f32 %v1068_v0, %v8502_v36  ;;  %v1136_v40 = vmul.f32 %v1068_v0, %v8496_v33  ;;  %v1137_v43 = vmul.f32 %v1068_v0, %v8506_v38  ;;  %v1138_v17 = vmul.f32 %v1068_v0, %v8516_v46 }
 0x14d   : > { %v1139_v19 = vmul.f32 %v1068_v0, %v8567_v18  ;;  %v1140_v51 = vmul.f32 %v1068_v0, %v9066_v63  ;;  %v1141_v24 = vmul.f32 %v1072_v41, %v8502_v36  ;;  %v1142_v23 = vmul.f32 %v1072_v41, %v8496_v33 }
 0x14e   : > { %v1143_v22 = vmul.f32 %v1072_v41, %v8506_v38  ;;  %v1144_v3 = vmul.f32 %v1072_v41, %v8516_v46  ;;  %v1145_v21 = vmul.f32 %v1072_v41, %v8567_v18  ;;  %v1146_v15 = vmul.f32 %v1072_v41, %v9066_v63 }
 0x14f   : > { %v1147_v14 = vmul.f32 %v1076_v10, %v8502_v36  ;;  %v1148_v13 = vmul.f32 %v1076_v10, %v8496_v33  ;;  %v1149_v44 = vmul.f32 %v1076_v10, %v8506_v38  ;;  %v1150_v0 = vmul.f32 %v1076_v10, %v8516_v46  ;;  %v15921_v46 = vld [vmem:[#allocation51_spill] sm:$0xff] }
 0x150   : > { %v1151_v58 = vmul.f32 %v1076_v10, %v8567_v18  ;;  %v1152_v1 = vmul.f32 %v1076_v10, %v9066_v63  ;;  %v9229_v7 = vadd.f32 %v1105_v28, %v8733_v62  ;;  %v9232_v12 = vadd.f32 %v1106_v16, %v8736_v49  ;;  %v15922_v62 = vld [vmem:[#allocation52_spill] sm:$0xff]  ;;  %v15923_v49 = vld [vmem:[#allocation53_spill] sm:$0xff] }
 0x151   : > { %v9235_v41 = vadd.f32 %v1107_v5, %v8739_v60  ;;  %v9238_v36 = vadd.f32 %v1108_v11, %v8742_v9  ;;  %v9241_v33 = vadd.f32 %v1109_v6, %v8745_v48  ;;  %v9244_v38 = vadd.f32 %v1110_v59, %v8748_v4  ;;  %v15924_v60 = vld [vmem:[#allocation56_spill] sm:$0xff]  ;;  %v15925_v9 = vld [vmem:[#allocation54_spill] sm:$0xff]  ;;  %v15926_v48 = vld [vmem:[#allocation55_spill] sm:$0xff] }
 0x152   : > { %v9247_v18 = vadd.f32 %v1111_v32, %v15921_v46  ;;  %v9250_v28 = vadd.f32 %v1112_v61, %v15922_v62  ;;  %v9253_v16 = vadd.f32 %v1113_v35, %v15923_v49  ;;  %v9256_v5 = vadd.f32 %v1116_v56, %v15924_v60  ;;  %v15927_v4 = vld [vmem:[#allocation57_spill] sm:$0xff]  ;;  %v15928_v59 = vld [vmem:[#allocation58_spill] sm:$0xff]  ;;  %v15930_v35 = vld [vmem:[#allocation63_spill] sm:$0xff] }
 0x153   : > { %v9259_v10 = vadd.f32 %v1114_v57, %v15925_v9  ;;  %v9262_v11 = vadd.f32 %v1115_v2, %v15926_v48  ;;  %v9265_v6 = vadd.f32 %v1117_v45, %v15927_v4  ;;  %v9268_v32 = vadd.f32 %v1118_v31, %v15928_v59  ;;  %v15929_v61 = vld [vmem:[#allocation62_spill] sm:$0xff]  ;;  %v15931_v56 = vld [vmem:[#allocation64_spill] sm:$0xff]  ;;  %v15932_v57 = vld [vmem:[#allocation65_spill] sm:$0xff] }
 0x154   : > { %v9271_v46 = vadd.f32 %v1122_v42, %v15929_v61  ;;  %v9274_v62 = vadd.f32 %v1123_v47, %v15930_v35  ;;  %v9277_v49 = vadd.f32 %v1124_v52, %v15931_v56  ;;  %v9280_v60 = vadd.f32 %v1125_v53, %v15932_v57  ;;  %v15933_v2 = vld [vmem:[#allocation66_spill] sm:$0xff]  ;;  %v15934_v45 = vld [vmem:[#allocation67_spill] sm:$0xff]  ;;  %v15935_v31 = vld [vmem:[#allocation68_spill] sm:$0xff] }
 0x155   : > { %v9283_v9 = vadd.f32 %v1126_v55, %v15933_v2  ;;  %v9286_v48 = vadd.f32 %v1127_v34, %v15934_v45  ;;  %v9289_v4 = vadd.f32 %v1128_v50, %v15935_v31  ;;  %v15936_v42 = vld [vmem:[#allocation69_spill] sm:$0xff]  ;;  %v15937_v47 = vld [vmem:[#allocation70_spill] sm:$0xff]  ;;  %v15938_v52 = vld [vmem:[#allocation71_spill] sm:$0xff] }
 0x156   : > { %v9292_v59 = vadd.f32 %v1129_v39, %v15936_v42  ;;  %v9295_v61 = vadd.f32 %v1130_v8, %v15937_v47  ;;  %v9298_v35 = vadd.f32 %v1131_v25, %v15938_v52  ;;  %v15939_v53 = vld [vmem:[#allocation72_spill] sm:$0xff]  ;;  %v15940_v55 = vld [vmem:[#allocation73_spill] sm:$0xff]  ;;  %v15941_v34 = vld [vmem:[#allocation74_spill] sm:$0xff] }
 0x157   : > { %v9301_v56 = vadd.f32 %v1132_v37, %v15939_v53  ;;  %v9304_v57 = vadd.f32 %v1133_v27, %v15940_v55  ;;  %v9307_v2 = vadd.f32 %v1134_v26, %v15941_v34  ;;  %v15943_v50 = vld [vmem:[#allocation75_spill] sm:$0xff]  ;;  %v15945_v39 = vld [vmem:[#allocation76_spill] sm:$0xff]  ;;  %v15947_v8 = vld [vmem:[#allocation77_spill] sm:$0xff] }
 0x158   : > { %v9310_v45 = vadd.f32 %v1135_v54, %v15943_v50  ;;  %v9313_v31 = vadd.f32 %v1136_v40, %v15945_v39  ;;  %v9316_v42 = vadd.f32 %v1137_v43, %v15947_v8  ;;  %v15949_v25 = vld [vmem:[#allocation78_spill] sm:$0xff]  ;;  %v15951_v37 = vld [vmem:[#allocation79_spill] sm:$0xff]  ;;  %v15953_v27 = vld [vmem:[#allocation80_spill] sm:$0xff] }
 0x159   : > { %15942 = vst [vmem:[#allocation51_spill] sm:$0xff] %v9307_v2  ;;  %v9319_v47 = vadd.f32 %v1138_v17, %v15949_v25  ;;  %v9322_v52 = vadd.f32 %v1139_v19, %v15951_v37  ;;  %v9325_v53 = vadd.f32 %v1140_v51, %v15953_v27  ;;  %v15955_v26 = vld [vmem:[#allocation81_spill] sm:$0xff]  ;;  %v15957_v54 = vld [vmem:[#allocation59_spill] sm:$0xff]  ;;  %v15959_v40 = vld [vmem:[#allocation82_spill] sm:$0xff] }
 0x15a   : > { %15944 = vst [vmem:[#allocation52_spill] sm:$0xff] %v9310_v45  ;;  %15946 = vst [vmem:[#allocation53_spill] sm:$0xff] %v9313_v31  ;;  %v9328_v55 = vadd.f32 %v1141_v24, %v15955_v26  ;;  %v9332_v34 = vadd.f32 %v9189_v20, %v15957_v54  ;;  %v9335_v50 = vadd.f32 %v1142_v23, %v15959_v40  ;;  %v15961_v43 = vld [vmem:[#allocation83_spill] sm:$0xff]  ;;  %v15963_v17 = vld [vmem:[#allocation84_spill] sm:$0xff] }
 0x15b   : > { %15948 = vst [vmem:[#allocation56_spill] sm:$0xff] %v9316_v42  ;;  %15950 = vst [vmem:[#allocation54_spill] sm:$0xff] %v9319_v47  ;;  %v9338_v39 = vadd.f32 %v1143_v22, %v15961_v43  ;;  %v9341_v8 = vadd.f32 %v1144_v3, %v15963_v17  ;;  %v15965_v19 = vld [vmem:[#allocation60_spill] sm:$0xff]  ;;  %v15967_v25 = vld [vmem:[#allocation61_spill] sm:$0xff] }
 0x15c   : > { %15952 = vst [vmem:[#allocation55_spill] sm:$0xff] %v9322_v52  ;;  %15954 = vst [vmem:[#allocation57_spill] sm:$0xff] %v9325_v53  ;;  %v9345_v51 = vadd.f32 %v9192_v29, %v15965_v19  ;;  %v9349_v24 = vadd.f32 %v9195_v30, %v15967_v25  ;;  %v15969_v37 = vld [vmem:[#allocation85_spill] sm:$0xff]  ;;  %v15971_v27 = vld [vmem:[#allocation86_spill] sm:$0xff] }
 0x15d   : > { %15956 = vst [vmem:[#allocation58_spill] sm:$0xff] %v9328_v55  ;;  %15958 = vst [vmem:[#allocation62_spill] sm:$0xff] %v9332_v34  ;;  %v9352_v20 = vadd.f32 %v1145_v21, %v15969_v37  ;;  %v9355_v23 = vadd.f32 %v1146_v15, %v15971_v27  ;;  %v15973_v26 = vld [vmem:[#allocation87_spill] sm:$0xff]  ;;  %v15975_v54 = vld [vmem:[#allocation88_spill] sm:$0xff] }
 0x15e   : > { %15960 = vst [vmem:[#allocation63_spill] sm:$0xff] %v9335_v50  ;;  %15962 = vst [vmem:[#allocation64_spill] sm:$0xff] %v9338_v39  ;;  %v9358_v22 = vadd.f32 %v1147_v14, %v15973_v26  ;;  %v9361_v3 = vadd.f32 %v1148_v13, %v15975_v54  ;;  %v15977_v40 = vld [vmem:[#allocation89_spill] sm:$0xff]  ;;  %v15979_v29 = vld [vmem:[#allocation90_spill] sm:$0xff] }
 0x15f   : > { %15964 = vst [vmem:[#allocation65_spill] sm:$0xff] %v9341_v8  ;;  %15966 = vst [vmem:[#allocation66_spill] sm:$0xff] %v9345_v51  ;;  %v9364_v43 = vadd.f32 %v1149_v44, %v15977_v40  ;;  %v9367_v17 = vadd.f32 %v1150_v0, %v15979_v29  ;;  %v15981_v30 = vld [vmem:[#allocation91_spill] sm:$0xff]  ;;  %v15983_v21 = vld [vmem:[#allocation92_spill] sm:$0xff] }
 0x160   : > { %15968 = vst [vmem:[#allocation67_spill] sm:$0xff] %v9349_v24  ;;  %15970 = vst [vmem:[#allocation68_spill] sm:$0xff] %v9352_v20  ;;  %v9370_v19 = vadd.f32 %v1151_v58, %v15981_v30  ;;  %v9373_v25 = vadd.f32 %v1152_v1, %v15983_v21  ;;  %v15985_v15 = vld [vmem:[#allocation152_spill] sm:$0xff]  ;;  %v15986_v37 = vld [vmem:[#allocation35_spill] sm:$0xff] }
 0x161   : > { %15972 = vst [vmem:[#allocation69_spill] sm:$0xff] %v9355_v23  ;;  %15974 = vst [vmem:[#allocation70_spill] sm:$0xff] %v9358_v22  ;;  %v1621_v27 = vadd.f32 %v15986_v37, %v15985_v15  ;;  %v15987_v14 = vld [vmem:[#allocation153_spill] sm:$0xff]  ;;  %v15988_v26 = vld [vmem:[#allocation36_spill] sm:$0xff] }
 0x162   : > { %15976 = vst [vmem:[#allocation71_spill] sm:$0xff] %v9361_v3  ;;  %15978 = vst [vmem:[#allocation72_spill] sm:$0xff] %v9364_v43  ;;  %v1622_v63 = vadd.f32 %v15988_v26, %v15987_v14  ;;  %v15989_v13 = vld [vmem:[#allocation154_spill] sm:$0xff]  ;;  %v15990_v54 = vld [vmem:[#allocation37_spill] sm:$0xff] }
 0x163   : > { %15980 = vst [vmem:[#allocation73_spill] sm:$0xff] %v9367_v17  ;;  %15982 = vst [vmem:[#allocation74_spill] sm:$0xff] %v9370_v19  ;;  %v1623_v3 = vadd.f32 %v15990_v54, %v15989_v13  ;;  %v15991_v44 = vld [vmem:[#allocation155_spill] sm:$0xff]  ;;  %v15992_v40 = vld [vmem:[#allocation38_spill] sm:$0xff] }
 0x164   : > { %15984 = vst [vmem:[#allocation75_spill] sm:$0xff] %v9373_v25  ;;  %v1624_v43 = vadd.f32 %v15992_v40, %v15991_v44  ;;  %v15993_v0 = vld [vmem:[#allocation156_spill] sm:$0xff]  ;;  %v15994_v29 = vld [vmem:[#allocation39_spill] sm:$0xff]  ;;  %v15995_v58 = vld [vmem:[#allocation157_spill] sm:$0xff] }
 0x165   : > { %v1625_v17 = vadd.f32 %v15994_v29, %v15993_v0  ;;  %v15996_v30 = vld [vmem:[#allocation43_spill] sm:$0xff]  ;;  %v15997_v1 = vld [vmem:[#allocation158_spill] sm:$0xff]  ;;  %v15998_v21 = vld [vmem:[#allocation44_spill] sm:$0xff] }
 0x166   : > { %v1629_v19 = vadd.f32 %v15996_v30, %v15995_v58  ;;  %v1630_v25 = vadd.f32 %v15998_v21, %v15997_v1  ;;  %v15999_v22 = vld [vmem:[#allocation159_spill] sm:$0xff]  ;;  %v16000_v15 = vld [vmem:[#allocation45_spill] sm:$0xff]  ;;  %v16001_v23 = vld [vmem:[#allocation160_spill] sm:$0xff] }
 0x167   : > { %v1631_v37 = vadd.f32 %v16000_v15, %v15999_v22  ;;  %v16002_v14 = vld [vmem:[#allocation46_spill] sm:$0xff]  ;;  %v16003_v20 = vld [vmem:[#allocation161_spill] sm:$0xff]  ;;  %v16004_v13 = vld [vmem:[#allocation47_spill] sm:$0xff] }
 0x168   : > { %v1632_v26 = vadd.f32 %v16002_v14, %v16001_v23  ;;  %v1633_v54 = vadd.f32 %v16004_v13, %v16003_v20  ;;  %v16005_v8 = vld [vmem:[#allocation162_spill] sm:$0xff]  ;;  %v16006_v44 = vld [vmem:[#allocation48_spill] sm:$0xff]  ;;  %v16007_v24 = vld [vmem:[#allocation163_spill] sm:$0xff] }
 0x169   : > { %v1634_v40 = vadd.f32 %v16006_v44, %v16005_v8  ;;  %v16008_v0 = vld [vmem:[#allocation49_spill] sm:$0xff]  ;;  %v16009_v51 = vld [vmem:[#allocation22_spill] sm:$0xff]  ;;  %v16013_v15 = vld [vmem:[#allocation40_spill] sm:$0xff] }
 0x16a   : > { %v1635_v29 = vadd.f32 %v16008_v0, %v16007_v24  ;;  %v16010_v58 = vld [vmem:[#allocation141_spill] sm:$0xff]  ;;  %v16014_v14 = vld [vmem:[#allocation166_spill] sm:$0xff]  ;;  %v16016_v13 = vld [vmem:[#allocation167_spill] sm:$0xff] }
 0x16b   : > { %v1793_v30 = vrot.slane %v16010_v58, %v16009_v51  ;;  %v16011_v1 = vcombine.high %v16010_v58, %v16010_v58  ;;  %v16012_v21 = vld [vmem:[#allocation165_spill] sm:$0xff]  ;;  %v16017_v39 = vld [vmem:[#allocation42_spill] sm:$0xff]  ;;  %v16020_v55 = vld [vmem:[#allocation23_spill] sm:$0xff] }
 0x16c   : > { %v1626_v23 = vadd.f32 %v16013_v15, %v16012_v21  ;;  %v16015_v34 = vld [vmem:[#allocation41_spill] sm:$0xff]  ;;  %v1628_v8 = vadd.f32 %v16017_v39, %v16016_v13  ;;  %v16023_v21 = vld [vmem:[#allocation95_spill] sm:$0xff]  ;;  %v16025_v39 = vld [vmem:[#allocation96_spill] sm:$0xff] }
 0x16d   : > { %v1800_v22 = vrot.slane %v16011_v1, %v16009_v51  ;;  %v1627_v20 = vadd.f32 %v16015_v34, %v16014_v14  ;;  %v16018_v44 = vld [vmem:[#allocation93_spill] sm:$0xff]  ;;  %v1801_v0 = vcombine.high %v1793_v30, %v1793_v30  ;;  %v1868_v53 = vrot.slane %v1793_v30, %v16020_v55  ;;  %v16021_v1 = vld [vmem:[#allocation94_spill] sm:$0xff]  ;;  %v16043_v47 = vld [vmem:[#allocation168_spill] sm:$0xff] }
 0x16e   : > { %v9413_v24 = vadd.f32 %v16018_v44, %v9229_v7  ;;  %v9419_v51 = vadd.f32 %v16021_v1, %v9232_v12  ;;  %v9423_v34 = vadd.f32 %v16023_v21, %v9235_v41  ;;  %v9427_v15 = vadd.f32 %v16025_v39, %v9238_v36  ;;  %v16027_v7 = vld [vmem:[#allocation98_spill] sm:$0xff]  ;;  %v16031_v12 = vld [vmem:[#allocation99_spill] sm:$0xff]  ;;  %v16033_v41 = vld [vmem:[#allocation100_spill] sm:$0xff]  ;;  %v9446_v36 = vpop.permute.xlu1 %1830 }
 0x16f   : > { %v1802_v50 = vcombine.high %v1800_v22, %v1800_v22  ;;  %v1872_v58 = vrot.slane %v1800_v22, %v16020_v55  ;;  %v9431_v14 = vadd.f32 %v16027_v7, %v9244_v38  ;;  %v1876_v30 = vrot.slane %v1801_v0, %v16020_v55  ;;  %v16029_v22 = vld [vmem:[#allocation97_spill] sm:$0xff]  ;;  %16035 = vst [vmem:[#allocation83_spill] sm:$0xff] %v9446_v36  ;;  %v16037_v38 = vld [vmem:[#allocation18_spill] sm:$0xff]  ;;  %v16038_v0 = vld [vmem:[#allocation16_spill] sm:$0xff] }
 0x170   : > { %16019 = vst [vmem:[#allocation76_spill] sm:$0xff] %v9413_v24  ;;  %16022 = vst [vmem:[#allocation77_spill] sm:$0xff] %v9419_v51  ;;  %v9436_v13 = vadd.f32 %v16029_v22, %v9241_v33  ;;  %v9440_v44 = vadd.f32 %v16031_v12, %v9247_v18  ;;  %v9444_v1 = vadd.f32 %v16033_v41, %v9250_v28  ;;  %v16040_v22 = vld [vmem:[#allocation24_spill] sm:$0xff]  ;;  %v16045_v31 = vld [vmem:[#allocation169_spill] sm:$0xff] }
 0x171   : > { %16024 = vst [vmem:[#allocation78_spill] sm:$0xff] %v9423_v34  ;;  %16026 = vst [vmem:[#allocation79_spill] sm:$0xff] %v9427_v15  ;;  %v9449_v21 = vrot.slane %v1802_v50, %v16020_v55  ;;  %v1941_v39 = vmul.f32 %v1868_v53, %v16037_v38  ;;  %v1942_v7 = vmul.f32 %v1868_v53, %v16038_v0  ;;  %v16041_v15 = vld [vmem:[#allocation136_spill] sm:$0xff] }
 0x172   : > { %16028 = vst [vmem:[#allocation80_spill] sm:$0xff] %v9431_v14  ;;  %16030 = vst [vmem:[#allocation81_spill] sm:$0xff] %v9436_v13  ;;  %v16039_v14 = vld [vmem:[#allocation20_spill] sm:$0xff]  ;;  %v1944_v13 = vmul.f32 %v1868_v53, %v16040_v22  ;;  %v1945_v18 = vmul.f32 %v1868_v53, %v16041_v15  ;;  %v1946_v12 = vmul.f32 %v1868_v53, %v9446_v36 }
 0x173   : > { %16032 = vst [vmem:[#allocation59_spill] sm:$0xff] %v9440_v44  ;;  %16034 = vst [vmem:[#allocation82_spill] sm:$0xff] %v9444_v1  ;;  %v1943_v33 = vmul.f32 %v1868_v53, %v16039_v14  ;;  %v1947_v28 = vmul.f32 %v1872_v58, %v16037_v38  ;;  %v1948_v41 = vmul.f32 %v1872_v58, %v16038_v0 }
 0x174   : > { %16036 = vst [vmem:[#allocation84_spill] sm:$0xff] %v9449_v21  ;;  %v1949_v1 = vmul.f32 %v1872_v58, %v16039_v14  ;;  %v1951_v50 = vmul.f32 %v1872_v58, %v16041_v15  ;;  %v1952_v21 = vmul.f32 %v1872_v58, %v9446_v36  ;;  %v1953_v44 = vmul.f32 %v1876_v30, %v16037_v38 }
 0x175   : > { %v1954_v34 = vmul.f32 %v1876_v30, %v16038_v0  ;;  %v1955_v51 = vmul.f32 %v1876_v30, %v16039_v14  ;;  %v1956_v24 = vmul.f32 %v1876_v30, %v16040_v22  ;;  %v1950_v53 = vmul.f32 %v1872_v58, %v16040_v22 }
 0x176   : > { %v1957_v55 = vmul.f32 %v1876_v30, %v16041_v15  ;;  %v9469_v52 = vmul.f32 %v1876_v30, %v9446_v36  ;;  %v9472_v42 = vadd.f32 %v1941_v39, %v16043_v47  ;;  %v9475_v45 = vadd.f32 %v1942_v7, %v16045_v31  ;;  %v16075_v39 = vld [vmem:[#allocation117_spill] sm:$0xff]  ;;  %v16077_v7 = vld [vmem:[#allocation118_spill] sm:$0xff] }
 0x177   : > { %v9477_v38 = vadd.f32 %v1943_v33, %v1621_v27  ;;  %v9479_v0 = vadd.f32 %v1944_v13, %v1622_v63  ;;  %v9481_v14 = vadd.f32 %v1945_v18, %v1623_v3  ;;  %v9483_v2 = vadd.f32 %v1946_v12, %v1624_v43  ;;  %v16071_v13 = vld [vmem:[#allocation113_spill] sm:$0xff]  ;;  %v16079_v33 = vld [vmem:[#allocation119_spill] sm:$0xff]  ;;  %v16081_v18 = vld [vmem:[#allocation120_spill] sm:$0xff] }
 0x178   : > { %16042 = vst [vmem:[#allocation60_spill] sm:$0xff] %v9469_v52  ;;  %16044 = vst [vmem:[#allocation61_spill] sm:$0xff] %v9472_v42  ;;  %v9485_v58 = vadd.f32 %v1947_v28, %v1625_v17  ;;  %v9487_v15 = vadd.f32 %v1951_v50, %v1629_v19  ;;  %v9489_v30 = vadd.f32 %v1952_v21, %v1630_v25  ;;  %v16062_v19 = vld [vmem:[#allocation101_spill] sm:$0xff]  ;;  %v16074_v21 = vld [vmem:[#allocation116_spill] sm:$0xff] }
 0x179   : > { %16046 = vst [vmem:[#allocation85_spill] sm:$0xff] %v9475_v45  ;;  %16047 = vst [vmem:[#allocation86_spill] sm:$0xff] %v9477_v38  ;;  %v9491_v52 = vadd.f32 %v1953_v44, %v1631_v37  ;;  %v9493_v47 = vadd.f32 %v1954_v34, %v1632_v26  ;;  %v9495_v31 = vadd.f32 %v1955_v51, %v1633_v54  ;;  %v16063_v37 = vld [vmem:[#allocation102_spill] sm:$0xff]  ;;  %v16064_v51 = vld [vmem:[#allocation103_spill] sm:$0xff] }
 0x17a   : > { %16048 = vst [vmem:[#allocation87_spill] sm:$0xff] %v9479_v0  ;;  %16049 = vst [vmem:[#allocation88_spill] sm:$0xff] %v9481_v14  ;;  %v9497_v27 = vadd.f32 %v1956_v24, %v1634_v40  ;;  %v9499_v63 = vadd.f32 %v1948_v41, %v1626_v23  ;;  %v9501_v3 = vadd.f32 %v1949_v1, %v1627_v20  ;;  %v16065_v40 = vld [vmem:[#allocation104_spill] sm:$0xff]  ;;  %v16066_v20 = vld [vmem:[#allocation105_spill] sm:$0xff] }
 0x17b   : > { %16050 = vst [vmem:[#allocation89_spill] sm:$0xff] %v9483_v2  ;;  %16051 = vst [vmem:[#allocation90_spill] sm:$0xff] %v9485_v58  ;;  %v9503_v43 = vadd.f32 %v1950_v53, %v1628_v8  ;;  %v9505_v17 = vadd.f32 %v1957_v55, %v1635_v29  ;;  %v9509_v25 = vadd.f32 %v16062_v19, %v9253_v16  ;;  %v16067_v29 = vld [vmem:[#allocation106_spill] sm:$0xff]  ;;  %v16069_v24 = vld [vmem:[#allocation111_spill] sm:$0xff]  ;;  %v15454_v2 = vmov 0.0  }
 0x17c   : > { %16052 = vst [vmem:[#allocation91_spill] sm:$0xff] %v9487_v15  ;;  %16053 = vst [vmem:[#allocation92_spill] sm:$0xff] %v9489_v30  ;;  %v9513_v26 = vadd.f32 %v16063_v37, %v9259_v10  ;;  %v9517_v54 = vadd.f32 %v16064_v51, %v9262_v11  ;;  %v9521_v23 = vadd.f32 %v16065_v40, %v9256_v5  ;;  %v16068_v8 = vld [vmem:[#allocation110_spill] sm:$0xff]  ;;  %v16070_v34 = vld [vmem:[#allocation112_spill] sm:$0xff]  ;;  %7856 = vmatprep.subr.bf16.mxu0 %v15454_v2 }
 0x17d   : > { %16054 = vst [vmem:[#allocation152_spill] sm:$0xff] %v9491_v52  ;;  %16055 = vst [vmem:[#allocation35_spill] sm:$0xff] %v9493_v47  ;;  %v9525_v55 = vadd.f32 %v16066_v20, %v9265_v6  ;;  %v9529_v16 = vadd.f32 %v16067_v29, %v9268_v32  ;;  %v9533_v10 = vadd.f32 %v16068_v8, %v9271_v46  ;;  %v16072_v44 = vld [vmem:[#allocation114_spill] sm:$0xff]  ;;  %v16073_v1 = vld [vmem:[#allocation115_spill] sm:$0xff]  ;;  %8010 = vmatprep.subr.bf16.mxu1 %v15454_v2 }
 0x17e   : > { %16056 = vst [vmem:[#allocation153_spill] sm:$0xff] %v9495_v31  ;;  %16057 = vst [vmem:[#allocation36_spill] sm:$0xff] %v9497_v27  ;;  %v9537_v11 = vadd.f32 %v16069_v24, %v9274_v62  ;;  %v9541_v5 = vadd.f32 %v16070_v34, %v9277_v49  ;;  %v9545_v6 = vadd.f32 %v16071_v13, %v9280_v60  ;;  %v16083_v12 = vld [vmem:[#allocation121_spill] sm:$0xff]  ;;  %v16085_v28 = vld [vmem:[#allocation51_spill] sm:$0xff] }
 0x17f   : > { %16058 = vst [vmem:[#allocation154_spill] sm:$0xff] %v9499_v63  ;;  %16059 = vst [vmem:[#allocation37_spill] sm:$0xff] %v9501_v3  ;;  %v9549_v32 = vadd.f32 %v16072_v44, %v9283_v9  ;;  %v9553_v46 = vadd.f32 %v16073_v1, %v9286_v48  ;;  %v9557_v62 = vadd.f32 %v16074_v21, %v9289_v4  ;;  %v16086_v41 = vld [vmem:[#allocation122_spill] sm:$0xff]  ;;  %v16088_v50 = vld [vmem:[#allocation52_spill] sm:$0xff] }
 0x180   : > { %16060 = vst [vmem:[#allocation155_spill] sm:$0xff] %v9503_v43  ;;  %16061 = vst [vmem:[#allocation38_spill] sm:$0xff] %v9505_v17  ;;  %v9561_v49 = vadd.f32 %v16075_v39, %v9292_v59  ;;  %v9565_v60 = vadd.f32 %v16077_v7, %v9295_v61  ;;  %v9569_v9 = vadd.f32 %v16079_v33, %v9298_v35  ;;  %v16089_v53 = vld [vmem:[#allocation123_spill] sm:$0xff]  ;;  %v16091_v19 = vld [vmem:[#allocation53_spill] sm:$0xff] }
 0x181   : > { %v9573_v48 = vadd.f32 %v16081_v18, %v9301_v56  ;;  %v9577_v4 = vadd.f32 %v16083_v12, %v9304_v57  ;;  %v9581_v59 = vadd.f32 %v16086_v41, %v16085_v28  ;;  %v9585_v61 = vadd.f32 %v16089_v53, %v16088_v50  ;;  %v16092_v37 = vld [vmem:[#allocation124_spill] sm:$0xff]  ;;  %v16095_v40 = vld [vmem:[#allocation125_spill] sm:$0xff]  ;;  %v16097_v20 = vld [vmem:[#allocation54_spill] sm:$0xff] }
 0x182   : > { %16076 = vst [vmem:[#allocation156_spill] sm:$0xff] %v9561_v49  ;;  %16078 = vst [vmem:[#allocation39_spill] sm:$0xff] %v9565_v60  ;;  %v9589_v35 = vadd.f32 %v16092_v37, %v16091_v19  ;;  %v16094_v51 = vld [vmem:[#allocation56_spill] sm:$0xff]  ;;  %v16098_v29 = vld [vmem:[#allocation126_spill] sm:$0xff] }
 0x183   : > { %16080 = vst [vmem:[#allocation157_spill] sm:$0xff] %v9569_v9  ;;  %16082 = vst [vmem:[#allocation43_spill] sm:$0xff] %v9573_v48  ;;  %v9593_v56 = vadd.f32 %v16095_v40, %v16094_v51  ;;  %v9597_v57 = vadd.f32 %v16098_v29, %v16097_v20  ;;  %v16100_v8 = vld [vmem:[#allocation55_spill] sm:$0xff]  ;;  %v16103_v13 = vld [vmem:[#allocation57_spill] sm:$0xff] }
 0x184   : > { %16084 = vst [vmem:[#allocation158_spill] sm:$0xff] %v9577_v4  ;;  %16087 = vst [vmem:[#allocation44_spill] sm:$0xff] %v9581_v59  ;;  %v16101_v24 = vld [vmem:[#allocation127_spill] sm:$0xff]  ;;  %v16104_v44 = vld [vmem:[#allocation128_spill] sm:$0xff] }
 0x185   : > { %16090 = vst [vmem:[#allocation159_spill] sm:$0xff] %v9585_v61  ;;  %16093 = vst [vmem:[#allocation45_spill] sm:$0xff] %v9589_v35  ;;  %v9601_v34 = vadd.f32 %v16101_v24, %v16100_v8  ;;  %v9605_v1 = vadd.f32 %v16104_v44, %v16103_v13  ;;  %v16106_v21 = vld [vmem:[#allocation58_spill] sm:$0xff]  ;;  %v16107_v39 = vld [vmem:[#allocation129_spill] sm:$0xff] }
 0x186   : > { %16096 = vst [vmem:[#allocation160_spill] sm:$0xff] %v9593_v56  ;;  %16099 = vst [vmem:[#allocation46_spill] sm:$0xff] %v9597_v57  ;;  %v9609_v7 = vadd.f32 %v16107_v39, %v16106_v21  ;;  %v16109_v33 = vld [vmem:[#allocation63_spill] sm:$0xff]  ;;  %v16110_v18 = vld [vmem:[#allocation130_spill] sm:$0xff] }
 0x187   : > { %16102 = vst [vmem:[#allocation161_spill] sm:$0xff] %v9601_v34  ;;  %16105 = vst [vmem:[#allocation47_spill] sm:$0xff] %v9605_v1  ;;  %v9613_v12 = vadd.f32 %v16110_v18, %v16109_v33  ;;  %v16112_v28 = vld [vmem:[#allocation64_spill] sm:$0xff]  ;;  %v16113_v41 = vld [vmem:[#allocation131_spill] sm:$0xff] }
 0x188   : > { %16108 = vst [vmem:[#allocation162_spill] sm:$0xff] %v9609_v7  ;;  %v9617_v50 = vadd.f32 %v16113_v41, %v16112_v28  ;;  %v16115_v53 = vld [vmem:[#allocation62_spill] sm:$0xff]  ;;  %v16116_v19 = vld [vmem:[#allocation107_spill] sm:$0xff]  ;;  %v16118_v40 = vld [vmem:[#allocation108_spill] sm:$0xff] }
 0x189   : > { %16111 = vst [vmem:[#allocation48_spill] sm:$0xff] %v9613_v12  ;;  %v9621_v37 = vadd.f32 %v16116_v19, %v16115_v53  ;;  %v16117_v51 = vld [vmem:[#allocation66_spill] sm:$0xff]  ;;  %v16119_v29 = vld [vmem:[#allocation67_spill] sm:$0xff]  ;;  %v16120_v8 = vld [vmem:[#allocation109_spill] sm:$0xff] }
 0x18a   : > { %16114 = vst [vmem:[#allocation163_spill] sm:$0xff] %v9617_v50  ;;  %v9625_v20 = vadd.f32 %v16118_v40, %v16117_v51  ;;  %v9629_v24 = vadd.f32 %v16120_v8, %v16119_v29  ;;  %v16121_v13 = vld [vmem:[#allocation65_spill] sm:$0xff]  ;;  %v16122_v44 = vld [vmem:[#allocation132_spill] sm:$0xff]  ;;  %v16128_v41 = vld [vmem:[#allocation134_spill] sm:$0xff] }
 0x18b   : > { %v9633_v21 = vadd.f32 %v16122_v44, %v16121_v13  ;;  %v16124_v39 = vld [vmem:[#allocation68_spill] sm:$0xff]  ;;  %v16125_v33 = vld [vmem:[#allocation133_spill] sm:$0xff]  ;;  %v16130_v19 = vld [vmem:[#allocation70_spill] sm:$0xff] }
 0x18c   : > { %v9637_v18 = vadd.f32 %v16125_v33, %v16124_v39  ;;  %v16127_v28 = vld [vmem:[#allocation69_spill] sm:$0xff]  ;;  %v16131_v17 = vld [vmem:[#allocation135_spill] sm:$0xff]  ;;  %v16136_v13 = vld [vmem:[#allocation72_spill] sm:$0xff] }
 0x18d   : > { %16123 = vst [vmem:[#allocation49_spill] sm:$0xff] %v9633_v21  ;;  %v9641_v53 = vadd.f32 %v16128_v41, %v16127_v28  ;;  %v9645_v51 = vadd.f32 %v16131_v17, %v16130_v19  ;;  %v16133_v40 = vld [vmem:[#allocation71_spill] sm:$0xff]  ;;  %v16134_v27 = vld [vmem:[#allocation137_spill] sm:$0xff]  ;;  %v16137_v44 = vld [vmem:[#allocation138_spill] sm:$0xff] }
 0x18e   : > { %16126 = vst [vmem:[#allocation141_spill] sm:$0xff] %v9637_v18  ;;  %v9649_v29 = vadd.f32 %v16134_v27, %v16133_v40  ;;  %v8099_v8 = vld [vmem:[%s15380_s5 + $0x28] sm:$0xff]   ;;  %v9656_v39 = vadd.f32 %v16137_v44, %v16136_v13  ;;  %v16139_v33 = vld [vmem:[#allocation22_spill] sm:$0xff]  ;;  %v16140_v31 = vld [vmem:[#allocation139_spill] sm:$0xff] }
 0x18f   : > { %16129 = vst [vmem:[#allocation165_spill] sm:$0xff] %v9641_v53  ;;  %16132 = vst [vmem:[#allocation40_spill] sm:$0xff] %v9645_v51  ;;  %v16141_v28 = vcombine.high %v16140_v31, %v16140_v31  ;;  %v16142_v47 = vld [vmem:[#allocation144_spill] sm:$0xff]  ;;  %v16145_v13 = vld [vmem:[#allocation73_spill] sm:$0xff]  ;;  %7857 = vmatpush3.bf16.msra.mxu0 %v8099_v8  ;;  %8016 = vmatpush3.bf16.msra.mxu1 %v8099_v8 }
 0x190   : > { %16135 = vst [vmem:[#allocation166_spill] sm:$0xff] %v9649_v29  ;;  %16138 = vst [vmem:[#allocation41_spill] sm:$0xff] %v9656_v39  ;;  %v1745_v17 = vcombine.high %v16142_v47, %v16142_v47  ;;  %v1753_v27 = vrot.slane %v16142_v47, %v16139_v33  ;;  %v9669_v19 = vld [vmem:[%s15378_s3 + $0x3] ss:$0 sm:$0xff]  ;;  %v9674_v40 = vld [vmem:[%s15378_s3 + $0x4] ss:$0 sm:$0xff]  ;;  %7858 = vmatprep.subr.bf16.mxu0 %v15454_v2  ;;  %8011 = vmatprep.subr.bf16.mxu1 %v15454_v2 }
 0x191   : > { %v1744_v41 = vrot.slane %v16141_v28, %v16139_v33  ;;  %16143 = vst [vmem:[#allocation167_spill] sm:$0xff] %v9669_v19  ;;  %16144 = vst [vmem:[#allocation42_spill] sm:$0xff] %v9674_v40  ;;  %v16146_v44 = vld [vmem:[#allocation140_spill] sm:$0xff]  ;;  %v16148_v28 = vld [vmem:[#allocation74_spill] sm:$0xff]  ;;  %v16161_v39 = vmov 0.0  }
 0x192   : > { %v9678_v31 = vadd.f32 %v16146_v44, %v16145_v13  ;;  %v16149_v52 = vld [vmem:[#allocation142_spill] sm:$0xff]  ;;  %v16151_v15 = vld [vmem:[#allocation75_spill] sm:$0xff]  ;;  %v1767_v38 = vrot.slane %v1745_v17, %v16139_v33  ;;  %v1775_v63 = vcombine.high %v1753_v27, %v1753_v27  ;;  %7868 = vmatprep.mubr.msk.bf16.mxu0 %vm8256_vm2, %v16161_v39  ;;  %7936 = vmatprep.mubr.msk.bf16.mxu1 %vm8256_vm2, %v16161_v39 }
 0x193   : > { %v9682_v30 = vadd.f32 %v16149_v52, %v16148_v28  ;;  %v16152_v47 = vld [vmem:[#allocation143_spill] sm:$0xff]  ;;  %v1746_v3 = vcombine.high %v1744_v41, %v1744_v41  ;;  %v1760_v0 = vrot.slane %v1744_v41, %v16139_v33  ;;  %v8100_v52 = vld [vmem:[%s15380_s5 + $0x20] sm:$0xff]   ;;  %v9702_v41 = vmul.f32 %v9674_v40, %v9472_v42  ;;  %v16157_v45 = vld [vmem:[#allocation18_spill] sm:$0xff] }
 0x194   : > { %16147 = vst [vmem:[#allocation93_spill] sm:$0xff] %v9678_v31  ;;  %v9686_v43 = vadd.f32 %v16152_v47, %v16151_v15  ;;  %v16154_v58 = vld [vmem:[#allocation23_spill] sm:$0xff]  ;;  %v9698_v15 = vmul.f32 %v9669_v19, %v9472_v42  ;;  %v1777_v28 = vcombine.high %v1767_v38, %v1767_v38  ;;  %v16160_v40 = vld [vmem:[#allocation136_spill] sm:$0xff]  ;;  %7859 = vmatpush3.bf16.msra.mxu0 %v8100_v52  ;;  %v8102_v7 = vld [vmem:[%s15380_s5 + $0x10] sm:$0xff]  }
 0x195   : > { %16150 = vst [vmem:[#allocation94_spill] sm:$0xff] %v9682_v30  ;;  %v1836_v13 = vrot.slane %v1753_v27, %v16154_v58  ;;  %16156 = vst [vmem:[#allocation98_spill] sm:$0xff] %v9702_v41  ;;  %v1774_v17 = vrot.slane %v1746_v3, %v16139_v33  ;;  %v1776_v44 = vcombine.high %v1760_v0, %v1760_v0  ;;  %v16159_v41 = vld [vmem:[#allocation20_spill] sm:$0xff]  ;;  %7860 = vmatprep.subr.bf16.mxu0 %v16161_v39 }
 0x196   : > { %16153 = vst [vmem:[#allocation95_spill] sm:$0xff] %v9686_v43  ;;  %16155 = vst [vmem:[#allocation96_spill] sm:$0xff] %v9698_v15  ;;  %v1840_v27 = vrot.slane %v1767_v38, %v16154_v58  ;;  %v1844_v47 = vrot.slane %v1775_v63, %v16154_v58  ;;  %v1852_v14 = vrot.slane %v1760_v0, %v16154_v58  ;;  %v16158_v15 = vld [vmem:[#allocation16_spill] sm:$0xff]  ;;  %8017 = vmatpush3.bf16.msra.mxu1 %v8100_v52 }
 0x197   : > { %v9710_v43 = vmul.f32 %v1836_v13, %v16157_v45  ;;  %v9713_v19 = vmul.f32 %v1836_v13, %v16158_v15  ;;  %v1778_v42 = vcombine.high %v1774_v17, %v1774_v17  ;;  %v1848_v3 = vrot.slane %v1777_v28, %v16154_v58  ;;  %8012 = vmatprep.subr.bf16.mxu1 %v16161_v39 }
 0x198   : > { %v1856_v33 = vrot.slane %v1774_v17, %v16154_v58  ;;  %v1860_v38 = vrot.slane %v1776_v44, %v16154_v58  ;;  %v9720_v63 = vmul.f32 %v1836_v13, %v16159_v41  ;;  %v9723_v0 = vmul.f32 %v1836_v13, %v16040_v22  ;;  %v8101_v17 = vld [vmem:[%s15380_s5 + $0x18] sm:$0xff]  }
 0x199   : > { %v9726_v30 = vmul.f32 %v1836_v13, %v16160_v40  ;;  %v9729_v8 = vmul.f32 %v1836_v13, %v9446_v36  ;;  %v1864_v44 = vrot.slane %v1778_v42, %v16154_v58  ;;  %v9736_v28 = vmul.f32 %v1840_v27, %v16157_v45  ;;  %7861 = vmatpush3.bf16.msra.mxu0 %v8101_v17 }
 0x19a   : > { %v9739_v2 = vmul.f32 %v1840_v27, %v16158_v15  ;;  %v9742_v31 = vmul.f32 %v1840_v27, %v16159_v41  ;;  %v9746_v13 = vmul.f32 %v1840_v27, %v16040_v22  ;;  %v9749_v29 = vmul.f32 %v1840_v27, %v16160_v40  ;;  %7862 = vmatprep.subr.bf16.mxu0 %v16161_v39 }
 0x19b   : > { %v9752_v51 = vmul.f32 %v1840_v27, %v9446_v36  ;;  %v9755_v42 = vmul.f32 %v1844_v47, %v16157_v45  ;;  %v9758_v58 = vmul.f32 %v1844_v47, %v16158_v15  ;;  %v9761_v53 = vmul.f32 %v1844_v47, %v16159_v41  ;;  %8018 = vmatpush3.bf16.msra.mxu1 %v8101_v17 }
 0x19c   : > { %v9764_v18 = vmul.f32 %v1844_v47, %v16040_v22  ;;  %v9767_v21 = vmul.f32 %v1844_v47, %v16160_v40  ;;  %v9771_v27 = vmul.f32 %v1844_v47, %v9446_v36  ;;  %v9774_v50 = vmul.f32 %v1848_v3, %v16157_v45  ;;  %8013 = vmatprep.subr.bf16.mxu1 %v16161_v39 }
 0x19d   : > { %v9777_v52 = vmul.f32 %v1848_v3, %v16158_v15  ;;  %v9780_v12 = vmul.f32 %v1848_v3, %v16159_v41  ;;  %v9786_v1 = vmul.f32 %v1848_v3, %v16040_v22  ;;  %v9789_v47 = vmul.f32 %v1848_v3, %v16160_v40  ;;  %7863 = vmatpush3.bf16.msra.mxu0 %v8102_v7 }
 0x19e   : > { %v9792_v34 = vmul.f32 %v1848_v3, %v9446_v36  ;;  %v9795_v57 = vmul.f32 %v1852_v14, %v16157_v45  ;;  %v9799_v56 = vmul.f32 %v1852_v14, %v16158_v15  ;;  %v9802_v35 = vmul.f32 %v1852_v14, %v16159_v41  ;;  %7864 = vmatprep.subr.bf16.mxu0 %v16161_v39 }
 0x19f   : > { %v9805_v61 = vmul.f32 %v1852_v14, %v16040_v22  ;;  %v9808_v59 = vmul.f32 %v1852_v14, %v16160_v40  ;;  %v9811_v3 = vmul.f32 %v1852_v14, %v9446_v36  ;;  %v9814_v4 = vmul.f32 %v1856_v33, %v16157_v45  ;;  %8019 = vmatpush3.bf16.msra.mxu1 %v8102_v7  ;;  %v16178_v7 = vld [vmem:[#allocation79_spill] sm:$0xff] }
 0x1a0   : > { %16162 = vst [vmem:[#allocation97_spill] sm:$0xff] %v9795_v57  ;;  %16163 = vst [vmem:[#allocation99_spill] sm:$0xff] %v9799_v56  ;;  %v9817_v48 = vmul.f32 %v1856_v33, %v16158_v15  ;;  %v9820_v9 = vmul.f32 %v1856_v33, %v16159_v41  ;;  %v9830_v14 = vmul.f32 %v1856_v33, %v9446_v36  ;;  %v16175_v57 = vld [vmem:[#allocation76_spill] sm:$0xff]  ;;  %8014 = vmatprep.subr.bf16.mxu1 %v16161_v39 }
 0x1a1   : > { %16164 = vst [vmem:[#allocation100_spill] sm:$0xff] %v9802_v35  ;;  %16165 = vst [vmem:[#allocation168_spill] sm:$0xff] %v9805_v61  ;;  %v9824_v61 = vmul.f32 %v1856_v33, %v16040_v22  ;;  %v9833_v17 = vmul.f32 %v1860_v38, %v16157_v45  ;;  %v1938_v35 = vmul.f32 %v1864_v44, %v16040_v22 }
 0x1a2   : > { %16166 = vst [vmem:[#allocation169_spill] sm:$0xff] %v9808_v59  ;;  %16167 = vst [vmem:[#allocation101_spill] sm:$0xff] %v9811_v3  ;;  %v9827_v59 = vmul.f32 %v1856_v33, %v16160_v40  ;;  %v1933_v3 = vmul.f32 %v1860_v38, %v16160_v40  ;;  %v1934_v33 = vmul.f32 %v1860_v38, %v9446_v36 }
 0x1a3   : > { %16168 = vst [vmem:[#allocation102_spill] sm:$0xff] %v9814_v4  ;;  %16169 = vst [vmem:[#allocation103_spill] sm:$0xff] %v9817_v48  ;;  %v8103_v48 = vld [vmem:[%s15380_s5 + $0x8] sm:$0xff]   ;;  %v1931_v4 = vmul.f32 %v1860_v38, %v16159_v41  ;;  %v1939_v56 = vmul.f32 %v1864_v44, %v16160_v40  ;;  %v1940_v60 = vmul.f32 %v1864_v44, %v9446_v36 }
 0x1a4   : > { %16170 = vst [vmem:[#allocation104_spill] sm:$0xff] %v9820_v9  ;;  %16171 = vst [vmem:[#allocation105_spill] sm:$0xff] %v9824_v61  ;;  %v1930_v9 = vmul.f32 %v1860_v38, %v16158_v15  ;;  %v1932_v61 = vmul.f32 %v1860_v38, %v16040_v22  ;;  %v9852_v49 = vadd.f32 %v9710_v43, %v16175_v57  ;;  %v16176_v38 = vld [vmem:[#allocation77_spill] sm:$0xff]  ;;  %7865 = vmatpush3.bf16.msra.mxu0 %v8103_v48  ;;  %v8104_v43 = vld [vmem:[%s15380_s5] sm:$0xff]  }
 0x1a5   : > { %16172 = vst [vmem:[#allocation106_spill] sm:$0xff] %v9827_v59  ;;  %16173 = vst [vmem:[#allocation110_spill] sm:$0xff] %v9830_v14  ;;  %v1935_v14 = vmul.f32 %v1864_v44, %v16157_v45  ;;  %v1937_v59 = vmul.f32 %v1864_v44, %v16159_v41  ;;  %v9857_v45 = vadd.f32 %v9713_v19, %v16176_v38  ;;  %v16179_v40 = vld [vmem:[#allocation81_spill] sm:$0xff]  ;;  %v16180_v57 = vld [vmem:[#allocation80_spill] sm:$0xff]  ;;  %7866 = vmatprep.subr.bf16.mxu0 %v16161_v39 }
 0x1a6   : > { %16174 = vst [vmem:[#allocation111_spill] sm:$0xff] %v9833_v17  ;;  %v1936_v17 = vmul.f32 %v1864_v44, %v16158_v15  ;;  %v16177_v15 = vld [vmem:[#allocation78_spill] sm:$0xff]  ;;  %v9865_v22 = vadd.f32 %v9723_v0, %v16178_v7  ;;  %v9869_v44 = vadd.f32 %v9726_v30, %v16179_v40  ;;  %v9876_v19 = vadd.f32 %v9729_v8, %v16180_v57  ;;  %v16181_v38 = vld [vmem:[#allocation59_spill] sm:$0xff] }
 0x1a7   : > { %v9861_v41 = vadd.f32 %v9720_v63, %v16177_v15  ;;  %v9880_v15 = vadd.f32 %v9736_v28, %v16181_v38  ;;  %v16182_v63 = vld [vmem:[#allocation82_spill] sm:$0xff]  ;;  %v9888_v30 = vadd.f32 %v9742_v31, %v9509_v25  ;;  %v9893_v40 = vadd.f32 %v9746_v13, %v9513_v26  ;;  %8020 = vmatpush3.bf16.msra.mxu1 %v8103_v48  ;;  %v16208_v31 = vld [vmem:[#allocation44_spill] sm:$0xff] }
 0x1a8   : > { %v9884_v0 = vadd.f32 %v9739_v2, %v16182_v63  ;;  %v9897_v8 = vadd.f32 %v9749_v29, %v9517_v54  ;;  %v9901_v28 = vadd.f32 %v9752_v51, %v9521_v23  ;;  %v9905_v2 = vadd.f32 %v9755_v42, %v9525_v55  ;;  %7867 = vmatpush3.bf16.msra.mxu0 %v8104_v43  ;;  %v16217_v38 = vld [vmem:[#allocation160_spill] sm:$0xff] }
 0x1a9   : > { %v9909_v25 = vadd.f32 %v9758_v58, %v9529_v16  ;;  %v9913_v26 = vadd.f32 %v9761_v53, %v9621_v37  ;;  %v9917_v54 = vadd.f32 %v9764_v18, %v9625_v20  ;;  %v9921_v23 = vadd.f32 %v9767_v21, %v9629_v24  ;;  %8015 = vmatprep.subr.bf16.mxu1 %v16161_v39  ;;  %v16203_v53 = vld [vmem:[#allocation168_spill] sm:$0xff]  ;;  %v16209_v13 = vld [vmem:[#allocation101_spill] sm:$0xff]  ;;  %v16211_v58 = vld [vmem:[#allocation159_spill] sm:$0xff] }
 0x1aa   : > { %16183 = vst [vmem:[#allocation112_spill] sm:$0xff] %v9901_v28  ;;  %16184 = vst [vmem:[#allocation113_spill] sm:$0xff] %v9905_v2  ;;  %v9927_v55 = vadd.f32 %v9771_v27, %v9533_v10  ;;  %v9931_v16 = vadd.f32 %v9774_v50, %v9537_v11  ;;  %v9935_v48 = vadd.f32 %v9777_v52, %v9541_v5  ;;  %v16193_v50 = vld [vmem:[#allocation156_spill] sm:$0xff]  ;;  %v16194_v5 = vld [vmem:[#allocation97_spill] sm:$0xff] }
 0x1ab   : > { %16185 = vst [vmem:[#allocation114_spill] sm:$0xff] %v9909_v25  ;;  %v9939_v37 = vadd.f32 %v9780_v12, %v9545_v6  ;;  %v9943_v20 = vadd.f32 %v9786_v1, %v9549_v32  ;;  %v9947_v10 = vadd.f32 %v9789_v47, %v9553_v46  ;;  %v9951_v11 = vadd.f32 %v9792_v34, %v9557_v62  ;;  %v16196_v6 = vld [vmem:[#allocation39_spill] sm:$0xff]  ;;  %v16199_v32 = vld [vmem:[#allocation157_spill] sm:$0xff]  ;;  %v16200_v1 = vld [vmem:[#allocation100_spill] sm:$0xff] }
 0x1ac   : > { %16186 = vst [vmem:[#allocation115_spill] sm:$0xff] %v9927_v55  ;;  %16187 = vst [vmem:[#allocation116_spill] sm:$0xff] %v9931_v16  ;;  %v9955_v24 = vadd.f32 %v16194_v5, %v16193_v50  ;;  %v16197_v12 = vld [vmem:[#allocation99_spill] sm:$0xff]  ;;  %v9964_v18 = vadd.f32 %v16200_v1, %v16199_v32  ;;  %v16205_v62 = vld [vmem:[#allocation158_spill] sm:$0xff]  ;;  %8021 = vmatpush3.bf16.msra.mxu1 %v8104_v43  ;;  %v9976_v42 = vadd.f32 %v16209_v13, %v16208_v31 }
 0x1ad   : > { %16188 = vst [vmem:[#allocation117_spill] sm:$0xff] %v9935_v48  ;;  %16189 = vst [vmem:[#allocation118_spill] sm:$0xff] %v9939_v37  ;;  %v9960_v21 = vadd.f32 %v16197_v12, %v16196_v6  ;;  %v16202_v46 = vld [vmem:[#allocation43_spill] sm:$0xff]  ;;  %v16206_v34 = vld [vmem:[#allocation169_spill] sm:$0xff] }
 0x1ae   : > { %16190 = vst [vmem:[#allocation119_spill] sm:$0xff] %v9943_v20  ;;  %16191 = vst [vmem:[#allocation120_spill] sm:$0xff] %v9947_v10  ;;  %v9968_v51 = vadd.f32 %v16203_v53, %v16202_v46  ;;  %v9972_v29 = vadd.f32 %v16206_v34, %v16205_v62  ;;  %v16212_v27 = vld [vmem:[#allocation102_spill] sm:$0xff]  ;;  %v16214_v47 = vld [vmem:[#allocation45_spill] sm:$0xff] }
 0x1af   : > { %16192 = vst [vmem:[#allocation121_spill] sm:$0xff] %v9951_v11  ;;  %16195 = vst [vmem:[#allocation51_spill] sm:$0xff] %v9955_v24  ;;  %v9980_v52 = vadd.f32 %v16212_v27, %v16211_v58  ;;  %v16215_v7 = vld [vmem:[#allocation103_spill] sm:$0xff]  ;;  %v16218_v63 = vld [vmem:[#allocation104_spill] sm:$0xff] }
 0x1b0   : > { %16198 = vst [vmem:[#allocation122_spill] sm:$0xff] %v9960_v21  ;;  %16201 = vst [vmem:[#allocation52_spill] sm:$0xff] %v9964_v18  ;;  %v9984_v57 = vadd.f32 %v16215_v7, %v16214_v47  ;;  %v9988_v50 = vadd.f32 %v16218_v63, %v16217_v38  ;;  %v16220_v43 = vld [vmem:[#allocation46_spill] sm:$0xff]  ;;  %v16221_v5 = vld [vmem:[#allocation105_spill] sm:$0xff] }
 0x1b1   : > { %16204 = vst [vmem:[#allocation123_spill] sm:$0xff] %v9968_v51  ;;  %16207 = vst [vmem:[#allocation53_spill] sm:$0xff] %v9972_v29  ;;  %v9994_v6 = vadd.f32 %v16221_v5, %v16220_v43  ;;  %v16223_v12 = vld [vmem:[#allocation161_spill] sm:$0xff]  ;;  %v16224_v32 = vld [vmem:[#allocation106_spill] sm:$0xff] }
 0x1b2   : > { %16210 = vst [vmem:[#allocation124_spill] sm:$0xff] %v9976_v42  ;;  %16213 = vst [vmem:[#allocation56_spill] sm:$0xff] %v9980_v52  ;;  %v9998_v1 = vadd.f32 %v16224_v32, %v16223_v12  ;;  %v16226_v46 = vld [vmem:[#allocation47_spill] sm:$0xff]  ;;  %v16227_v53 = vld [vmem:[#allocation110_spill] sm:$0xff] }
 0x1b3   : > { %16216 = vst [vmem:[#allocation125_spill] sm:$0xff] %v9984_v57  ;;  %16219 = vst [vmem:[#allocation54_spill] sm:$0xff] %v9988_v50  ;;  %v10002_v62 = vadd.f32 %v16227_v53, %v16226_v46  ;;  %v16229_v34 = vld [vmem:[#allocation162_spill] sm:$0xff]  ;;  %v16230_v31 = vld [vmem:[#allocation111_spill] sm:$0xff] }
 0x1b4   : > { %16222 = vst [vmem:[#allocation126_spill] sm:$0xff] %v9994_v6  ;;  %16225 = vst [vmem:[#allocation55_spill] sm:$0xff] %v9998_v1  ;;  %v10006_v13 = vadd.f32 %v16230_v31, %v16229_v34  ;;  %v16232_v58 = vld [vmem:[#allocation48_spill] sm:$0xff]  ;;  %v16234_v47 = vld [vmem:[#allocation163_spill] sm:$0xff] }
 0x1b5   : > { %16228 = vst [vmem:[#allocation127_spill] sm:$0xff] %v10002_v62  ;;  %v10009_v27 = vadd.f32 %v1930_v9, %v16232_v58  ;;  %v10012_v7 = vadd.f32 %v1931_v4, %v16234_v47  ;;  %v16236_v38 = vld [vmem:[#allocation49_spill] sm:$0xff]  ;;  %v16242_v46 = vld [vmem:[#allocation40_spill] sm:$0xff]  ;;  %v16244_v34 = vld [vmem:[#allocation166_spill] sm:$0xff] }
 0x1b6   : > { %16231 = vst [vmem:[#allocation57_spill] sm:$0xff] %v10006_v13  ;;  %v10015_v63 = vadd.f32 %v1932_v61, %v16236_v38  ;;  %v16238_v43 = vld [vmem:[#allocation141_spill] sm:$0xff]  ;;  %v10024_v53 = vadd.f32 %v1935_v14, %v16242_v46  ;;  %v10027_v31 = vadd.f32 %v1936_v17, %v16244_v34  ;;  %v10035_v4 = vld [vmem:[%s15378_s3] ss:$0 sm:$0xff]  ;;  %v16250_v47 = vld [vmem:[#allocation94_spill] sm:$0xff] }
 0x1b7   : > { %16233 = vst [vmem:[#allocation128_spill] sm:$0xff] %v10009_v27  ;;  %16235 = vst [vmem:[#allocation58_spill] sm:$0xff] %v10012_v7  ;;  %v10018_v5 = vadd.f32 %v1933_v3, %v16238_v43  ;;  %v16240_v12 = vld [vmem:[#allocation165_spill] sm:$0xff]  ;;  %v16252_v38 = vld [vmem:[#allocation95_spill] sm:$0xff]  ;;  %v2042_v17 = vmul.f32 %v10035_v4, %v9852_v49  ;;  %v2043_v43 = vmul.f32 %v10035_v4, %v9857_v45 }
 0x1b8   : > { %16237 = vst [vmem:[#allocation129_spill] sm:$0xff] %v10015_v63  ;;  %v10021_v32 = vadd.f32 %v1934_v33, %v16240_v12  ;;  %16243 = vst [vmem:[#allocation64_spill] sm:$0xff] %v10024_v53  ;;  %v16246_v9 = vld [vmem:[#allocation41_spill] sm:$0xff]  ;;  %v10041_v33 = vadd.f32 %v1939_v56, %v16250_v47  ;;  %v10044_v14 = vadd.f32 %v1940_v60, %v16252_v38  ;;  %v10066_v12 = vld [vmem:[%s15378_s3 + $0x2] ss:$0 sm:$0xff] }
 0x1b9   : > { %16239 = vst [vmem:[#allocation63_spill] sm:$0xff] %v10018_v5  ;;  %16245 = vst [vmem:[#allocation131_spill] sm:$0xff] %v10027_v31  ;;  %v10030_v58 = vadd.f32 %v1937_v59, %v16246_v9  ;;  %v16248_v61 = vld [vmem:[#allocation93_spill] sm:$0xff]  ;;  %v10051_v59 = vld [vmem:[%s15378_s3 + $0x1] ss:$0 sm:$0xff]  ;;  %v2484_v7 = vmul.f32 %v10066_v12, %v9857_v45  ;;  %v10090_v1 = vmul.f32 %v10066_v12, %v9861_v41 }
 0x1ba   : > { %16241 = vst [vmem:[#allocation130_spill] sm:$0xff] %v10021_v32  ;;  %v10038_v3 = vadd.f32 %v1938_v35, %v16248_v61  ;;  %16251 = vst [vmem:[#allocation66_spill] sm:$0xff] %v10041_v33  ;;  %v2147_v35 = vmul.f32 %v10051_v59, %v9852_v49  ;;  %v2148_v56 = vmul.f32 %v10051_v59, %v9857_v45  ;;  %v16255_v62 = vld [vmem:[#allocation167_spill] sm:$0xff]  ;;  %v16256_v42 = vld [vmem:[#allocation42_spill] sm:$0xff] }
 0x1bb   : > { %16247 = vst [vmem:[#allocation62_spill] sm:$0xff] %v10030_v58  ;;  %16253 = vst [vmem:[#allocation108_spill] sm:$0xff] %v10044_v14  ;;  %v10061_v60 = vmul.f32 %v10051_v59, %v9861_v41  ;;  %v10070_v46 = vmul.f32 %v10051_v59, %v9865_v22  ;;  %v10074_v34 = vmul.f32 %v10051_v59, %v9869_v44  ;;  %v15472_v45 = vrot.slane %v10090_v1, 2  ;;  %v10135_v29 = vld [vmem:[%s15378_s3 + $0x6] ss:$0 sm:$0xff] }
 0x1bc   : > { %16249 = vst [vmem:[#allocation107_spill] sm:$0xff] %v10038_v3  ;;  %v10078_v9 = vmul.f32 %v10051_v59, %v9876_v19  ;;  %v2483_v61 = vmul.f32 %v10066_v12, %v9852_v49  ;;  %v2268_v47 = vrot.slane %v2147_v35, 1  ;;  %v2269_v38 = vrot.slane %v2148_v56, 1 }
 0x1bd   : > { %v10094_v49 = vmul.f32 %v10066_v12, %v9876_v19  ;;  %v2605_v56 = vrot.slane %v2484_v7, 2  ;;  %v16254_v27 = vrot.slane %v10061_v60, 1  ;;  %v2819_v50 = vmul.f32 %v16255_v62, %v9880_v15 }
 0x1be   : > { %v2604_v35 = vrot.slane %v2483_v61, 2  ;;  %v2270_v63 = vsel %vm2267_vm3, %v2268_v47, %v2269_v38  ;;  %v2820_v7 = vmul.f32 %v16255_v62, %v9884_v0 }
 0x1bf   : > { %v2272_v13 = vsel %vm2267_vm3, %v2269_v38, %v16254_v27  ;;  %v2428_v6 = vadd.f32 %v2270_v63, %v2042_v17  ;;  %v2608_v61 = vsel %vm2603_vm4, %v2605_v56, %v15472_v45  ;;  %v2924_v27 = vmul.f32 %v16256_v42, %v9880_v15 }
 0x1c0   : > { %v2429_v57 = vadd.f32 %v2272_v13, %v2043_v43  ;;  %v2606_v19 = vsel %vm2603_vm4, %v2604_v35, %v2605_v56  ;;  %v2925_v63 = vmul.f32 %v16256_v42, %v9884_v0  ;;  %v10117_v13 = vld [vmem:[%s15378_s3 + $0x5] ss:$0 sm:$0xff]  ;;  %v10121_v43 = vmul.f32 %v16256_v42, %v9888_v30 }
 0x1c1   : > { %v2764_v47 = vadd.f32 %v2606_v19, %v2428_v6  ;;  %v3259_v38 = vmul.f32 %v10117_v13, %v9880_v15  ;;  %v3260_v6 = vmul.f32 %v10117_v13, %v9884_v0  ;;  %v3044_v56 = vrot.slane %v2924_v27, 1 }
 0x1c2   : > { %v2765_v17 = vadd.f32 %v2608_v61, %v2429_v57  ;;  %v3045_v19 = vrot.slane %v2925_v63, 1  ;;  %v10129_v36 = vmul.f32 %v10117_v13, %v9888_v30  ;;  %v15480_v57 = vrot.slane %v10121_v43, 1 }
 0x1c3   : > { %v2869_v35 = vadd.f32 %v2819_v50, %v2764_v47  ;;  %v3379_v61 = vrot.slane %v3259_v38, 2  ;;  %v3380_v52 = vrot.slane %v3260_v6, 2  ;;  %v3594_v47 = vmul.f32 %v10135_v29, %v9905_v2 }
 0x1c4   : > { %v2870_v45 = vadd.f32 %v2820_v7, %v2765_v17  ;;  %v3046_v51 = vsel %vm2267_vm3, %v3044_v56, %v3045_v19  ;;  %v15479_v50 = vrot.slane %v10129_v36, 2  ;;  %v3595_v27 = vmul.f32 %v10135_v29, %v9909_v25  ;;  %v10146_v7 = vld [vmem:[%s15378_s3 + $0x7] ss:$0 sm:$0xff] }
 0x1c5   : > { %v3048_v63 = vsel %vm2267_vm3, %v3045_v19, %v15480_v57  ;;  %v3204_v17 = vadd.f32 %v3046_v51, %v2869_v35  ;;  %v3381_v38 = vsel %vm2603_vm4, %v3379_v61, %v3380_v52  ;;  %v3699_v6 = vmul.f32 %v10146_v7, %v9905_v2  ;;  %v10166_v51 = vld [vmem:[%s15378_s3 + $0x8] ss:$0 sm:$0xff] }
 0x1c6   : > { %v3205_v56 = vadd.f32 %v3048_v63, %v2870_v45  ;;  %v3383_v18 = vsel %vm2603_vm4, %v3380_v52, %v15479_v50  ;;  %v3700_v21 = vmul.f32 %v10146_v7, %v9909_v25  ;;  %v10161_v24 = vmul.f32 %v10146_v7, %v9913_v26 }
 0x1c7   : > { %v3539_v35 = vadd.f32 %v3381_v38, %v3204_v17  ;;  %v3819_v19 = vrot.slane %v3699_v6, 1  ;;  %v4034_v45 = vmul.f32 %v10166_v51, %v9905_v2  ;;  %v4035_v52 = vmul.f32 %v10166_v51, %v9909_v25 }
 0x1c8   : > { %v3540_v61 = vadd.f32 %v3383_v18, %v3205_v56  ;;  %v3820_v63 = vrot.slane %v3700_v21, 1  ;;  %v15486_v50 = vrot.slane %v10161_v24, 1  ;;  %v10175_v57 = vmul.f32 %v10166_v51, %v9913_v26 }
 0x1c9   : > { %v3644_v11 = vadd.f32 %v3594_v47, %v3539_v35  ;;  %v4154_v10 = vrot.slane %v4034_v45, 2  ;;  %v4155_v20 = vrot.slane %v4035_v52, 2  ;;  %v2076_v17 = vmul.f32 %v10035_v4, %v10018_v5 }
 0x1ca   : > { %v3645_v38 = vadd.f32 %v3595_v27, %v3540_v61  ;;  %v3821_v6 = vsel %vm2267_vm3, %v3819_v19, %v3820_v63  ;;  %v3823_v18 = vsel %vm2267_vm3, %v3820_v63, %v15486_v50  ;;  %v15485_v21 = vrot.slane %v10175_v57, 2 }
 0x1cb   : > { %v3979_v56 = vadd.f32 %v3821_v6, %v3644_v11  ;;  %v4156_v37 = vsel %vm2603_vm4, %v4154_v10, %v4155_v20  ;;  %v2077_v47 = vmul.f32 %v10035_v4, %v10024_v53  ;;  %v10189_v35 = vmul.f32 %v10051_v59, %v10018_v5 }
 0x1cc   : > { %v3980_v27 = vadd.f32 %v3823_v18, %v3645_v38  ;;  %v4158_v19 = vsel %vm2603_vm4, %v4155_v20, %v15485_v21  ;;  %v2188_v45 = vmul.f32 %v10051_v59, %v10021_v32  ;;  %v2189_v11 = vmul.f32 %v10051_v59, %v10024_v53  ;;  %v10210_v20 = vld [vmem:[%s15379_s4] ss:$0 sm:$0xff] }
 0x1cd   : > { %16257 = vst [vmem:[#allocation67_spill] sm:$0xff] %v10189_v35  ;;  %v4314_v10 = vadd.f32 %v4156_v37, %v3979_v56  ;;  %v10200_v52 = vmul.f32 %v10051_v59, %v10027_v31  ;;  %v15500_v61 = vrot.slane %v10189_v35, 1  ;;  %v10205_v63 = vmul.f32 %v10066_v12, %v10018_v5 }
 0x1ce   : > { %v4315_v38 = vadd.f32 %v4158_v19, %v3980_v27  ;;  %v2343_v6 = vrot.slane %v2188_v45, 1  ;;  %v2345_v18 = vrot.slane %v2189_v11, 1  ;;  %v2524_v37 = vmul.f32 %v10066_v12, %v10021_v32 }
 0x1cf   : > { %16258 = vst [vmem:[#allocation109_spill] sm:$0xff] %v10205_v63  ;;  %v4371_v56 = vadd.f32 %v10210_v20, %v4314_v10  ;;  %v15502_v21 = vrot.slane %v10200_v52, 1  ;;  %v2525_v50 = vmul.f32 %v10066_v12, %v10024_v53  ;;  %v10220_v27 = vmul.f32 %v10066_v12, %v10027_v31 }
 0x1d0   : > { %v4372_v19 = vadd.f32 %v10210_v20, %v4315_v38  ;;  %v2344_v45 = vsel %vm2267_vm3, %v15500_v61, %v2343_v6  ;;  %v15499_v11 = vrot.slane %v10205_v63, 2  ;;  %v2679_v32 = vrot.slane %v2524_v37, 2 }
 0x1d1   : > { %v4421_v5 = vmax.f32 %v4371_v56, 0.0  ;;  %v2347_v10 = vsel %vm2267_vm3, %v2345_v18, %v15502_v21  ;;  %v2462_v48 = vadd.f32 %v2344_v45, %v2076_v17  ;;  %v2681_v53 = vrot.slane %v2525_v50, 2  ;;  %v16260_v18 = vld [vmem:[#allocation85_spill] sm:$0xff] }
 0x1d2   : > { %v4422_v55 = vmax.f32 %v4372_v19, 0.0  ;;  %v2463_v16 = vadd.f32 %v2347_v10, %v2077_v47  ;;  %v2680_v38 = vsel %vm2603_vm4, %v15499_v11, %v2679_v32  ;;  %v15501_v35 = vrot.slane %v10220_v27, 2 }
 0x1d3   : > { %v2798_v25 = vadd.f32 %v2680_v38, %v2462_v48  ;;  %v2853_v6 = vmul.f32 %v16255_v62, %v10041_v33  ;;  %v10238_v37 = vmul.f32 %v16256_v42, %v10041_v33  ;;  %v2965_v17 = vmul.f32 %v16256_v42, %v10044_v14  ;;  %v16261_v48 = vld [vmem:[#allocation98_spill] sm:$0xff] }
 0x1d4   : > { %v4471_v50 = vpack.c.bf16 %v4422_v55, %v4421_v5  ;;  %v2683_v47 = vsel %vm2603_vm4, %v2681_v53, %v15501_v35  ;;  %v10247_v32 = vmul.f32 %v16256_v42, %v16260_v18  ;;  %v3121_v56 = vrot.slane %v16261_v48, 1  ;;  %v16263_v53 = vld [vmem:[#allocation61_spill] sm:$0xff]  ;;  %v16264_v48 = vld [vmem:[#allocation96_spill] sm:$0xff] }
 0x1d5   : > { %16259 = vst [vmem:[#allocation65_spill] sm:$0xff] %v10238_v37  ;;  %v2799_v19 = vadd.f32 %v2683_v47, %v2463_v16  ;;  %v2903_v45 = vadd.f32 %v2853_v6, %v2798_v25  ;;  %v15503_v10 = vrot.slane %v10238_v37, 1  ;;  %v3119_v38 = vrot.slane %v2965_v17, 1  ;;  %v16265_v17 = vld [vmem:[#allocation88_spill] sm:$0xff]  ;;  %v16266_v37 = vld [vmem:[#allocation90_spill] sm:$0xff] }
 0x1d6   : > { %7869 = vmatmul.mubr.msk.bf16.vlgmr.msra.gmra.mxu0 %vm4551_vm5, %v4471_v50  ;;  %v15509_v11 = vrot.slane %v10247_v32, 1  ;;  %v10255_v55 = vmul.f32 %v10117_v13, %v10041_v33  ;;  %v3300_v5 = vmul.f32 %v10117_v13, %v10044_v14  ;;  %v3301_v61 = vmul.f32 %v10117_v13, %v16263_v53 }
 0x1d7   : > { %v2904_v16 = vadd.f32 %v16264_v48, %v2799_v19  ;;  %v3120_v25 = vsel %vm2267_vm3, %v15503_v10, %v3119_v38  ;;  %v10267_v6 = vmul.f32 %v10117_v13, %v16260_v18  ;;  %v3628_v50 = vmul.f32 %v10135_v29, %v16265_v17  ;;  %7872 = vmatprep.mubr.msk.bf16.mxu0 %vm8256_vm2, %v16161_v39 }
 0x1d8   : > { %16262 = vst [vmem:[#allocation132_spill] sm:$0xff] %v10255_v55  ;;  %v3123_v47 = vsel %vm2267_vm3, %v3121_v56, %v15509_v11  ;;  %v3238_v35 = vadd.f32 %v3120_v25, %v2903_v45  ;;  %v15508_v19 = vrot.slane %v10255_v55, 2  ;;  %v3454_v48 = vrot.slane %v3300_v5, 2  ;;  %v16268_v56 = vld [vmem:[#allocation89_spill] sm:$0xff]  ;;  %v16269_v25 = vld [vmem:[#allocation154_spill] sm:$0xff] }
 0x1d9   : > { %v3239_v21 = vadd.f32 %v3123_v47, %v2904_v16  ;;  %v3456_v38 = vrot.slane %v3301_v61, 2  ;;  %v15516_v10 = vrot.slane %v10267_v6, 2  ;;  %v3629_v63 = vmul.f32 %v10135_v29, %v16266_v37 }
 0x1da   : > { %v3455_v53 = vsel %vm2603_vm4, %v15508_v19, %v3454_v48  ;;  %v10285_v14 = vmul.f32 %v10146_v7, %v16265_v17  ;;  %v3740_v45 = vmul.f32 %v10146_v7, %v16268_v56  ;;  %v3741_v5 = vmul.f32 %v10146_v7, %v16266_v37 }
 0x1db   : > { %v3458_v61 = vsel %vm2603_vm4, %v3456_v38, %v15516_v10  ;;  %v3573_v16 = vadd.f32 %v3455_v53, %v3238_v35  ;;  %v10296_v47 = vmul.f32 %v10146_v7, %v16269_v25  ;;  %v10300_v48 = vmul.f32 %v10166_v51, %v16265_v17 }
 0x1dc   : > { %16267 = vst [vmem:[#allocation68_spill] sm:$0xff] %v10285_v14  ;;  %v3574_v19 = vadd.f32 %v3458_v61, %v3239_v21  ;;  %v15518_v11 = vrot.slane %v10285_v14, 1  ;;  %v3894_v55 = vrot.slane %v3740_v45, 1  ;;  %v3896_v33 = vrot.slane %v3741_v5, 1 }
 0x1dd   : > { %16270 = vst [vmem:[#allocation133_spill] sm:$0xff] %v10300_v48  ;;  %v3678_v28 = vadd.f32 %v3628_v50, %v3573_v16  ;;  %v15521_v2 = vrot.slane %v10296_v47, 1  ;;  %v4075_v38 = vmul.f32 %v10166_v51, %v16268_v56  ;;  %v4076_v35 = vmul.f32 %v10166_v51, %v16266_v37 }
 0x1de   : > { %v3679_v53 = vadd.f32 %v3629_v63, %v3574_v19  ;;  %v3895_v10 = vsel %vm2267_vm3, %v15518_v11, %v3894_v55  ;;  %v10313_v21 = vmul.f32 %v10166_v51, %v16269_v25  ;;  %v15520_v45 = vrot.slane %v10300_v48, 2 }
 0x1df   : > { %v3898_v50 = vsel %vm2267_vm3, %v3896_v33, %v15521_v2  ;;  %v4013_v5 = vadd.f32 %v3895_v10, %v3678_v28  ;;  %v4229_v61 = vrot.slane %v4075_v38, 2  ;;  %v4231_v16 = vrot.slane %v4076_v35, 2 }
 0x1e0   : > { %v4014_v56 = vadd.f32 %v3898_v50, %v3679_v53  ;;  %v15522_v63 = vrot.slane %v10313_v21, 2  ;;  %v2044_v19 = vmul.f32 %v10035_v4, %v9861_v41  ;;  %v2045_v55 = vmul.f32 %v10035_v4, %v9865_v22 }
 0x1e1   : > { %v4230_v11 = vsel %vm2603_vm4, %v15520_v45, %v4229_v61  ;;  %v16271_v14 = vrot.slane %v10070_v46, 1  ;;  %v16272_v33 = vrot.slane %v10061_v60, 1  ;;  %v16273_v10 = vrot.slane %v10074_v34, 1 }
 0x1e2   : > { %v2486_v41 = vmul.f32 %v10066_v12, %v9865_v22  ;;  %v4233_v53 = vsel %vm2603_vm4, %v4231_v16, %v15522_v63  ;;  %v4348_v50 = vadd.f32 %v4230_v11, %v4013_v5  ;;  %v2821_v46 = vmul.f32 %v16255_v62, %v9888_v30 }
 0x1e3   : > { %v2274_v28 = vsel %vm2267_vm3, %v16272_v33, %v16271_v14  ;;  %v16274_v38 = vmov %v16271_v14  ;;  %v4349_v2 = vadd.f32 %v4233_v53, %v4014_v56  ;;  %v10344_v14 = vmul.f32 %v10066_v12, %v9869_v44 }
 0x1e4   : > { %v2276_v35 = vsel %vm2267_vm3, %v16274_v38, %v16273_v10  ;;  %v2430_v61 = vadd.f32 %v2274_v28, %v2044_v19  ;;  %v2609_v60 = vrot.slane %v2486_v41, 2  ;;  %v4405_v33 = vadd.f32 %v10210_v20, %v4348_v50 }
 0x1e5   : > { %v2431_v45 = vadd.f32 %v2276_v35, %v2045_v55  ;;  %v2822_v22 = vmul.f32 %v16255_v62, %v9893_v40  ;;  %v2927_v16 = vmul.f32 %v16256_v42, %v9893_v40  ;;  %v10355_v11 = vmul.f32 %v16256_v42, %v9897_v8 }
 0x1e6   : > { %v4406_v56 = vadd.f32 %v10210_v20, %v4349_v2  ;;  %v16275_v5 = vrot.slane %v10090_v1, 2  ;;  %v15528_v55 = vrot.slane %v10344_v14, 2  ;;  %v3262_v28 = vmul.f32 %v10117_v13, %v9893_v40 }
 0x1e7   : > { %v4455_v10 = vmax.f32 %v4405_v33, 0.0  ;;  %v3049_v35 = vrot.slane %v2927_v16, 1  ;;  %v15527_v41 = vrot.slane %v10355_v11, 1  ;;  %v10370_v2 = vmul.f32 %v10117_v13, %v9897_v8 }
 0x1e8   : > { %v2610_v19 = vsel %vm2603_vm4, %v16275_v5, %v2609_v60  ;;  %v4456_v53 = vmax.f32 %v4406_v56, 0.0  ;;  %v2612_v50 = vsel %vm2603_vm4, %v2609_v60, %v15528_v55  ;;  %v3384_v1 = vrot.slane %v3262_v28, 2 }
 0x1e9   : > { %v2766_v38 = vadd.f32 %v2610_v19, %v2430_v61  ;;  %v2767_v5 = vadd.f32 %v2612_v50, %v2431_v45  ;;  %v16276_v48 = vrot.slane %v10121_v43, 1  ;;  %v3052_v61 = vsel %vm2267_vm3, %v3049_v35, %v15527_v41 }
 0x1ea   : > { %v4488_v16 = vpack.c.bf16 %v4456_v53, %v4455_v10  ;;  %v16277_v56 = vrot.slane %v10129_v36, 2  ;;  %v15524_v19 = vrot.slane %v10370_v2, 2  ;;  %v3596_v28 = vmul.f32 %v10135_v29, %v9913_v26 }
 0x1eb   : > { %v2871_v63 = vadd.f32 %v2821_v46, %v2766_v38  ;;  %v3050_v33 = vsel %vm2267_vm3, %v16276_v48, %v3049_v35  ;;  %v2872_v45 = vadd.f32 %v2822_v22, %v2767_v5  ;;  %v3597_v43 = vmul.f32 %v10135_v29, %v9917_v54 }
 0x1ec   : > { %v3385_v60 = vsel %vm2603_vm4, %v16277_v56, %v3384_v1  ;;  %v3702_v48 = vmul.f32 %v10146_v7, %v9917_v54  ;;  %7937 = vmatmul.mubr.msk.bf16.vlgmr.msra.gmra.mxu1 %vm4551_vm5, %v4488_v16  ;;  %v3387_v36 = vsel %vm2603_vm4, %v3384_v1, %v15524_v19  ;;  %v10394_v10 = vmul.f32 %v10146_v7, %v9921_v23 }
 0x1ed   : > { %v3206_v46 = vadd.f32 %v3050_v33, %v2871_v63  ;;  %v4037_v22 = vmul.f32 %v10166_v51, %v9917_v54  ;;  %v10400_v63 = vmul.f32 %v10166_v51, %v9921_v23  ;;  %v3207_v38 = vadd.f32 %v3052_v61, %v2872_v45  ;;  %7940 = vmatprep.mubr.msk.bf16.mxu1 %vm8256_vm2, %v16161_v39 }
 0x1ee   : > { %v3824_v53 = vrot.slane %v3702_v48, 1  ;;  %v2078_v50 = vmul.f32 %v10035_v4, %v10027_v31  ;;  %v15526_v1 = vrot.slane %v10394_v10, 1  ;;  %v2079_v16 = vmul.f32 %v10035_v4, %v10030_v58 }
 0x1ef   : > { %v3541_v35 = vadd.f32 %v3385_v60, %v3206_v46  ;;  %v4159_v5 = vrot.slane %v4037_v22, 2  ;;  %v15525_v33 = vrot.slane %v10400_v63, 2  ;;  %v3542_v56 = vadd.f32 %v3387_v36, %v3207_v38 }
 0x1f0   : > { %v16278_v61 = vrot.slane %v10161_v24, 1  ;;  %v2191_v45 = vmul.f32 %v10051_v59, %v10030_v58  ;;  %v3827_v46 = vsel %vm2267_vm3, %v3824_v53, %v15526_v1  ;;  %v16279_v48 = vrot.slane %v10175_v57, 2 }
 0x1f1   : > { %v3646_v19 = vadd.f32 %v3596_v28, %v3541_v35  ;;  %v4162_v36 = vsel %vm2603_vm4, %v4159_v5, %v15525_v33  ;;  %v10426_v24 = vmul.f32 %v10051_v59, %v10038_v3  ;;  %v3647_v28 = vadd.f32 %v3597_v43, %v3542_v56 }
 0x1f2   : > { %v3825_v60 = vsel %vm2267_vm3, %v16278_v61, %v3824_v53  ;;  %v4160_v22 = vsel %vm2603_vm4, %v16279_v48, %v4159_v5  ;;  %v2348_v35 = vrot.slane %v2191_v45, 1  ;;  %v2527_v61 = vmul.f32 %v10066_v12, %v10030_v58  ;;  %v16280_v5 = vld [vmem:[#allocation86_spill] sm:$0xff] }
 0x1f3   : > { %v3981_v38 = vadd.f32 %v3825_v60, %v3646_v19  ;;  %v2350_v53 = vrot.slane %v10426_v24, 1  ;;  %v10433_v57 = vmul.f32 %v10066_v12, %v10038_v3  ;;  %v2855_v48 = vmul.f32 %v16255_v62, %v16260_v18 }
 0x1f4   : > { %v2856_v33 = vmul.f32 %v16255_v62, %v16280_v5  ;;  %v3982_v1 = vadd.f32 %v3827_v46, %v3647_v28  ;;  %v16281_v19 = vrot.slane %v10200_v52, 1  ;;  %v2684_v56 = vrot.slane %v2527_v61, 2 }
 0x1f5   : > { %v4316_v41 = vadd.f32 %v4160_v22, %v3981_v38  ;;  %v2351_v60 = vsel %vm2267_vm3, %v2348_v35, %v2350_v53  ;;  %v15542_v55 = vrot.slane %v10433_v57, 2  ;;  %v2968_v58 = vmul.f32 %v16256_v42, %v16280_v5 }
 0x1f6   : > { %v2349_v43 = vsel %vm2267_vm3, %v16281_v19, %v2348_v35  ;;  %v4317_v31 = vadd.f32 %v4162_v36, %v3982_v1  ;;  %v2465_v46 = vadd.f32 %v2351_v60, %v2079_v16  ;;  %v16282_v22 = vrot.slane %v10220_v27, 2  ;;  %v16283_v35 = vld [vmem:[#allocation87_spill] sm:$0xff] }
 0x1f7   : > { %v2464_v45 = vadd.f32 %v2349_v43, %v2078_v50  ;;  %v4373_v37 = vadd.f32 %v10210_v20, %v4316_v41  ;;  %v2687_v28 = vsel %vm2603_vm4, %v2684_v56, %v15542_v55  ;;  %v10457_v50 = vmul.f32 %v16256_v42, %v16283_v35 }
 0x1f8   : > { %v2685_v52 = vsel %vm2603_vm4, %v16282_v22, %v2684_v56  ;;  %v3124_v61 = vrot.slane %v2968_v58, 1  ;;  %v4374_v19 = vadd.f32 %v10210_v20, %v4317_v31  ;;  %v2801_v36 = vadd.f32 %v2687_v28, %v2465_v46  ;;  %v16285_v46 = vld [vmem:[#allocation37_spill] sm:$0xff] }
 0x1f9   : > { %v2800_v38 = vadd.f32 %v2685_v52, %v2464_v45  ;;  %v4423_v1 = vmax.f32 %v4373_v37, 0.0  ;;  %v3303_v41 = vmul.f32 %v10117_v13, %v16280_v5  ;;  %v16284_v16 = vrot.slane %v10247_v32, 1 }
 0x1fa   : > { %v15536_v56 = vrot.slane %v10457_v50, 1  ;;  %v10468_v60 = vmul.f32 %v10117_v13, %v16283_v35  ;;  %v4424_v45 = vmax.f32 %v4374_v19, 0.0  ;;  %v2906_v58 = vadd.f32 %v2856_v33, %v2801_v36 }
 0x1fb   : > { %v2905_v27 = vadd.f32 %v2855_v48, %v2800_v38  ;;  %v3125_v43 = vsel %vm2267_vm3, %v16284_v16, %v3124_v61  ;;  %v3459_v22 = vrot.slane %v3303_v41, 2  ;;  %v3630_v31 = vmul.f32 %v10135_v29, %v16269_v25  ;;  %v16287_v41 = vld [vmem:[#allocation155_spill] sm:$0xff] }
 0x1fc   : > { %v3127_v37 = vsel %vm2267_vm3, %v3124_v61, %v15536_v56  ;;  %v15534_v32 = vrot.slane %v10468_v60, 2  ;;  %v3631_v52 = vmul.f32 %v10135_v29, %v16285_v46  ;;  %v4472_v28 = vpack.c.bf16 %v4424_v45, %v4423_v1 }
 0x1fd   : > { %v3240_v48 = vadd.f32 %v3125_v43, %v2905_v27  ;;  %v3241_v38 = vadd.f32 %v3127_v37, %v2906_v58  ;;  %v16286_v16 = vrot.slane %v10267_v6, 2  ;;  %v3743_v19 = vmul.f32 %v10146_v7, %v16285_v46 }
 0x1fe   : > { %v3462_v36 = vsel %vm2603_vm4, %v3459_v22, %v15534_v32  ;;  %v10488_v27 = vmul.f32 %v10146_v7, %v16287_v41  ;;  %v4078_v1 = vmul.f32 %v10166_v51, %v16285_v46  ;;  %7873 = vmatmul.mubr.msk.bf16.gmra.mxu0 %vm4551_vm5, %v4472_v28  ;;  %v10495_v45 = vmul.f32 %v10166_v51, %v16287_v41 }
 0x1ff   : > { %v3460_v33 = vsel %vm2603_vm4, %v16286_v16, %v3459_v22  ;;  %v3576_v6 = vadd.f32 %v3462_v36, %v3241_v38  ;;  %v3899_v43 = vrot.slane %v3743_v19, 1  ;;  %v2046_v58 = vmul.f32 %v10035_v4, %v9869_v44  ;;  %7876 = vmatprep.mubr.msk.bf16.mxu0 %vm8256_vm2, %v16161_v39 }
 0x200   : > { %v3575_v61 = vadd.f32 %v3460_v33, %v3240_v48  ;;  %v15535_v37 = vrot.slane %v10488_v27, 1  ;;  %v4234_v48 = vrot.slane %v4078_v1, 2  ;;  %v2047_v16 = vmul.f32 %v10035_v4, %v9880_v15 }
 0x201   : > { %v3681_v28 = vadd.f32 %v3631_v52, %v3576_v6  ;;  %v16288_v38 = vrot.slane %v10296_v47, 1  ;;  %v15541_v19 = vrot.slane %v10495_v45, 2  ;;  %v2153_v44 = vmul.f32 %v10051_v59, %v9880_v15 }
 0x202   : > { %v3680_v22 = vadd.f32 %v3630_v31, %v3575_v61  ;;  %v3902_v31 = vsel %vm2267_vm3, %v3899_v43, %v15535_v37  ;;  %v16289_v61 = vrot.slane %v10313_v21, 2  ;;  %v10518_v52 = vmul.f32 %v10051_v59, %v9884_v0 }
 0x203   : > { %v3900_v33 = vsel %vm2267_vm3, %v16288_v38, %v3899_v43  ;;  %v4016_v47 = vadd.f32 %v3902_v31, %v3681_v28  ;;  %v4237_v6 = vsel %vm2603_vm4, %v4234_v48, %v15541_v19  ;;  %v16290_v38 = vrot.slane %v10078_v9, 1 }
 0x204   : > { %v4015_v36 = vadd.f32 %v3900_v33, %v3680_v22  ;;  %v4235_v1 = vsel %vm2603_vm4, %v16289_v61, %v4234_v48  ;;  %v16291_v32 = vrot.slane %v10074_v34, 1  ;;  %v2279_v22 = vrot.slane %v2153_v44, 1 }
 0x205   : > { %v15538_v21 = vrot.slane %v10518_v52, 1  ;;  %v2489_v37 = vmul.f32 %v10066_v12, %v9880_v15  ;;  %v4351_v56 = vadd.f32 %v4237_v6, %v4016_v47  ;;  %v10533_v28 = vmul.f32 %v10066_v12, %v9884_v0  ;;  %v16294_v47 = vld [vmem:[#allocation113_spill] sm:$0xff] }
 0x206   : > { %v2278_v43 = vsel %vm2267_vm3, %v16291_v32, %v16290_v38  ;;  %v4350_v33 = vadd.f32 %v4235_v1, %v4015_v36  ;;  %v16292_v48 = vrot.slane %v10094_v49, 2  ;;  %v16293_v9 = vrot.slane %v10344_v14, 2 }
 0x207   : > { %v2432_v61 = vadd.f32 %v2278_v43, %v2046_v58  ;;  %v2823_v32 = vmul.f32 %v16255_v62, %v9897_v8  ;;  %v2281_v15 = vsel %vm2267_vm3, %v2279_v22, %v15538_v21  ;;  %v2615_v58 = vrot.slane %v2489_v37, 2  ;;  %v16295_v43 = vld [vmem:[#allocation112_spill] sm:$0xff] }
 0x208   : > { %v2614_v34 = vsel %vm2603_vm4, %v16293_v9, %v16292_v48  ;;  %v4407_v44 = vadd.f32 %v10210_v20, %v4350_v33  ;;  %v4408_v36 = vadd.f32 %v10210_v20, %v4351_v56  ;;  %v2433_v1 = vadd.f32 %v2281_v15, %v2047_v16  ;;  %v16296_v56 = vld [vmem:[#allocation114_spill] sm:$0xff] }
 0x209   : > { %v2768_v31 = vadd.f32 %v2614_v34, %v2432_v61  ;;  %v15537_v49 = vrot.slane %v10533_v28, 2  ;;  %v2824_v14 = vmul.f32 %v16255_v62, %v16294_v47  ;;  %v2929_v48 = vmul.f32 %v16256_v42, %v16295_v43 }
 0x20a   : > { %v4457_v6 = vmax.f32 %v4407_v44, 0.0  ;;  %v2930_v33 = vmul.f32 %v16256_v42, %v16294_v47  ;;  %v4458_v9 = vmax.f32 %v4408_v36, 0.0  ;;  %v10559_v16 = vmul.f32 %v16256_v42, %v16296_v56 }
 0x20b   : > { %v2873_v38 = vadd.f32 %v2823_v32, %v2768_v31  ;;  %v2617_v37 = vsel %vm2603_vm4, %v2615_v58, %v15537_v49  ;;  %v3264_v62 = vmul.f32 %v10117_v13, %v16295_v43  ;;  %v3053_v61 = vrot.slane %v2929_v48, 1 }
 0x20c   : > { %v2769_v22 = vadd.f32 %v2617_v37, %v2433_v1  ;;  %v3055_v34 = vrot.slane %v2930_v33, 1  ;;  %v3265_v32 = vmul.f32 %v10117_v13, %v16294_v47  ;;  %v4489_v44 = vpack.c.bf16 %v4458_v9, %v4457_v6  ;;  %v16299_v37 = vld [vmem:[#allocation116_spill] sm:$0xff] }
 0x20d   : > { %v15539_v15 = vrot.slane %v10559_v16, 1  ;;  %v10568_v31 = vmul.f32 %v10117_v13, %v16296_v56  ;;  %v3388_v58 = vrot.slane %v3264_v62, 2  ;;  %v16297_v42 = vrot.slane %v10355_v11, 1 }
 0x20e   : > { %v2874_v36 = vadd.f32 %v2824_v14, %v2769_v22  ;;  %v3390_v21 = vrot.slane %v3265_v32, 2  ;;  %v3598_v1 = vmul.f32 %v10135_v29, %v9921_v23  ;;  %7941 = vmatmul.mubr.msk.bf16.gmra.mxu1 %vm4551_vm5, %v4489_v44  ;;  %v16298_v33 = vrot.slane %v10370_v2, 2  ;;  %v16300_v22 = vld [vmem:[#allocation115_spill] sm:$0xff] }
 0x20f   : > { %v3054_v49 = vsel %vm2267_vm3, %v16297_v42, %v3053_v61  ;;  %v3057_v6 = vsel %vm2267_vm3, %v3055_v34, %v15539_v15  ;;  %v15540_v14 = vrot.slane %v10568_v31, 2  ;;  %v3599_v62 = vmul.f32 %v10135_v29, %v16299_v37  ;;  %7944 = vmatprep.mubr.msk.bf16.mxu1 %vm8256_vm2, %v16161_v39 }
 0x210   : > { %v3208_v48 = vadd.f32 %v3054_v49, %v2873_v38  ;;  %v3389_v9 = vsel %vm2603_vm4, %v16298_v33, %v3388_v58  ;;  %v3209_v11 = vadd.f32 %v3057_v6, %v2874_v36  ;;  %v3704_v61 = vmul.f32 %v10146_v7, %v16300_v22  ;;  %v16301_v38 = vld [vmem:[#allocation117_spill] sm:$0xff] }
 0x211   : > { %v3705_v32 = vmul.f32 %v10146_v7, %v16299_v37  ;;  %v3392_v2 = vsel %vm2603_vm4, %v3390_v21, %v15540_v14  ;;  %v10596_v34 = vmul.f32 %v10146_v7, %v16301_v38  ;;  %v4039_v44 = vmul.f32 %v10166_v51, %v16300_v22 }
 0x212   : > { %v3543_v49 = vadd.f32 %v3389_v9, %v3208_v48  ;;  %v3544_v58 = vadd.f32 %v3392_v2, %v3209_v11  ;;  %v3828_v36 = vrot.slane %v3704_v61, 1  ;;  %v4040_v6 = vmul.f32 %v10166_v51, %v16299_v37 }
 0x213   : > { %v3830_v42 = vrot.slane %v3705_v32, 1  ;;  %v15544_v15 = vrot.slane %v10596_v34, 1  ;;  %v10605_v21 = vmul.f32 %v10166_v51, %v16301_v38  ;;  %v4163_v48 = vrot.slane %v4039_v44, 2  ;;  %v16304_v44 = vld [vmem:[#allocation66_spill] sm:$0xff] }
 0x214   : > { %v3648_v33 = vadd.f32 %v3598_v1, %v3543_v49  ;;  %v3649_v9 = vadd.f32 %v3599_v62, %v3544_v58  ;;  %v16302_v14 = vrot.slane %v10394_v10, 1  ;;  %v4165_v55 = vrot.slane %v4040_v6, 2  ;;  %v16305_v58 = vld [vmem:[#allocation108_spill] sm:$0xff] }
 0x215   : > { %v2080_v11 = vmul.f32 %v10035_v4, %v10038_v3  ;;  %v3832_v1 = vsel %vm2267_vm3, %v3830_v42, %v15544_v15  ;;  %v16303_v32 = vrot.slane %v10400_v63, 2  ;;  %v15543_v49 = vrot.slane %v10605_v21, 2 }
 0x216   : > { %v3829_v19 = vsel %vm2267_vm3, %v16302_v14, %v3828_v36  ;;  %v3984_v62 = vadd.f32 %v3832_v1, %v3649_v9  ;;  %v2081_v10 = vmul.f32 %v10035_v4, %v16304_v44  ;;  %v2193_v14 = vmul.f32 %v10051_v59, %v16304_v44  ;;  %v10635_v1 = vld [vmem:[%s15378_s3 + $0x3] ss:$0 sm:$0xff] }
 0x217   : > { %v3983_v61 = vadd.f32 %v3829_v19, %v3648_v33  ;;  %v4164_v2 = vsel %vm2603_vm4, %v16303_v32, %v4163_v48  ;;  %v2194_v36 = vmul.f32 %v10051_v59, %v16305_v58  ;;  %v4167_v19 = vsel %vm2603_vm4, %v4165_v55, %v15543_v49 }
 0x218   : > { %v2529_v63 = vmul.f32 %v10066_v12, %v16304_v44  ;;  %v2530_v6 = vmul.f32 %v10066_v12, %v16305_v58  ;;  %v4319_v33 = vadd.f32 %v4167_v19, %v3984_v62  ;;  %v2352_v48 = vrot.slane %v2193_v14, 1  ;;  %v16307_v44 = vld [vmem:[#allocation89_spill] sm:$0xff] }
 0x219   : > { %v4318_v42 = vadd.f32 %v4164_v2, %v3983_v61  ;;  %v2354_v9 = vrot.slane %v2194_v36, 1  ;;  %v2857_v32 = vmul.f32 %v10635_v1, %v16283_v35  ;;  %v2858_v49 = vmul.f32 %v10635_v1, %v16265_v17  ;;  %v10650_v36 = vld [vmem:[%s15378_s3 + $0x4] ss:$0 sm:$0xff] }
 0x21a   : > { %v2688_v61 = vrot.slane %v2529_v63, 2  ;;  %v2690_v2 = vrot.slane %v2530_v6, 2  ;;  %v4376_v15 = vadd.f32 %v10210_v20, %v4319_v33  ;;  %v2353_v62 = vsel %vm2267_vm3, %v2350_v53, %v2352_v48 }
 0x21b   : > { %v4375_v55 = vadd.f32 %v10210_v20, %v4318_v42  ;;  %v2355_v14 = vsel %vm2267_vm3, %v2352_v48, %v2354_v9  ;;  %v2970_v19 = vmul.f32 %v10650_v36, %v16265_v17  ;;  %v2466_v63 = vadd.f32 %v2353_v62, %v2080_v11 }
 0x21c   : > { %v2467_v6 = vadd.f32 %v2355_v14, %v2081_v10  ;;  %v16306_v58 = vrot.slane %v10433_v57, 2  ;;  %v4426_v24 = vmax.f32 %v4376_v15, 0.0  ;;  %v2691_v53 = vsel %vm2603_vm4, %v2688_v61, %v2690_v2 }
 0x21d   : > { %v4425_v42 = vmax.f32 %v4375_v55, 0.0  ;;  %v2971_v48 = vmul.f32 %v10650_v36, %v16307_v44  ;;  %v3128_v9 = vrot.slane %v2970_v19, 1  ;;  %v3305_v47 = vmul.f32 %v10117_v13, %v16265_v17 }
 0x21e   : > { %v2689_v33 = vsel %vm2603_vm4, %v16306_v58, %v2688_v61  ;;  %v2803_v37 = vadd.f32 %v2691_v53, %v2467_v6  ;;  %v3306_v11 = vmul.f32 %v10117_v13, %v16307_v44  ;;  %v16308_v57 = vrot.slane %v10457_v50, 1 }
 0x21f   : > { %v2802_v3 = vadd.f32 %v2689_v33, %v2466_v63  ;;  %v4473_v10 = vpack.c.bf16 %v4426_v24, %v4425_v42  ;;  %v3130_v15 = vrot.slane %v2971_v48, 1  ;;  %v3632_v55 = vmul.f32 %v10135_v29, %v16287_v41  ;;  %v16309_v63 = vld [vmem:[#allocation91_spill] sm:$0xff]  ;;  %v16310_v42 = vld [vmem:[#allocation92_spill] sm:$0xff] }
 0x220   : > { %v3129_v58 = vsel %vm2267_vm3, %v16308_v57, %v3128_v9  ;;  %v2908_v2 = vadd.f32 %v2858_v49, %v2803_v37  ;;  %v3463_v62 = vrot.slane %v3305_v47, 2  ;;  %v3465_v14 = vrot.slane %v3306_v11, 2 }
 0x221   : > { %v2907_v61 = vadd.f32 %v2857_v32, %v2802_v3  ;;  %7877 = vmatmul.mubr.msk.bf16.gmra.mxu0 %vm4551_vm5, %v4473_v10  ;;  %v3131_v19 = vsel %vm2267_vm3, %v3128_v9, %v3130_v15  ;;  %v3633_v6 = vmul.f32 %v10135_v29, %v16309_v63  ;;  %v3745_v50 = vmul.f32 %v10146_v7, %v16309_v63 }
 0x222   : > { %v3746_v33 = vmul.f32 %v10146_v7, %v16310_v42  ;;  %v3243_v53 = vadd.f32 %v3131_v19, %v2908_v2  ;;  %v16311_v3 = vrot.slane %v10468_v60, 2  ;;  %v3466_v37 = vsel %vm2603_vm4, %v3463_v62, %v3465_v14  ;;  %7880 = vmatprep.mubr.msk.bf16.mxu0 %vm8256_vm2, %v16161_v39 }
 0x223   : > { %v3242_v24 = vadd.f32 %v3129_v58, %v2907_v61  ;;  %v3903_v49 = vrot.slane %v3745_v50, 1  ;;  %v4080_v48 = vmul.f32 %v10166_v51, %v16309_v63  ;;  %v4081_v9 = vmul.f32 %v10166_v51, %v16310_v42 }
 0x224   : > { %v3464_v47 = vsel %vm2603_vm4, %v16311_v3, %v3463_v62  ;;  %v3905_v32 = vrot.slane %v3746_v33, 1  ;;  %v3578_v10 = vadd.f32 %v3466_v37, %v3243_v53  ;;  %v2048_v60 = vmul.f32 %v10035_v4, %v9884_v0 }
 0x225   : > { %v3577_v11 = vadd.f32 %v3464_v47, %v3242_v24  ;;  %v2049_v57 = vmul.f32 %v10035_v4, %v9888_v30  ;;  %v16312_v58 = vrot.slane %v10488_v27, 1  ;;  %v4238_v2 = vrot.slane %v4080_v48, 2 }
 0x226   : > { %v3906_v61 = vsel %vm2267_vm3, %v3903_v49, %v3905_v32  ;;  %v4240_v62 = vrot.slane %v4081_v9, 2  ;;  %v3683_v19 = vadd.f32 %v3633_v6, %v3578_v10  ;;  %v2155_v50 = vmul.f32 %v10051_v59, %v9888_v30 }
 0x227   : > { %v3904_v15 = vsel %vm2267_vm3, %v16312_v58, %v3903_v49  ;;  %v3682_v14 = vadd.f32 %v3632_v55, %v3577_v11  ;;  %v10699_v33 = vmul.f32 %v10051_v59, %v9893_v40  ;;  %v16313_v0 = vrot.slane %v10495_v45, 2 }
 0x228   : > { %v4241_v27 = vsel %vm2603_vm4, %v4238_v2, %v4240_v62  ;;  %v2491_v53 = vmul.f32 %v10066_v12, %v9888_v30  ;;  %v10709_v55 = vmul.f32 %v10066_v12, %v9893_v40  ;;  %v4018_v3 = vadd.f32 %v3906_v61, %v3683_v19 }
 0x229   : > { %v4239_v24 = vsel %vm2603_vm4, %v16313_v0, %v4238_v2  ;;  %v4017_v6 = vadd.f32 %v3904_v15, %v3682_v14  ;;  %v2282_v47 = vrot.slane %v2155_v50, 1  ;;  %v15562_v37 = vrot.slane %v10699_v33, 1 }
 0x22a   : > { %v2618_v49 = vrot.slane %v2491_v53, 2  ;;  %v15561_v32 = vrot.slane %v10709_v55, 2  ;;  %v2825_v45 = vmul.f32 %v10635_v1, %v16296_v56  ;;  %v2826_v48 = vmul.f32 %v10635_v1, %v9913_v26 }
 0x22b   : > { %v4352_v9 = vadd.f32 %v4239_v24, %v4017_v6  ;;  %v4353_v30 = vadd.f32 %v4241_v27, %v4018_v3  ;;  %v16314_v11 = vrot.slane %v10518_v52, 1  ;;  %v2285_v58 = vsel %vm2267_vm3, %v2282_v47, %v15562_v37 }
 0x22c   : > { %v2435_v61 = vadd.f32 %v2285_v58, %v2049_v57  ;;  %v16315_v2 = vrot.slane %v10533_v28, 2  ;;  %v2621_v14 = vsel %vm2603_vm4, %v2618_v49, %v15561_v32  ;;  %v2932_v50 = vmul.f32 %v10650_v36, %v9913_v26 }
 0x22d   : > { %v2283_v10 = vsel %vm2267_vm3, %v16314_v11, %v2282_v47  ;;  %v4409_v19 = vadd.f32 %v10210_v20, %v4352_v9  ;;  %v4410_v52 = vadd.f32 %v10210_v20, %v4353_v30  ;;  %v10735_v0 = vmul.f32 %v10650_v36, %v9917_v54 }
 0x22e   : > { %v2434_v15 = vadd.f32 %v2283_v10, %v2048_v60  ;;  %v2619_v62 = vsel %vm2603_vm4, %v16315_v2, %v2618_v49  ;;  %v2771_v57 = vadd.f32 %v2621_v14, %v2435_v61  ;;  %v3267_v28 = vmul.f32 %v10117_v13, %v9913_v26 }
 0x22f   : > { %v10741_v24 = vmul.f32 %v10117_v13, %v9917_v54  ;;  %v4459_v27 = vmax.f32 %v4409_v19, 0.0  ;;  %v4460_v53 = vmax.f32 %v4410_v52, 0.0  ;;  %v3058_v6 = vrot.slane %v2932_v50, 1  ;;  %v16319_v50 = vld [vmem:[#allocation119_spill] sm:$0xff] }
 0x230   : > { %v2770_v60 = vadd.f32 %v2619_v62, %v2434_v15  ;;  %v15558_v3 = vrot.slane %v10735_v0, 1  ;;  %v2876_v49 = vadd.f32 %v2826_v48, %v2771_v57  ;;  %v3393_v9 = vrot.slane %v3267_v28, 2 }
 0x231   : > { %v15555_v30 = vrot.slane %v10741_v24, 2  ;;  %v4490_v11 = vpack.c.bf16 %v4460_v53, %v4459_v27  ;;  %v16316_v10 = vrot.slane %v10559_v16, 1  ;;  %v3600_v61 = vmul.f32 %v10135_v29, %v16301_v38  ;;  %v16318_v16 = vld [vmem:[#allocation118_spill] sm:$0xff]  ;;  %v16320_v53 = vld [vmem:[#allocation61_spill] sm:$0xff] }
 0x232   : > { %v2875_v47 = vadd.f32 %v2825_v45, %v2770_v60  ;;  %v3061_v15 = vsel %vm2267_vm3, %v3058_v6, %v15558_v3  ;;  %v16317_v45 = vrot.slane %v10568_v31, 2  ;;  %v3601_v19 = vmul.f32 %v10135_v29, %v16318_v16 }
 0x233   : > { %v3059_v58 = vsel %vm2267_vm3, %v16316_v10, %v3058_v6  ;;  %v3211_v62 = vadd.f32 %v3061_v15, %v2876_v49  ;;  %v3396_v14 = vsel %vm2603_vm4, %v3393_v9, %v15555_v30  ;;  %7945 = vmatmul.mubr.msk.bf16.gmra.mxu1 %vm4551_vm5, %v4490_v11  ;;  %v3707_v52 = vmul.f32 %v10146_v7, %v16318_v16  ;;  %v16324_v30 = vld [vmem:[#allocation152_spill] sm:$0xff] }
 0x234   : > { %v3210_v2 = vadd.f32 %v3059_v58, %v2875_v47  ;;  %v3394_v48 = vsel %vm2603_vm4, %v16317_v45, %v3393_v9  ;;  %v10766_v60 = vmul.f32 %v10146_v7, %v16319_v50  ;;  %v4042_v31 = vmul.f32 %v10166_v51, %v16318_v16  ;;  %7948 = vmatprep.mubr.msk.bf16.mxu1 %vm8256_vm2, %v16161_v39 }
 0x235   : > { %v3546_v28 = vadd.f32 %v3396_v14, %v3211_v62  ;;  %v10772_v27 = vmul.f32 %v10166_v51, %v16319_v50  ;;  %v2082_v6 = vmul.f32 %v10035_v4, %v16320_v53  ;;  %v3833_v47 = vrot.slane %v3707_v52, 1 }
 0x236   : > { %v3545_v57 = vadd.f32 %v3394_v48, %v3210_v2  ;;  %v15552_v49 = vrot.slane %v10766_v60, 1  ;;  %v4168_v9 = vrot.slane %v4042_v31, 2  ;;  %v2083_v11 = vmul.f32 %v10035_v4, %v16260_v18 }
 0x237   : > { %v3651_v58 = vadd.f32 %v3601_v19, %v3546_v28  ;;  %v15551_v15 = vrot.slane %v10772_v27, 2  ;;  %v2195_v2 = vmul.f32 %v10051_v59, %v16320_v53  ;;  %v16321_v62 = vrot.slane %v10596_v34, 1 }
 0x238   : > { %v3650_v10 = vadd.f32 %v3600_v61, %v3545_v57  ;;  %v3836_v48 = vsel %vm2267_vm3, %v3833_v47, %v15552_v49  ;;  %v16322_v14 = vrot.slane %v10605_v21, 2  ;;  %v2196_v4 = vmul.f32 %v10051_v59, %v16260_v18 }
 0x239   : > { %v3834_v45 = vsel %vm2267_vm3, %v16321_v62, %v3833_v47  ;;  %v3986_v19 = vadd.f32 %v3836_v48, %v3651_v58  ;;  %v4171_v31 = vsel %vm2603_vm4, %v4168_v9, %v15551_v15  ;;  %v10800_v34 = vmul.f32 %v10051_v59, %v16280_v5 }
 0x23a   : > { %v4169_v52 = vsel %vm2603_vm4, %v16322_v14, %v4168_v9  ;;  %v3985_v61 = vadd.f32 %v3834_v45, %v3650_v10  ;;  %v2356_v57 = vrot.slane %v2195_v2, 1  ;;  %v2357_v28 = vrot.slane %v2196_v4, 1  ;;  %v16323_v2 = vld [vmem:[#allocation90_spill] sm:$0xff] }
 0x23b   : > { %v2531_v21 = vmul.f32 %v10066_v12, %v16320_v53  ;;  %v2532_v47 = vmul.f32 %v10066_v12, %v16260_v18  ;;  %v4321_v14 = vadd.f32 %v4171_v31, %v3986_v19  ;;  %v15554_v10 = vrot.slane %v10800_v34, 1 }
 0x23c   : > { %v4320_v62 = vadd.f32 %v4169_v52, %v3985_v61  ;;  %v10809_v58 = vmul.f32 %v10066_v12, %v16280_v5  ;;  %v2358_v9 = vsel %vm2267_vm3, %v2356_v57, %v2357_v28  ;;  %v2859_v48 = vmul.f32 %v10635_v1, %v16323_v2 }
 0x23d   : > { %v2692_v59 = vrot.slane %v2531_v21, 2  ;;  %v2693_v45 = vrot.slane %v2532_v47, 2  ;;  %v4378_v15 = vadd.f32 %v10210_v20, %v4321_v14  ;;  %v2360_v52 = vsel %vm2267_vm3, %v2357_v28, %v15554_v10 }
 0x23e   : > { %v4377_v4 = vadd.f32 %v10210_v20, %v4320_v62  ;;  %v2468_v61 = vadd.f32 %v2358_v9, %v2082_v6  ;;  %v2469_v19 = vadd.f32 %v2360_v52, %v2083_v11  ;;  %v15553_v31 = vrot.slane %v10809_v58, 2 }
 0x23f   : > { %v2694_v12 = vsel %vm2603_vm4, %v2692_v59, %v2693_v45  ;;  %v2860_v57 = vmul.f32 %v10635_v1, %v16269_v25  ;;  %v4428_v47 = vmax.f32 %v4378_v15, 0.0  ;;  %v2972_v62 = vmul.f32 %v10650_v36, %v16323_v2 }
 0x240   : > { %v4427_v21 = vmax.f32 %v4377_v4, 0.0  ;;  %v2804_v49 = vadd.f32 %v2694_v12, %v2468_v61  ;;  %v2696_v14 = vsel %vm2603_vm4, %v2693_v45, %v15553_v31  ;;  %v2973_v6 = vmul.f32 %v10650_v36, %v16269_v25 }
 0x241   : > { %v10832_v11 = vmul.f32 %v10650_v36, %v16285_v46  ;;  %v3307_v28 = vmul.f32 %v10117_v13, %v16323_v2  ;;  %v2805_v15 = vadd.f32 %v2696_v14, %v2469_v19  ;;  %v3132_v4 = vrot.slane %v2972_v62, 1  ;;  %v16325_v19 = vld [vmem:[#allocation35_spill] sm:$0xff] }
 0x242   : > { %v4474_v9 = vpack.c.bf16 %v4428_v47, %v4427_v21  ;;  %v2909_v59 = vadd.f32 %v2859_v48, %v2804_v49  ;;  %v3133_v52 = vrot.slane %v2973_v6, 1  ;;  %v3308_v45 = vmul.f32 %v10117_v13, %v16269_v25 }
 0x243   : > { %v15556_v61 = vrot.slane %v10832_v11, 1  ;;  %v10841_v12 = vmul.f32 %v10117_v13, %v16285_v46  ;;  %v2910_v31 = vadd.f32 %v2860_v57, %v2805_v15  ;;  %v3467_v10 = vrot.slane %v3307_v28, 2  ;;  %v16326_v15 = vld [vmem:[#allocation153_spill] sm:$0xff] }
 0x244   : > { %7881 = vmatmul.mubr.msk.bf16.gmra.mxu0 %vm4551_vm5, %v4474_v9  ;;  %v3634_v21 = vmul.f32 %v10135_v29, %v16324_v30  ;;  %v3635_v49 = vmul.f32 %v10135_v29, %v16325_v19  ;;  %v3134_v48 = vsel %vm2267_vm3, %v3132_v4, %v3133_v52  ;;  %v3468_v62 = vrot.slane %v3308_v45, 2 }
 0x245   : > { %v3136_v47 = vsel %vm2267_vm3, %v3133_v52, %v15556_v61  ;;  %v15557_v13 = vrot.slane %v10841_v12, 2  ;;  %7884 = vmatprep.mubr.msk.bf16.mxu0 %vm8256_vm2, %v16161_v39  ;;  %v3244_v57 = vadd.f32 %v3134_v48, %v2909_v59  ;;  %v3747_v6 = vmul.f32 %v10146_v7, %v16324_v30 }
 0x246   : > { %v3245_v14 = vadd.f32 %v3136_v47, %v2910_v31  ;;  %v3748_v29 = vmul.f32 %v10146_v7, %v16325_v19  ;;  %v3469_v28 = vsel %vm2603_vm4, %v3467_v10, %v3468_v62  ;;  %v10865_v4 = vmul.f32 %v10146_v7, %v16326_v15 }
 0x247   : > { %v3471_v9 = vsel %vm2603_vm4, %v3468_v62, %v15557_v13  ;;  %v4082_v59 = vmul.f32 %v10166_v51, %v16324_v30  ;;  %v3579_v31 = vadd.f32 %v3469_v28, %v3244_v57  ;;  %v3907_v45 = vrot.slane %v3747_v6, 1  ;;  %v10880_v57 = vld [vmem:[%s15378_s3] ss:$0 sm:$0xff] }
 0x248   : > { %v3580_v52 = vadd.f32 %v3471_v9, %v3245_v14  ;;  %v3908_v48 = vrot.slane %v3748_v29, 1  ;;  %v15559_v47 = vrot.slane %v10865_v4, 1  ;;  %v4083_v10 = vmul.f32 %v10166_v51, %v16325_v19  ;;  %v10893_v9 = vld [vmem:[%s15378_s3 + $0x1] ss:$0 sm:$0xff] }
 0x249   : > { %v10874_v61 = vmul.f32 %v10166_v51, %v16326_v15  ;;  %v4242_v62 = vrot.slane %v4082_v59, 2  ;;  %v3684_v13 = vadd.f32 %v3634_v21, %v3579_v31  ;;  %v2050_v14 = vmul.f32 %v10880_v57, %v9893_v40 }
 0x24a   : > { %v3685_v7 = vadd.f32 %v3635_v49, %v3580_v52  ;;  %v3909_v3 = vsel %vm2267_vm3, %v3907_v45, %v3908_v48  ;;  %v3911_v6 = vsel %vm2267_vm3, %v3908_v48, %v15559_v47  ;;  %v4243_v29 = vrot.slane %v4083_v10, 2 }
 0x24b   : > { %v15560_v51 = vrot.slane %v10874_v61, 2  ;;  %v2051_v21 = vmul.f32 %v10880_v57, %v9897_v8  ;;  %v4019_v49 = vadd.f32 %v3909_v3, %v3684_v13  ;;  %v2157_v40 = vmul.f32 %v10893_v9, %v9897_v8  ;;  %v10906_v3 = vld [vmem:[%s15378_s3 + $0x2] ss:$0 sm:$0xff] }
 0x24c   : > { %v4020_v28 = vadd.f32 %v3911_v6, %v3685_v7  ;;  %v2158_v59 = vmul.f32 %v10893_v9, %v16295_v43  ;;  %v4244_v31 = vsel %vm2603_vm4, %v4242_v62, %v4243_v29  ;;  %v2493_v13 = vmul.f32 %v10906_v3, %v9897_v8 }
 0x24d   : > { %v4246_v52 = vsel %vm2603_vm4, %v4243_v29, %v15560_v51  ;;  %v2494_v45 = vmul.f32 %v10906_v3, %v16295_v43  ;;  %v4354_v48 = vadd.f32 %v4244_v31, %v4019_v49  ;;  %v2286_v7 = vrot.slane %v2157_v40, 1 }
 0x24e   : > { %v4355_v10 = vadd.f32 %v4246_v52, %v4020_v28  ;;  %v2288_v6 = vrot.slane %v2158_v59, 1  ;;  %v2622_v62 = vrot.slane %v2493_v13, 2  ;;  %v2827_v29 = vmul.f32 %v10635_v1, %v9917_v54 }
 0x24f   : > { %v2624_v47 = vrot.slane %v2494_v45, 2  ;;  %v2828_v51 = vmul.f32 %v10635_v1, %v9921_v23  ;;  %v4411_v32 = vadd.f32 %v10210_v20, %v4354_v48  ;;  %v16327_v8 = vrot.slane %v10699_v33, 1 }
 0x250   : > { %v4412_v37 = vadd.f32 %v10210_v20, %v4355_v10  ;;  %v2289_v49 = vsel %vm2267_vm3, %v2286_v7, %v2288_v6  ;;  %v16328_v59 = vrot.slane %v10709_v55, 2  ;;  %v2934_v48 = vmul.f32 %v10650_v36, %v9921_v23 }
 0x251   : > { %v2287_v43 = vsel %vm2267_vm3, %v16327_v8, %v2286_v7  ;;  %v2437_v40 = vadd.f32 %v2289_v49, %v2051_v21  ;;  %v2625_v52 = vsel %vm2603_vm4, %v2622_v62, %v2624_v47  ;;  %v4461_v13 = vmax.f32 %v4411_v32, 0.0  ;;  %v10942_v7 = vld [vmem:[%s15378_s3 + $0x6] ss:$0 sm:$0xff] }
 0x252   : > { %v2436_v28 = vadd.f32 %v2287_v43, %v2050_v14  ;;  %v2623_v31 = vsel %vm2603_vm4, %v16328_v59, %v2622_v62  ;;  %v4462_v45 = vmax.f32 %v4412_v37, 0.0  ;;  %v2935_v20 = vmul.f32 %v10650_v36, %v16300_v22  ;;  %v10933_v14 = vld [vmem:[%s15378_s3 + $0x5] ss:$0 sm:$0xff] }
 0x253   : > { %v2773_v10 = vadd.f32 %v2625_v52, %v2437_v40  ;;  %v3269_v55 = vmul.f32 %v10933_v14, %v9921_v23  ;;  %v3270_v32 = vmul.f32 %v10933_v14, %v16300_v22  ;;  %v3062_v47 = vrot.slane %v2934_v48, 1 }
 0x254   : > { %v2772_v33 = vadd.f32 %v2623_v31, %v2436_v28  ;;  %v4491_v37 = vpack.c.bf16 %v4462_v45, %v4461_v13  ;;  %v3064_v21 = vrot.slane %v2935_v20, 1  ;;  %v3602_v6 = vmul.f32 %v10942_v7, %v16319_v50  ;;  %v16330_v31 = vld [vmem:[#allocation120_spill] sm:$0xff] }
 0x255   : > { %v2878_v8 = vadd.f32 %v2828_v51, %v2773_v10  ;;  %v3397_v43 = vrot.slane %v3269_v55, 2  ;;  %v3399_v49 = vrot.slane %v3270_v32, 2  ;;  %v16329_v28 = vrot.slane %v10735_v0, 1  ;;  %v10956_v13 = vld [vmem:[%s15378_s3 + $0x7] ss:$0 sm:$0xff] }
 0x256   : > { %v2877_v62 = vadd.f32 %v2827_v29, %v2772_v33  ;;  %7949 = vmatmul.mubr.msk.bf16.gmra.mxu1 %vm4551_vm5, %v4491_v37  ;;  %v3065_v59 = vsel %vm2267_vm3, %v3062_v47, %v3064_v21  ;;  %v3603_v52 = vmul.f32 %v10942_v7, %v16330_v31  ;;  %v3709_v51 = vmul.f32 %v10956_v13, %v16330_v31  ;;  %v16332_v33 = vld [vmem:[#allocation121_spill] sm:$0xff] }
 0x257   : > { %v3063_v40 = vsel %vm2267_vm3, %v16329_v28, %v3062_v47  ;;  %v3213_v45 = vadd.f32 %v3065_v59, %v2878_v8  ;;  %v16331_v48 = vrot.slane %v10741_v24, 2  ;;  %v3400_v20 = vsel %vm2603_vm4, %v3397_v43, %v3399_v49  ;;  %7952 = vmatprep.mubr.msk.bf16.mxu1 %vm8256_vm2, %v16161_v39  ;;  %v10971_v32 = vld [vmem:[%s15378_s3 + $0x8] ss:$0 sm:$0xff] }
 0x258   : > { %v3212_v29 = vadd.f32 %v3063_v40, %v2877_v62  ;;  %v3710_v10 = vmul.f32 %v10956_v13, %v16332_v33  ;;  %v3837_v55 = vrot.slane %v3709_v51, 1  ;;  %v4044_v37 = vmul.f32 %v10971_v32, %v16330_v31 }
 0x259   : > { %v3398_v0 = vsel %vm2603_vm4, %v16331_v48, %v3397_v43  ;;  %v4045_v24 = vmul.f32 %v10971_v32, %v16332_v33  ;;  %v3548_v21 = vadd.f32 %v3400_v20, %v3213_v45  ;;  %v2084_v62 = vmul.f32 %v10880_v57, %v16280_v5 }
 0x25a   : > { %v3547_v47 = vadd.f32 %v3398_v0, %v3212_v29  ;;  %v2085_v8 = vmul.f32 %v10880_v57, %v16283_v35  ;;  %v16333_v43 = vrot.slane %v10766_v60, 1  ;;  %v3839_v28 = vrot.slane %v3710_v10, 1 }
 0x25b   : > { %v4172_v40 = vrot.slane %v4044_v37, 2  ;;  %v4174_v59 = vrot.slane %v4045_v24, 2  ;;  %v3653_v48 = vadd.f32 %v3603_v52, %v3548_v21  ;;  %v2198_v18 = vmul.f32 %v10893_v9, %v16283_v35 }
 0x25c   : > { %v3838_v49 = vsel %vm2267_vm3, %v16333_v43, %v3837_v55  ;;  %v3652_v51 = vadd.f32 %v3602_v6, %v3547_v47  ;;  %v10988_v29 = vmul.f32 %v10893_v9, %v16265_v17  ;;  %v3840_v45 = vsel %vm2267_vm3, %v3837_v55, %v3839_v28 }
 0x25d   : > { %v16334_v0 = vrot.slane %v10772_v27, 2  ;;  %v4175_v20 = vsel %vm2603_vm4, %v4172_v40, %v4174_v59  ;;  %v2534_v10 = vmul.f32 %v10906_v3, %v16283_v35  ;;  %v3988_v52 = vadd.f32 %v3840_v45, %v3653_v48 }
 0x25e   : > { %v3987_v6 = vadd.f32 %v3838_v49, %v3652_v51  ;;  %v2361_v37 = vrot.slane %v2198_v18, 1  ;;  %v15564_v24 = vrot.slane %v10988_v29, 1  ;;  %v11000_v47 = vmul.f32 %v10906_v3, %v16265_v17 }
 0x25f   : > { %v4173_v60 = vsel %vm2603_vm4, %v16334_v0, %v4172_v40  ;;  %v2697_v21 = vrot.slane %v2534_v10, 2  ;;  %v2861_v27 = vmul.f32 %v10635_v1, %v16285_v46  ;;  %v2862_v55 = vmul.f32 %v10635_v1, %v16287_v41 }
 0x260   : > { %v4322_v43 = vadd.f32 %v4173_v60, %v3987_v6  ;;  %v4323_v28 = vadd.f32 %v4175_v20, %v3988_v52  ;;  %v16335_v40 = vrot.slane %v10800_v34, 1  ;;  %v2364_v18 = vsel %vm2267_vm3, %v2361_v37, %v15564_v24  ;;  %v11019_v60 = vld [vmem:[%s15379_s4] ss:$0 sm:$0xff] }
 0x261   : > { %v2471_v51 = vadd.f32 %v2364_v18, %v2085_v8  ;;  %v16336_v48 = vrot.slane %v10809_v58, 2  ;;  %v15566_v0 = vrot.slane %v11000_v47, 2  ;;  %v2975_v10 = vmul.f32 %v10650_v36, %v16287_v41 }
 0x262   : > { %v2362_v49 = vsel %vm2267_vm3, %v16335_v40, %v2361_v37  ;;  %v4379_v34 = vadd.f32 %v11019_v60, %v4322_v43  ;;  %v4380_v20 = vadd.f32 %v11019_v60, %v4323_v28  ;;  %v3310_v6 = vmul.f32 %v10933_v14, %v16287_v41 }
 0x263   : > { %v2470_v59 = vadd.f32 %v2362_v49, %v2084_v62  ;;  %v2698_v45 = vsel %vm2603_vm4, %v16336_v48, %v2697_v21  ;;  %v11027_v62 = vmul.f32 %v10650_v36, %v16309_v63  ;;  %v2700_v58 = vsel %vm2603_vm4, %v2697_v21, %v15566_v0 }
 0x264   : > { %v11036_v52 = vmul.f32 %v10933_v14, %v16309_v63  ;;  %v4429_v37 = vmax.f32 %v4379_v34, 0.0  ;;  %v4430_v43 = vmax.f32 %v4380_v20, 0.0  ;;  %v2807_v28 = vadd.f32 %v2700_v58, %v2471_v51 }
 0x265   : > { %v2806_v8 = vadd.f32 %v2698_v45, %v2470_v59  ;;  %v3137_v40 = vrot.slane %v2975_v10, 1  ;;  %v15568_v18 = vrot.slane %v11027_v62, 1  ;;  %v3472_v48 = vrot.slane %v3310_v6, 2  ;;  %v16339_v10 = vld [vmem:[#allocation36_spill] sm:$0xff]  ;;  %v16340_v6 = vld [vmem:[#allocation38_spill] sm:$0xff] }
 0x266   : > { %v15567_v24 = vrot.slane %v11036_v52, 2  ;;  %v4475_v35 = vpack.c.bf16 %v4430_v43, %v4429_v37  ;;  %v2912_v21 = vadd.f32 %v2862_v55, %v2807_v28  ;;  %v16337_v59 = vrot.slane %v10832_v11, 1 }
 0x267   : > { %v2911_v49 = vadd.f32 %v2861_v27, %v2806_v8  ;;  %v3636_v0 = vmul.f32 %v10942_v7, %v16326_v15  ;;  %v3140_v51 = vsel %vm2267_vm3, %v3137_v40, %v15568_v18  ;;  %v16338_v27 = vrot.slane %v10841_v12, 2  ;;  %v16350_v15 = vld [vmem:[#allocation147_spill] sm:$0xff] }
 0x268   : > { %v3138_v45 = vsel %vm2267_vm3, %v16337_v59, %v3137_v40  ;;  %v3475_v55 = vsel %vm2603_vm4, %v3472_v48, %v15567_v24  ;;  %7885 = vmatmul.mubr.msk.bf16.gmra.mxu0 %vm4551_vm5, %v4475_v35  ;;  %v3247_v11 = vadd.f32 %v3140_v51, %v2912_v21  ;;  %v3637_v58 = vmul.f32 %v10942_v7, %v16339_v10  ;;  %v16341_v35 = vld [vmem:[#allocation113_spill] sm:$0xff] }
 0x269   : > { %v3246_v34 = vadd.f32 %v3138_v45, %v2911_v49  ;;  %v3473_v20 = vsel %vm2603_vm4, %v16338_v27, %v3472_v48  ;;  %v3750_v8 = vmul.f32 %v10956_v13, %v16339_v10  ;;  %v11061_v37 = vmul.f32 %v10956_v13, %v16340_v6  ;;  %7888 = vmatprep.mubr.msk.bf16.mxu0 %vm8256_vm2, %v16161_v39 }
 0x26a   : > { %v4085_v43 = vmul.f32 %v10971_v32, %v16339_v10  ;;  %v11067_v28 = vmul.f32 %v10971_v32, %v16340_v6  ;;  %v2052_v40 = vmul.f32 %v10880_v57, %v16341_v35  ;;  %v3582_v49 = vadd.f32 %v3475_v55, %v3247_v11  ;;  %v16349_v10 = vld [vmem:[#allocation27_spill] sm:$0xff] }
 0x26b   : > { %v3581_v12 = vadd.f32 %v3473_v20, %v3246_v34  ;;  %v3912_v48 = vrot.slane %v3750_v8, 1  ;;  %v15569_v21 = vrot.slane %v11061_v37, 1  ;;  %v2053_v59 = vmul.f32 %v10880_v57, %v16296_v56 }
 0x26c   : > { %v4247_v51 = vrot.slane %v4085_v43, 2  ;;  %v15570_v34 = vrot.slane %v11067_v28, 2  ;;  %v2159_v27 = vmul.f32 %v10893_v9, %v16341_v35  ;;  %v3687_v20 = vadd.f32 %v3637_v58, %v3582_v49 }
 0x26d   : > { %v3686_v45 = vadd.f32 %v3636_v0, %v3581_v12  ;;  %v16342_v24 = vrot.slane %v10865_v4, 1  ;;  %v3915_v55 = vsel %vm2267_vm3, %v3912_v48, %v15569_v21  ;;  %v2160_v11 = vmul.f32 %v10893_v9, %v16296_v56 }
 0x26e   : > { %v16343_v0 = vrot.slane %v10874_v61, 2  ;;  %v4250_v58 = vsel %vm2603_vm4, %v4247_v51, %v15570_v34  ;;  %v11095_v4 = vmul.f32 %v10893_v9, %v9913_v26  ;;  %v2290_v43 = vrot.slane %v2159_v27, 1 }
 0x26f   : > { %v3913_v18 = vsel %vm2267_vm3, %v16342_v24, %v3912_v48  ;;  %v4022_v24 = vadd.f32 %v3915_v55, %v3687_v20  ;;  %v2291_v49 = vrot.slane %v2160_v11, 1  ;;  %v2495_v48 = vmul.f32 %v10906_v3, %v16341_v35  ;;  %v16344_v20 = vld [vmem:[#allocation116_spill] sm:$0xff] }
 0x270   : > { %v4021_v8 = vadd.f32 %v3913_v18, %v3686_v45  ;;  %v4248_v12 = vsel %vm2603_vm4, %v16343_v0, %v4247_v51  ;;  %v15572_v18 = vrot.slane %v11095_v4, 1  ;;  %v2496_v61 = vmul.f32 %v10906_v3, %v16296_v56 }
 0x271   : > { %v11104_v45 = vmul.f32 %v10906_v3, %v9913_v26  ;;  %v4357_v51 = vadd.f32 %v4250_v58, %v4022_v24  ;;  %v2292_v0 = vsel %vm2267_vm3, %v2290_v43, %v2291_v49  ;;  %v2626_v34 = vrot.slane %v2495_v48, 2 }
 0x272   : > { %v4356_v21 = vadd.f32 %v4248_v12, %v4021_v8  ;;  %v2829_v27 = vmul.f32 %v10635_v1, %v16344_v20  ;;  %v2294_v35 = vsel %vm2267_vm3, %v2291_v49, %v15572_v18  ;;  %v2438_v11 = vadd.f32 %v2292_v0, %v2052_v40 }
 0x273   : > { %v2627_v8 = vrot.slane %v2496_v61, 2  ;;  %v4414_v56 = vadd.f32 %v11019_v60, %v4357_v51  ;;  %v2439_v12 = vadd.f32 %v2294_v35, %v2053_v59  ;;  %v15576_v5 = vrot.slane %v11104_v45, 2 }
 0x274   : > { %v4413_v55 = vadd.f32 %v11019_v60, %v4356_v21  ;;  %v2830_v58 = vmul.f32 %v10635_v1, %v16301_v38  ;;  %v2936_v21 = vmul.f32 %v10650_v36, %v16344_v20  ;;  %v2937_v48 = vmul.f32 %v10650_v36, %v16301_v38 }
 0x275   : > { %v2628_v43 = vsel %vm2603_vm4, %v2626_v34, %v2627_v8  ;;  %v4464_v49 = vmax.f32 %v4414_v56, 0.0  ;;  %v2630_v40 = vsel %vm2603_vm4, %v2627_v8, %v15576_v5  ;;  %v11127_v61 = vmul.f32 %v10650_v36, %v16318_v16 }
 0x276   : > { %v4463_v24 = vmax.f32 %v4413_v55, 0.0  ;;  %v2774_v59 = vadd.f32 %v2628_v43, %v2438_v11  ;;  %v2775_v51 = vadd.f32 %v2630_v40, %v2439_v12  ;;  %v3066_v0 = vrot.slane %v2936_v21, 1  ;;  %v16345_v21 = vld [vmem:[#allocation51_spill] sm:$0xff]  ;;  %v16346_v40 = vld [vmem:[#allocation122_spill] sm:$0xff] }
 0x277   : > { %v3067_v55 = vrot.slane %v2937_v48, 1  ;;  %v3271_v34 = vmul.f32 %v10933_v14, %v16344_v20  ;;  %v15575_v53 = vrot.slane %v11127_v61, 1  ;;  %v3272_v56 = vmul.f32 %v10933_v14, %v16301_v38 }
 0x278   : > { %v4492_v35 = vpack.c.bf16 %v4464_v49, %v4463_v24  ;;  %v2879_v18 = vadd.f32 %v2829_v27, %v2774_v59  ;;  %v2880_v33 = vadd.f32 %v2830_v58, %v2775_v51  ;;  %v11137_v8 = vmul.f32 %v10933_v14, %v16318_v16 }
 0x279   : > { %v3068_v11 = vsel %vm2267_vm3, %v3066_v0, %v3067_v55  ;;  %v3401_v12 = vrot.slane %v3271_v34, 2  ;;  %v3070_v24 = vsel %vm2267_vm3, %v3067_v55, %v15575_v53  ;;  %v3402_v43 = vrot.slane %v3272_v56, 2  ;;  %v16347_v55 = vld [vmem:[#allocation52_spill] sm:$0xff] }
 0x27a   : > { %7953 = vmatmul.mubr.msk.bf16.gmra.mxu1 %vm4551_vm5, %v4492_v35  ;;  %v3214_v27 = vadd.f32 %v3068_v11, %v2879_v18  ;;  %v3604_v48 = vmul.f32 %v10942_v7, %v16345_v21  ;;  %v3215_v49 = vadd.f32 %v3070_v24, %v2880_v33  ;;  %v15584_v58 = vrot.slane %v11137_v8, 2 }
 0x27b   : > { %v3605_v59 = vmul.f32 %v10942_v7, %v16346_v40  ;;  %v3711_v51 = vmul.f32 %v10956_v13, %v16345_v21  ;;  %7956 = vmatprep.mubr.msk.bf16.mxu1 %vm8256_vm2, %v16161_v39  ;;  %v3403_v0 = vsel %vm2603_vm4, %v3401_v12, %v3402_v43  ;;  %v3712_v18 = vmul.f32 %v10956_v13, %v16346_v40 }
 0x27c   : > { %v11157_v34 = vmul.f32 %v10956_v13, %v16347_v55  ;;  %v4046_v33 = vmul.f32 %v10971_v32, %v16345_v21  ;;  %v3405_v35 = vsel %vm2603_vm4, %v3402_v43, %v15584_v58  ;;  %v3549_v56 = vadd.f32 %v3403_v0, %v3214_v27  ;;  %v16352_v58 = vld [vmem:[#allocation148_spill] sm:$0xff] }
 0x27d   : > { %v3841_v11 = vrot.slane %v3711_v51, 1  ;;  %v4047_v24 = vmul.f32 %v10971_v32, %v16346_v40  ;;  %v3550_v12 = vadd.f32 %v3405_v35, %v3215_v49  ;;  %v3842_v53 = vrot.slane %v3712_v18, 1  ;;  %v16351_v35 = vld [vmem:[#allocation28_spill] sm:$0xff] }
 0x27e   : > { %v15586_v5 = vrot.slane %v11157_v34, 1  ;;  %v11169_v38 = vmul.f32 %v10971_v32, %v16347_v55  ;;  %v3654_v22 = vadd.f32 %v3604_v48, %v3549_v56  ;;  %v4176_v20 = vrot.slane %v4046_v33, 2  ;;  %v16353_v33 = vld [vmem:[#allocation14_spill] sm:$0xff] }
 0x27f   : > { %v4177_v21 = vrot.slane %v4047_v24, 2  ;;  %v1243_v41 = vadd.f32 %v16350_v15, %v16349_v10  ;;  %v3655_v43 = vadd.f32 %v3605_v59, %v3550_v12  ;;  %v3843_v27 = vsel %vm2267_vm3, %v3841_v11, %v3842_v53  ;;  %v16354_v56 = vld [vmem:[#allocation34_spill] sm:$0xff]  ;;  %v16355_v10 = vld [vmem:[#allocation17_spill] sm:$0xff] }
 0x280   : > { %16348 = vst [vmem:[#allocation69_spill] sm:$0xff] %v11169_v38  ;;  %v3845_v49 = vsel %vm2267_vm3, %v3842_v53, %v15586_v5  ;;  %v15589_v51 = vrot.slane %v11169_v38, 2  ;;  %v3989_v0 = vadd.f32 %v3843_v27, %v3654_v22  ;;  %v1244_v48 = vadd.f32 %v16352_v58, %v16351_v35  ;;  %v16356_v53 = vld [vmem:[#allocation164_spill] sm:$0xff]  ;;  %v16357_v11 = vld [vmem:[#allocation50_spill] sm:$0xff] }
 0x281   : > { %v4178_v18 = vsel %vm2603_vm4, %v4176_v20, %v4177_v21  ;;  %v1565_v24 = vmul.f32 %v16354_v56, %v16353_v33  ;;  %v3990_v40 = vadd.f32 %v3845_v49, %v3655_v43  ;;  %v1566_v59 = vmul.f32 %v16354_v56, %v16355_v10  ;;  %v16358_v20 = vld [vmem:[#allocation18_spill] sm:$0xff]  ;;  %v16359_v5 = vld [vmem:[#allocation84_spill] sm:$0xff] }
 0x282   : > { %v4180_v15 = vsel %vm2603_vm4, %v4177_v21, %v15589_v51  ;;  %v1636_v12 = vadd.f32 %v16357_v11, %v16356_v53  ;;  %v4324_v22 = vadd.f32 %v4178_v18, %v3989_v0  ;;  %v1959_v46 = vmul.f32 %v16359_v5, %v16358_v20  ;;  %v16360_v58 = vld [vmem:[#allocation16_spill] sm:$0xff] }
 0x283   : > { %v1637_v27 = vadd.f32 %v1565_v24, %v1243_v41  ;;  %v1960_v35 = vmul.f32 %v16359_v5, %v16360_v58  ;;  %v4325_v33 = vadd.f32 %v4180_v15, %v3990_v40  ;;  %v1638_v43 = vadd.f32 %v1566_v59, %v1244_v48  ;;  %v16361_v49 = vld [vmem:[#allocation60_spill] sm:$0xff] }
 0x284   : > { %v11195_v38 = vadd.f32 %v16361_v49, %v1636_v12  ;;  %v2086_v21 = vmul.f32 %v10880_v57, %v16265_v17  ;;  %v4381_v10 = vadd.f32 %v11019_v60, %v4324_v22  ;;  %v2087_v41 = vmul.f32 %v10880_v57, %v16323_v2 }
 0x285   : > { %v2031_v51 = vadd.f32 %v1959_v46, %v1637_v27  ;;  %v2200_v0 = vmul.f32 %v10893_v9, %v16307_v44  ;;  %v4382_v18 = vadd.f32 %v11019_v60, %v4325_v33  ;;  %v11205_v24 = vadd.f32 %v1960_v35, %v1638_v43 }
 0x286   : > { %v2201_v40 = vmul.f32 %v10893_v9, %v16323_v2  ;;  %v11211_v48 = vmul.f32 %v10893_v9, %v16269_v25  ;;  %v4431_v17 = vmax.f32 %v4381_v10, 0.0  ;;  %v2536_v46 = vmul.f32 %v10906_v3, %v16307_v44 }
 0x287   : > { %v2365_v15 = vrot.slane %v2200_v0, 1  ;;  %v2537_v59 = vmul.f32 %v10906_v3, %v16323_v2  ;;  %v4432_v53 = vmax.f32 %v4382_v18, 0.0  ;;  %v11220_v22 = vmul.f32 %v10906_v3, %v16269_v25 }
 0x288   : > { %v2367_v11 = vrot.slane %v2201_v40, 1  ;;  %v2368_v12 = vrot.slane %v11211_v48, 1  ;;  %v16362_v27 = vrot.slane %v10988_v29, 1  ;;  %v2701_v58 = vrot.slane %v2536_v46, 2 }
 0x289   : > { %v2703_v35 = vrot.slane %v2537_v59, 2  ;;  %v2863_v44 = vmul.f32 %v10635_v1, %v16309_v63  ;;  %v4476_v33 = vpack.c.bf16 %v4432_v53, %v4431_v17  ;;  %v2704_v49 = vrot.slane %v11220_v22, 2 }
 0x28a   : > { %v2366_v20 = vsel %vm2267_vm3, %v16362_v27, %v2365_v15  ;;  %v2369_v2 = vsel %vm2267_vm3, %v2367_v11, %v2368_v12  ;;  %v16363_v0 = vrot.slane %v11000_v47, 2  ;;  %v2864_v18 = vmul.f32 %v10635_v1, %v16324_v30 }
 0x28b   : > { %v2472_v43 = vadd.f32 %v2366_v20, %v2086_v21  ;;  %v2473_v10 = vadd.f32 %v2369_v2, %v2087_v41  ;;  %v2977_v40 = vmul.f32 %v10650_v36, %v16310_v42  ;;  %7889 = vmatmul.mubr.msk.bf16.gmra.mxu0 %vm4551_vm5, %v4476_v33  ;;  %v2705_v17 = vsel %vm2603_vm4, %v2703_v35, %v2704_v49 }
 0x28c   : > { %v2702_v29 = vsel %vm2603_vm4, %v16363_v0, %v2701_v58  ;;  %v2978_v41 = vmul.f32 %v10650_v36, %v16324_v30  ;;  %v11246_v47 = vmul.f32 %v10650_v36, %v16325_v19  ;;  %v3312_v59 = vmul.f32 %v10933_v14, %v16310_v42  ;;  %7892 = vmatprep.mubr.msk.bf16.mxu0 %vm8256_vm2, %v16161_v39 }
 0x28d   : > { %v2808_v21 = vadd.f32 %v2702_v29, %v2472_v43  ;;  %v2809_v15 = vadd.f32 %v2705_v17, %v2473_v10  ;;  %v3141_v46 = vrot.slane %v2977_v40, 1  ;;  %v3313_v53 = vmul.f32 %v10933_v14, %v16324_v30 }
 0x28e   : > { %v3143_v27 = vrot.slane %v2978_v41, 1  ;;  %v15598_v20 = vrot.slane %v11246_v47, 1  ;;  %v11257_v58 = vmul.f32 %v10933_v14, %v16325_v19  ;;  %v16364_v33 = vrot.slane %v11027_v62, 1 }
 0x28f   : > { %v2913_v11 = vadd.f32 %v2863_v44, %v2808_v21  ;;  %v2914_v35 = vadd.f32 %v2864_v18, %v2809_v15  ;;  %v3476_v43 = vrot.slane %v3312_v59, 2  ;;  %v3478_v10 = vrot.slane %v3313_v53, 2 }
 0x290   : > { %v3142_v2 = vsel %vm2267_vm3, %v16364_v33, %v3141_v46  ;;  %v3145_v30 = vsel %vm2267_vm3, %v3143_v27, %v15598_v20  ;;  %v15596_v44 = vrot.slane %v11257_v58, 2  ;;  %v3638_v29 = vmul.f32 %v10942_v7, %v16340_v6 }
 0x291   : > { %v3248_v0 = vadd.f32 %v3142_v2, %v2913_v11  ;;  %v3249_v40 = vadd.f32 %v3145_v30, %v2914_v35  ;;  %v16365_v17 = vrot.slane %v11036_v52, 2  ;;  %v3639_v62 = vmul.f32 %v10942_v7, %v2031_v51 }
 0x292   : > { %v3752_v21 = vmul.f32 %v10956_v13, %v11195_v38  ;;  %v3480_v41 = vsel %vm2603_vm4, %v3478_v10, %v15596_v44  ;;  %v3753_v46 = vmul.f32 %v10956_v13, %v2031_v51  ;;  %v11280_v59 = vmul.f32 %v10956_v13, %v11205_v24 }
 0x293   : > { %v3477_v18 = vsel %vm2603_vm4, %v16365_v17, %v3476_v43  ;;  %v3584_v53 = vadd.f32 %v3480_v41, %v3249_v40  ;;  %v4087_v11 = vmul.f32 %v10971_v32, %v11195_v38  ;;  %v4088_v27 = vmul.f32 %v10971_v32, %v2031_v51 }
 0x294   : > { %v3583_v15 = vadd.f32 %v3477_v18, %v3248_v0  ;;  %v3916_v52 = vrot.slane %v3752_v21, 1  ;;  %v3918_v33 = vrot.slane %v3753_v46, 1  ;;  %v15595_v2 = vrot.slane %v11280_v59, 1 }
 0x295   : > { %v11288_v43 = vmul.f32 %v10971_v32, %v11205_v24  ;;  %v3689_v10 = vadd.f32 %v3639_v62, %v3584_v53  ;;  %v16366_v30 = vrot.slane %v11061_v37, 1  ;;  %v4251_v40 = vrot.slane %v4087_v11, 2 }
 0x296   : > { %v3688_v35 = vadd.f32 %v3638_v29, %v3583_v15  ;;  %v4253_v17 = vrot.slane %v4088_v27, 2  ;;  %v3920_v18 = vsel %vm2267_vm3, %v3918_v33, %v15595_v2  ;;  %v2054_v21 = vmul.f32 %v10880_v57, %v9913_v26 }
 0x297   : > { %v3917_v0 = vsel %vm2267_vm3, %v16366_v30, %v3916_v52  ;;  %v15594_v29 = vrot.slane %v11288_v43, 2  ;;  %v4024_v41 = vadd.f32 %v3920_v18, %v3689_v10  ;;  %v16367_v15 = vrot.slane %v11067_v28, 2 }
 0x298   : > { %v4023_v51 = vadd.f32 %v3917_v0, %v3688_v35  ;;  %v2055_v37 = vmul.f32 %v10880_v57, %v9917_v54  ;;  %v2162_v46 = vmul.f32 %v10893_v9, %v9917_v54  ;;  %v11311_v11 = vmul.f32 %v10893_v9, %v9921_v23 }
 0x299   : > { %v4252_v62 = vsel %vm2603_vm4, %v16367_v15, %v4251_v40  ;;  %v4255_v53 = vsel %vm2603_vm4, %v4253_v17, %v15594_v29  ;;  %v2498_v26 = vmul.f32 %v10906_v3, %v9917_v54  ;;  %v11317_v35 = vmul.f32 %v10906_v3, %v9921_v23 }
 0x29a   : > { %v4358_v52 = vadd.f32 %v4252_v62, %v4023_v51  ;;  %v4359_v28 = vadd.f32 %v4255_v53, %v4024_v41  ;;  %v2295_v27 = vrot.slane %v2162_v46, 1  ;;  %v2831_v33 = vmul.f32 %v10635_v1, %v16318_v16 }
 0x29b   : > { %v15593_v30 = vrot.slane %v11311_v11, 1  ;;  %v2631_v0 = vrot.slane %v2498_v26, 2  ;;  %v2832_v40 = vmul.f32 %v10635_v1, %v16319_v50  ;;  %v16368_v54 = vrot.slane %v11095_v4, 1 }
 0x29c   : > { %v4415_v10 = vadd.f32 %v11019_v60, %v4358_v52  ;;  %v4416_v17 = vadd.f32 %v11019_v60, %v4359_v28  ;;  %v15592_v51 = vrot.slane %v11317_v35, 2  ;;  %v2939_v41 = vmul.f32 %v10650_v36, %v16319_v50 }
 0x29d   : > { %v2296_v18 = vsel %vm2267_vm3, %v16368_v54, %v2295_v27  ;;  %v2298_v62 = vsel %vm2267_vm3, %v2295_v27, %v15593_v30  ;;  %v16369_v53 = vrot.slane %v11104_v45, 2  ;;  %v11343_v28 = vmul.f32 %v10650_v36, %v16330_v31 }
 0x29e   : > { %v4465_v15 = vmax.f32 %v4415_v10, 0.0  ;;  %v2440_v46 = vadd.f32 %v2296_v18, %v2054_v21  ;;  %v4466_v52 = vmax.f32 %v4416_v17, 0.0  ;;  %v2441_v26 = vadd.f32 %v2298_v62, %v2055_v37 }
 0x29f   : > { %v2632_v1 = vsel %vm2603_vm4, %v16369_v53, %v2631_v0  ;;  %v2634_v4 = vsel %vm2603_vm4, %v2631_v0, %v15592_v51  ;;  %v3071_v54 = vrot.slane %v2939_v41, 1  ;;  %v3274_v27 = vmul.f32 %v10933_v14, %v16319_v50 }
 0x2a0   : > { %v2776_v10 = vadd.f32 %v2632_v1, %v2440_v46  ;;  %v11349_v45 = vmul.f32 %v10933_v14, %v16330_v31  ;;  %v4493_v21 = vpack.c.bf16 %v4466_v52, %v4465_v15  ;;  %v2777_v17 = vadd.f32 %v2634_v4, %v2441_v26  ;;  %v16371_v1 = vld [vmem:[#allocation123_spill] sm:$0xff] }
 0x2a1   : > { %v15591_v37 = vrot.slane %v11343_v28, 1  ;;  %v3606_v0 = vmul.f32 %v10942_v7, %v16347_v55  ;;  %v16370_v36 = vrot.slane %v11127_v61, 1  ;;  %v3406_v41 = vrot.slane %v3274_v27, 2 }
 0x2a2   : > { %v2881_v18 = vadd.f32 %v2831_v33, %v2776_v10  ;;  %v15590_v46 = vrot.slane %v11349_v45, 2  ;;  %7957 = vmatmul.mubr.msk.bf16.gmra.mxu1 %vm4551_vm5, %v4493_v21  ;;  %v2882_v53 = vadd.f32 %v2832_v40, %v2777_v17  ;;  %v3607_v52 = vmul.f32 %v10942_v7, %v16371_v1  ;;  %v16373_v40 = vld [vmem:[#allocation53_spill] sm:$0xff] }
 0x2a3   : > { %v3072_v62 = vsel %vm2267_vm3, %v16370_v36, %v3071_v54  ;;  %v3074_v15 = vsel %vm2267_vm3, %v3071_v54, %v15591_v37  ;;  %v3714_v33 = vmul.f32 %v10956_v13, %v16371_v1  ;;  %v16372_v61 = vrot.slane %v11137_v8, 2  ;;  %7960 = vmatprep.mubr.msk.bf16.mxu1 %vm8256_vm2, %v16161_v39  ;;  %v16377_v37 = vld [vmem:[#allocation150_spill] sm:$0xff] }
 0x2a4   : > { %v3216_v26 = vadd.f32 %v3072_v62, %v2881_v18  ;;  %v3409_v10 = vsel %vm2603_vm4, %v3406_v41, %v15590_v46  ;;  %v11374_v27 = vmul.f32 %v10956_v13, %v16373_v40  ;;  %v3217_v54 = vadd.f32 %v3074_v15, %v2882_v53  ;;  %v16374_v62 = vld [vmem:[#allocation29_spill] sm:$0xff]  ;;  %v16376_v46 = vld [vmem:[#allocation30_spill] sm:$0xff] }
 0x2a5   : > { %v3407_v4 = vsel %vm2603_vm4, %v16372_v61, %v3406_v41  ;;  %v3846_v21 = vrot.slane %v3714_v33, 1  ;;  %v4049_v17 = vmul.f32 %v10971_v32, %v16371_v1  ;;  %v11382_v8 = vmul.f32 %v10971_v32, %v16373_v40  ;;  %v16375_v41 = vld [vmem:[#allocation149_spill] sm:$0xff] }
 0x2a6   : > { %v3551_v18 = vadd.f32 %v3407_v4, %v3216_v26  ;;  %v15597_v36 = vrot.slane %v11374_v27, 1  ;;  %v1245_v61 = vadd.f32 %v16375_v41, %v16374_v62  ;;  %v1246_v51 = vadd.f32 %v16377_v37, %v16376_v46  ;;  %v16379_v4 = vld [vmem:[#allocation15_spill] sm:$0xff]  ;;  %v16380_v62 = vld [vmem:[#allocation21_spill] sm:$0xff] }
 0x2a7   : > { %v3552_v30 = vadd.f32 %v3409_v10, %v3217_v54  ;;  %v16378_v53 = vrot.slane %v11157_v34, 1  ;;  %v4181_v33 = vrot.slane %v4049_v17, 2  ;;  %v15599_v29 = vrot.slane %v11382_v8, 2  ;;  %v16381_v46 = vld [vmem:[#allocation69_spill] sm:$0xff] }
 0x2a8   : > { %v3656_v2 = vadd.f32 %v3606_v0, %v3551_v18  ;;  %v3849_v26 = vsel %vm2267_vm3, %v3846_v21, %v15597_v36  ;;  %v1567_v44 = vmul.f32 %v16354_v56, %v16379_v4  ;;  %v1568_v41 = vmul.f32 %v16354_v56, %v16380_v62  ;;  %v16383_v0 = vld [vmem:[#allocation20_spill] sm:$0xff] }
 0x2a9   : > { %v3847_v15 = vsel %vm2267_vm3, %v16378_v53, %v3846_v21  ;;  %v3657_v37 = vadd.f32 %v3607_v52, %v3552_v30  ;;  %v16382_v10 = vrot.slane %v16381_v46, 2  ;;  %v4184_v54 = vsel %vm2603_vm4, %v4181_v33, %v15599_v29  ;;  %v16384_v36 = vld [vmem:[#allocation24_spill] sm:$0xff]  ;;  %v16385_v52 = vld [vmem:[#allocation37_spill] sm:$0xff] }
 0x2aa   : > { %v1961_v17 = vmul.f32 %v16359_v5, %v16383_v0  ;;  %v3991_v18 = vadd.f32 %v3847_v15, %v3656_v2  ;;  %v1639_v21 = vadd.f32 %v1567_v44, %v1245_v61  ;;  %v1640_v53 = vadd.f32 %v1568_v41, %v1246_v51  ;;  %v16386_v2 = vld [vmem:[#allocation155_spill] sm:$0xff]  ;;  %v11433_v41 = vld [vmem:[%s15378_s3 + $0x3] ss:$0 sm:$0xff] }
 0x2ab   : > { %v4182_v34 = vsel %vm2603_vm4, %v16382_v10, %v4181_v33  ;;  %v1962_v4 = vmul.f32 %v16359_v5, %v16384_v36  ;;  %v3992_v20 = vadd.f32 %v3849_v26, %v3657_v37  ;;  %v2088_v30 = vmul.f32 %v10880_v57, %v16269_v25  ;;  %v16387_v37 = vld [vmem:[#allocation153_spill] sm:$0xff] }
 0x2ac   : > { %v2089_v62 = vmul.f32 %v10880_v57, %v16385_v52  ;;  %v2203_v46 = vmul.f32 %v10893_v9, %v16385_v52  ;;  %v4326_v33 = vadd.f32 %v4182_v34, %v3991_v18  ;;  %v2033_v10 = vadd.f32 %v1961_v17, %v1639_v21 }
 0x2ad   : > { %v11416_v29 = vadd.f32 %v1962_v4, %v1640_v53  ;;  %v11420_v44 = vmul.f32 %v10893_v9, %v16386_v2  ;;  %v4327_v51 = vadd.f32 %v4184_v54, %v3992_v20  ;;  %v2539_v61 = vmul.f32 %v10906_v3, %v16385_v52 }
 0x2ae   : > { %v2370_v36 = vrot.slane %v2203_v46, 1  ;;  %v11426_v25 = vmul.f32 %v10906_v3, %v16386_v2  ;;  %v4383_v15 = vadd.f32 %v11019_v60, %v4326_v33  ;;  %v2865_v20 = vmul.f32 %v11433_v41, %v16325_v19  ;;  %v11450_v19 = vld [vmem:[%s15378_s3 + $0x4] ss:$0 sm:$0xff] }
 0x2af   : > { %v2372_v26 = vrot.slane %v11420_v44, 1  ;;  %v2866_v34 = vmul.f32 %v11433_v41, %v16387_v37  ;;  %v4384_v54 = vadd.f32 %v11019_v60, %v4327_v51  ;;  %v2706_v17 = vrot.slane %v2539_v61, 2 }
 0x2b0   : > { %v2371_v0 = vsel %vm2267_vm3, %v2368_v12, %v2370_v36  ;;  %v2708_v18 = vrot.slane %v11426_v25, 2  ;;  %v4433_v21 = vmax.f32 %v4383_v15, 0.0  ;;  %v2980_v52 = vmul.f32 %v11450_v19, %v16387_v37 }
 0x2b1   : > { %v2373_v53 = vsel %vm2267_vm3, %v2370_v36, %v2372_v26  ;;  %v2474_v4 = vadd.f32 %v2371_v0, %v2088_v30  ;;  %v4434_v48 = vmax.f32 %v4384_v54, 0.0  ;;  %v2707_v12 = vsel %vm2603_vm4, %v2704_v49, %v2706_v17  ;;  %v16388_v30 = vld [vmem:[#allocation36_spill] sm:$0xff] }
 0x2b2   : > { %v2475_v46 = vadd.f32 %v2373_v53, %v2089_v62  ;;  %v2709_v33 = vsel %vm2603_vm4, %v2706_v17, %v2708_v18  ;;  %v11462_v36 = vmul.f32 %v11450_v19, %v16388_v30  ;;  %v3146_v61 = vrot.slane %v2980_v52, 1 }
 0x2b3   : > { %v2810_v51 = vadd.f32 %v2707_v12, %v2474_v4  ;;  %v3315_v15 = vmul.f32 %v10933_v14, %v16387_v37  ;;  %v4477_v0 = vpack.c.bf16 %v4434_v48, %v4433_v21  ;;  %v11468_v22 = vmul.f32 %v10933_v14, %v16388_v30 }
 0x2b4   : > { %v2811_v54 = vadd.f32 %v2709_v33, %v2475_v46  ;;  %v3640_v49 = vmul.f32 %v10942_v7, %v11205_v24  ;;  %v16389_v17 = vrot.slane %v11246_v47, 1  ;;  %v15607_v4 = vrot.slane %v11462_v36, 1 }
 0x2b5   : > { %v2915_v62 = vadd.f32 %v2865_v20, %v2810_v51  ;;  %v3481_v52 = vrot.slane %v3315_v15, 2  ;;  %7893 = vmatmul.mubr.msk.bf16.gmra.mxu0 %vm4551_vm5, %v4477_v0  ;;  %v15600_v21 = vrot.slane %v11468_v22, 2  ;;  %v3641_v48 = vmul.f32 %v10942_v7, %v2033_v10 }
 0x2b6   : > { %v3147_v53 = vsel %vm2267_vm3, %v16389_v17, %v3146_v61  ;;  %v2916_v37 = vadd.f32 %v2866_v34, %v2811_v54  ;;  %v3755_v46 = vmul.f32 %v10956_v13, %v2033_v10  ;;  %v3149_v24 = vsel %vm2267_vm3, %v3146_v61, %v15607_v4  ;;  %7896 = vmatprep.mubr.msk.bf16.mxu0 %vm8256_vm2, %v16161_v39  ;;  %v16414_v4 = vld [vmem:[#allocation31_spill] sm:$0xff] }
 0x2b7   : > { %v3250_v20 = vadd.f32 %v3147_v53, %v2915_v62  ;;  %v16390_v47 = vrot.slane %v11257_v58, 2  ;;  %v11488_v33 = vmul.f32 %v10956_v13, %v11416_v29  ;;  %v3484_v51 = vsel %vm2603_vm4, %v3481_v52, %v15600_v21 }
 0x2b8   : > { %v3251_v34 = vadd.f32 %v3149_v24, %v2916_v37  ;;  %v3921_v15 = vrot.slane %v3755_v46, 1  ;;  %v4090_v61 = vmul.f32 %v10971_v32, %v2033_v10  ;;  %v11499_v54 = vmul.f32 %v10971_v32, %v11416_v29 }
 0x2b9   : > { %v3482_v12 = vsel %vm2603_vm4, %v16390_v47, %v3481_v52  ;;  %v15601_v58 = vrot.slane %v11488_v33, 1  ;;  %v2056_v62 = vmul.f32 %v10880_v57, %v9921_v23  ;;  %v16391_v53 = vrot.slane %v11280_v59, 1  ;;  %v16392_v52 = vld [vmem:[#allocation116_spill] sm:$0xff] }
 0x2ba   : > { %v3585_v0 = vadd.f32 %v3482_v12, %v3250_v20  ;;  %v3586_v17 = vadd.f32 %v3484_v51, %v3251_v34  ;;  %v4256_v24 = vrot.slane %v4090_v61, 2  ;;  %v2057_v46 = vmul.f32 %v10880_v57, %v16392_v52  ;;  %v16393_v12 = vld [vmem:[#allocation115_spill] sm:$0xff]  ;;  %v16395_v61 = vld [vmem:[#allocation117_spill] sm:$0xff] }
 0x2bb   : > { %v3922_v37 = vsel %vm2267_vm3, %v16391_v53, %v3921_v15  ;;  %v3924_v20 = vsel %vm2267_vm3, %v3921_v15, %v15601_v58  ;;  %v15606_v47 = vrot.slane %v11499_v54, 2  ;;  %v2164_v21 = vmul.f32 %v10893_v9, %v16393_v12 }
 0x2bc   : > { %v3690_v10 = vadd.f32 %v3640_v49, %v3585_v0  ;;  %v3691_v23 = vadd.f32 %v3641_v48, %v3586_v17  ;;  %v16394_v34 = vrot.slane %v11288_v43, 2  ;;  %v2165_v51 = vmul.f32 %v10893_v9, %v16392_v52 }
 0x2bd   : > { %v11521_v57 = vmul.f32 %v10893_v9, %v16395_v61  ;;  %v4259_v15 = vsel %vm2603_vm4, %v4256_v24, %v15606_v47  ;;  %v2299_v0 = vrot.slane %v2164_v21, 1  ;;  %v2500_v48 = vmul.f32 %v10906_v3, %v16393_v12 }
 0x2be   : > { %v4257_v59 = vsel %vm2603_vm4, %v16394_v34, %v4256_v24  ;;  %v4025_v49 = vadd.f32 %v3922_v37, %v3690_v10  ;;  %v4026_v17 = vadd.f32 %v3924_v20, %v3691_v23  ;;  %v2301_v43 = vrot.slane %v2165_v51, 1 }
 0x2bf   : > { %v15605_v53 = vrot.slane %v11521_v57, 1  ;;  %v2501_v34 = vmul.f32 %v10906_v3, %v16392_v52  ;;  %v16396_v9 = vrot.slane %v11311_v11, 1  ;;  %v11536_v10 = vmul.f32 %v10906_v3, %v16395_v61 }
 0x2c0   : > { %v4360_v58 = vadd.f32 %v4257_v59, %v4025_v49  ;;  %v2635_v21 = vrot.slane %v2500_v48, 2  ;;  %v4361_v24 = vadd.f32 %v4259_v15, %v4026_v17  ;;  %v16397_v59 = vrot.slane %v11317_v35, 2  ;;  %v16398_v48 = vld [vmem:[#allocation51_spill] sm:$0xff] }
 0x2c1   : > { %v2300_v37 = vsel %vm2267_vm3, %v16396_v9, %v2299_v0  ;;  %v2303_v20 = vsel %vm2267_vm3, %v2301_v43, %v15605_v53  ;;  %v2637_v23 = vrot.slane %v2501_v34, 2  ;;  %v15602_v49 = vrot.slane %v11536_v10, 2 }
 0x2c2   : > { %v2442_v12 = vadd.f32 %v2300_v37, %v2056_v62  ;;  %v4417_v51 = vadd.f32 %v11019_v60, %v4360_v58  ;;  %v2443_v52 = vadd.f32 %v2303_v20, %v2057_v46  ;;  %v2636_v11 = vsel %vm2603_vm4, %v16397_v59, %v2635_v21  ;;  %v16399_v46 = vld [vmem:[#allocation121_spill] sm:$0xff]  ;;  %v16400_v21 = vld [vmem:[#allocation122_spill] sm:$0xff] }
 0x2c3   : > { %v4418_v3 = vadd.f32 %v11019_v60, %v4361_v24  ;;  %v2833_v15 = vmul.f32 %v11433_v41, %v16330_v31  ;;  %v2834_v17 = vmul.f32 %v11433_v41, %v16398_v48  ;;  %v2639_v58 = vsel %vm2603_vm4, %v2637_v23, %v15602_v49 }
 0x2c4   : > { %v2778_v0 = vadd.f32 %v2636_v11, %v2442_v12  ;;  %v4467_v62 = vmax.f32 %v4417_v51, 0.0  ;;  %v2941_v35 = vmul.f32 %v11450_v19, %v16399_v46  ;;  %v2942_v43 = vmul.f32 %v11450_v19, %v16398_v48 }
 0x2c5   : > { %v4468_v34 = vmax.f32 %v4418_v3, 0.0  ;;  %v2779_v9 = vadd.f32 %v2639_v58, %v2443_v52  ;;  %v11560_v24 = vmul.f32 %v11450_v19, %v16400_v21  ;;  %v3276_v51 = vmul.f32 %v10933_v14, %v16399_v46 }
 0x2c6   : > { %v2883_v37 = vadd.f32 %v2833_v15, %v2778_v0  ;;  %v3075_v20 = vrot.slane %v2941_v35, 1  ;;  %v3077_v12 = vrot.slane %v2942_v43, 1  ;;  %v3277_v23 = vmul.f32 %v10933_v14, %v16398_v48 }
 0x2c7   : > { %v4494_v59 = vpack.c.bf16 %v4468_v34, %v4467_v62  ;;  %v2884_v11 = vadd.f32 %v2834_v17, %v2779_v9  ;;  %v15603_v49 = vrot.slane %v11560_v24, 1  ;;  %v11569_v52 = vmul.f32 %v10933_v14, %v16400_v21  ;;  %v16402_v14 = vld [vmem:[#allocation56_spill] sm:$0xff] }
 0x2c8   : > { %v16401_v3 = vrot.slane %v11343_v28, 1  ;;  %v3410_v15 = vrot.slane %v3276_v51, 2  ;;  %v3412_v58 = vrot.slane %v3277_v23, 2  ;;  %v3608_v35 = vmul.f32 %v10942_v7, %v16373_v40  ;;  %v16404_v51 = vld [vmem:[#allocation124_spill] sm:$0xff] }
 0x2c9   : > { %7961 = vmatmul.mubr.msk.bf16.gmra.mxu1 %vm4551_vm5, %v4494_v59  ;;  %v3079_v17 = vsel %vm2267_vm3, %v3077_v12, %v15603_v49  ;;  %v15604_v43 = vrot.slane %v11569_v52, 2  ;;  %v3609_v34 = vmul.f32 %v10942_v7, %v16402_v14  ;;  %v16403_v9 = vrot.slane %v11349_v45, 2  ;;  %v16405_v7 = vld [vmem:[#allocation125_spill] sm:$0xff] }
 0x2ca   : > { %v3076_v0 = vsel %vm2267_vm3, %v16401_v3, %v3075_v20  ;;  %v3219_v28 = vadd.f32 %v3079_v17, %v2884_v11  ;;  %v3716_v23 = vmul.f32 %v10956_v13, %v16404_v51  ;;  %v3717_v59 = vmul.f32 %v10956_v13, %v16402_v14  ;;  %7964 = vmatprep.mubr.msk.bf16.mxu1 %vm8256_vm2, %v16161_v39 }
 0x2cb   : > { %v3218_v62 = vadd.f32 %v3076_v0, %v2883_v37  ;;  %v3411_v20 = vsel %vm2603_vm4, %v16403_v9, %v3410_v15  ;;  %v3414_v37 = vsel %vm2603_vm4, %v3412_v58, %v15604_v43  ;;  %v11597_v11 = vmul.f32 %v10956_v13, %v16405_v7 }
 0x2cc   : > { %v4051_v45 = vmul.f32 %v10971_v32, %v16404_v51  ;;  %v3554_v3 = vadd.f32 %v3414_v37, %v3219_v28  ;;  %v3850_v0 = vrot.slane %v3716_v23, 1  ;;  %v3852_v15 = vrot.slane %v3717_v59, 1  ;;  %v16407_v28 = vld [vmem:[#allocation25_spill] sm:$0xff]  ;;  %v16408_v23 = vld [vmem:[#allocation26_spill] sm:$0xff] }
 0x2cd   : > { %v3553_v12 = vadd.f32 %v3411_v20, %v3218_v62  ;;  %v4052_v17 = vmul.f32 %v10971_v32, %v16402_v14  ;;  %v3853_v49 = vrot.slane %v11597_v11, 1  ;;  %v11606_v58 = vmul.f32 %v10971_v32, %v16405_v7 }
 0x2ce   : > { %v4185_v62 = vrot.slane %v4051_v45, 2  ;;  %v3659_v20 = vadd.f32 %v3609_v34, %v3554_v3  ;;  %v16406_v13 = vrot.slane %v11374_v27, 1  ;;  %v782_v59 = vmul.f32 %v16408_v23, %v16407_v28  ;;  %v16410_v3 = vld [vmem:[#allocation145_spill] sm:$0xff]  ;;  %v16411_v27 = vld [vmem:[#allocation146_spill] sm:$0xff] }
 0x2cf   : > { %v3658_v9 = vadd.f32 %v3608_v35, %v3553_v12  ;;  %v4187_v53 = vrot.slane %v4052_v17, 2  ;;  %v3854_v35 = vsel %vm2267_vm3, %v3852_v15, %v3853_v49  ;;  %v16409_v12 = vrot.slane %v11382_v8, 2  ;;  %v16413_v17 = vld [vmem:[#allocation151_spill] sm:$0xff]  ;;  %v16415_v8 = vld [vmem:[#allocation32_spill] sm:$0xff] }
 0x2d0   : > { %v3851_v43 = vsel %vm2267_vm3, %v16406_v13, %v3850_v0  ;;  %v4188_v45 = vrot.slane %v11606_v58, 2  ;;  %v3994_v34 = vadd.f32 %v3854_v35, %v3659_v20  ;;  %v1176_v47 = vmul.f32 %v16411_v27, %v16410_v3  ;;  %v16412_v0 = vld [vmem:[#allocation33_spill] sm:$0xff]  ;;  %v16417_v3 = vld [vmem:[#allocation83_spill] sm:$0xff] }
 0x2d1   : > { %v3993_v37 = vadd.f32 %v3851_v43, %v3658_v9  ;;  %v4186_v32 = vsel %vm2603_vm4, %v16409_v12, %v4185_v62  ;;  %v1247_v13 = vadd.f32 %v16413_v17, %v16412_v0  ;;  %v1569_v28 = vmul.f32 %v16354_v56, %v16414_v4  ;;  %v16416_v62 = vld [vmem:[#allocation136_spill] sm:$0xff] }
 0x2d2   : > { %v4189_v43 = vsel %vm2603_vm4, %v4187_v53, %v4188_v45  ;;  %v1570_v9 = vmul.f32 %v16354_v56, %v16415_v8  ;;  %v1963_v20 = vmul.f32 %v16359_v5, %v16416_v62  ;;  %v1248_v35 = vadd.f32 %v1176_v47, %v782_v59  ;;  %v11639_v4 = vld [vmem:[%s15378_s3] ss:$0 sm:$0xff]  ;;  %v11648_v47 = vld [vmem:[%s15378_s3 + $0x1] ss:$0 sm:$0xff] }
 0x2d3   : > { %v4328_v15 = vadd.f32 %v4186_v32, %v3993_v37  ;;  %v4329_v23 = vadd.f32 %v4189_v43, %v3994_v34  ;;  %v1641_v12 = vadd.f32 %v1569_v28, %v1247_v13  ;;  %v1964_v27 = vmul.f32 %v16359_v5, %v16417_v3  ;;  %v11658_v13 = vld [vmem:[%s15378_s3 + $0x2] ss:$0 sm:$0xff] }
 0x2d4   : > { %v2090_v53 = vmul.f32 %v11639_v4, %v16386_v2  ;;  %v2091_v56 = vmul.f32 %v11639_v4, %v16309_v63  ;;  %v2205_v5 = vmul.f32 %v11648_v47, %v16309_v63  ;;  %v1642_v37 = vadd.f32 %v1570_v9, %v1248_v35 }
 0x2d5   : > { %v4385_v0 = vadd.f32 %v11019_v60, %v4328_v15  ;;  %v4386_v59 = vadd.f32 %v11019_v60, %v4329_v23  ;;  %v2035_v32 = vadd.f32 %v1963_v20, %v1641_v12  ;;  %v2206_v34 = vmul.f32 %v11648_v47, %v16310_v42 }
 0x2d6   : > { %v2374_v2 = vrot.slane %v2205_v5, 1  ;;  %v2541_v28 = vmul.f32 %v11658_v13, %v16309_v63  ;;  %v2542_v43 = vmul.f32 %v11658_v13, %v16310_v42  ;;  %v2036_v60 = vadd.f32 %v1964_v27, %v1642_v37  ;;  %v11693_v37 = vld [vmem:[%s15378_s3 + $0x6] ss:$0 sm:$0xff] }
 0x2d7   : > { %v4435_v17 = vmax.f32 %v4385_v0, 0.0  ;;  %v4436_v15 = vmax.f32 %v4386_v59, 0.0  ;;  %v2376_v8 = vrot.slane %v2206_v34, 1  ;;  %v2867_v9 = vmul.f32 %v11433_v41, %v16388_v30 }
 0x2d8   : > { %v2375_v62 = vsel %vm2267_vm3, %v2372_v26, %v2374_v2  ;;  %v2710_v20 = vrot.slane %v2541_v28, 2  ;;  %v2712_v23 = vrot.slane %v2542_v43, 2  ;;  %v2868_v35 = vmul.f32 %v11433_v41, %v16340_v6 }
 0x2d9   : > { %v4478_v12 = vpack.c.bf16 %v4436_v15, %v4435_v17  ;;  %v2377_v63 = vsel %vm2267_vm3, %v2374_v2, %v2376_v8  ;;  %v2476_v3 = vadd.f32 %v2375_v62, %v2090_v53  ;;  %v2982_v42 = vmul.f32 %v11450_v19, %v16340_v6  ;;  %v11684_v53 = vld [vmem:[%s15378_s3 + $0x5] ss:$0 sm:$0xff]  ;;  %v11707_v62 = vld [vmem:[%s15378_s3 + $0x7] ss:$0 sm:$0xff] }
 0x2da   : > { %v2477_v27 = vadd.f32 %v2377_v63, %v2091_v56  ;;  %v2711_v30 = vsel %vm2603_vm4, %v2708_v18, %v2710_v20  ;;  %v2713_v44 = vsel %vm2603_vm4, %v2710_v20, %v2712_v23  ;;  %v2983_v26 = vmul.f32 %v11450_v19, %v11195_v38 }
 0x2db   : > { %7897 = vmatmul.mubr.msk.bf16.gmra.mxu0 %vm4551_vm5, %v4478_v12  ;;  %v2812_v0 = vadd.f32 %v2711_v30, %v2476_v3  ;;  %v3150_v5 = vrot.slane %v2982_v42, 1  ;;  %v3317_v56 = vmul.f32 %v11684_v53, %v16340_v6  ;;  %v3318_v25 = vmul.f32 %v11684_v53, %v11195_v38 }
 0x2dc   : > { %v2813_v18 = vadd.f32 %v2713_v44, %v2477_v27  ;;  %v3152_v59 = vrot.slane %v2983_v26, 1  ;;  %v3642_v34 = vmul.f32 %v11693_v37, %v11416_v29  ;;  %v3643_v17 = vmul.f32 %v11693_v37, %v2035_v32  ;;  %7900 = vmatprep.mubr.msk.bf16.mxu0 %vm8256_vm2, %v16161_v39 }
 0x2dd   : > { %v2917_v2 = vadd.f32 %v2867_v9, %v2812_v0  ;;  %v16418_v6 = vrot.slane %v11462_v36, 1  ;;  %v3485_v28 = vrot.slane %v3317_v56, 2  ;;  %v3487_v43 = vrot.slane %v3318_v25, 2 }
 0x2de   : > { %v2918_v15 = vadd.f32 %v2868_v35, %v2813_v18  ;;  %v3153_v8 = vsel %vm2267_vm3, %v3150_v5, %v3152_v59  ;;  %v3757_v29 = vmul.f32 %v11707_v62, %v2035_v32  ;;  %v3758_v20 = vmul.f32 %v11707_v62, %v2036_v60  ;;  %v11718_v35 = vld [vmem:[%s15378_s3 + $0x8] ss:$0 sm:$0xff] }
 0x2df   : > { %v3151_v38 = vsel %vm2267_vm3, %v16418_v6, %v3150_v5  ;;  %v16419_v9 = vrot.slane %v11468_v22, 2  ;;  %v3488_v12 = vsel %vm2603_vm4, %v3485_v28, %v3487_v43  ;;  %v4092_v63 = vmul.f32 %v11718_v35, %v2035_v32 }
 0x2e0   : > { %v3252_v23 = vadd.f32 %v3151_v38, %v2917_v2  ;;  %v3253_v3 = vadd.f32 %v3153_v8, %v2918_v15  ;;  %v3925_v42 = vrot.slane %v3757_v29, 1  ;;  %v3927_v27 = vrot.slane %v3758_v20, 1 }
 0x2e1   : > { %v3486_v36 = vsel %vm2603_vm4, %v16419_v9, %v3485_v28  ;;  %v4093_v30 = vmul.f32 %v11718_v35, %v2036_v60  ;;  %v4260_v26 = vrot.slane %v4092_v63, 2  ;;  %v2058_v22 = vmul.f32 %v11639_v4, %v16395_v61 }
 0x2e2   : > { %v3587_v44 = vadd.f32 %v3486_v36, %v3252_v23  ;;  %v2059_v0 = vmul.f32 %v11639_v4, %v16318_v16  ;;  %v3588_v5 = vadd.f32 %v3488_v12, %v3253_v3  ;;  %v16420_v56 = vrot.slane %v11488_v33, 1 }
 0x2e3   : > { %v3928_v32 = vsel %vm2267_vm3, %v3925_v42, %v3927_v27  ;;  %v4262_v18 = vrot.slane %v4093_v30, 2  ;;  %v16421_v2 = vrot.slane %v11499_v54, 2  ;;  %v2167_v6 = vmul.f32 %v11648_v47, %v16318_v16 }
 0x2e4   : > { %v3926_v25 = vsel %vm2267_vm3, %v16420_v56, %v3925_v42  ;;  %v3692_v59 = vadd.f32 %v3642_v34, %v3587_v44  ;;  %v11737_v61 = vmul.f32 %v11648_v47, %v16319_v50  ;;  %v3693_v38 = vadd.f32 %v3643_v17, %v3588_v5 }
 0x2e5   : > { %v4261_v60 = vsel %vm2603_vm4, %v16421_v2, %v4260_v26  ;;  %v4263_v33 = vsel %vm2603_vm4, %v4260_v26, %v4262_v18  ;;  %v2503_v28 = vmul.f32 %v11658_v13, %v16318_v16  ;;  %v11744_v34 = vmul.f32 %v11658_v13, %v16319_v50 }
 0x2e6   : > { %v4027_v54 = vadd.f32 %v3926_v25, %v3692_v59  ;;  %v2304_v43 = vrot.slane %v2167_v6, 1  ;;  %v2306_v15 = vrot.slane %v11737_v61, 1  ;;  %v2835_v8 = vmul.f32 %v11433_v41, %v16400_v21 }
 0x2e7   : > { %v4028_v29 = vadd.f32 %v3928_v32, %v3693_v38  ;;  %v2640_v20 = vrot.slane %v2503_v28, 2  ;;  %v2642_v17 = vrot.slane %v11744_v34, 2  ;;  %v2836_v23 = vmul.f32 %v11433_v41, %v16347_v55 }
 0x2e8   : > { %v4362_v9 = vadd.f32 %v4261_v60, %v4027_v54  ;;  %v16422_v16 = vrot.slane %v11521_v57, 1  ;;  %v2307_v12 = vsel %vm2267_vm3, %v2304_v43, %v2306_v15  ;;  %v2944_v63 = vmul.f32 %v11450_v19, %v16347_v55  ;;  %v11766_v57 = vld [vmem:[%s15379_s4] ss:$0 sm:$0xff] }
 0x2e9   : > { %v4363_v3 = vadd.f32 %v4263_v33, %v4028_v29  ;;  %v2445_v27 = vadd.f32 %v2307_v12, %v2059_v0  ;;  %v16423_v30 = vrot.slane %v11536_v10, 2  ;;  %v2643_v5 = vsel %vm2603_vm4, %v2640_v20, %v2642_v17 }
 0x2ea   : > { %v2305_v36 = vsel %vm2267_vm3, %v16422_v16, %v2304_v43  ;;  %v4419_v26 = vadd.f32 %v11766_v57, %v4362_v9  ;;  %v11774_v56 = vmul.f32 %v11450_v19, %v16371_v1  ;;  %v3279_v32 = vmul.f32 %v11684_v53, %v16347_v55 }
 0x2eb   : > { %v2444_v42 = vadd.f32 %v2305_v36, %v2058_v22  ;;  %v2641_v44 = vsel %vm2603_vm4, %v16423_v30, %v2640_v20  ;;  %v3080_v22 = vrot.slane %v2944_v63, 1  ;;  %v4420_v10 = vadd.f32 %v11766_v57, %v4363_v3  ;;  %v16425_v20 = vld [vmem:[#allocation54_spill] sm:$0xff] }
 0x2ec   : > { %v2781_v25 = vadd.f32 %v2643_v5, %v2445_v27  ;;  %v4469_v18 = vmax.f32 %v4419_v26, 0.0  ;;  %v16424_v59 = vrot.slane %v11560_v24, 1  ;;  %v3082_v60 = vrot.slane %v11774_v56, 1 }
 0x2ed   : > { %v2780_v0 = vadd.f32 %v2641_v44, %v2444_v42  ;;  %v11785_v6 = vmul.f32 %v11684_v53, %v16371_v1  ;;  %v4470_v38 = vmax.f32 %v4420_v10, 0.0  ;;  %v3415_v54 = vrot.slane %v3279_v32, 2  ;;  %v16427_v42 = vld [vmem:[#allocation126_spill] sm:$0xff] }
 0x2ee   : > { %v3081_v2 = vsel %vm2267_vm3, %v16424_v59, %v3080_v22  ;;  %v2886_v28 = vadd.f32 %v2836_v23, %v2781_v25  ;;  %v3083_v43 = vsel %vm2267_vm3, %v3080_v22, %v3082_v60  ;;  %v3610_v24 = vmul.f32 %v11693_v37, %v16405_v7 }
 0x2ef   : > { %v2885_v33 = vadd.f32 %v2835_v8, %v2780_v0  ;;  %v3417_v29 = vrot.slane %v11785_v6, 2  ;;  %v3611_v9 = vmul.f32 %v11693_v37, %v16425_v20  ;;  %v4495_v16 = vpack.c.bf16 %v4470_v38, %v4469_v18 }
 0x2f0   : > { %v3221_v12 = vadd.f32 %v3083_v43, %v2886_v28  ;;  %v16426_v63 = vrot.slane %v11569_v52, 2  ;;  %v3719_v3 = vmul.f32 %v11707_v62, %v16425_v20  ;;  %v11805_v27 = vmul.f32 %v11707_v62, %v16427_v42 }
 0x2f1   : > { %v3220_v36 = vadd.f32 %v3081_v2, %v2885_v33  ;;  %v3418_v23 = vsel %vm2603_vm4, %v3415_v54, %v3417_v29  ;;  %v4054_v30 = vmul.f32 %v11718_v35, %v16425_v20  ;;  %7965 = vmatmul.mubr.msk.bf16.gmra.mxu1 %vm4551_vm5, %v4495_v16  ;;  %v11812_v26 = vmul.f32 %v11718_v35, %v16427_v42 }
 0x2f2   : > { %v3416_v8 = vsel %vm2603_vm4, %v16426_v63, %v3415_v54  ;;  %v3556_v52 = vadd.f32 %v3418_v23, %v3221_v12  ;;  %v2060_v5 = vmul.f32 %v11639_v4, %v16319_v50  ;;  %v3855_v22 = vrot.slane %v3719_v3, 1 }
 0x2f3   : > { %v3555_v44 = vadd.f32 %v3416_v8, %v3220_v36  ;;  %v3857_v10 = vrot.slane %v11805_v27, 1  ;;  %v4190_v0 = vrot.slane %v4054_v30, 2  ;;  %v2061_v25 = vmul.f32 %v11639_v4, %v16330_v31 }
 0x2f4   : > { %v3661_v18 = vadd.f32 %v3611_v9, %v3556_v52  ;;  %v4192_v59 = vrot.slane %v11812_v26, 2  ;;  %v2169_v2 = vmul.f32 %v11648_v47, %v16330_v31  ;;  %v3856_v38 = vsel %vm2267_vm3, %v3853_v49, %v3855_v22 }
 0x2f5   : > { %v3660_v32 = vadd.f32 %v3610_v24, %v3555_v44  ;;  %v3858_v50 = vsel %vm2267_vm3, %v3855_v22, %v3857_v10  ;;  %v4191_v33 = vsel %vm2603_vm4, %v4188_v45, %v4190_v0  ;;  %v2170_v28 = vmul.f32 %v11648_v47, %v16399_v46 }
 0x2f6   : > { %v3996_v43 = vadd.f32 %v3858_v50, %v3661_v18  ;;  %v4193_v24 = vsel %vm2603_vm4, %v4190_v0, %v4192_v59  ;;  %v2308_v11 = vrot.slane %v2169_v2, 1  ;;  %v2505_v49 = vmul.f32 %v11658_v13, %v16330_v31 }
 0x2f7   : > { %v3995_v54 = vadd.f32 %v3856_v38, %v3660_v32  ;;  %v2310_v9 = vrot.slane %v2170_v28, 1  ;;  %v2506_v16 = vmul.f32 %v11658_v13, %v16399_v46  ;;  %v2837_v58 = vmul.f32 %v11433_v41, %v16371_v1 }
 0x2f8   : > { %v4331_v36 = vadd.f32 %v4193_v24, %v3996_v43  ;;  %v2309_v12 = vsel %vm2267_vm3, %v2306_v15, %v2308_v11  ;;  %v2838_v63 = vmul.f32 %v11433_v41, %v16373_v40  ;;  %v2644_v3 = vrot.slane %v2505_v49, 2 }
 0x2f9   : > { %v4330_v45 = vadd.f32 %v4191_v33, %v3995_v54  ;;  %v2311_v8 = vsel %vm2267_vm3, %v2308_v11, %v2310_v9  ;;  %v2446_v23 = vadd.f32 %v2309_v12, %v2060_v5  ;;  %v2646_v31 = vrot.slane %v2506_v16, 2 }
 0x2fa   : > { %v4388_v46 = vadd.f32 %v11766_v57, %v4331_v36  ;;  %v2447_v44 = vadd.f32 %v2311_v8, %v2061_v25  ;;  %v2946_v52 = vmul.f32 %v11450_v19, %v16373_v40  ;;  %v2645_v61 = vsel %vm2603_vm4, %v2642_v17, %v2644_v3 }
 0x2fb   : > { %v4387_v30 = vadd.f32 %v11766_v57, %v4330_v45  ;;  %v2647_v15 = vsel %vm2603_vm4, %v2644_v3, %v2646_v31  ;;  %v2947_v22 = vmul.f32 %v11450_v19, %v16404_v51  ;;  %v3281_v5 = vmul.f32 %v11684_v53, %v16373_v40 }
 0x2fc   : > { %v4438_v32 = vmax.f32 %v4388_v46, 0.0  ;;  %v2782_v18 = vadd.f32 %v2645_v61, %v2446_v23  ;;  %v2783_v2 = vadd.f32 %v2647_v15, %v2447_v44  ;;  %v3084_v25 = vrot.slane %v2946_v52, 1 }
 0x2fd   : > { %v4437_v0 = vmax.f32 %v4387_v30, 0.0  ;;  %v3086_v38 = vrot.slane %v2947_v22, 1  ;;  %v3282_v50 = vmul.f32 %v11684_v53, %v16404_v51  ;;  %v3419_v34 = vrot.slane %v3281_v5, 2 }
 0x2fe   : > { %v2887_v17 = vadd.f32 %v2837_v58, %v2782_v18  ;;  %v2888_v28 = vadd.f32 %v2838_v63, %v2783_v2  ;;  %v3612_v54 = vmul.f32 %v11693_v37, %v16427_v42  ;;  %v3085_v43 = vsel %vm2267_vm3, %v3082_v60, %v3084_v25  ;;  %v16428_v58 = vld [vmem:[#allocation55_spill] sm:$0xff] }
 0x2ff   : > { %v4479_v33 = vpack.c.bf16 %v4438_v32, %v4437_v0  ;;  %v3087_v24 = vsel %vm2267_vm3, %v3084_v25, %v3086_v38  ;;  %v3420_v11 = vsel %vm2603_vm4, %v3417_v29, %v3419_v34  ;;  %v3421_v9 = vrot.slane %v3282_v50, 2  ;;  %v16429_v60 = vld [vmem:[#allocation127_spill] sm:$0xff] }
 0x300   : > { %v3222_v49 = vadd.f32 %v3085_v43, %v2887_v17  ;;  %v3223_v16 = vadd.f32 %v3087_v24, %v2888_v28  ;;  %v3613_v45 = vmul.f32 %v11693_v37, %v16428_v58  ;;  %v3721_v36 = vmul.f32 %v11707_v62, %v16428_v58 }
 0x301   : > { %7901 = vmatmul.mubr.msk.bf16.gmra.mxu0 %vm4551_vm5, %v4479_v33  ;;  %v3422_v56 = vsel %vm2603_vm4, %v3419_v34, %v3421_v9  ;;  %v3722_v6 = vmul.f32 %v11707_v62, %v16429_v60  ;;  %v4056_v29 = vmul.f32 %v11718_v35, %v16428_v58  ;;  %v4057_v12 = vmul.f32 %v11718_v35, %v16429_v60  ;;  %v11913_v34 = vpop.f32.mrf.mxu0  ;;  %v11915_v33 = vpop.f32.mrf.mxu1 }
 0x302   : > { %7904 = vmatprep.mubr.msk.bf16.mxu0 %vm8256_vm2, %v16161_v39  ;;  %v3557_v63 = vadd.f32 %v3420_v11, %v3222_v49  ;;  %v3558_v8 = vadd.f32 %v3422_v56, %v3223_v16  ;;  %v3859_v23 = vrot.slane %v3721_v36, 1  ;;  %v2062_v3 = vmul.f32 %v11639_v4, %v16398_v48 }
 0x303   : > { %v3861_v31 = vrot.slane %v3722_v6, 1  ;;  %v4194_v30 = vrot.slane %v4056_v29, 2  ;;  %v4196_v46 = vrot.slane %v4057_v12, 2  ;;  %v2063_v44 = vmul.f32 %v11639_v4, %v16400_v21  ;;  %v7870_v9 = vpop.f32.mrf.mxu0  ;;  %v7938_v49 = vpop.f32.mrf.mxu1 }
 0x304   : > { %v3662_v52 = vadd.f32 %v3612_v54, %v3557_v63  ;;  %v3663_v61 = vadd.f32 %v3613_v45, %v3558_v8  ;;  %v3860_v15 = vsel %vm2267_vm3, %v3857_v10, %v3859_v23  ;;  %v2171_v22 = vmul.f32 %v11648_v47, %v16398_v48 }
 0x305   : > { %v3862_v5 = vsel %vm2267_vm3, %v3859_v23, %v3861_v31  ;;  %v4195_v0 = vsel %vm2603_vm4, %v4192_v59, %v4194_v30  ;;  %v4197_v32 = vsel %vm2603_vm4, %v4194_v30, %v4196_v46  ;;  %v2172_v18 = vmul.f32 %v11648_v47, %v16400_v21  ;;  %v11933_v8 = vpop.f32.mrf.mxu0 }
 0x306   : > { %v3997_v2 = vadd.f32 %v3860_v15, %v3662_v52  ;;  %v3998_v25 = vadd.f32 %v3862_v5, %v3663_v61  ;;  %v11903_v27 = vmul.f32 %v11648_v47, %v16347_v55  ;;  %v2312_v10 = vrot.slane %v2171_v22, 1 }
 0x307   : > { %v2313_v38 = vrot.slane %v2172_v18, 1  ;;  %v2507_v50 = vmul.f32 %v11658_v13, %v16398_v48  ;;  %v2508_v26 = vmul.f32 %v11658_v13, %v16400_v21  ;;  %v11911_v59 = vmul.f32 %v11658_v13, %v16347_v55  ;;  %v7871_v15 = vpop.f32.mrf.mxu0 }
 0x308   : > { %v4332_v17 = vadd.f32 %v4195_v0, %v3997_v2  ;;  %v4333_v28 = vadd.f32 %v4197_v32, %v3998_v25  ;;  %v2315_v54 = vrot.slane %v11903_v27, 1  ;;  %v2839_v43 = vmul.f32 %v11433_v41, %v16402_v14 }
 0x309   : > { %v2314_v48 = vsel %vm2267_vm3, %v2312_v10, %v2313_v38  ;;  %v2648_v24 = vrot.slane %v2507_v50, 2  ;;  %v2649_v11 = vrot.slane %v2508_v26, 2  ;;  %v2651_v21 = vrot.slane %v11911_v59, 2  ;;  %v11954_v50 = vpop.f32.mrf.mxu1 }
 0x30a   : > { %v4389_v16 = vadd.f32 %v11766_v57, %v4332_v17  ;;  %v4390_v45 = vadd.f32 %v11766_v57, %v4333_v28  ;;  %v2316_v36 = vsel %vm2267_vm3, %v2313_v38, %v2315_v54  ;;  %v2448_v56 = vadd.f32 %v2314_v48, %v2062_v3  ;;  %v11952_v38 = vpop.f32.mrf.mxu0  ;;  %v16430_v28 = vld [vmem:[#allocation57_spill] sm:$0xff]  ;;  %v16431_v48 = vld [vmem:[#allocation128_spill] sm:$0xff] }
 0x30b   : > { %v2449_v6 = vadd.f32 %v2316_v36, %v2063_v44  ;;  %v2650_v29 = vsel %vm2603_vm4, %v2648_v24, %v2649_v11  ;;  %v2652_v12 = vsel %vm2603_vm4, %v2649_v11, %v2651_v21  ;;  %v2840_v63 = vmul.f32 %v11433_v41, %v16405_v7  ;;  %v7939_v36 = vpop.f32.mrf.mxu1 }
 0x30c   : > { %v4439_v23 = vmax.f32 %v4389_v16, 0.0  ;;  %v4440_v31 = vmax.f32 %v4390_v45, 0.0  ;;  %v2784_v30 = vadd.f32 %v2650_v29, %v2448_v56  ;;  %v2948_v46 = vmul.f32 %v11450_v19, %v16402_v14  ;;  %v7874_v45 = vpop.f32.mrf.mxu0 }
 0x30d   : > { %v2785_v52 = vadd.f32 %v2652_v12, %v2449_v6  ;;  %v2949_v3 = vmul.f32 %v11450_v19, %v16405_v7  ;;  %v11941_v44 = vmul.f32 %v11450_v19, %v16425_v20  ;;  %v3283_v61 = vmul.f32 %v11684_v53, %v16402_v14 }
 0x30e   : > { %v4480_v22 = vpack.c.bf16 %v4440_v31, %v4439_v23  ;;  %v2889_v5 = vadd.f32 %v2839_v43, %v2784_v30  ;;  %v3088_v0 = vrot.slane %v2948_v46, 1  ;;  %v3284_v32 = vmul.f32 %v11684_v53, %v16405_v7  ;;  %v16432_v23 = vld [vmem:[#allocation58_spill] sm:$0xff] }
 0x30f   : > { %v2890_v18 = vadd.f32 %v2840_v63, %v2785_v52  ;;  %v3089_v2 = vrot.slane %v2949_v3, 1  ;;  %v3091_v25 = vrot.slane %v11941_v44, 1  ;;  %v11950_v10 = vmul.f32 %v11684_v53, %v16425_v20  ;;  %v11982_v52 = vpop.f32.mrf.mxu0 }
 0x310   : > { %7905 = vmatmul.mubr.msk.bf16.gmra.mxu0 %vm4551_vm5, %v4480_v22  ;;  %v3423_v26 = vrot.slane %v3283_v61, 2  ;;  %v3424_v17 = vrot.slane %v3284_v32, 2  ;;  %v3614_v43 = vmul.f32 %v11693_v37, %v16430_v28  ;;  %v3615_v24 = vmul.f32 %v11693_v37, %v16431_v48 }
 0x311   : > { %7908 = vmatprep.mubr.msk.bf16.mxu0 %vm8256_vm2, %v16161_v39  ;;  %v3090_v11 = vsel %vm2267_vm3, %v3088_v0, %v3089_v2  ;;  %v3092_v9 = vsel %vm2267_vm3, %v3089_v2, %v3091_v25  ;;  %v3426_v49 = vrot.slane %v11950_v10, 2  ;;  %v3723_v16 = vmul.f32 %v11707_v62, %v16430_v28  ;;  %v7875_v2 = vpop.f32.mrf.mxu0 }
 0x312   : > { %v3224_v56 = vadd.f32 %v3090_v11, %v2889_v5  ;;  %v3225_v6 = vadd.f32 %v3092_v9, %v2890_v18  ;;  %v3425_v29 = vsel %vm2603_vm4, %v3423_v26, %v3424_v17  ;;  %v3724_v12 = vmul.f32 %v11707_v62, %v16431_v48 }
 0x313   : > { %v3427_v63 = vsel %vm2603_vm4, %v3424_v17, %v3426_v49  ;;  %v11978_v31 = vmul.f32 %v11707_v62, %v16432_v23  ;;  %v3863_v30 = vrot.slane %v3723_v16, 1  ;;  %v4058_v46 = vmul.f32 %v11718_v35, %v16430_v28  ;;  %v11994_v16 = vpop.f32.mrf.mxu1 }
 0x314   : > { %v3559_v3 = vadd.f32 %v3425_v29, %v3224_v56  ;;  %v3560_v61 = vadd.f32 %v3427_v63, %v3225_v6  ;;  %v3864_v15 = vrot.slane %v3724_v12, 1  ;;  %v4059_v22 = vmul.f32 %v11718_v35, %v16431_v48  ;;  %v12004_v6 = vpop.f32.mrf.mxu0 }
 0x315   : > { %v3866_v5 = vrot.slane %v11978_v31, 1  ;;  %v11989_v0 = vmul.f32 %v11718_v35, %v16432_v23  ;;  %v4198_v32 = vrot.slane %v4058_v46, 2  ;;  %v2064_v18 = vmul.f32 %v11639_v4, %v16347_v55  ;;  %v7942_v63 = vpop.f32.mrf.mxu1 }
 0x316   : > { %v3664_v26 = vadd.f32 %v3614_v43, %v3559_v3  ;;  %v3665_v17 = vadd.f32 %v3615_v24, %v3560_v61  ;;  %v3865_v11 = vsel %vm2267_vm3, %v3863_v30, %v3864_v15  ;;  %v4199_v9 = vrot.slane %v4059_v22, 2 }
 0x317   : > { %v3867_v45 = vsel %vm2267_vm3, %v3864_v15, %v3866_v5  ;;  %v15608_v36 = vrot.slane %v11989_v0, 2  ;;  %v2065_v56 = vmul.f32 %v11639_v4, %v16371_v1  ;;  %v2174_v55 = vmul.f32 %v11648_v47, %v16371_v1  ;;  %v7878_v15 = vpop.f32.mrf.mxu0 }
 0x318   : > { %v3999_v43 = vadd.f32 %v3865_v11, %v3664_v26  ;;  %v4000_v24 = vadd.f32 %v3867_v45, %v3665_v17  ;;  %v4200_v29 = vsel %vm2603_vm4, %v4198_v32, %v4199_v9  ;;  %v12009_v12 = vmul.f32 %v11648_v47, %v16373_v40  ;;  %v12023_v17 = vpop.f32.mrf.mxu1 }
 0x319   : > { %v4202_v30 = vsel %vm2603_vm4, %v4199_v9, %v15608_v36  ;;  %v2317_v46 = vrot.slane %v2174_v55, 1  ;;  %v2510_v3 = vmul.f32 %v11658_v13, %v16371_v1  ;;  %v12018_v61 = vmul.f32 %v11658_v13, %v16373_v40  ;;  %v12031_v55 = vpop.f32.mrf.mxu0 }
 0x31a   : > { %v4334_v22 = vadd.f32 %v4200_v29, %v3999_v43  ;;  %v4335_v32 = vadd.f32 %v4202_v30, %v4000_v24  ;;  %v2319_v2 = vrot.slane %v12009_v12, 1  ;;  %v2841_v26 = vmul.f32 %v11433_v41, %v16425_v20  ;;  %v7943_v27 = vpop.f32.mrf.mxu1 }
 0x31b   : > { %v2318_v11 = vsel %vm2267_vm3, %v2315_v54, %v2317_v46  ;;  %v2653_v9 = vrot.slane %v2510_v3, 2  ;;  %v2655_v1 = vrot.slane %v12018_v61, 2  ;;  %v2842_v45 = vmul.f32 %v11433_v41, %v16427_v42  ;;  %v7879_v15 = vpop.f32.mrf.mxu0 }
 0x31c   : > { %v4391_v43 = vadd.f32 %v11766_v57, %v4334_v22  ;;  %v4392_v24 = vadd.f32 %v11766_v57, %v4335_v32  ;;  %v2320_v29 = vsel %vm2267_vm3, %v2317_v46, %v2319_v2  ;;  %v2450_v63 = vadd.f32 %v2318_v11, %v2064_v18  ;;  %v16434_v15 = vld [vmem:[#allocation129_spill] sm:$0xff] }
 0x31d   : > { %v2451_v30 = vadd.f32 %v2320_v29, %v2065_v56  ;;  %v2654_v54 = vsel %vm2603_vm4, %v2651_v21, %v2653_v9  ;;  %v2656_v41 = vsel %vm2603_vm4, %v2653_v9, %v2655_v1  ;;  %v2951_v3 = vmul.f32 %v11450_v19, %v16427_v42  ;;  %v12050_v56 = vpop.f32.mrf.mxu1  ;;  %v12058_v9 = vpop.f32.mrf.mxu0 }
 0x31e   : > { %v4441_v22 = vmax.f32 %v4391_v43, 0.0  ;;  %v4442_v32 = vmax.f32 %v4392_v24, 0.0  ;;  %v2786_v36 = vadd.f32 %v2654_v54, %v2450_v63  ;;  %v12048_v18 = vmul.f32 %v11450_v19, %v16428_v58  ;;  %16433 = vst [vmem:[#allocation134_spill] sm:$0xff] %v12058_v9 }
 0x31f   : > { %v2787_v59 = vadd.f32 %v2656_v41, %v2451_v30  ;;  %v3093_v46 = vrot.slane %v2951_v3, 1  ;;  %v3286_v21 = vmul.f32 %v11684_v53, %v16427_v42  ;;  %v12056_v11 = vmul.f32 %v11684_v53, %v16428_v58  ;;  %v7946_v63 = vpop.f32.mrf.mxu1  ;;  %v7882_v3 = vpop.f32.mrf.mxu0 }
 0x320   : > { %v4481_v43 = vpack.c.bf16 %v4442_v32, %v4441_v22  ;;  %v2891_v24 = vadd.f32 %v2841_v26, %v2786_v36  ;;  %v3095_v29 = vrot.slane %v12048_v18, 1  ;;  %v3616_v19 = vmul.f32 %v11693_v37, %v16432_v23 }
 0x321   : > { %v2892_v27 = vadd.f32 %v2842_v45, %v2787_v59  ;;  %v3094_v30 = vsel %vm2267_vm3, %v3091_v25, %v3093_v46  ;;  %v3428_v54 = vrot.slane %v3286_v21, 2  ;;  %v15609_v41 = vrot.slane %v12056_v11, 2  ;;  %v16435_v59 = vld [vmem:[#allocation63_spill] sm:$0xff]  ;;  %v12093_v10 = vpop.f32.mrf.mxu1 }
 0x322   : > { %7909 = vmatmul.mubr.msk.bf16.gmra.mxu0 %vm4551_vm5, %v4481_v43  ;;  %v3096_v36 = vsel %vm2267_vm3, %v3093_v46, %v3095_v29  ;;  %v3226_v26 = vadd.f32 %v3094_v30, %v2891_v24  ;;  %v3617_v22 = vmul.f32 %v11693_v37, %v16434_v15  ;;  %v3726_v45 = vmul.f32 %v11707_v62, %v16434_v15 }
 0x323   : > { %7912 = vmatprep.mubr.msk.bf16.mxu0 %vm8256_vm2, %v16161_v39  ;;  %v3227_v44 = vadd.f32 %v3096_v36, %v2892_v27  ;;  %v3429_v25 = vsel %vm2603_vm4, %v3426_v49, %v3428_v54  ;;  %v3431_v32 = vsel %vm2603_vm4, %v3428_v54, %v15609_v41  ;;  %v12085_v46 = vmul.f32 %v11707_v62, %v16435_v59 }
 0x324   : > { %v3561_v21 = vadd.f32 %v3429_v25, %v3226_v26  ;;  %v3868_v43 = vrot.slane %v3726_v45, 1  ;;  %v4061_v24 = vmul.f32 %v11718_v35, %v16434_v15  ;;  %v12091_v63 = vmul.f32 %v11718_v35, %v16435_v59  ;;  %16436 = vst [vmem:[#allocation70_spill] sm:$0xff] %v12093_v10  ;;  %v7947_v25 = vpop.f32.mrf.mxu1 }
 0x325   : > { %v3562_v49 = vadd.f32 %v3431_v32, %v3227_v44  ;;  %v15611_v27 = vrot.slane %v12085_v46, 1  ;;  %v2066_v30 = vmul.f32 %v11639_v4, %v16373_v40  ;;  %v2067_v54 = vmul.f32 %v11639_v4, %v16402_v14 }
 0x326   : > { %v3666_v3 = vadd.f32 %v3616_v19, %v3561_v21  ;;  %v3869_v36 = vsel %vm2267_vm3, %v3866_v5, %v3868_v43  ;;  %v4203_v26 = vrot.slane %v4061_v24, 2  ;;  %v15610_v45 = vrot.slane %v12091_v63, 2 }
 0x327   : > { %v3667_v41 = vadd.f32 %v3617_v22, %v3562_v49  ;;  %v3871_v44 = vsel %vm2267_vm3, %v3868_v43, %v15611_v27  ;;  %v2176_v40 = vmul.f32 %v11648_v47, %v16404_v51  ;;  %v2177_v32 = vmul.f32 %v11648_v47, %v16402_v14  ;;  %v12121_v43 = vpop.f32.mrf.mxu0 }
 0x328   : > { %v4001_v19 = vadd.f32 %v3869_v36, %v3666_v3  ;;  %v16437_v31 = vrot.slane %v11989_v0, 2  ;;  %v4206_v21 = vsel %vm2603_vm4, %v4203_v26, %v15610_v45  ;;  %v12119_v22 = vmul.f32 %v11648_v47, %v16405_v7  ;;  %16438 = vst [vmem:[#allocation135_spill] sm:$0xff] %v12121_v43 }
 0x329   : > { %v4002_v24 = vadd.f32 %v3871_v44, %v3667_v41  ;;  %v2321_v49 = vrot.slane %v2176_v40, 1  ;;  %v2323_v25 = vrot.slane %v2177_v32, 1  ;;  %v2512_v3 = vmul.f32 %v11658_v13, %v16404_v51  ;;  %v7883_v45 = vpop.f32.mrf.mxu0  ;;  %v12138_v51 = vld [vmem:[%s15378_s3 + $0x3] ss:$0 sm:$0xff] }
 0x32a   : > { %v4204_v5 = vsel %vm2603_vm4, %v16437_v31, %v4203_v26  ;;  %v15613_v0 = vrot.slane %v12119_v22, 1  ;;  %v2513_v31 = vmul.f32 %v11658_v13, %v16402_v14  ;;  %v12130_v26 = vmul.f32 %v11658_v13, %v16405_v7 }
 0x32b   : > { %v4336_v36 = vadd.f32 %v4204_v5, %v4001_v19  ;;  %v4337_v27 = vadd.f32 %v4206_v21, %v4002_v24  ;;  %v2322_v41 = vsel %vm2267_vm3, %v2319_v2, %v2321_v49  ;;  %v2657_v44 = vrot.slane %v2512_v3, 2 }
 0x32c   : > { %v2843_v40 = vmul.f32 %v12138_v51, %v16428_v58  ;;  %v2325_v45 = vsel %vm2267_vm3, %v2323_v25, %v15613_v0  ;;  %v2452_v32 = vadd.f32 %v2322_v41, %v2066_v30  ;;  %v2659_v19 = vrot.slane %v2513_v31, 2  ;;  %v12156_v25 = vld [vmem:[%s15378_s3 + $0x4] ss:$0 sm:$0xff] }
 0x32d   : > { %v4393_v14 = vadd.f32 %v11766_v57, %v4336_v36  ;;  %v4394_v12 = vadd.f32 %v11766_v57, %v4337_v27  ;;  %v2453_v2 = vadd.f32 %v2325_v45, %v2067_v54  ;;  %v2658_v5 = vsel %vm2603_vm4, %v2655_v1, %v2657_v44  ;;  %v12169_v36 = vpop.f32.mrf.mxu1 }
 0x32e   : > { %v15612_v21 = vrot.slane %v12130_v26, 2  ;;  %v2788_v49 = vadd.f32 %v2658_v5, %v2452_v32  ;;  %v2844_v3 = vmul.f32 %v12138_v51, %v16430_v28  ;;  %v2953_v27 = vmul.f32 %v12156_v25, %v16429_v60  ;;  %16439 = vst [vmem:[#allocation71_spill] sm:$0xff] %v12169_v36  ;;  %v12176_v5 = vpop.f32.mrf.mxu0 }
 0x32f   : > { %v4443_v24 = vmax.f32 %v4393_v14, 0.0  ;;  %v4444_v30 = vmax.f32 %v4394_v12, 0.0  ;;  %v2954_v1 = vmul.f32 %v12156_v25, %v16430_v28  ;;  %v12167_v54 = vmul.f32 %v12156_v25, %v16431_v48  ;;  %16440 = vst [vmem:[#allocation137_spill] sm:$0xff] %v12176_v5 }
 0x330   : > { %v2661_v61 = vsel %vm2603_vm4, %v2659_v19, %v15612_v21  ;;  %v2893_v41 = vadd.f32 %v2843_v40, %v2788_v49  ;;  %v3097_v44 = vrot.slane %v2953_v27, 1  ;;  %v3288_v14 = vmul.f32 %v11684_v53, %v16429_v60  ;;  %v7950_v21 = vpop.f32.mrf.mxu1 }
 0x331   : > { %v2789_v31 = vadd.f32 %v2661_v61, %v2453_v2  ;;  %v4482_v45 = vpack.c.bf16 %v4444_v30, %v4443_v24  ;;  %v3099_v32 = vrot.slane %v2954_v1, 1  ;;  %v15614_v12 = vrot.slane %v12167_v54, 1 }
 0x332   : > { %v3289_v19 = vmul.f32 %v11684_v53, %v16430_v28  ;;  %v3098_v2 = vsel %vm2267_vm3, %v3095_v29, %v3097_v44  ;;  %v12183_v40 = vmul.f32 %v11684_v53, %v16431_v48  ;;  %v3432_v49 = vrot.slane %v3288_v14, 2 }
 0x333   : > { %v2894_v0 = vadd.f32 %v2844_v3, %v2789_v31  ;;  %7913 = vmatmul.mubr.msk.bf16.gmra.mxu0 %vm4551_vm5, %v4482_v45  ;;  %v3101_v24 = vsel %vm2267_vm3, %v3099_v32, %v15614_v12  ;;  %v3228_v27 = vadd.f32 %v3098_v2, %v2893_v41  ;;  %v3618_v21 = vmul.f32 %v11693_v37, %v16435_v59  ;;  %v7886_v3 = vpop.f32.mrf.mxu0  ;;  %v16442_v31 = vld [vmem:[#allocation64_spill] sm:$0xff]  ;;  %v16443_v41 = vld [vmem:[#allocation130_spill] sm:$0xff] }
 0x334   : > { %v3434_v30 = vrot.slane %v3289_v19, 2  ;;  %7916 = vmatprep.mubr.msk.bf16.mxu0 %vm8256_vm2, %v16161_v39  ;;  %v16441_v29 = vrot.slane %v12056_v11, 2  ;;  %v15615_v1 = vrot.slane %v12183_v40, 2  ;;  %v3619_v44 = vmul.f32 %v11693_v37, %v16442_v31  ;;  %v16444_v19 = vld [vmem:[#allocation131_spill] sm:$0xff] }
 0x335   : > { %v3229_v18 = vadd.f32 %v3101_v24, %v2894_v0  ;;  %v3728_v45 = vmul.f32 %v11707_v62, %v16443_v41  ;;  %v3729_v32 = vmul.f32 %v11707_v62, %v16442_v31  ;;  %v12205_v2 = vmul.f32 %v11707_v62, %v16444_v19 }
 0x336   : > { %v3433_v61 = vsel %vm2603_vm4, %v16441_v29, %v3432_v49  ;;  %v3436_v11 = vsel %vm2603_vm4, %v3434_v30, %v15615_v1  ;;  %v4063_v0 = vmul.f32 %v11718_v35, %v16443_v41  ;;  %v4064_v49 = vmul.f32 %v11718_v35, %v16442_v31 }
 0x337   : > { %v3563_v14 = vadd.f32 %v3433_v61, %v3228_v27  ;;  %v12216_v24 = vmul.f32 %v11718_v35, %v16444_v19  ;;  %v3564_v27 = vadd.f32 %v3436_v11, %v3229_v18  ;;  %v3872_v29 = vrot.slane %v3728_v45, 1 }
 0x338   : > { %v3874_v61 = vrot.slane %v3729_v32, 1  ;;  %v15617_v12 = vrot.slane %v12205_v2, 1  ;;  %v4207_v5 = vrot.slane %v4063_v0, 2  ;;  %v4209_v36 = vrot.slane %v4064_v49, 2 }
 0x339   : > { %v3668_v3 = vadd.f32 %v3618_v21, %v3563_v14  ;;  %v15616_v30 = vrot.slane %v12216_v24, 2  ;;  %v3669_v1 = vadd.f32 %v3619_v44, %v3564_v27  ;;  %v16445_v43 = vrot.slane %v12085_v46, 1  ;;  %v12238_v44 = vpop.f32.mrf.mxu0 }
 0x33a   : > { %v2068_v9 = vmul.f32 %v11639_v4, %v16405_v7  ;;  %v2069_v18 = vmul.f32 %v11639_v4, %v16425_v20  ;;  %v3876_v21 = vsel %vm2267_vm3, %v3874_v61, %v15617_v12  ;;  %v16446_v45 = vrot.slane %v12091_v63, 2  ;;  %16447 = vst [vmem:[#allocation72_spill] sm:$0xff] %v12238_v44 }
 0x33b   : > { %v3873_v10 = vsel %vm2267_vm3, %v16445_v43, %v3872_v29  ;;  %v4211_v46 = vsel %vm2603_vm4, %v4209_v36, %v15616_v30  ;;  %v12236_v43 = vpop.f32.mrf.mxu1  ;;  %v4004_v7 = vadd.f32 %v3876_v21, %v3669_v1  ;;  %v2179_v11 = vmul.f32 %v11648_v47, %v16425_v20  ;;  %v7887_v27 = vpop.f32.mrf.mxu0 }
 0x33c   : > { %v4003_v14 = vadd.f32 %v3873_v10, %v3668_v3  ;;  %v4208_v32 = vsel %vm2603_vm4, %v16446_v45, %v4207_v5  ;;  %v12244_v0 = vmul.f32 %v11648_v47, %v16427_v42  ;;  %v2515_v63 = vmul.f32 %v11658_v13, %v16425_v20 }
 0x33d   : > { %v12250_v5 = vmul.f32 %v11658_v13, %v16427_v42  ;;  %v2845_v36 = vmul.f32 %v12138_v51, %v16431_v48  ;;  %v2846_v1 = vmul.f32 %v12138_v51, %v16432_v23  ;;  %v7951_v49 = vpop.f32.mrf.mxu1  ;;  %v4339_v3 = vadd.f32 %v4211_v46, %v4004_v7 }
 0x33e   : > { %v4338_v10 = vadd.f32 %v4208_v32, %v4003_v14  ;;  %v2326_v29 = vrot.slane %v2179_v11, 1  ;;  %v2328_v47 = vrot.slane %v12244_v0, 1  ;;  %v2662_v61 = vrot.slane %v2515_v63, 2 }
 0x33f   : > { %v2664_v21 = vrot.slane %v12250_v5, 2  ;;  %v2956_v13 = vmul.f32 %v12156_v25, %v16432_v23  ;;  %v12263_v14 = vmul.f32 %v12156_v25, %v16434_v15  ;;  %v4396_v45 = vadd.f32 %v11766_v57, %v4339_v3 }
 0x340   : > { %v4395_v20 = vadd.f32 %v11766_v57, %v4338_v10  ;;  %v16448_v32 = vrot.slane %v12119_v22, 1  ;;  %v2329_v7 = vsel %vm2267_vm3, %v2326_v29, %v2328_v47  ;;  %v16449_v11 = vrot.slane %v12130_v26, 2 }
 0x341   : > { %v2455_v27 = vadd.f32 %v2329_v7, %v2069_v18  ;;  %v2665_v30 = vsel %vm2603_vm4, %v2662_v61, %v2664_v21  ;;  %v4446_v3 = vmax.f32 %v4396_v45, 0.0  ;;  %v3102_v12 = vrot.slane %v2956_v13, 1  ;;  %v12287_v18 = vpop.f32.mrf.mxu1 }
 0x342   : > { %v2327_v46 = vsel %vm2267_vm3, %v16448_v32, %v2326_v29  ;;  %v2663_v63 = vsel %vm2603_vm4, %v16449_v11, %v2662_v61  ;;  %v4445_v10 = vmax.f32 %v4395_v20, 0.0  ;;  %v3104_v22 = vrot.slane %v12263_v14, 1  ;;  %v16451_v11 = vld [vmem:[#allocation62_spill] sm:$0xff] }
 0x343   : > { %v2454_v49 = vadd.f32 %v2327_v46, %v2068_v9  ;;  %v3291_v32 = vmul.f32 %v11684_v53, %v16432_v23  ;;  %v2791_v29 = vadd.f32 %v2665_v30, %v2455_v27  ;;  %v12283_v26 = vmul.f32 %v11684_v53, %v16434_v15  ;;  %v16456_v14 = vld [vmem:[#allocation66_spill] sm:$0xff] }
 0x344   : > { %v3620_v9 = vmul.f32 %v11693_v37, %v16444_v19  ;;  %v4483_v20 = vpack.c.bf16 %v4446_v3, %v4445_v10  ;;  %v16450_v61 = vrot.slane %v12167_v54, 1  ;;  %v3105_v45 = vsel %vm2267_vm3, %v3102_v12, %v3104_v22  ;;  %v16453_v3 = vld [vmem:[#allocation107_spill] sm:$0xff] }
 0x345   : > { %v2790_v44 = vadd.f32 %v2663_v63, %v2454_v49  ;;  %v3437_v46 = vrot.slane %v3291_v32, 2  ;;  %v2896_v7 = vadd.f32 %v2846_v1, %v2791_v29  ;;  %v15620_v53 = vrot.slane %v12283_v26, 2  ;;  %v7954_v49 = vpop.f32.mrf.mxu1 }
 0x346   : > { %v3103_v13 = vsel %vm2267_vm3, %v16450_v61, %v3102_v12  ;;  %v3621_v63 = vmul.f32 %v11693_v37, %v16451_v11  ;;  %7917 = vmatmul.mubr.msk.bf16.gmra.mxu0 %vm4551_vm5, %v4483_v20  ;;  %v16452_v10 = vrot.slane %v12183_v40, 2  ;;  %v3731_v27 = vmul.f32 %v11707_v62, %v16451_v11 }
 0x347   : > { %v2895_v30 = vadd.f32 %v2845_v36, %v2790_v44  ;;  %v12306_v12 = vmul.f32 %v11707_v62, %v16453_v3  ;;  %v4066_v44 = vmul.f32 %v11718_v35, %v16451_v11  ;;  %7920 = vmatprep.mubr.msk.bf16.mxu0 %vm8256_vm2, %v16161_v39  ;;  %v3231_v36 = vadd.f32 %v3105_v45, %v2896_v7  ;;  %v12319_v32 = vpop.f32.mrf.mxu1 }
 0x348   : > { %v3438_v54 = vsel %vm2603_vm4, %v16452_v10, %v3437_v46  ;;  %v3440_v40 = vsel %vm2603_vm4, %v3437_v46, %v15620_v53  ;;  %v12317_v1 = vmul.f32 %v11718_v35, %v16453_v3  ;;  %v3877_v62 = vrot.slane %v3731_v27, 1 }
 0x349   : > { %v3230_v37 = vadd.f32 %v3103_v13, %v2895_v30  ;;  %v15619_v29 = vrot.slane %v12306_v12, 1  ;;  %v4212_v20 = vrot.slane %v4066_v44, 2  ;;  %v2070_v61 = vmul.f32 %v11639_v4, %v16427_v42  ;;  %v7955_v30 = vpop.f32.mrf.mxu1 }
 0x34a   : > { %v3566_v13 = vadd.f32 %v3440_v40, %v3231_v36  ;;  %v15618_v45 = vrot.slane %v12317_v1, 2  ;;  %v2071_v46 = vmul.f32 %v11639_v4, %v16428_v58  ;;  %v16454_v35 = vrot.slane %v12205_v2, 1  ;;  %v12351_v40 = vld [vmem:[%s15378_s3 + $0x2] ss:$0 sm:$0xff] }
 0x34b   : > { %v3565_v49 = vadd.f32 %v3438_v54, %v3230_v37  ;;  %v3880_v10 = vsel %vm2267_vm3, %v3877_v62, %v15619_v29  ;;  %v16455_v27 = vrot.slane %v12216_v24, 2  ;;  %v12339_v54 = vld [vmem:[%s15378_s3 + $0x1] ss:$0 sm:$0xff]  ;;  %v2848_v30 = vmul.f32 %v12138_v51, %v16435_v59 }
 0x34c   : > { %v3878_v7 = vsel %vm2267_vm3, %v16454_v35, %v3877_v62  ;;  %v2181_v4 = vmul.f32 %v12339_v54, %v16428_v58  ;;  %v3671_v2 = vadd.f32 %v3621_v63, %v3566_v13  ;;  %v4215_v37 = vsel %vm2603_vm4, %v4212_v20, %v15618_v45 }
 0x34d   : > { %v4213_v42 = vsel %vm2603_vm4, %v16455_v27, %v4212_v20  ;;  %v3670_v44 = vadd.f32 %v3620_v9, %v3565_v49  ;;  %v2182_v36 = vmul.f32 %v12339_v54, %v16429_v60  ;;  %v2517_v62 = vmul.f32 %v12351_v40, %v16428_v58 }
 0x34e   : > { %v2330_v24 = vrot.slane %v2181_v4, 1  ;;  %v2518_v9 = vmul.f32 %v12351_v40, %v16429_v60  ;;  %v2847_v63 = vmul.f32 %v12138_v51, %v16434_v15  ;;  %v4006_v20 = vadd.f32 %v3880_v10, %v3671_v2 }
 0x34f   : > { %v4005_v49 = vadd.f32 %v3878_v7, %v3670_v44  ;;  %v2332_v13 = vrot.slane %v2182_v36, 1  ;;  %v2666_v27 = vrot.slane %v2517_v62, 2  ;;  %v2958_v58 = vmul.f32 %v12156_v25, %v16435_v59 }
 0x350   : > { %v2331_v35 = vsel %vm2267_vm3, %v2328_v47, %v2330_v24  ;;  %v2668_v4 = vrot.slane %v2518_v9, 2  ;;  %v4341_v60 = vadd.f32 %v4215_v37, %v4006_v20  ;;  %v2959_v0 = vmul.f32 %v12156_v25, %v16443_v41  ;;  %v12388_v20 = vpop.f32.mrf.mxu0 }
 0x351   : > { %v4340_v45 = vadd.f32 %v4213_v42, %v4005_v49  ;;  %v2333_v29 = vsel %vm2267_vm3, %v2330_v24, %v2332_v13  ;;  %v2456_v53 = vadd.f32 %v2331_v35, %v2070_v61  ;;  %v2667_v10 = vsel %vm2603_vm4, %v2664_v21, %v2666_v27 }
 0x352   : > { %v2457_v7 = vadd.f32 %v2333_v29, %v2071_v46  ;;  %v2669_v44 = vsel %vm2603_vm4, %v2666_v27, %v2668_v4  ;;  %v4398_v2 = vadd.f32 %v11766_v57, %v4341_v60  ;;  %v3106_v42 = vrot.slane %v2958_v58, 1  ;;  %v12378_v29 = vld [vmem:[%s15378_s3 + $0x5] ss:$0 sm:$0xff]  ;;  %v12406_v58 = vld [vmem:[%s15378_s3 + $0x7] ss:$0 sm:$0xff] }
 0x353   : > { %v4397_v47 = vadd.f32 %v11766_v57, %v4340_v45  ;;  %v2792_v36 = vadd.f32 %v2667_v10, %v2456_v53  ;;  %v3108_v62 = vrot.slane %v2959_v0, 1  ;;  %v3293_v5 = vmul.f32 %v12378_v29, %v16435_v59  ;;  %v12393_v59 = vld [vmem:[%s15378_s3 + $0x6] ss:$0 sm:$0xff] }
 0x354   : > { %v2793_v37 = vadd.f32 %v2669_v44, %v2457_v7  ;;  %v3294_v21 = vmul.f32 %v12378_v29, %v16443_v41  ;;  %v4448_v46 = vmax.f32 %v4398_v2, 0.0  ;;  %v3107_v57 = vsel %vm2267_vm3, %v3104_v22, %v3106_v42  ;;  %v7890_v7 = vpop.f32.mrf.mxu0  ;;  %v16458_v44 = vld [vmem:[#allocation108_spill] sm:$0xff] }
 0x355   : > { %v4447_v61 = vmax.f32 %v4397_v47, 0.0  ;;  %v2897_v45 = vadd.f32 %v2847_v63, %v2792_v36  ;;  %v3109_v24 = vsel %vm2267_vm3, %v3106_v42, %v3108_v62  ;;  %v3441_v9 = vrot.slane %v3293_v5, 2 }
 0x356   : > { %v2898_v53 = vadd.f32 %v2848_v30, %v2793_v37  ;;  %v3443_v49 = vrot.slane %v3294_v21, 2  ;;  %v3622_v41 = vmul.f32 %v12393_v59, %v16453_v3  ;;  %v3623_v22 = vmul.f32 %v12393_v59, %v16456_v14  ;;  %v12427_v37 = vld [vmem:[%s15378_s3] ss:$0 sm:$0xff]  ;;  %v12433_v21 = vpop.f32.mrf.mxu0 }
 0x357   : > { %v4484_v13 = vpack.c.bf16 %v4448_v46, %v4447_v61  ;;  %v3232_v35 = vadd.f32 %v3107_v57, %v2897_v45  ;;  %v16457_v30 = vrot.slane %v12283_v26, 2  ;;  %v3733_v60 = vmul.f32 %v12406_v58, %v16456_v14  ;;  %v12416_v26 = vld [vmem:[%s15378_s3 + $0x8] ss:$0 sm:$0xff] }
 0x358   : > { %v3233_v63 = vadd.f32 %v3109_v24, %v2898_v53  ;;  %v3444_v4 = vsel %vm2603_vm4, %v3441_v9, %v3443_v49  ;;  %v3734_v0 = vmul.f32 %v12406_v58, %v16458_v44  ;;  %v4068_v47 = vmul.f32 %v12416_v26, %v16456_v14 }
 0x359   : > { %v3442_v27 = vsel %vm2603_vm4, %v16457_v30, %v3441_v9  ;;  %7921 = vmatmul.mubr.msk.bf16.gmra.mxu0 %vm4551_vm5, %v4484_v13  ;;  %v4069_v2 = vmul.f32 %v12416_v26, %v16458_v44  ;;  %v3881_v42 = vrot.slane %v3733_v60, 1  ;;  %v2072_v62 = vmul.f32 %v12427_v37, %v16430_v28 }
 0x35a   : > { %v3567_v10 = vadd.f32 %v3442_v27, %v3232_v35  ;;  %7924 = vmatprep.mubr.msk.bf16.mxu0 %vm8256_vm2, %v16161_v39  ;;  %v3568_v36 = vadd.f32 %v3444_v4, %v3233_v63  ;;  %v2073_v5 = vmul.f32 %v12427_v37, %v16431_v48  ;;  %v3883_v46 = vrot.slane %v3734_v0, 1  ;;  %v7891_v35 = vpop.f32.mrf.mxu0 }
 0x35b   : > { %v4216_v45 = vrot.slane %v4068_v47, 2  ;;  %v4218_v57 = vrot.slane %v4069_v2, 2  ;;  %v16459_v24 = vrot.slane %v12306_v12, 1  ;;  %v2183_v49 = vmul.f32 %v12339_v54, %v16430_v28 }
 0x35c   : > { %v3672_v61 = vadd.f32 %v3622_v41, %v3567_v10  ;;  %v3673_v53 = vadd.f32 %v3623_v22, %v3568_v36  ;;  %v2184_v13 = vmul.f32 %v12339_v54, %v16431_v48  ;;  %v3884_v14 = vsel %vm2267_vm3, %v3881_v42, %v3883_v46 }
 0x35d   : > { %v3882_v9 = vsel %vm2267_vm3, %v16459_v24, %v3881_v42  ;;  %v16460_v41 = vrot.slane %v12317_v1, 2  ;;  %v4219_v22 = vsel %vm2603_vm4, %v4216_v45, %v4218_v57  ;;  %v12449_v12 = vmul.f32 %v12339_v54, %v16432_v23  ;;  %v12466_v42 = vld [vmem:[%s15379_s4] ss:$0 sm:$0xff] }
 0x35e   : > { %v4007_v63 = vadd.f32 %v3882_v9, %v3672_v61  ;;  %v4008_v27 = vadd.f32 %v3884_v14, %v3673_v53  ;;  %v2334_v4 = vrot.slane %v2183_v49, 1  ;;  %v2335_v60 = vrot.slane %v2184_v13, 1 }
 0x35f   : > { %v4217_v30 = vsel %vm2603_vm4, %v16460_v41, %v4216_v45  ;;  %v2519_v10 = vmul.f32 %v12351_v40, %v16430_v28  ;;  %v2520_v44 = vmul.f32 %v12351_v40, %v16431_v48  ;;  %v12457_v1 = vmul.f32 %v12351_v40, %v16432_v23 }
 0x360   : > { %v4342_v7 = vadd.f32 %v4217_v30, %v4007_v63  ;;  %v4343_v0 = vadd.f32 %v4219_v22, %v4008_v27  ;;  %v2336_v47 = vsel %vm2267_vm3, %v2334_v4, %v2335_v60  ;;  %v2337_v2 = vrot.slane %v12449_v12, 1 }
 0x361   : > { %v2849_v36 = vmul.f32 %v12138_v51, %v16442_v31  ;;  %v2458_v48 = vadd.f32 %v2336_v47, %v2072_v62  ;;  %v2670_v61 = vrot.slane %v2519_v10, 2  ;;  %v2671_v46 = vrot.slane %v2520_v44, 2 }
 0x362   : > { %v4399_v28 = vadd.f32 %v12466_v42, %v4342_v7  ;;  %v4400_v45 = vadd.f32 %v12466_v42, %v4343_v0  ;;  %v2338_v57 = vsel %vm2267_vm3, %v2335_v60, %v2337_v2  ;;  %v2673_v53 = vrot.slane %v12457_v1, 2  ;;  %v12580_v1 = vld [vmem:[%s15381_s6] ss:$0 sm:$0xff] }
 0x363   : > { %v2850_v24 = vmul.f32 %v12138_v51, %v16444_v19  ;;  %v2459_v49 = vadd.f32 %v2338_v57, %v2073_v5  ;;  %v2672_v13 = vsel %vm2603_vm4, %v2670_v61, %v2671_v46  ;;  %v2960_v62 = vmul.f32 %v12156_v25, %v16442_v31 }
 0x364   : > { %v4449_v9 = vmax.f32 %v4399_v28, 0.0  ;;  %v4450_v35 = vmax.f32 %v4400_v45, 0.0  ;;  %v2674_v14 = vsel %vm2603_vm4, %v2671_v46, %v2673_v53  ;;  %v2794_v63 = vadd.f32 %v2672_v13, %v2458_v48  ;;  %v16462_v46 = vld [vmem:[#allocation85_spill] sm:$0xff] }
 0x365   : > { %v2961_v41 = vmul.f32 %v12156_v25, %v16444_v19  ;;  %v2795_v30 = vadd.f32 %v2674_v14, %v2459_v49  ;;  %v12486_v22 = vmul.f32 %v12156_v25, %v16451_v11  ;;  %v3110_v5 = vrot.slane %v2960_v62, 1 }
 0x366   : > { %v3295_v27 = vmul.f32 %v12378_v29, %v16442_v31  ;;  %v4485_v4 = vpack.c.bf16 %v4450_v35, %v4449_v9  ;;  %v2899_v60 = vadd.f32 %v2849_v36, %v2794_v63  ;;  %v3296_v10 = vmul.f32 %v12378_v29, %v16444_v19  ;;  %v16461_v31 = vld [vmem:[#allocation61_spill] sm:$0xff]  ;;  %v16463_v35 = vld [vmem:[#allocation86_spill] sm:$0xff] }
 0x367   : > { %v3111_v7 = vrot.slane %v2961_v41, 1  ;;  %v2900_v44 = vadd.f32 %v2850_v24, %v2795_v30  ;;  %v3113_v0 = vrot.slane %v12486_v22, 1  ;;  %v12495_v47 = vmul.f32 %v12378_v29, %v16451_v11 }
 0x368   : > { %v3445_v28 = vrot.slane %v3295_v27, 2  ;;  %7925 = vmatmul.mubr.msk.bf16.gmra.mxu0 %vm4551_vm5, %v4485_v4  ;;  %v3446_v61 = vrot.slane %v3296_v10, 2  ;;  %v3624_v36 = vmul.f32 %v12393_v59, %v16461_v31  ;;  %v3625_v45 = vmul.f32 %v12393_v59, %v16462_v46  ;;  %v12523_v27 = vpop.f32.mrf.mxu1 }
 0x369   : > { %v3112_v48 = vsel %vm2267_vm3, %v3110_v5, %v3111_v7  ;;  %7928 = vmatprep.mubr.msk.bf16.mxu0 %vm8256_vm2, %v16161_v39  ;;  %v3114_v19 = vsel %vm2267_vm3, %v3111_v7, %v3113_v0  ;;  %v3448_v24 = vrot.slane %v12495_v47, 2  ;;  %v3735_v9 = vmul.f32 %v12406_v58, %v16461_v31  ;;  %v16473_v47 = vld [vmem:[#allocation19_spill] sm:$0xff] }
 0x36a   : > { %v3234_v57 = vadd.f32 %v3112_v48, %v2899_v60  ;;  %v3235_v49 = vadd.f32 %v3114_v19, %v2900_v44  ;;  %v3447_v13 = vsel %vm2603_vm4, %v3445_v28, %v3446_v61  ;;  %v3736_v62 = vmul.f32 %v12406_v58, %v16462_v46 }
 0x36b   : > { %v12516_v14 = vmul.f32 %v12406_v58, %v16463_v35  ;;  %v3449_v63 = vsel %vm2603_vm4, %v3446_v61, %v3448_v24  ;;  %v3885_v30 = vrot.slane %v3735_v9, 1  ;;  %v4070_v5 = vmul.f32 %v12416_v26, %v16461_v31  ;;  %v7958_v61 = vpop.f32.mrf.mxu1 }
 0x36c   : > { %v3569_v41 = vadd.f32 %v3447_v13, %v3234_v57  ;;  %v3570_v4 = vadd.f32 %v3449_v63, %v3235_v49  ;;  %v3886_v60 = vrot.slane %v3736_v62, 1  ;;  %v4071_v10 = vmul.f32 %v12416_v26, %v16462_v46 }
 0x36d   : > { %v3888_v7 = vrot.slane %v12516_v14, 1  ;;  %v12530_v28 = vmul.f32 %v12416_v26, %v16463_v35  ;;  %v4220_v48 = vrot.slane %v4070_v5, 2  ;;  %v12539_v46 = vpop.f32.mrf.mxu1  ;;  %v16478_v14 = vld [vmem:[#allocation133_spill] sm:$0xff] }
 0x36e   : > { %v3674_v44 = vadd.f32 %v3624_v36, %v3569_v41  ;;  %v3675_v19 = vadd.f32 %v3625_v45, %v3570_v4  ;;  %v3887_v57 = vsel %vm2267_vm3, %v3885_v30, %v3886_v60  ;;  %v4221_v31 = vrot.slane %v4071_v10, 2  ;;  %v8105_v10 = vld [vmem:[%s15384_s9 + $0x20] sm:$0xff]  }
 0x36f   : > { %v3889_v9 = vsel %vm2267_vm3, %v3886_v60, %v3888_v7  ;;  %v4223_v13 = vrot.slane %v12530_v28, 2  ;;  %v2186_v36 = vmul.f32 %v12339_v54, %v16434_v15  ;;  %v2074_v45 = vmul.f32 %v12427_v37, %v16432_v23  ;;  %v7959_v60 = vpop.f32.mrf.mxu1  ;;  %7968 = vmatprep.subr.bf16.mxu1 %v8105_v10 }
 0x370   : > { %v4009_v49 = vadd.f32 %v3887_v57, %v3674_v44  ;;  %v4010_v62 = vadd.f32 %v3889_v9, %v3675_v19  ;;  %v4222_v63 = vsel %vm2603_vm4, %v4220_v48, %v4221_v31  ;;  %v2522_v41 = vmul.f32 %v12351_v40, %v16434_v15  ;;  %7969 = vmatpush3.bf16.msra.mxu1 %v8105_v10 }
 0x371   : > { %v4224_v30 = vsel %vm2603_vm4, %v4221_v31, %v4223_v13  ;;  %v2075_v54 = vmul.f32 %v12427_v37, %v16434_v15  ;;  %v2339_v4 = vrot.slane %v2186_v36, 1  ;;  %v2963_v48 = vmul.f32 %v12156_v25, %v16453_v3  ;;  %v16464_v37 = vld [vmem:[#allocation67_spill] sm:$0xff] }
 0x372   : > { %v4344_v5 = vadd.f32 %v4222_v63, %v4009_v49  ;;  %v4345_v44 = vadd.f32 %v4224_v30, %v4010_v62  ;;  %v2675_v23 = vrot.slane %v2522_v41, 2  ;;  %v3298_v40 = vmul.f32 %v12378_v29, %v16453_v3 }
 0x373   : > { %v2340_v15 = vsel %vm2267_vm3, %v2337_v2, %v2339_v4  ;;  %v16465_v19 = vrot.slane %v16464_v37, 1  ;;  %v2851_v31 = vmul.f32 %v12138_v51, %v16451_v11  ;;  %v16466_v2 = vld [vmem:[#allocation109_spill] sm:$0xff]  ;;  %v3115_v63 = vrot.slane %v2963_v48, 1 }
 0x374   : > { %v4401_v61 = vadd.f32 %v12466_v42, %v4344_v5  ;;  %v4402_v25 = vadd.f32 %v12466_v42, %v4345_v44  ;;  %v2460_v9 = vadd.f32 %v2340_v15, %v2074_v45  ;;  %v2676_v29 = vsel %vm2603_vm4, %v2673_v53, %v2675_v23  ;;  %v16468_v45 = vld [vmem:[#allocation65_spill] sm:$0xff]  ;;  %v16470_v44 = vld [vmem:[#allocation132_spill] sm:$0xff] }
 0x375   : > { %v2342_v57 = vsel %vm2267_vm3, %v2339_v4, %v16465_v19  ;;  %v16467_v36 = vrot.slane %v16466_v2, 2  ;;  %v3450_v41 = vrot.slane %v3298_v40, 2  ;;  %v2852_v4 = vmul.f32 %v12138_v51, %v16453_v3  ;;  %v12628_v2 = vpop.f32.mrf.mxu0 }
 0x376   : > { %v2461_v49 = vadd.f32 %v2342_v57, %v2075_v54  ;;  %v4451_v12 = vmax.f32 %v4401_v61, 0.0  ;;  %v4452_v30 = vmax.f32 %v4402_v25, 0.0  ;;  %v2796_v11 = vadd.f32 %v2676_v29, %v2460_v9  ;;  %v16472_v61 = vld [vmem:[#allocation87_spill] sm:$0xff] }
 0x377   : > { %v2678_v62 = vsel %vm2603_vm4, %v2675_v23, %v16467_v36  ;;  %v3116_v53 = vsel %vm2267_vm3, %v3113_v0, %v3115_v63  ;;  %v16469_v54 = vrot.slane %v16468_v45, 1  ;;  %v3451_v10 = vsel %vm2603_vm4, %v3448_v24, %v3450_v41 }
 0x378   : > { %v2797_v5 = vadd.f32 %v2678_v62, %v2461_v49  ;;  %v16471_v51 = vrot.slane %v16470_v44, 2  ;;  %v4486_v23 = vpack.c.bf16 %v4452_v30, %v4451_v12  ;;  %v2901_v48 = vadd.f32 %v2851_v31, %v2796_v11  ;;  %v16476_v30 = vld [vmem:[#allocation68_spill] sm:$0xff] }
 0x379   : > { %v3118_v60 = vsel %vm2267_vm3, %v3115_v63, %v16469_v54  ;;  %v3738_v22 = vmul.f32 %v12406_v58, %v16472_v61  ;;  %v4073_v0 = vmul.f32 %v12416_v26, %v16472_v61  ;;  %v4662_v15 = vadd.f32 %v12580_v1, %v11913_v34  ;;  %v8106_v34 = vld [vmem:[%s15384_s9 + $0x18] sm:$0xff]  }
 0x37a   : > { %v3453_v3 = vsel %vm2603_vm4, %v3450_v41, %v16471_v51  ;;  %v2902_v40 = vadd.f32 %v2852_v4, %v2797_v5  ;;  %v12600_v37 = vstv %s7731_s30  ;;  %v12603_v24 = vadd.s32 4294967295, %v16473_v47  ;;  %7929 = vmatmul.mubr.msk.bf16.gmra.mxu0 %vm4551_vm5, %v4486_v23  ;;  %7970 = vmatprep.subr.bf16.mxu1 %v8106_v34 }
 0x37b   : > { %v3236_v19 = vadd.f32 %v3116_v53, %v2901_v48  ;;  %v3890_v31 = vrot.slane %v3738_v22, 1  ;;  %vm4932_vm6 = vcmp.ge.s32.totalorder %v12600_v37, 0  ;;  %7932 = vmatprep.mubr.msk.bf16.mxu0 %vm8256_vm2, %v16161_v39  ;;  %v4225_v58 = vrot.slane %v4073_v0, 2  ;;  %7971 = vmatpush3.bf16.msra.mxu1 %v8106_v34  ;;  %v7894_v53 = vpop.f32.mrf.mxu0  ;;  %v8107_v0 = vld [vmem:[%s15384_s9 + $0x10] sm:$0xff]  }
 0x37c   : > { %v3237_v57 = vadd.f32 %v3118_v60, %v2902_v40  ;;  %v4860_v26 = vmax.f32 %v4662_v15, 0.0  ;;  %vm4942_vm7 = vcmp.lt.s32.totalorder %v12600_v37, 32  ;;  %vm4962_vm8 = vcmp.ge.s32.totalorder %v12603_v24, 0  ;;  %7972 = vmatprep.subr.bf16.mxu1 %v8107_v0 }
 0x37d   : > { %v3571_v25 = vadd.f32 %v3451_v10, %v3236_v19  ;;  %v3626_v49 = vmul.f32 %v12393_v59, %v16463_v35  ;;  %v3627_v29 = vmul.f32 %v12393_v59, %v16472_v61  ;;  %vm12618_vm9 = vmand %vm4932_vm6, %vm4942_vm7  ;;  %v4665_v12 = vadd.f32 %v12580_v1, %v11933_v8  ;;  %v12633_v59 = vld [vmem:[%s15382_s7 + $0x1] ss:$0 sm:$0xff] }
 0x37e   : > { %v3572_v9 = vadd.f32 %v3453_v3, %v3237_v57  ;;  %vm4997_vm10 = vmand %vm12618_vm9, %vm4962_vm8  ;;  %v4917_v63 = vadd.s32 6, %v12600_v37  ;;  %v3891_v41 = vsel %vm2267_vm3, %v3888_v7, %v3890_v31  ;;  %v16477_v8 = vrot.slane %v16476_v30, 1  ;;  %v12676_v57 = vld [vmem:[%s15382_s7] ss:$0 sm:$0xff] }
 0x37f   : > { %v3676_v36 = vadd.f32 %v3626_v49, %v3571_v25  ;;  %v5212_v62 = vsel %vm4997_vm10, %v4860_v26, 0.0  ;;  %v4226_v5 = vsel %vm2603_vm4, %v4223_v13, %v4225_v58  ;;  %v4861_v4 = vmax.f32 %v4665_v12, 0.0  ;;  %v12654_v13 = vpop.f32.mrf.mxu0  ;;  %7973 = vmatpush3.bf16.msra.mxu1 %v8107_v0 }
 0x380   : > { %v3677_v35 = vadd.f32 %v3627_v29, %v3572_v9  ;;  %v3893_v11 = vsel %vm2267_vm3, %v3890_v31, %v16477_v8  ;;  %v4798_v60 = vadd.f32 %v12580_v1, %v11915_v33  ;;  %v4926_v10 = vadd.s32 32, %v16473_v47  ;;  %v12662_v33 = vld [vmem:[%s15382_s7 + $0x2] ss:$0 sm:$0xff]  ;;  %v12704_v8 = vld [vmem:[%s15382_s7 + $0x4] ss:$0 sm:$0xff] }
 0x381   : > { %v4011_v45 = vadd.f32 %v3891_v41, %v3676_v36  ;;  %v16479_v44 = vrot.slane %v16478_v14, 2  ;;  %v5336_v51 = vmul.f32 %v12633_v59, %v5212_v62  ;;  %v5213_v28 = vsel %vm12618_vm9, %v4861_v4, 0.0  ;;  %v7895_v22 = vpop.f32.mrf.mxu0 }
 0x382   : > { %v4012_v54 = vadd.f32 %v3893_v11, %v3677_v35  ;;  %vm4938_vm11 = vcmp.ge.s32.totalorder %v4917_v63, 0  ;;  %v12657_v48 = vmul.f32 %v12633_v59, %v5213_v28  ;;  %v12664_v40 = vadd.s32 4294967295, %v4926_v10 }
 0x383   : > { %v4228_v7 = vsel %vm2603_vm4, %v4225_v58, %v16479_v44  ;;  %v4346_v3 = vadd.f32 %v4226_v5, %v4011_v45  ;;  %vm4948_vm12 = vcmp.lt.s32.totalorder %v4917_v63, 32  ;;  %v4670_v61 = vadd.f32 %v12580_v1, %v11952_v38  ;;  %v12736_v44 = vld [vmem:[%s15382_s7 + $0x8] ss:$0 sm:$0xff] }
 0x384   : > { %v4347_v23 = vadd.f32 %v4228_v7, %v4012_v54  ;;  %v5417_v31 = vrot.slane %v12657_v48, 1  ;;  %v4894_v58 = vmax.f32 %v4798_v60, 0.0  ;;  %vm12680_vm13 = vmand %vm4938_vm11, %vm4948_vm12  ;;  %v16480_v38 = vmov 0  ;;  %v12722_v60 = vld [vmem:[%s15382_s7 + $0x5] ss:$0 sm:$0xff] }
 0x385   : > { %v4403_v15 = vadd.f32 %v12466_v42, %v4346_v3  ;;  %v16481_v38 = vsel %vm12680_vm13, 4294967295, %v16480_v38  ;;  %v5416_v26 = vrot.slane %v5336_v51, 1  ;;  %v12685_v34 = vmul.f32 %v12662_v33, %v5213_v28  ;;  %v12800_v48 = vld [vmem:[%s15382_s7 + $0x3] ss:$0 sm:$0xff] }
 0x386   : > { %v4404_v19 = vadd.f32 %v12466_v42, %v4347_v23  ;;  %16482 = vst [vmem:[#allocation138_spill] sm:$0xff] %v16481_v38  ;;  %vm5051_vm14 = vcmp.lt.s32.totalorder %v12664_v40, 32  ;;  %v4862_v42 = vmax.f32 %v4670_v61, 0.0  ;;  %v5557_v49 = vmul.f32 %v12662_v33, %v5212_v62 }
 0x387   : > { %v4453_v25 = vmax.f32 %v4403_v15, 0.0  ;;  %vm5096_vm15 = vmand %vm12680_vm13, %vm5051_vm14  ;;  %v5267_v29 = vmul.f32 %v12676_v57, %v5212_v62  ;;  %v5418_v12 = vsel %vm2267_vm3, %v5416_v26, %v5417_v31  ;;  %v4918_v41 = vadd.s32 7, %v12600_v37  ;;  %v8108_v62 = vld [vmem:[%s15384_s9 + $0x8] sm:$0xff]  }
 0x388   : > { %v4454_v9 = vmax.f32 %v4404_v19, 0.0  ;;  %v5246_v35 = vsel %vm5096_vm15, %v4894_v58, 0.0  ;;  %v5214_v63 = vsel %vm12618_vm9, %v4862_v42, 0.0  ;;  %v5638_v30 = vrot.slane %v12685_v34, 2  ;;  %7974 = vmatprep.subr.bf16.mxu1 %v8108_v62  ;;  %v8109_v34 = vld [vmem:[%s15384_s9] sm:$0xff]  }
 0x389   : > { %v5637_v11 = vrot.slane %v5557_v49, 2  ;;  %v5520_v5 = vadd.f32 %v5418_v12, %v5267_v29  ;;  %v4801_v4 = vadd.f32 %v12580_v1, %v11954_v50  ;;  %v5268_v53 = vmul.f32 %v12676_v57, %v5213_v28  ;;  %v12731_v50 = vld [vmem:[%s15382_s7 + $0x7] ss:$0 sm:$0xff]  ;;  %7975 = vmatpush3.bf16.msra.mxu1 %v8108_v62  ;;  %v12773_v26 = vpop.f32.mrf.mxu1 }
 0x38a   : > { %v4487_v36 = vpack.c.bf16 %v4454_v9, %v4453_v25  ;;  %v12714_v45 = vmul.f32 %v12633_v59, %v5246_v35  ;;  %v12717_v54 = vmul.f32 %v12662_v33, %v5246_v35  ;;  %v5338_v10 = vmul.f32 %v12633_v59, %v5214_v63  ;;  %7976 = vmatprep.subr.bf16.mxu1 %v8109_v34 }
 0x38b   : > { %v12726_v14 = vmul.f32 %v12704_v8, %v5246_v35  ;;  %vm4939_vm0 = vcmp.ge.s32.totalorder %v4918_v41, 0  ;;  %vm4949_vm1 = vcmp.lt.s32.totalorder %v4918_v41, 32  ;;  %v4673_v7 = vadd.f32 %v12580_v1, %v11982_v52  ;;  %v7962_v41 = vpop.f32.mrf.mxu1 }
 0x38c   : > { %7933 = vmatmul.mubr.msk.bf16.gmra.mxu0 %vm4551_vm5, %v4487_v36  ;;  %16483 = vst [vmem:[#allocation22_spill] sm:$0xff] %v12714_v45  ;;  %16484 = vst [vmem:[#allocation139_spill] sm:$0xff] %v12717_v54  ;;  %v5639_v51 = vsel %vm2603_vm4, %v5637_v11, %v5638_v30  ;;  %v12744_v28 = vmul.f32 %v12662_v33, %v5214_v63  ;;  %v4806_v23 = vadd.f32 %v12580_v1, %v11994_v16 }
 0x38d   : > { %16485 = vst [vmem:[#allocation144_spill] sm:$0xff] %v12726_v14  ;;  %vm12746_vm2 = vmand %vm4939_vm0, %vm4949_vm1  ;;  %v4678_v61 = vadd.f32 %v12580_v1, %v12004_v6  ;;  %v12754_v22 = vadd.f32 %v5639_v51, %v5520_v5  ;;  %v5419_v52 = vrot.slane %v5338_v10, 1  ;;  %v4895_v0 = vmax.f32 %v4801_v4, 0.0  ;;  %v12795_v51 = vpop.f32.mrf.mxu1  ;;  %7977 = vmatpush3.bf16.msra.mxu1 %v8109_v34 }
 0x38e   : > { %v4863_v15 = vmax.f32 %v4673_v7, 0.0  ;;  %vm5066_vm5 = vmand %vm12618_vm9, %vm5051_vm14  ;;  %v12761_v19 = vmul.f32 %v12722_v60, %v5246_v35  ;;  %v12764_v58 = vmul.f32 %v12731_v50, %v5246_v35  ;;  %v12767_v16 = vmul.f32 %v12736_v44, %v5246_v35  ;;  %16492 = vst [vmem:[#allocation75_spill] sm:$0xff] %v12795_v51 }
 0x38f   : > { %vm5032_vm6 = vmand %vm12746_vm2, %vm4962_vm8  ;;  %v4864_v6 = vmax.f32 %v4678_v61, 0.0  ;;  %v4809_v49 = vadd.f32 %v12580_v1, %v12023_v17  ;;  %v5640_v29 = vrot.slane %v12744_v28, 2  ;;  %v4896_v36 = vmax.f32 %v4806_v23, 0.0 }
 0x390   : > { %16488 = vst [vmem:[#allocation73_spill] sm:$0xff] %v12761_v19  ;;  %16489 = vst [vmem:[#allocation140_spill] sm:$0xff] %v12764_v58  ;;  %v5215_v12 = vsel %vm12618_vm9, %v4863_v15, 0.0  ;;  %v5420_v62 = vsel %vm2267_vm3, %v5417_v31, %v5419_v52  ;;  %v12786_v11 = vsel %vm5032_vm6, %v4895_v0, 0.0  ;;  %v4912_v4 = vadd.s32 1, %v12600_v37 }
 0x391   : > { %16490 = vst [vmem:[#allocation74_spill] sm:$0xff] %v12767_v16  ;;  %v5216_v35 = vsel %vm5066_vm5, %v4864_v6, 0.0  ;;  %16491 = vst [vmem:[#allocation142_spill] sm:$0xff] %v12786_v11  ;;  %v5339_v5 = vmul.f32 %v12633_v59, %v5215_v12  ;;  %v5269_v39 = vmul.f32 %v12676_v57, %v5214_v63  ;;  %v4681_v7 = vadd.f32 %v12580_v1, %v12031_v55  ;;  %v7963_v6 = vpop.f32.mrf.mxu1 }
 0x392   : > { %v5560_v28 = vmul.f32 %v12662_v33, %v5215_v12  ;;  %v5340_v23 = vmul.f32 %v12633_v59, %v5216_v35  ;;  %v4897_v61 = vmax.f32 %v4809_v49, 0.0  ;;  %v5521_v0 = vadd.f32 %v5420_v62, %v5268_v53  ;;  %vm5101_vm12 = vmand %vm12746_vm2, %vm5051_vm14 }
 0x393   : > { %v5421_v31 = vrot.slane %v5339_v5, 1  ;;  %v12806_v63 = vmul.f32 %v12704_v8, %v12786_v11  ;;  %v12810_v55 = vsel %vm12746_vm2, %v4896_v36, 0.0  ;;  %v5561_v15 = vmul.f32 %v12662_v33, %v5216_v35 }
 0x394   : > { %16494 = vst [vmem:[#allocation23_spill] sm:$0xff] %v12810_v55  ;;  %v5641_v5 = vsel %vm2603_vm4, %v5638_v30, %v5640_v29  ;;  %v5423_v25 = vrot.slane %v5340_v23, 1  ;;  %vm4933_vm7 = vcmp.ge.s32.totalorder %v4912_v4, 0  ;;  %v12819_v53 = vmul.f32 %v12800_v48, %v12786_v11 }
 0x395   : > { %16493 = vst [vmem:[#allocation143_spill] sm:$0xff] %v12806_v63  ;;  %v12823_v49 = vmul.f32 %v12722_v60, %v12786_v11  ;;  %v5422_v36 = vsel %vm2267_vm3, %v5419_v52, %v5421_v31  ;;  %v12828_v35 = vsel %vm12746_vm2, %v4897_v61, 0.0  ;;  %v5642_v30 = vrot.slane %v5560_v28, 2 }
 0x396   : > { %16495 = vst [vmem:[#allocation76_spill] sm:$0xff] %v12819_v53  ;;  %16497 = vst [vmem:[#allocation78_spill] sm:$0xff] %v12828_v35  ;;  %v12835_v62 = vmul.f32 %v12704_v8, %v12810_v55  ;;  %v4865_v23 = vmax.f32 %v4681_v7, 0.0  ;;  %vm4943_vm9 = vcmp.lt.s32.totalorder %v4912_v4, 32  ;;  %v12837_v6 = vadd.f32 %v5641_v5, %v5521_v0  ;;  %v16502_v4 = vld [vmem:[#allocation134_spill] sm:$0xff] }
 0x397   : > { %16496 = vst [vmem:[#allocation77_spill] sm:$0xff] %v12823_v49  ;;  %v5644_v52 = vrot.slane %v5561_v15, 2  ;;  %vm12840_vm10 = vmand %vm4933_vm7, %vm4943_vm9  ;;  %v4814_v61 = vadd.f32 %v12580_v1, %v12050_v56  ;;  %v5522_v28 = vadd.f32 %v5422_v36, %v5269_v39  ;;  %v5424_v41 = vsel %vm2267_vm3, %v5421_v31, %v5423_v25  ;;  %v16505_v39 = vld [vmem:[#allocation70_spill] sm:$0xff] }
 0x398   : > { %16498 = vst [vmem:[#allocation79_spill] sm:$0xff] %v12835_v62  ;;  %v12849_v7 = vmul.f32 %v12704_v8, %v12828_v35  ;;  %vm5002_vm11 = vmand %vm12840_vm10, %vm4962_vm8  ;;  %v4686_v0 = vadd.f32 %v12580_v1, %v16502_v4  ;;  %v5270_v15 = vmul.f32 %v12676_v57, %v5215_v12  ;;  %v12860_v56 = vmul.f32 %v12800_v48, %v12810_v55 }
 0x399   : > { %v12864_v25 = vmul.f32 %v12722_v60, %v12810_v55  ;;  %v4817_v31 = vadd.f32 %v12580_v1, %v16505_v39  ;;  %v5643_v5 = vsel %vm2603_vm4, %v5640_v29, %v5642_v30  ;;  %v5217_v17 = vsel %vm5002_vm11, %v4865_v23, 0.0  ;;  %v16508_v29 = vld [vmem:[#allocation135_spill] sm:$0xff]  ;;  %vm5071_vm5 = vmand %vm12840_vm10, %vm5051_vm14 }
 0x39a   : > { %16501 = vst [vmem:[#allocation81_spill] sm:$0xff] %v12849_v7  ;;  %16503 = vst [vmem:[#allocation80_spill] sm:$0xff] %v12860_v56  ;;  %v4898_v4 = vmax.f32 %v4814_v61, 0.0  ;;  %v5523_v34 = vadd.f32 %v5424_v41, %v5270_v15  ;;  %v5645_v12 = vsel %vm2603_vm4, %v5642_v30, %v5644_v52  ;;  %v12873_v10 = vmul.f32 %v12800_v48, %v12828_v35  ;;  %v16509_v61 = vld [vmem:[#allocation71_spill] sm:$0xff] }
 0x39b   : > { %16504 = vst [vmem:[#allocation59_spill] sm:$0xff] %v12864_v25  ;;  %v4866_v42 = vmax.f32 %v4686_v0, 0.0  ;;  %v12875_v47 = vadd.f32 %v5643_v5, %v5522_v28  ;;  %v12880_v39 = vmul.f32 %v12722_v60, %v12828_v35  ;;  %v4689_v41 = vadd.f32 %v12580_v1, %v16508_v29  ;;  %v12906_v54 = vpop.f32.mrf.mxu0 }
 0x39c   : > { %16506 = vst [vmem:[#allocation82_spill] sm:$0xff] %v12873_v10  ;;  %v5341_v30 = vmul.f32 %v12633_v59, %v5217_v17  ;;  %v4899_v52 = vmax.f32 %v4817_v31, 0.0  ;;  %v12893_v28 = vadd.f32 %v12580_v1, %v16509_v61  ;;  %v5562_v0 = vmul.f32 %v12662_v33, %v5217_v17 }
 0x39d   : > { %16507 = vst [vmem:[#allocation156_spill] sm:$0xff] %v12880_v39  ;;  %v5218_v23 = vsel %vm12840_vm10, %v4866_v42, 0.0  ;;  %v12898_v15 = vsel %vm12746_vm2, %v4898_v4, 0.0  ;;  %v12908_v42 = vadd.f32 %v5645_v12, %v5523_v34  ;;  %v5778_v31 = vmul.f32 %v12800_v48, %v5217_v17  ;;  %v7898_v49 = vpop.f32.mrf.mxu0 }
 0x39e   : > { %16510 = vst [vmem:[#allocation97_spill] sm:$0xff] %v12898_v15  ;;  %v12901_v5 = vmul.f32 %v12633_v59, %v5218_v23  ;;  %v12904_v29 = vmul.f32 %v12662_v33, %v5218_v23  ;;  %v12912_v61 = vmul.f32 %v12704_v8, %v5218_v23  ;;  %v5251_v36 = vsel %vm5101_vm12, %v4899_v52, 0.0 }
 0x39f   : > { %v5847_v3 = vmul.f32 %v12704_v8, %v5217_v17  ;;  %v6068_v4 = vmul.f32 %v12722_v60, %v5217_v17  ;;  %v12918_v7 = vmul.f32 %v12722_v60, %v5218_v23  ;;  %v5425_v56 = vrot.slane %v5341_v30, 1  ;;  %v12929_v62 = vpop.f32.mrf.mxu0 }
 0x3a0   : > { %v5779_v12 = vmul.f32 %v12800_v48, %v5218_v23  ;;  %v12924_v39 = vmul.f32 %v12633_v59, %v12898_v15  ;;  %v5271_v52 = vmul.f32 %v12676_v57, %v5217_v17  ;;  %v5646_v25 = vrot.slane %v5562_v0, 2  ;;  %16511 = vst [vmem:[#allocation39_spill] sm:$0xff] %v12929_v62 }
 0x3a1   : > { %v5375_v63 = vmul.f32 %v12633_v59, %v5251_v36  ;;  %v4919_v10 = vadd.s32 8, %v12600_v37  ;;  %v5810_v49 = vadd.f32 %v5778_v31, %v12754_v22  ;;  %v12934_v30 = vmul.f32 %v12800_v48, %v12898_v15  ;;  %v7899_v58 = vpop.f32.mrf.mxu0 }
 0x3a2   : > { %v16513_v34 = vrot.slane %v12901_v5, 1  ;;  %v5928_v19 = vrot.slane %v12912_v61, 1  ;;  %v5927_v17 = vrot.slane %v5847_v3, 1  ;;  %v6148_v0 = vrot.slane %v6068_v4, 2 }
 0x3a3   : > { %16512 = vst [vmem:[#allocation99_spill] sm:$0xff] %v12934_v30  ;;  %v5272_v14 = vmul.f32 %v12676_v57, %v5218_v23  ;;  %v6149_v16 = vrot.slane %v12918_v7, 2  ;;  %v16514_v45 = vrot.slane %v12904_v29, 2  ;;  %v12946_v31 = vadd.f32 %v5779_v12, %v12837_v6 }
 0x3a4   : > { %v5427_v53 = vsel %vm2267_vm3, %v5425_v56, %v16513_v34  ;;  %v12950_v56 = vmul.f32 %v12662_v33, %v5251_v36  ;;  %v5486_v3 = vrot.slane %v5375_v63, 1  ;;  %v12954_v23 = vmul.f32 %v12704_v8, %v12898_v15 }
 0x3a5   : > { %v5648_v22 = vsel %vm2603_vm4, %v5646_v25, %v16514_v45  ;;  %v5524_v61 = vadd.f32 %v5427_v53, %v5271_v52  ;;  %v4867_v7 = vmax.f32 %v4689_v41, 0.0  ;;  %v5929_v58 = vsel %vm2267_vm3, %v5927_v17, %v5928_v19 }
 0x3a6   : > { %16515 = vst [vmem:[#allocation157_spill] sm:$0xff] %v12950_v56  ;;  %16516 = vst [vmem:[#allocation100_spill] sm:$0xff] %v12954_v23  ;;  %v5881_v4 = vmul.f32 %v12704_v8, %v5251_v36  ;;  %v6102_v45 = vmul.f32 %v12722_v60, %v5251_v36  ;;  %vm4940_vm15 = vcmp.ge.s32.totalorder %v4919_v10, 0  ;;  %v12960_v6 = vsel %vm2603_vm4, %v6148_v0, %v6149_v16 }
 0x3a7   : > { %16517 = vst [vmem:[#allocation43_spill] sm:$0xff] %v12960_v6  ;;  %v12964_v25 = vmul.f32 %v12722_v60, %v12898_v15  ;;  %v5219_v63 = vsel %vm12840_vm10, %v4867_v7, 0.0  ;;  %vm4950_vm0 = vcmp.lt.s32.totalorder %v4919_v10, 32  ;;  %v4900_v12 = vmax.f32 %v12893_v28, 0.0 }
 0x3a8   : > { %v12970_v41 = vmul.f32 %v12633_v59, %v5219_v63  ;;  %v12973_v34 = vmul.f32 %v12662_v33, %v5219_v63  ;;  %vm12976_vm1 = vmand %vm4940_vm15, %vm4950_vm0  ;;  %v12980_v17 = vadd.f32 %v5929_v58, %v5810_v49  ;;  %v12983_v0 = vmul.f32 %v12731_v50, %v5251_v36 }
 0x3a9   : > { %16518 = vst [vmem:[#allocation168_spill] sm:$0xff] %v12964_v25  ;;  %v12986_v10 = vmul.f32 %v12704_v8, %v5219_v63  ;;  %v12989_v7 = vmul.f32 %v12722_v60, %v5219_v63  ;;  %vm5037_vm2 = vmand %vm12976_vm1, %vm4962_vm8  ;;  %v5988_v28 = vrot.slane %v5881_v4, 1  ;;  %v6209_v53 = vrot.slane %v6102_v45, 2 }
 0x3aa   : > { %16521 = vst [vmem:[#allocation158_spill] sm:$0xff] %v12980_v17  ;;  %16522 = vst [vmem:[#allocation169_spill] sm:$0xff] %v12983_v0  ;;  %v12996_v30 = vmul.f32 %v12736_v44, %v5251_v36  ;;  %v5428_v49 = vrot.slane %v12970_v41, 1  ;;  %v5780_v6 = vmul.f32 %v12800_v48, %v5219_v63  ;;  %v16524_v17 = vld [vmem:[#allocation137_spill] sm:$0xff]  ;;  %v5252_v4 = vsel %vm5037_vm2, %v4900_v12, 0.0 }
 0x3ab   : > { %v4694_v56 = vadd.f32 %v12580_v1, %v16524_v17  ;;  %v15638_v15 = vrot.slane %v12986_v10, 1  ;;  %v4825_v36 = vadd.f32 %v12580_v1, %v12236_v43  ;;  %v13008_v45 = vadd.f32 %v5648_v22, %v5524_v61  ;;  %vm5106_vm11 = vmand %vm12976_vm1, %vm5051_vm14 }
 0x3ac   : > { %16523 = vst [vmem:[#allocation44_spill] sm:$0xff] %v12996_v30  ;;  %v16526_v41 = vrot.slane %v12924_v39, 1  ;;  %v16528_v17 = vrot.slane %v12954_v23, 1  ;;  %v16530_v12 = vrot.slane %v12964_v25, 2  ;;  %v16532_v61 = vrot.slane %v12901_v5, 1 }
 0x3ad   : > { %16525 = vst [vmem:[#allocation101_spill] sm:$0xff] %v13008_v45  ;;  %v13033_v38 = vadd.f32 %v5780_v6, %v12875_v47  ;;  %v13036_v51 = vmul.f32 %v12704_v8, %v5252_v4  ;;  %v5931_v5 = vsel %vm2267_vm3, %v5928_v19, %v15638_v15  ;;  %v16535_v6 = vrot.slane %v12989_v7, 2  ;;  %v16542_v15 = vld [vmem:[#allocation72_spill] sm:$0xff] }
 0x3ae   : > { %v13013_v58 = vsel %vm2267_vm3, %v16526_v41, %v5486_v3  ;;  %v13020_v62 = vsel %vm2267_vm3, %v16528_v17, %v5988_v28  ;;  %v13025_v43 = vsel %vm2603_vm4, %v16530_v12, %v6209_v53  ;;  %v5429_v3 = vsel %vm2267_vm3, %v16532_v61, %v5428_v49 }
 0x3af   : > { %16527 = vst [vmem:[#allocation159_spill] sm:$0xff] %v13013_v58  ;;  %16529 = vst [vmem:[#allocation102_spill] sm:$0xff] %v13020_v62  ;;  %v5273_v41 = vmul.f32 %v12676_v57, %v5219_v63  ;;  %v4868_v28 = vmax.f32 %v4694_v56, 0.0  ;;  %v16533_v17 = vrot.slane %v12973_v34, 2  ;;  %v16534_v53 = vrot.slane %v12904_v29, 2 }
 0x3b0   : > { %16531 = vst [vmem:[#allocation45_spill] sm:$0xff] %v13025_v43  ;;  %v13047_v61 = vmul.f32 %v12800_v48, %v5252_v4  ;;  %v4901_v63 = vmax.f32 %v4825_v36, 0.0  ;;  %v5525_v47 = vadd.f32 %v5429_v3, %v5272_v14  ;;  %v13052_v22 = vsel %vm2603_vm4, %v6149_v16, %v16535_v6  ;;  %v13060_v29 = vld [vmem:[%s15382_s7 + $0x6] ss:$0 sm:$0xff] }
 0x3b1   : > { %v5650_v12 = vsel %vm2603_vm4, %v16534_v53, %v16533_v17  ;;  %16536 = vst [vmem:[#allocation103_spill] sm:$0xff] %v13052_v22  ;;  %v13055_v56 = vmul.f32 %v12722_v60, %v5252_v4  ;;  %v5220_v19 = vsel %vm12840_vm10, %v4868_v28, 0.0  ;;  %v13065_v17 = vmul.f32 %v13060_v29, %v5252_v4  ;;  %v13074_v3 = vpop.f32.mrf.mxu1 }
 0x3b2   : > { %v13068_v14 = vmul.f32 %v12731_v50, %v5252_v4  ;;  %v13071_v16 = vmul.f32 %v12736_v44, %v5252_v4  ;;  %v5344_v36 = vmul.f32 %v12633_v59, %v5220_v19  ;;  %16540 = vst [vmem:[#allocation105_spill] sm:$0xff] %v13074_v3  ;;  %v13077_v53 = vadd.f32 %v5931_v5, %v12946_v31 }
 0x3b3   : > { %16537 = vst [vmem:[#allocation160_spill] sm:$0xff] %v13065_v17  ;;  %v5850_v28 = vmul.f32 %v12704_v8, %v5220_v19  ;;  %v4697_v25 = vadd.f32 %v12580_v1, %v16542_v15  ;;  %v13084_v23 = vmul.f32 %v12662_v33, %v5220_v19  ;;  %v5253_v4 = vsel %vm12976_vm1, %v4901_v63, 0.0  ;;  %v7966_v17 = vpop.f32.mrf.mxu1 }
 0x3b4   : > { %16538 = vst [vmem:[#allocation104_spill] sm:$0xff] %v13068_v14  ;;  %16539 = vst [vmem:[#allocation46_spill] sm:$0xff] %v13071_v16  ;;  %v5430_v43 = vrot.slane %v5344_v36, 1  ;;  %v4830_v62 = vadd.f32 %v12580_v1, %v12287_v18  ;;  %v5781_v5 = vmul.f32 %v12800_v48, %v5220_v19  ;;  %v13093_v6 = vmul.f32 %v12722_v60, %v5220_v19 }
 0x3b5   : > { %16541 = vst [vmem:[#allocation161_spill] sm:$0xff] %v13077_v53  ;;  %v4913_v15 = vadd.s32 2, %v12600_v37  ;;  %v13096_v36 = vadd.f32 %v5650_v12, %v5525_v47  ;;  %v4702_v63 = vadd.f32 %v12580_v1, %v12388_v20  ;;  %v13102_v18 = vpop.f32.mrf.mxu1  ;;  %v5274_v17 = vmul.f32 %v12676_v57, %v5220_v19 }
 0x3b6   : > { %16544 = vst [vmem:[#allocation47_spill] sm:$0xff] %v13102_v18  ;;  %v5431_v31 = vsel %vm2267_vm3, %v5428_v49, %v5430_v43  ;;  %v5932_v45 = vrot.slane %v5850_v28, 1  ;;  %v13107_v22 = vmul.f32 %v12800_v48, %v5253_v4  ;;  %v5651_v12 = vrot.slane %v13084_v23, 2 }
 0x3b7   : > { %16543 = vst [vmem:[#allocation106_spill] sm:$0xff] %v13096_v36  ;;  %v13115_v47 = vmul.f32 %v12704_v8, %v5253_v4  ;;  %v4869_v20 = vmax.f32 %v4697_v25, 0.0  ;;  %v4902_v0 = vmax.f32 %v4830_v62, 0.0  ;;  %v7967_v30 = vpop.f32.mrf.mxu1  ;;  %v5813_v19 = vadd.f32 %v5781_v5, %v12908_v42 }
 0x3b8   : > { %v6153_v49 = vrot.slane %v13093_v6, 2  ;;  %v13120_v28 = vmul.f32 %v12722_v60, %v5253_v4  ;;  %vm4934_vm6 = vcmp.ge.s32.totalorder %v4913_v15, 0  ;;  %v5526_v16 = vadd.f32 %v5431_v31, %v5273_v41 }
 0x3b9   : > { %v13123_v9 = vmul.f32 %v12731_v50, %v5253_v4  ;;  %v5221_v14 = vsel %vm5071_vm5, %v4869_v20, 0.0  ;;  %vm4944_vm7 = vcmp.lt.s32.totalorder %v4913_v15, 32  ;;  %v16546_v23 = vrot.slane %v12986_v10, 1 }
 0x3ba   : > { %v13129_v62 = vmul.f32 %v12736_v44, %v5253_v4  ;;  %v5345_v42 = vmul.f32 %v12633_v59, %v5221_v14  ;;  %v5851_v30 = vmul.f32 %v12704_v8, %v5221_v14  ;;  %v13135_v41 = vmul.f32 %v13060_v29, %v5253_v4  ;;  %vm13140_vm9 = vmand %vm4934_vm6, %vm4944_vm7 }
 0x3bb   : > { %16545 = vst [vmem:[#allocation110_spill] sm:$0xff] %v13123_v9  ;;  %v5933_v25 = vsel %vm2267_vm3, %v16546_v23, %v5932_v45  ;;  %v5566_v31 = vmul.f32 %v12662_v33, %v5221_v14  ;;  %v5254_v5 = vsel %vm12976_vm1, %v4902_v0, 0.0  ;;  %v16551_v15 = vrot.slane %v12973_v34, 2  ;;  %vm5007_vm10 = vmand %vm13140_vm9, %vm4962_vm8 }
 0x3bc   : > { %16547 = vst [vmem:[#allocation162_spill] sm:$0xff] %v13129_v62  ;;  %16548 = vst [vmem:[#allocation111_spill] sm:$0xff] %v13135_v41  ;;  %v5432_v23 = vrot.slane %v5345_v42, 1  ;;  %v5934_v36 = vrot.slane %v5851_v30, 1  ;;  %v6072_v6 = vmul.f32 %v12722_v60, %v5221_v14  ;;  %v6033_v4 = vadd.f32 %v5933_v25, %v13033_v38 }
 0x3bd   : > { %v5652_v20 = vsel %vm2603_vm4, %v16551_v15, %v5651_v12  ;;  %v16552_v41 = vrot.slane %v12989_v7, 2  ;;  %v4870_v18 = vmax.f32 %v4702_v63, 0.0  ;;  %v13158_v42 = vmul.f32 %v12704_v8, %v5254_v5  ;;  %vm5076_vm2 = vmand %vm13140_vm9, %vm5051_vm14 }
 0x3be   : > { %v13153_v58 = vadd.f32 %v5652_v20, %v5526_v16  ;;  %v5433_v38 = vsel %vm2267_vm3, %v5430_v43, %v5432_v23  ;;  %v5653_v7 = vrot.slane %v5566_v31, 2  ;;  %v5935_v14 = vsel %vm2267_vm3, %v5932_v45, %v5934_v36 }
 0x3bf   : > { %v6154_v53 = vsel %vm2603_vm4, %v16552_v41, %v6153_v49  ;;  %v13167_v16 = vmul.f32 %v12722_v60, %v5254_v5  ;;  %v6155_v25 = vrot.slane %v6072_v6, 2  ;;  %v4833_v30 = vadd.f32 %v12580_v1, %v12319_v32 }
 0x3c0   : > { %16553 = vst [vmem:[#allocation48_spill] sm:$0xff] %v13153_v58  ;;  %v4705_v41 = vadd.f32 %v12580_v1, %v12433_v21  ;;  %v4838_v15 = vadd.f32 %v12580_v1, %v12523_v27  ;;  %v13177_v20 = vadd.f32 %v6154_v53, %v6033_v4  ;;  %v13180_v43 = vmul.f32 %v12800_v48, %v5254_v5 }
 0x3c1   : > { %v13169_v63 = vpop.f32.mrf.mxu0  ;;  %v13183_v45 = vmul.f32 %v12731_v50, %v5254_v5  ;;  %v13185_v36 = vsel %vm5007_vm10, %v4870_v18, 0.0  ;;  %v5527_v31 = vadd.f32 %v5433_v38, %v5274_v17  ;;  %v6034_v23 = vadd.f32 %v5935_v14, %v5813_v19 }
 0x3c2   : > { %v13188_v32 = vmul.f32 %v13060_v29, %v5254_v5  ;;  %v13191_v21 = vmul.f32 %v12736_v44, %v5254_v5  ;;  %v4903_v4 = vmax.f32 %v4833_v30, 0.0  ;;  %v4904_v34 = vmax.f32 %v4838_v15, 0.0 }
 0x3c3   : > { %16554 = vst [vmem:[#allocation163_spill] sm:$0xff] %v13183_v45  ;;  %v7902_v6 = vpop.f32.mrf.mxu0  ;;  %v5654_v18 = vsel %vm2603_vm4, %v5651_v12, %v5653_v7  ;;  %v13201_v17 = vmul.f32 %v12633_v59, %v13185_v36  ;;  %v4871_v19 = vmax.f32 %v4705_v41, 0.0  ;;  %v13210_v38 = vmul.f32 %v12662_v33, %v13185_v36 }
 0x3c4   : > { %16555 = vst [vmem:[#allocation49_spill] sm:$0xff] %v13188_v32  ;;  %16556 = vst [vmem:[#allocation141_spill] sm:$0xff] %v13191_v21  ;;  %v6156_v6 = vsel %vm2603_vm4, %v6153_v49, %v6155_v25  ;;  %v13214_v12 = vmul.f32 %v12704_v8, %v13185_v36  ;;  %v5255_v49 = vsel %vm12976_vm1, %v4903_v4, 0.0  ;;  %v13218_v14 = vadd.f32 %v5654_v18, %v5527_v31 }
 0x3c5   : > { %v13195_v3 = vpop.f32.mrf.mxu0  ;;  %16557 = vst [vmem:[#allocation165_spill] sm:$0xff] %v13201_v17  ;;  %16558 = vst [vmem:[#allocation40_spill] sm:$0xff] %v13210_v38  ;;  %v13220_v25 = vadd.f32 %v6156_v6, %v6034_v23  ;;  %v13225_v41 = vmul.f32 %v12676_v57, %v13185_v36  ;;  %v13229_v15 = vmul.f32 %v12800_v48, %v13185_v36  ;;  %v5256_v52 = vsel %vm5106_vm11, %v4904_v34, 0.0 }
 0x3c6   : > { %16559 = vst [vmem:[#allocation166_spill] sm:$0xff] %v13214_v12  ;;  %v13233_v5 = vmul.f32 %v12722_v60, %v13185_v36  ;;  %v4710_v31 = vadd.f32 %v12580_v1, %v12628_v2  ;;  %v13239_v4 = vmul.f32 %v12704_v8, %v5255_v49  ;;  %v13242_v18 = vmul.f32 %v12722_v60, %v5255_v49 }
 0x3c7   : > { %v7903_v7 = vpop.f32.mrf.mxu0  ;;  %16560 = vst [vmem:[#allocation41_spill] sm:$0xff] %v13225_v41  ;;  %16561 = vst [vmem:[#allocation93_spill] sm:$0xff] %v13229_v15  ;;  %v13246_v6 = vsel %vm13140_vm9, %v4871_v19, 0.0  ;;  %v4841_v34 = vadd.f32 %v12580_v1, %v12539_v46  ;;  %v4920_v2 = vadd.s32 9, %v12600_v37  ;;  %v13254_v23 = vmul.f32 %v12800_v48, %v5255_v49 }
 0x3c8   : > { %16562 = vst [vmem:[#allocation94_spill] sm:$0xff] %v13233_v5  ;;  %v13257_v53 = vmul.f32 %v13060_v29, %v5255_v49  ;;  %v13260_v27 = vmul.f32 %v12731_v50, %v5255_v49  ;;  %v5886_v19 = vmul.f32 %v12704_v8, %v5256_v52  ;;  %v13264_v7 = vmul.f32 %v12736_v44, %v5255_v49 }
 0x3c9   : > { %v13268_v30 = vmul.f32 %v12676_v57, %v13246_v6  ;;  %v13272_v46 = vmul.f32 %v12633_v59, %v13246_v6  ;;  %v4872_v0 = vmax.f32 %v4710_v31, 0.0  ;;  %v13278_v21 = vmul.f32 %v12662_v33, %v13246_v6 }
 0x3ca   : > { %16563 = vst [vmem:[#allocation95_spill] sm:$0xff] %v13257_v53  ;;  %16564 = vst [vmem:[#allocation167_spill] sm:$0xff] %v13260_v27  ;;  %v13282_v49 = vmul.f32 %v12704_v8, %v13246_v6  ;;  %v13286_v62 = vmul.f32 %v12800_v48, %v13246_v6  ;;  %v13289_v45 = vmul.f32 %v12722_v60, %v5256_v52  ;;  %v5997_v32 = vrot.slane %v5886_v19, 1 }
 0x3cb   : > { %16565 = vst [vmem:[#allocation42_spill] sm:$0xff] %v13264_v7  ;;  %16566 = vst [vmem:[#allocation98_spill] sm:$0xff] %v13268_v30  ;;  %v13292_v31 = vmul.f32 %v12731_v50, %v5256_v52  ;;  %v13296_v53 = vsel %vm13140_vm9, %v4872_v0, 0.0  ;;  %v13299_v9 = vmul.f32 %v12736_v44, %v5256_v52  ;;  %vm4941_vm12 = vcmp.ge.s32.totalorder %v4920_v2, 0 }
 0x3cc   : > { %16567 = vst [vmem:[#allocation96_spill] sm:$0xff] %v13272_v46  ;;  %16568 = vst [vmem:[#allocation88_spill] sm:$0xff] %v13278_v21  ;;  %vm4951_vm15 = vcmp.lt.s32.totalorder %v4920_v2, 32  ;;  %v13306_v17 = vmul.f32 %v12633_v59, %v13296_v53  ;;  %v13314_v52 = vmul.f32 %v12722_v60, %v13246_v6  ;;  %v13318_v2 = vmul.f32 %v12662_v33, %v13296_v53 }
 0x3cd   : > { %16569 = vst [vmem:[#allocation154_spill] sm:$0xff] %v13282_v49  ;;  %16570 = vst [vmem:[#allocation112_spill] sm:$0xff] %v13286_v62  ;;  %v4905_v41 = vmax.f32 %v4841_v34, 0.0  ;;  %v5371_v0 = vmul.f32 %v12633_v59, %v12786_v11  ;;  %v16578_v27 = vrot.slane %v13239_v4, 1  ;;  %v5372_v38 = vmul.f32 %v12633_v59, %v12810_v55 }
 0x3ce   : > { %16571 = vst [vmem:[#allocation114_spill] sm:$0xff] %v13292_v31  ;;  %16572 = vst [vmem:[#allocation89_spill] sm:$0xff] %v13299_v9  ;;  %v5593_v34 = vmul.f32 %v12662_v33, %v12810_v55  ;;  %v13340_v30 = vmul.f32 %v12676_v57, %v13296_v53  ;;  %v5592_v31 = vmul.f32 %v12662_v33, %v12786_v11  ;;  %v16590_v10 = vrot.slane %v13158_v42, 1 }
 0x3cf   : > { %16574 = vst [vmem:[#allocation92_spill] sm:$0xff] %v13314_v52  ;;  %16575 = vst [vmem:[#allocation118_spill] sm:$0xff] %v13318_v2  ;;  %v13331_v21 = vsel %vm2267_vm3, %v16578_v27, %v5997_v32  ;;  %v13349_v32 = vmul.f32 %v12704_v8, %v13296_v53  ;;  %v5479_v9 = vrot.slane %v5371_v0, 1  ;;  %v5295_v52 = vmul.f32 %v12676_v57, %v12786_v11 }
 0x3d0   : > { %v13308_v58 = vpop.f32.mrf.mxu0  ;;  %vm13322_vm0 = vmand %vm4941_vm12, %vm4951_vm15  ;;  %16579 = vst [vmem:[#allocation119_spill] sm:$0xff] %v13340_v30  ;;  %v5480_v30 = vrot.slane %v5372_v38, 1  ;;  %v4713_v5 = vadd.f32 %v12580_v1, %v12654_v13  ;;  %v4846_v46 = vadd.f32 %v12580_v1, %v12773_v26  ;;  %v13370_v0 = vmul.f32 %v12722_v60, %v13296_v53 }
 0x3d1   : > { %16573 = vst [vmem:[#allocation91_spill] sm:$0xff] %v13308_v58  ;;  %16581 = vst [vmem:[#allocation152_spill] sm:$0xff] %v13349_v32  ;;  %v5701_v62 = vrot.slane %v5593_v34, 2  ;;  %v13375_v15 = vmul.f32 %v12633_v59, %v12828_v35  ;;  %v5700_v58 = vrot.slane %v5592_v31, 2  ;;  %vm6929_vm11 = vcmask 654336  }
 0x3d2   : > { %v7906_v19 = vpop.f32.mrf.mxu0  ;;  %vm5042_vm1 = vmand %vm13322_vm0, %vm4962_vm8  ;;  %16583 = vst [vmem:[#allocation120_spill] sm:$0xff] %v13370_v0  ;;  %v5481_v38 = vsel %vm2267_vm3, %v5479_v9, %v5480_v30  ;;  %v4873_v49 = vmax.f32 %v4713_v5, 0.0  ;;  %v16591_v0 = vrot.slane %v13115_v47, 1 }
 0x3d3   : > { %v13345_v19 = vmul.f32 %v12800_v48, %v13296_v53  ;;  %v5257_v12 = vsel %vm5042_vm1, %v4905_v41, 0.0  ;;  %v5548_v11 = vadd.f32 %v5481_v38, %v5295_v52  ;;  %v15672_v26 = vrot.slane %v13375_v15, 1  ;;  %vm5111_vm10 = vmand %vm13322_vm0, %vm5051_vm14 }
 0x3d4   : > { %v13351_v27 = vpop.f32.mrf.mxu0  ;;  %v13388_v34 = vsel %vm13140_vm9, %v4873_v49, 0.0  ;;  %v4718_v41 = vadd.f32 %v12580_v1, %v12906_v54  ;;  %v6393_v31 = vmul.f32 %v12731_v50, %v5257_v12  ;;  %v13397_v52 = vmul.f32 %v12736_v44, %v5257_v12 }
 0x3d5   : > { %16580 = vst [vmem:[#allocation90_spill] sm:$0xff] %v13345_v19  ;;  %16582 = vst [vmem:[#allocation35_spill] sm:$0xff] %v13351_v27  ;;  %v6291_v19 = vmul.f32 %v13060_v29, %v13296_v53  ;;  %v4906_v27 = vmax.f32 %v4846_v46, 0.0  ;;  %v5702_v46 = vsel %vm2603_vm4, %v5700_v58, %v5701_v62  ;;  %v16586_v1 = vrot.slane %v13036_v51, 1 }
 0x3d6   : > { %v7907_v2 = vpop.f32.mrf.mxu0  ;;  %16584 = vst [vmem:[#allocation38_spill] sm:$0xff] %v13397_v52  ;;  %v5769_v49 = vadd.f32 %v5702_v46, %v5548_v11  ;;  %v5296_v58 = vmul.f32 %v12676_v57, %v12810_v55  ;;  %v16587_v38 = vrot.slane %v13120_v28, 2  ;;  %v5349_v51 = vmul.f32 %v12633_v59, %v13388_v34 }
 0x3d7   : > { %v13381_v2 = vmul.f32 %v12662_v33, %v12828_v35  ;;  %v13384_v9 = vadd.f32 %v6291_v19, %v13177_v20  ;;  %v5258_v5 = vsel %vm13322_vm0, %v4906_v27, 0.0  ;;  %v5483_v20 = vsel %vm2267_vm3, %v5480_v30, %v15672_v26 }
 0x3d8   : > { %v16585_v19 = vrot.slane %v13115_v47, 1  ;;  %v4874_v27 = vmax.f32 %v4718_v41, 0.0  ;;  %v16588_v30 = vrot.slane %v13055_v56, 2  ;;  %v13420_v11 = vmul.f32 %v12731_v50, %v5258_v5 }
 0x3d9   : > { %v5838_v46 = vadd.f32 %v13047_v61, %v5769_v49  ;;  %v6501_v26 = vrot.slane %v6393_v31, 1  ;;  %v5994_v61 = vsel %vm2267_vm3, %v16591_v0, %v16590_v10  ;;  %v16594_v55 = vrot.slane %v13167_v16, 2 }
 0x3da   : > { %v5992_v54 = vsel %vm2267_vm3, %v16586_v1, %v16585_v19  ;;  %v6213_v13 = vsel %vm2603_vm4, %v16588_v30, %v16587_v38  ;;  %v6317_v19 = vmul.f32 %v13060_v29, %v5257_v12  ;;  %v5549_v1 = vadd.f32 %v5483_v20, %v5296_v58 }
 0x3db   : > { %v5226_v41 = vsel %vm5076_vm2, %v4874_v27, 0.0  ;;  %v13430_v38 = vmul.f32 %v12662_v33, %v13388_v34  ;;  %v6059_v30 = vadd.f32 %v5992_v54, %v5838_v46  ;;  %v13438_v12 = vmul.f32 %v12736_v44, %v5258_v5 }
 0x3dc   : > { %v5350_v56 = vmul.f32 %v12633_v59, %v5226_v41  ;;  %v5571_v31 = vmul.f32 %v12662_v33, %v5226_v41  ;;  %v16593_v20 = vrot.slane %v13381_v2, 2  ;;  %v5439_v58 = vrot.slane %v5349_v51, 1 }
 0x3dd   : > { %16589 = vst [vmem:[#allocation113_spill] sm:$0xff] %v13430_v38  ;;  %16592 = vst [vmem:[#allocation52_spill] sm:$0xff] %v13438_v12  ;;  %v5278_v46 = vmul.f32 %v12676_v57, %v13388_v34  ;;  %v15679_v47 = vrot.slane %v13430_v38, 2  ;;  %v16595_v52 = vrot.slane %v13120_v28, 2  ;;  %v5785_v51 = vmul.f32 %v12800_v48, %v13388_v34 }
 0x3de   : > { %v5704_v59 = vsel %vm2603_vm4, %v5701_v62, %v16593_v20  ;;  %v5441_v27 = vrot.slane %v5350_v56, 1  ;;  %v5662_v0 = vrot.slane %v5571_v31, 2  ;;  %v6280_v56 = vadd.f32 %v6213_v13, %v6059_v30 }
 0x3df   : > { %v5770_v54 = vadd.f32 %v5704_v59, %v5549_v1  ;;  %v6215_v32 = vsel %vm2603_vm4, %v16595_v52, %v16594_v55  ;;  %v5856_v1 = vmul.f32 %v12704_v8, %v5226_v41  ;;  %v13464_v28 = vmul.f32 %v13060_v29, %v5258_v5 }
 0x3e0   : > { %v5442_v62 = vsel %vm2267_vm3, %v5439_v58, %v5441_v27  ;;  %v5663_v31 = vsel %vm2603_vm4, %v15679_v47, %v5662_v0  ;;  %v16597_v55 = vrot.slane %v13420_v11, 1  ;;  %v13474_v13 = vmul.f32 %v12704_v8, %v13388_v34 }
 0x3e1   : > { %v5839_v20 = vadd.f32 %v13107_v22, %v5770_v54  ;;  %v5531_v59 = vadd.f32 %v5442_v62, %v5278_v46  ;;  %16596 = vst [vmem:[#allocation27_spill] sm:$0xff] %v13464_v28  ;;  %v13476_v22 = vadd.f32 %v6317_v19, %v6280_v56  ;;  %v16600_v54 = vrot.slane %v13306_v17, 1 }
 0x3e2   : > { %v13448_v10 = vpop.f32.mrf.mxu0  ;;  %v13469_v52 = vsel %vm2267_vm3, %v6501_v26, %v16597_v55  ;;  %v5817_v26 = vadd.f32 %v5785_v51, %v13218_v14  ;;  %v5943_v0 = vrot.slane %v5856_v1, 1  ;;  %v13490_v62 = vmul.f32 %v12731_v50, %v13388_v34  ;;  %v16602_v55 = vld [vmem:[#allocation75_spill] sm:$0xff] }
 0x3e3   : > { %16598 = vst [vmem:[#allocation147_spill] sm:$0xff] %v13469_v52  ;;  %16599 = vst [vmem:[#allocation28_spill] sm:$0xff] %v13476_v22  ;;  %v6060_v30 = vadd.f32 %v5994_v61, %v5839_v20  ;;  %v13483_v5 = vadd.f32 %v5663_v31, %v5531_v59  ;;  %v6362_v19 = vmul.f32 %v12731_v50, %v5226_v41  ;;  %v15682_v14 = vrot.slane %v13474_v13, 1  ;;  %v13506_v31 = vld [vmem:[%s15381_s6] ss:$0 sm:$0xff] }
 0x3e4   : > { %v7910_v49 = vpop.f32.mrf.mxu0  ;;  %v13495_v61 = vmul.f32 %v12722_v60, %v13388_v34  ;;  %v6292_v56 = vmul.f32 %v13060_v29, %v13388_v34  ;;  %v6583_v20 = vmul.f32 %v12736_v44, %v5226_v41  ;;  %v13514_v47 = vmul.f32 %v12736_v44, %v13388_v34  ;;  %v16607_v34 = vld [vmem:[#allocation97_spill] sm:$0xff] }
 0x3e5   : > { %v13481_v49 = vsel %vm2267_vm3, %v16600_v54, %v5439_v58  ;;  %v6077_v58 = vmul.f32 %v12722_v60, %v5226_v41  ;;  %v6445_v1 = vrot.slane %v6362_v19, 1  ;;  %v4849_v54 = vadd.f32 %v13506_v31, %v16602_v55 }
 0x3e6   : > { %16601 = vst [vmem:[#allocation148_spill] sm:$0xff] %v13481_v49  ;;  %v13485_v46 = vpop.f32.mrf.mxu0  ;;  %v13510_v27 = vadd.f32 %v6215_v32, %v6060_v30  ;;  %v5297_v41 = vmul.f32 %v12676_v57, %v12828_v35  ;;  %v16605_v19 = vrot.slane %v13375_v15, 1  ;;  %v5944_v12 = vsel %vm2267_vm3, %v15682_v14, %v5943_v0 }
 0x3e7   : > { %v16606_v32 = vrot.slane %v13490_v62, 1  ;;  %v4907_v55 = vmax.f32 %v4849_v54, 0.0  ;;  %v5595_v52 = vmul.f32 %v12662_v33, %v16607_v34  ;;  %v6164_v22 = vrot.slane %v6077_v58, 2 }
 0x3e8   : > { %v7911_v59 = vpop.f32.mrf.mxu0  ;;  %16603 = vst [vmem:[#allocation14_spill] sm:$0xff] %v13510_v27  ;;  %v6324_v28 = vadd.f32 %v6292_v56, %v13220_v25  ;;  %v4914_v14 = vadd.s32 3, %v12600_v37 }
 0x3e9   : > { %v16604_v59 = vrot.slane %v12924_v39, 1  ;;  %v6446_v30 = vsel %vm2267_vm3, %v16606_v32, %v6445_v1  ;;  %v6666_v39 = vrot.slane %v6583_v20, 2  ;;  %v5259_v15 = vsel %vm13322_vm0, %v4907_v55, 0.0 }
 0x3ea   : > { %v15683_v1 = vrot.slane %v13495_v61, 2  ;;  %v6545_v54 = vadd.f32 %v6446_v30, %v6324_v28  ;;  %v15684_v32 = vrot.slane %v13514_v47, 2  ;;  %v13540_v33 = vmul.f32 %v12731_v50, %v5259_v15 }
 0x3eb   : > { %v5485_v51 = vsel %vm2267_vm3, %v16605_v19, %v16604_v59  ;;  %v5705_v59 = vrot.slane %v5595_v52, 2  ;;  %v16608_v19 = vld [vmem:[#allocation39_spill] sm:$0xff]  ;;  %v13543_v25 = vmul.f32 %v12736_v44, %v5259_v15  ;;  %vm4935_vm5 = vcmp.ge.s32.totalorder %v4914_v14, 0 }
 0x3ec   : > { %v5550_v27 = vadd.f32 %v5485_v51, %v5297_v41  ;;  %v4721_v0 = vadd.f32 %v13506_v31, %v16608_v19  ;;  %vm4945_vm6 = vcmp.lt.s32.totalorder %v4914_v14, 32  ;;  %v13545_v52 = vadd.f32 %v5944_v12, %v5817_v26 }
 0x3ed   : > { %16609 = vst [vmem:[#allocation34_spill] sm:$0xff] %v13543_v25  ;;  %v13550_v56 = vsel %vm2603_vm4, %v15683_v1, %v6164_v22  ;;  %v16610_v28 = vrot.slane %v13381_v2, 2  ;;  %v16611_v51 = vrot.slane %v13239_v4, 1  ;;  %v16612_v41 = vrot.slane %v13158_v42, 1  ;;  %vm13560_vm7 = vmand %vm4935_vm5, %vm4945_vm6  ;;  %v16615_v4 = vld [vmem:[#allocation105_spill] sm:$0xff] }
 0x3ee   : > { %v4875_v58 = vmax.f32 %v4721_v0, 0.0  ;;  %v6667_v12 = vsel %vm2603_vm4, %v15684_v32, %v6666_v39  ;;  %v6504_v26 = vrot.slane %v13540_v33, 1  ;;  %vm5012_vm9 = vmand %vm13560_vm7, %vm4962_vm8  ;;  %v4854_v42 = vadd.f32 %v13506_v31, %v16615_v4  ;;  %v13626_v1 = vld [vmem:[%s15382_s7] ss:$0 sm:$0xff] }
 0x3ef   : > { %v5706_v20 = vsel %vm2603_vm4, %v16610_v28, %v5705_v59  ;;  %v5996_v30 = vsel %vm2267_vm3, %v16612_v41, %v16611_v51  ;;  %v13574_v2 = vadd.f32 %v6667_v12, %v6545_v54  ;;  %v16616_v14 = vrot.slane %v13242_v18, 2  ;;  %vm5081_vm12 = vmand %vm13560_vm7, %vm5051_vm14 }
 0x3f0   : > { %v5771_v22 = vadd.f32 %v5706_v20, %v5550_v27  ;;  %v16617_v19 = vrot.slane %v13167_v16, 2  ;;  %v13581_v39 = vsel %vm5012_vm9, %v4875_v58, 0.0  ;;  %v4726_v27 = vadd.f32 %v13506_v31, %v13169_v63  ;;  %v13595_v16 = vld [vmem:[%s15382_s7 + $0x1] ss:$0 sm:$0xff]  ;;  %v13604_v63 = vld [vmem:[%s15382_s7 + $0x2] ss:$0 sm:$0xff] }
 0x3f1   : > { %v6319_v28 = vmul.f32 %v13060_v29, %v5259_v15  ;;  %v5298_v54 = vmul.f32 %v12676_v57, %v16607_v34  ;;  %v13599_v58 = vmul.f32 %v13595_v16, %v13581_v39  ;;  %v16620_v57 = vld [vmem:[#allocation157_spill] sm:$0xff]  ;;  %v16622_v12 = vrot.slane %v13289_v45, 2 }
 0x3f2   : > { %v6217_v0 = vsel %vm2603_vm4, %v16617_v19, %v16616_v14  ;;  %v5840_v33 = vadd.f32 %v13180_v43, %v5771_v22  ;;  %v13608_v43 = vmul.f32 %v13604_v63, %v13581_v39  ;;  %v16621_v15 = vrot.slane %v16620_v57, 2 }
 0x3f3   : > { %v13590_v51 = vpop.f32.mrf.mxu0  ;;  %16618 = vst [vmem:[#allocation17_spill] sm:$0xff] %v13599_v58  ;;  %v16623_v22 = vmov %v16616_v14  ;;  %v16624_v19 = vrot.slane %v13420_v11, 1  ;;  %v4908_v45 = vmax.f32 %v4854_v42, 0.0  ;;  %v13634_v18 = vmul.f32 %v12800_v48, %v13581_v39  ;;  %v16628_v42 = vld [vmem:[#allocation47_spill] sm:$0xff] }
 0x3f4   : > { %16619 = vst [vmem:[#allocation164_spill] sm:$0xff] %v13608_v43  ;;  %v5708_v41 = vsel %vm2603_vm4, %v5705_v59, %v16621_v15  ;;  %v6219_v4 = vsel %vm2603_vm4, %v16623_v22, %v16622_v12  ;;  %v6061_v14 = vadd.f32 %v5996_v30, %v5840_v33  ;;  %v13630_v59 = vmul.f32 %v13626_v1, %v13581_v39  ;;  %v16627_v30 = vld [vmem:[#allocation159_spill] sm:$0xff] }
 0x3f5   : > { %v13621_v20 = vsel %vm2267_vm3, %v16624_v19, %v6504_v26  ;;  %v7914_v57 = vpop.f32.mrf.mxu0  ;;  %v13638_v11 = vmul.f32 %v12704_v8, %v13581_v39  ;;  %v5551_v33 = vadd.f32 %v16627_v30, %v5298_v54  ;;  %v4876_v15 = vmax.f32 %v4726_v27, 0.0  ;;  %v16639_v54 = vld [vmem:[#allocation161_spill] sm:$0xff] }
 0x3f6   : > { %16625 = vst [vmem:[#allocation50_spill] sm:$0xff] %v13621_v20  ;;  %16626 = vst [vmem:[#allocation18_spill] sm:$0xff] %v13630_v59  ;;  %v13643_v12 = vmul.f32 %v12722_v60, %v13581_v39  ;;  %v5260_v22 = vsel %vm13322_vm0, %v4908_v45, 0.0  ;;  %v4857_v19 = vadd.f32 %v13506_v31, %v16628_v42  ;;  %v4729_v57 = vadd.f32 %v13506_v31, %v13195_v3 }
 0x3f7   : > { %v13651_v32 = vpop.f32.mrf.mxu0  ;;  %v5772_v27 = vadd.f32 %v5708_v41, %v5551_v33  ;;  %v6396_v30 = vmul.f32 %v12731_v50, %v5260_v22  ;;  %v6282_v60 = vadd.f32 %v6217_v0, %v6061_v14  ;;  %v13657_v20 = vmul.f32 %v12736_v44, %v5260_v22  ;;  %v16640_v50 = vld [vmem:[#allocation103_spill] sm:$0xff] }
 0x3f8   : > { %v13661_v45 = vsel %vm13560_vm7, %v4876_v15, 0.0  ;;  %v4909_v42 = vmax.f32 %v4857_v19, 0.0  ;;  %v4877_v41 = vmax.f32 %v4729_v57, 0.0  ;;  %v6320_v15 = vmul.f32 %v13060_v29, %v5260_v22  ;;  %v13685_v19 = vld [vmem:[%s15382_s7 + $0x4] ss:$0 sm:$0xff] }
 0x3f9   : > { %16629 = vst [vmem:[#allocation84_spill] sm:$0xff] %v13657_v20  ;;  %v7915_v25 = vpop.f32.mrf.mxu0  ;;  %v5841_v3 = vadd.f32 %v13254_v23, %v5772_v27  ;;  %v6506_v34 = vrot.slane %v6396_v30, 1  ;;  %v13666_v8 = vmul.f32 %v13595_v16, %v13661_v45  ;;  %v6351_v33 = vadd.f32 %v6319_v28, %v6282_v60  ;;  %v16633_v23 = vld [vmem:[#allocation43_spill] sm:$0xff]  ;;  %v13706_v30 = vld [vmem:[%s15382_s7 + $0x5] ss:$0 sm:$0xff] }
 0x3fa   : > { %v13671_v44 = vmul.f32 %v13604_v63, %v13661_v45  ;;  %v16632_v25 = vld [vmem:[#allocation158_spill] sm:$0xff]  ;;  %v13689_v57 = vmul.f32 %v13685_v19, %v13661_v45  ;;  %v13694_v27 = vmul.f32 %v13626_v1, %v13661_v45  ;;  %v13710_v60 = vmul.f32 %v13706_v30, %v13661_v45 }
 0x3fb   : > { %16630 = vst [vmem:[#allocation16_spill] sm:$0xff] %v13666_v8  ;;  %v6252_v0 = vadd.f32 %v16633_v23, %v16632_v25  ;;  %v6062_v14 = vadd.f32 %v13331_v21, %v5841_v3  ;;  %v6507_v28 = vsel %vm2267_vm3, %v6504_v26, %v6506_v34  ;;  %v13699_v26 = vmul.f32 %v12800_v48, %v13661_v45  ;;  %v13726_v21 = vld [vmem:[%s15382_s7 + $0x8] ss:$0 sm:$0xff] }
 0x3fc   : > { %16631 = vst [vmem:[#allocation60_spill] sm:$0xff] %v13671_v44  ;;  %16634 = vst [vmem:[#allocation123_spill] sm:$0xff] %v13694_v27  ;;  %v13701_v22 = vadd.f32 %v6507_v28, %v6351_v33  ;;  %v5261_v3 = vsel %vm5111_vm10, %v4909_v42, 0.0  ;;  %v13714_v25 = vsel %vm13560_vm7, %v4877_v41, 0.0  ;;  %v13720_v33 = vld [vmem:[%s15382_s7 + $0x7] ss:$0 sm:$0xff]  ;;  %v6253_v7 = vadd.f32 %v16640_v50, %v16639_v54 }
 0x3fd   : > { %16635 = vst [vmem:[#allocation53_spill] sm:$0xff] %v13699_v26  ;;  %v6283_v23 = vadd.f32 %v6219_v4, %v6062_v14  ;;  %v6397_v28 = vmul.f32 %v13720_v33, %v5261_v3  ;;  %v6618_v42 = vmul.f32 %v13726_v21, %v5261_v3  ;;  %v13732_v4 = vmul.f32 %v13595_v16, %v13714_v25  ;;  %v16646_v26 = vld [vmem:[#allocation35_spill] sm:$0xff] }
 0x3fe   : > { %16636 = vst [vmem:[#allocation29_spill] sm:$0xff] %v13701_v22  ;;  %v13736_v14 = vmul.f32 %v13604_v63, %v13714_v25  ;;  %v13742_v44 = vmul.f32 %v13626_v1, %v13714_v25  ;;  %v13746_v3 = vmul.f32 %v12800_v48, %v13714_v25  ;;  %v13750_v41 = vmul.f32 %v13685_v19, %v13714_v25 }
 0x3ff   : > { %16637 = vst [vmem:[#allocation149_spill] sm:$0xff] %v13732_v4  ;;  %v6352_v22 = vadd.f32 %v6320_v15, %v6283_v23  ;;  %v6508_v35 = vrot.slane %v6397_v28, 1  ;;  %v6729_v43 = vrot.slane %v6618_v42, 2  ;;  %v13754_v27 = vmul.f32 %v13706_v30, %v13714_v25 }
 0x400   : > { %16638 = vst [vmem:[#allocation30_spill] sm:$0xff] %v13736_v14  ;;  %16641 = vst [vmem:[#allocation150_spill] sm:$0xff] %v13742_v44  ;;  %v6289_v54 = vmul.f32 %v13060_v29, %v13185_v36  ;;  %v16643_v15 = vrot.slane %v13657_v20, 2  ;;  %v6290_v48 = vmul.f32 %v13060_v29, %v13246_v6  ;;  %v6358_v28 = vmul.f32 %v13720_v33, %v13185_v36  ;;  %v16645_v14 = vld [vmem:[#allocation91_spill] sm:$0xff] }
 0x401   : > { %16642 = vst [vmem:[#allocation15_spill] sm:$0xff] %v13746_v3  ;;  %v6509_v50 = vsel %vm2267_vm3, %v6506_v34, %v6508_v35  ;;  %v6359_v58 = vmul.f32 %v13720_v33, %v13246_v6  ;;  %v6360_v35 = vmul.f32 %v13720_v33, %v13296_v53  ;;  %v6579_v34 = vmul.f32 %v13726_v21, %v13185_v36 }
 0x402   : > { %v6730_v23 = vsel %vm2603_vm4, %v16643_v15, %v6729_v43  ;;  %v6573_v42 = vadd.f32 %v6509_v50, %v6352_v22  ;;  %v6321_v8 = vadd.f32 %v6289_v54, %v6252_v0  ;;  %v6580_v43 = vmul.f32 %v13726_v21, %v13246_v6 }
 0x403   : > { %v6438_v50 = vrot.slane %v6358_v28, 1  ;;  %v6439_v44 = vrot.slane %v6359_v58, 1  ;;  %v6581_v59 = vmul.f32 %v13726_v21, %v13296_v53  ;;  %v6322_v20 = vadd.f32 %v6290_v48, %v6253_v7  ;;  %v13794_v48 = vld [vmem:[%s15383_s8] ss:$0 sm:$0xff] }
 0x404   : > { %v13778_v22 = vadd.f32 %v6730_v23, %v6573_v42  ;;  %v6441_v0 = vrot.slane %v6360_v35, 1  ;;  %v6660_v54 = vrot.slane %v6580_v43, 2  ;;  %v4734_v3 = vadd.f32 %v13506_v31, %v16645_v14 }
 0x405   : > { %v6440_v36 = vsel %vm2267_vm3, %v6438_v50, %v6439_v44  ;;  %v6659_v49 = vrot.slane %v6579_v34, 2  ;;  %v6662_v6 = vrot.slane %v6581_v59, 2  ;;  %v4737_v23 = vadd.f32 %v13506_v31, %v16646_v26 }
 0x406   : > { %v13776_v15 = vpop.f32.mrf.mxu0  ;;  %16644 = vst [vmem:[#allocation21_spill] sm:$0xff] %v13778_v22  ;;  %v6442_v28 = vsel %vm2267_vm3, %v6439_v44, %v6441_v0  ;;  %v16647_v58 = vrot.slane %v13490_v62, 1  ;;  %v6542_v7 = vadd.f32 %v6440_v36, %v6321_v8  ;;  %v4878_v42 = vmax.f32 %v4734_v3, 0.0 }
 0x407   : > { %v6543_v14 = vadd.f32 %v6442_v28, %v6322_v20  ;;  %v6661_v59 = vsel %vm2603_vm4, %v6659_v49, %v6660_v54  ;;  %v13805_v62 = vadd.f32 %v13794_v48, %v13574_v2  ;;  %v6663_v8 = vsel %vm2603_vm4, %v6660_v54, %v6662_v6  ;;  %v13832_v28 = vld [vmem:[%s15382_s7 + $0x3] ss:$0 sm:$0xff] }
 0x408   : > { %v7918_v38 = vpop.f32.mrf.mxu0  ;;  %v6444_v53 = vsel %vm2267_vm3, %v6441_v0, %v16647_v58  ;;  %v16648_v44 = vrot.slane %v13514_v47, 2  ;;  %v6763_v35 = vadd.f32 %v6661_v59, %v6542_v7  ;;  %v4879_v20 = vmax.f32 %v4737_v23, 0.0 }
 0x409   : > { %v6764_v49 = vadd.f32 %v6663_v8, %v6543_v14  ;;  %v13813_v3 = vsel %vm13560_vm7, %v4878_v42, 0.0  ;;  %v6544_v43 = vadd.f32 %v6444_v53, %v13384_v9  ;;  %v4742_v2 = vadd.f32 %v13506_v31, %v13448_v10 }
 0x40a   : > { %v13796_v38 = vpop.f32.mrf.mxu0  ;;  %v6665_v26 = vsel %vm2603_vm4, %v6662_v6, %v16648_v44  ;;  %v6802_v50 = vadd.f32 %v13794_v48, %v6763_v35  ;;  %v5231_v0 = vsel %vm5081_vm12, %v4879_v20, 0.0  ;;  %v5354_v47 = vmul.f32 %v13595_v16, %v13813_v3 }
 0x40b   : > { %v4915_v54 = vadd.s32 4, %v12600_v37  ;;  %v6803_v36 = vadd.f32 %v13794_v48, %v6764_v49  ;;  %v5355_v6 = vmul.f32 %v13595_v16, %v5231_v0  ;;  %v13826_v55 = vmul.f32 %v13604_v63, %v13813_v3 }
 0x40c   : > { %v7919_v34 = vpop.f32.mrf.mxu0  ;;  %v5576_v9 = vmul.f32 %v13604_v63, %v5231_v0  ;;  %v6834_v23 = vmax.f32 %v6802_v50, 0.0  ;;  %v5448_v10 = vrot.slane %v5354_v47, 1  ;;  %v5789_v58 = vmul.f32 %v13832_v28, %v13813_v3 }
 0x40d   : > { %16649 = vst [vmem:[#allocation69_spill] sm:$0xff] %v13826_v55  ;;  %v13838_v53 = vmul.f32 %v13685_v19, %v13813_v3  ;;  %v6835_v7 = vmax.f32 %v6803_v36, 0.0  ;;  %v5450_v14 = vrot.slane %v5355_v6, 1  ;;  %v15700_v59 = vrot.slane %v13826_v55, 2 }
 0x40e   : > { %v5671_v42 = vrot.slane %v5576_v9, 2  ;;  %v5282_v8 = vmul.f32 %v13626_v1, %v13813_v3  ;;  %v16651_v44 = vrot.slane %v13732_v4, 1  ;;  %v5821_v20 = vadd.f32 %v5789_v58, %v13483_v5 }
 0x40f   : > { %16650 = vst [vmem:[#allocation20_spill] sm:$0xff] %v13838_v53  ;;  %v5861_v34 = vmul.f32 %v13685_v19, %v5231_v0  ;;  %v6866_v49 = vpack.c.bf16 %v6835_v7, %v6834_v23  ;;  %v5451_v50 = vsel %vm2267_vm3, %v5448_v10, %v5450_v14  ;;  %v13856_v36 = vmul.f32 %v13706_v30, %v13813_v3 }
 0x410   : > { %v13846_v35 = vsel %vm2267_vm3, %v16651_v44, %v5448_v10  ;;  %v5672_v47 = vsel %vm2603_vm4, %v15700_v59, %v5671_v42  ;;  %v5535_v6 = vadd.f32 %v5451_v50, %v5282_v8  ;;  %v15702_v9 = vrot.slane %v13838_v53, 1 }
 0x411   : > { %16652 = vst [vmem:[#allocation24_spill] sm:$0xff] %v13846_v35  ;;  %16653 = vst [vmem:[#allocation37_spill] sm:$0xff] %v13856_v36  ;;  %v5952_v44 = vrot.slane %v5861_v34, 1  ;;  %v6082_v22 = vmul.f32 %v13706_v30, %v5231_v0  ;;  %7978 = vmatprep.mubr.msk.bf16.mxu1 %vm6929_vm11, %v6866_v49  ;;  %v15701_v5 = vrot.slane %v13856_v36, 2  ;;  %v13863_v23 = vmul.f32 %v13720_v33, %v5231_v0  ;;  %v16669_v35 = vld [vmem:[#allocation112_spill] sm:$0xff] }
 0x412   : > { %v6765_v10 = vadd.f32 %v6665_v26, %v6544_v43  ;;  %v6837_v58 = vmax.f32 %v13805_v62, 0.0  ;;  %v13866_v7 = vadd.f32 %v5672_v47, %v5535_v6  ;;  %v13872_v8 = vmul.f32 %v13726_v21, %v5231_v0  ;;  %v16658_v47 = vld [vmem:[#allocation154_spill] sm:$0xff] }
 0x413   : > { %v5953_v14 = vsel %vm2267_vm3, %v15702_v9, %v5952_v44  ;;  %v6173_v42 = vrot.slane %v6082_v22, 2  ;;  %v4880_v50 = vmax.f32 %v4742_v2, 0.0  ;;  %vm4936_vm15 = vcmp.ge.s32.totalorder %v4915_v54, 0  ;;  %v16660_v44 = vld [vmem:[#allocation166_spill] sm:$0xff]  ;;  %v16664_v9 = vld [vmem:[#allocation152_spill] sm:$0xff] }
 0x414   : > { %v13874_v34 = vadd.f32 %v5953_v14, %v5821_v20  ;;  %v6804_v49 = vadd.f32 %v13794_v48, %v6765_v10  ;;  %vm4946_vm0 = vcmp.lt.s32.totalorder %v4915_v54, 32  ;;  %v4745_v22 = vadd.f32 %v13506_v31, %v13485_v46 }
 0x415   : > { %v13882_v62 = vsel %vm2603_vm4, %v15701_v5, %v6173_v42  ;;  %v4750_v26 = vadd.f32 %v13506_v31, %v13590_v51  ;;  %vm13890_vm1 = vmand %vm4936_vm15, %vm4946_vm0  ;;  %v16659_v6 = vrot.slane %v16658_v47, 1  ;;  %v16661_v10 = vrot.slane %v16660_v44, 1  ;;  %v16662_v42 = vld [vmem:[#allocation101_spill] sm:$0xff] }
 0x416   : > { %16654 = vst [vmem:[#allocation155_spill] sm:$0xff] %v13874_v34  ;;  %16655 = vst [vmem:[#allocation153_spill] sm:$0xff] %v13882_v62  ;;  %v6836_v2 = vmax.f32 %v6804_v49, 0.0  ;;  %v4881_v46 = vmax.f32 %v4745_v22, 0.0  ;;  %v16663_v49 = vld [vmem:[#allocation93_spill] sm:$0xff]  ;;  %v16665_v43 = vrot.slane %v16664_v9, 1  ;;  %v6585_v36 = vmul.f32 %v13726_v21, %v13661_v45 }
 0x417   : > { %v5938_v54 = vsel %vm2267_vm3, %v16661_v10, %v16659_v6  ;;  %vm5017_vm2 = vmand %vm13890_vm1, %vm4962_vm8  ;;  %v4882_v51 = vmax.f32 %v4750_v26, 0.0  ;;  %v5814_v5 = vadd.f32 %v16663_v49, %v16662_v42  ;;  %v16666_v0 = vmov %v16659_v6 }
 0x418   : > { %v5940_v55 = vsel %vm2267_vm3, %v16666_v0, %v16665_v43  ;;  %v6867_v6 = vpack.c.bf16 %v6837_v58, %v6836_v2  ;;  %v13911_v10 = vsel %vm5017_vm2, %v4880_v50, 0.0  ;;  %v16672_v43 = vld [vmem:[#allocation94_spill] sm:$0xff]  ;;  %vm5086_vm5 = vmand %vm13890_vm1, %vm5051_vm14  ;;  %vm7533_vm15 = vcmask 1042434  }
 0x419   : > { %v13877_v59 = vpop.f32.mrf.mxu0  ;;  %16667 = vst [vmem:[#allocation36_spill] sm:$0xff] %v13911_v10  ;;  %v13919_v22 = vmul.f32 %v13595_v16, %v13911_v10  ;;  %v13923_v26 = vmul.f32 %v13604_v63, %v13911_v10  ;;  %v6035_v47 = vadd.f32 %v5938_v54, %v5814_v5  ;;  %v6157_v0 = vrot.slane %v16672_v43, 2 }
 0x41a   : > { %7979 = vmatmul.mubr.msk.bf16.vlgmr.msra.gmra.mxu1 %vm6929_vm11, %v6867_v6  ;;  %v13929_v58 = vmul.f32 %v13685_v19, %v13911_v10  ;;  %v13937_v50 = vsel %vm13890_vm1, %v4882_v51, 0.0  ;;  %v13941_v5 = vmul.f32 %v13626_v1, %v13911_v10  ;;  %v13945_v54 = vmul.f32 %v13832_v28, %v13911_v10  ;;  %v16688_v51 = vld [vmem:[#allocation92_spill] sm:$0xff] }
 0x41b   : > { %v7922_v14 = vpop.f32.mrf.mxu0  ;;  %16670 = vst [vmem:[#allocation116_spill] sm:$0xff] %v13919_v22  ;;  %16671 = vst [vmem:[#allocation115_spill] sm:$0xff] %v13923_v26  ;;  %v13949_v49 = vmul.f32 %v13706_v30, %v13911_v10  ;;  %v13995_v22 = vmul.f32 %v13832_v28, %v13937_v50  ;;  %v6158_v44 = vrot.slane %v16688_v51, 2  ;;  %v6364_v51 = vmul.f32 %v13720_v33, %v13661_v45 }
 0x41c   : > { %v16668_v14 = vld [vmem:[#allocation106_spill] sm:$0xff]  ;;  %16673 = vst [vmem:[#allocation117_spill] sm:$0xff] %v13929_v58  ;;  %16675 = vst [vmem:[#allocation121_spill] sm:$0xff] %v13941_v5  ;;  %v13991_v5 = vmul.f32 %v13604_v63, %v13937_v50  ;;  %v14018_v58 = vmul.f32 %v13720_v33, %v13714_v25  ;;  %vm7535_vm0 = vcmask 1043459   ;;  %vm7539_vm2 = vcmask 1045509  }
 0x41d   : > { %v5815_v4 = vadd.f32 %v16669_v35, %v16668_v14  ;;  %v13915_v62 = vpop.f32.mrf.mxu0  ;;  %v13933_v35 = vsel %vm13890_vm1, %v4881_v46, 0.0  ;;  %16676 = vst [vmem:[#allocation122_spill] sm:$0xff] %v13945_v54  ;;  %16677 = vst [vmem:[#allocation56_spill] sm:$0xff] %v13949_v49  ;;  %v13986_v14 = vmul.f32 %v13626_v1, %v13937_v50  ;;  %v6159_v54 = vsel %vm2603_vm4, %v6157_v0, %v6158_v44 }
 0x41e   : > { %16674 = vst [vmem:[#allocation51_spill] sm:$0xff] %v13933_v35  ;;  %v13953_v46 = vmul.f32 %v13595_v16, %v13933_v35  ;;  %v13963_v6 = vmul.f32 %v13685_v19, %v13933_v35  ;;  %v13968_v43 = vmul.f32 %v13626_v1, %v13933_v35  ;;  %v13982_v26 = vmul.f32 %v13706_v30, %v13933_v35 }
 0x41f   : > { %v6036_v2 = vadd.f32 %v5940_v55, %v5815_v4  ;;  %v7923_v42 = vpop.f32.mrf.mxu0  ;;  %v13959_v55 = vmul.f32 %v13604_v63, %v13933_v35  ;;  %v13976_v4 = vmul.f32 %v13595_v16, %v13937_v50  ;;  %16685 = vst [vmem:[#allocation151_spill] sm:$0xff] %v13986_v14  ;;  %16686 = vst [vmem:[#allocation31_spill] sm:$0xff] %v13991_v5  ;;  %v6448_v34 = vrot.slane %v6364_v51, 1 }
 0x420   : > { %16678 = vst [vmem:[#allocation124_spill] sm:$0xff] %v13953_v46  ;;  %16680 = vst [vmem:[#allocation25_spill] sm:$0xff] %v13963_v6  ;;  %v13972_v42 = vmul.f32 %v13832_v28, %v13933_v35  ;;  %v14001_v46 = vmul.f32 %v13685_v19, %v13937_v50  ;;  %v6256_v49 = vadd.f32 %v6159_v54, %v6035_v47  ;;  %v15722_v10 = vrot.slane %v14018_v58, 1 }
 0x421   : > { %16679 = vst [vmem:[#allocation125_spill] sm:$0xff] %v13959_v55  ;;  %16681 = vst [vmem:[#allocation26_spill] sm:$0xff] %v13968_v43  ;;  %v6293_v43 = vmul.f32 %v13060_v29, %v13581_v39  ;;  %v6584_v0 = vmul.f32 %v13726_v21, %v13581_v39 }
 0x422   : > { %16682 = vst [vmem:[#allocation145_spill] sm:$0xff] %v13972_v42  ;;  %16683 = vst [vmem:[#allocation146_spill] sm:$0xff] %v13976_v4  ;;  %v16689_v42 = vld [vmem:[#allocation120_spill] sm:$0xff] }
 0x423   : > { %16684 = vst [vmem:[#allocation33_spill] sm:$0xff] %v13982_v26  ;;  %16687 = vst [vmem:[#allocation32_spill] sm:$0xff] %v13995_v22  ;;  %v15720_v14 = vrot.slane %v16689_v42, 2  ;;  %v6294_v26 = vmul.f32 %v13060_v29, %v13661_v45  ;;  %v6363_v22 = vmul.f32 %v13720_v33, %v13581_v39  ;;  %v6325_v35 = vadd.f32 %v6293_v43, %v6256_v49 }
 0x424   : > { %v6668_v47 = vrot.slane %v6584_v0, 2  ;;  %v6669_v39 = vrot.slane %v6585_v36, 2  ;;  %v6451_v45 = vsel %vm2267_vm3, %v6448_v34, %v15722_v10  ;;  %v4758_v43 = vadd.f32 %v13506_v31, %v13776_v15  ;;  %v16691_v36 = vld [vmem:[#allocation90_spill] sm:$0xff] }
 0x425   : > { %v6161_v55 = vsel %vm2603_vm4, %v6158_v44, %v15720_v14  ;;  %v6447_v29 = vrot.slane %v6363_v22, 1  ;;  %v14029_v44 = vmul.f32 %v13726_v21, %v13714_v25  ;;  %v4753_v22 = vadd.f32 %v13506_v31, %v13651_v32  ;;  %v16690_v32 = vld [vmem:[#allocation48_spill] sm:$0xff] }
 0x426   : > { %v6257_v6 = vadd.f32 %v6161_v55, %v6036_v2  ;;  %v5816_v0 = vadd.f32 %v16691_v36, %v16690_v32  ;;  %v4884_v15 = vmax.f32 %v4758_v43, 0.0 }
 0x427   : > { %v6449_v14 = vsel %vm2267_vm3, %v6447_v29, %v6448_v34  ;;  %v15721_v55 = vrot.slane %v14029_v44, 2 }
 0x428   : > { %v14024_v53 = vpop.f32.mrf.mxu0  ;;  %v6326_v54 = vadd.f32 %v6294_v26, %v6257_v6  ;;  %v6546_v49 = vadd.f32 %v6449_v14, %v6325_v35  ;;  %v6670_v26 = vsel %vm2603_vm4, %v6668_v47, %v6669_v39  ;;  %v4883_v6 = vmax.f32 %v4753_v22, 0.0 }
 0x429   : > { %v6672_v34 = vsel %vm2603_vm4, %v6669_v39, %v15721_v55  ;;  %v16692_v14 = vrot.slane %v13474_v13, 1  ;;  %v16693_v47 = vrot.slane %v16664_v9, 1  ;;  %v5236_v43 = vsel %vm5086_vm5, %v4884_v15, 0.0 }
 0x42a   : > { %v7926_v2 = vpop.f32.mrf.mxu0  ;;  %v6547_v51 = vadd.f32 %v6451_v45, %v6326_v54  ;;  %v6767_v35 = vadd.f32 %v6670_v26, %v6546_v49  ;;  %v14064_v32 = vsel %vm13890_vm1, %v4883_v6, 0.0  ;;  %v5360_v36 = vmul.f32 %v13595_v16, %v5236_v43 }
 0x42b   : > { %v5942_v54 = vsel %vm2267_vm3, %v16693_v47, %v16692_v14  ;;  %v14060_v2 = vmul.f32 %v13706_v30, %v13937_v50  ;;  %v5359_v13 = vmul.f32 %v13595_v16, %v14064_v32  ;;  %v14073_v14 = vmul.f32 %v13604_v63, %v14064_v32 }
 0x42c   : > { %v14047_v29 = vpop.f32.mrf.mxu0  ;;  %v6768_v45 = vadd.f32 %v6672_v34, %v6547_v51  ;;  %v6806_v49 = vadd.f32 %v13794_v48, %v6767_v35  ;;  %v6037_v9 = vadd.f32 %v5942_v54, %v5816_v0  ;;  %v5581_v20 = vmul.f32 %v13604_v63, %v5236_v43 }
 0x42d   : > { %16694 = vst [vmem:[#allocation136_spill] sm:$0xff] %v14073_v14  ;;  %v5457_v6 = vrot.slane %v5359_v13, 1  ;;  %v5793_v34 = vmul.f32 %v13832_v28, %v14064_v32  ;;  %v14080_v35 = vmul.f32 %v13685_v19, %v14064_v32  ;;  %v5459_v15 = vrot.slane %v5360_v36, 1 }
 0x42e   : > { %v7927_v39 = vpop.f32.mrf.mxu0  ;;  %v6807_v26 = vadd.f32 %v13794_v48, %v6768_v45  ;;  %v6838_v51 = vmax.f32 %v6806_v49, 0.0  ;;  %v15725_v47 = vrot.slane %v14073_v14, 2  ;;  %v5680_v54 = vrot.slane %v5581_v20, 2 }
 0x42f   : > { %v5286_v45 = vmul.f32 %v13626_v1, %v14064_v32  ;;  %v16695_v39 = vrot.slane %v13976_v4, 1  ;;  %v5825_v13 = vadd.f32 %v5793_v34, %v13866_v7  ;;  %v5866_v22 = vmul.f32 %v13685_v19, %v5236_v43 }
 0x430   : > { %v6839_v0 = vmax.f32 %v6807_v26, 0.0  ;;  %v5460_v10 = vsel %vm2267_vm3, %v5457_v6, %v5459_v15  ;;  %v5681_v26 = vsel %vm2603_vm4, %v15725_v47, %v5680_v54  ;;  %v14098_v36 = vmul.f32 %v13706_v30, %v14064_v32 }
 0x431   : > { %v14088_v49 = vsel %vm2267_vm3, %v16695_v39, %v5457_v6  ;;  %v5539_v20 = vadd.f32 %v5460_v10, %v5286_v45  ;;  %v15727_v5 = vrot.slane %v14080_v35, 1  ;;  %v5961_v39 = vrot.slane %v5866_v22, 1 }
 0x432   : > { %16696 = vst [vmem:[#allocation83_spill] sm:$0xff] %v14088_v49  ;;  %v6868_v55 = vpack.c.bf16 %v6839_v0, %v6838_v51  ;;  %v6087_v49 = vmul.f32 %v13706_v30, %v5236_v43  ;;  %v15726_v51 = vrot.slane %v14098_v36, 2  ;;  %v14106_v6 = vmul.f32 %v13720_v33, %v5236_v43 }
 0x433   : > { %v16697_v34 = vrot.slane %v13495_v61, 2  ;;  %v16698_v0 = vrot.slane %v16689_v42, 2  ;;  %v14113_v15 = vadd.f32 %v5681_v26, %v5539_v20  ;;  %v5962_v22 = vsel %vm2267_vm3, %v15727_v5, %v5961_v39  ;;  %v14125_v61 = vld [vmem:[%s15382_s7 + $0x6] ss:$0 sm:$0xff] }
 0x434   : > { %7982 = vmatprep.mubr.msk.bf16.mxu1 %vm6929_vm11, %v6868_v55  ;;  %v6182_v54 = vrot.slane %v6087_v49, 2  ;;  %v14118_v55 = vadd.f32 %v5962_v22, %v5825_v13  ;;  %v6259_v47 = vadd.f32 %v13550_v56, %v13545_v52  ;;  %v6295_v42 = vmul.f32 %v14125_v61, %v13714_v25 }
 0x435   : > { %v6163_v10 = vsel %vm2603_vm4, %v16698_v0, %v16697_v34  ;;  %v6296_v26 = vmul.f32 %v14125_v61, %v13813_v3  ;;  %v6366_v49 = vmul.f32 %v13720_v33, %v13813_v3  ;;  %v6587_v52 = vmul.f32 %v13726_v21, %v13813_v3 }
 0x436   : > { %v6258_v45 = vadd.f32 %v6163_v10, %v6037_v9  ;;  %v14134_v9 = vsel %vm2603_vm4, %v15726_v51, %v6182_v54  ;;  %v4761_v56 = vadd.f32 %v13506_v31, %v13796_v38  ;;  %v14143_v13 = vmul.f32 %v13726_v21, %v5236_v43 }
 0x437   : > { %v6328_v25 = vadd.f32 %v6296_v26, %v6259_v47  ;;  %v4916_v20 = vadd.s32 5, %v12600_v37  ;;  %v4766_v39 = vadd.f32 %v13506_v31, %v13877_v59  ;;  %v6452_v10 = vrot.slane %v6366_v49, 1 }
 0x438   : > { %v6327_v0 = vadd.f32 %v6295_v42, %v6258_v45  ;;  %v6673_v22 = vrot.slane %v6587_v52, 2  ;;  %v4885_v54 = vmax.f32 %v4761_v56, 0.0  ;;  %v4769_v38 = vadd.f32 %v13506_v31, %v13915_v62 }
 0x439   : > { %vm4937_vm6 = vcmp.ge.s32.totalorder %v4916_v20, 0  ;;  %vm4947_vm7 = vcmp.lt.s32.totalorder %v4916_v20, 32  ;;  %v4886_v3 = vmax.f32 %v4766_v39, 0.0  ;;  %v16699_v47 = vrot.slane %v14018_v58, 1 }
 0x43a   : > { %v14148_v34 = vpop.f32.mrf.mxu0  ;;  %v16700_v26 = vrot.slane %v13863_v23, 1  ;;  %v16701_v45 = vrot.slane %v14029_v44, 2  ;;  %v16702_v49 = vrot.slane %v13872_v8, 2  ;;  %vm14164_vm9 = vmand %vm4937_vm6, %vm4947_vm7  ;;  %vm7537_vm1 = vcmask 1044484  }
 0x43b   : > { %v6453_v37 = vsel %vm2267_vm3, %v16699_v47, %v6452_v10  ;;  %vm5022_vm10 = vmand %vm14164_vm9, %vm4962_vm8  ;;  %v14175_v23 = vsel %vm14164_vm9, %v4886_v3, 0.0  ;;  %vm7541_vm5 = vcmask 1046534   ;;  %vm7543_vm6 = vcmask 1047559  }
 0x43c   : > { %v7930_v43 = vpop.f32.mrf.mxu0  ;;  %v6455_v59 = vsel %vm2267_vm3, %v6452_v10, %v16700_v26  ;;  %v6674_v42 = vsel %vm2603_vm4, %v16701_v45, %v6673_v22  ;;  %v6676_v52 = vsel %vm2603_vm4, %v6673_v22, %v16702_v49  ;;  %v6548_v58 = vadd.f32 %v6453_v37, %v6327_v0  ;;  %v16708_v22 = vld [vmem:[#allocation165_spill] sm:$0xff]  ;;  %vm5091_vm12 = vmand %vm14164_vm9, %vm5051_vm14 }
 0x43d   : > { %v6549_v20 = vadd.f32 %v6455_v59, %v6328_v25  ;;  %v14180_v39 = vsel %vm5022_vm10, %v4885_v54, 0.0  ;;  %v14184_v10 = vmul.f32 %v13595_v16, %v14175_v23  ;;  %v16706_v25 = vld [vmem:[#allocation96_spill] sm:$0xff]  ;;  %v16709_v43 = vrot.slane %v16708_v22, 1  ;;  %vm5027_vm14 = vmand %vm12680_vm13, %vm4962_vm8 }
 0x43e   : > { %v14177_v8 = vpop.f32.mrf.mxu0  ;;  %v16707_v0 = vrot.slane %v16706_v25, 1  ;;  %v6769_v37 = vadd.f32 %v6674_v42, %v6548_v58  ;;  %v14193_v3 = vmul.f32 %v13595_v16, %v14180_v39  ;;  %v4887_v59 = vmax.f32 %v4769_v38, 0.0 }
 0x43f   : > { %16705 = vst [vmem:[#allocation54_spill] sm:$0xff] %v14184_v10  ;;  %v6770_v26 = vadd.f32 %v6676_v52, %v6549_v20  ;;  %v14197_v54 = vmul.f32 %v13604_v63, %v14180_v39  ;;  %v14201_v49 = vmul.f32 %v13685_v19, %v14180_v39  ;;  %v14205_v22 = vmul.f32 %v13626_v1, %v14175_v23 }
 0x440   : > { %v5436_v47 = vsel %vm2267_vm3, %v16709_v43, %v16707_v0  ;;  %16710 = vst [vmem:[#allocation126_spill] sm:$0xff] %v14193_v3  ;;  %v7931_v45 = vpop.f32.mrf.mxu0  ;;  %v14209_v42 = vmul.f32 %v13604_v63, %v14175_v23  ;;  %v6808_v52 = vadd.f32 %v13794_v48, %v6769_v37  ;;  %v14215_v58 = vmul.f32 %v13626_v1, %v14180_v39 }
 0x441   : > { %16711 = vst [vmem:[#allocation55_spill] sm:$0xff] %v14197_v54  ;;  %16712 = vst [vmem:[#allocation127_spill] sm:$0xff] %v14201_v49  ;;  %v6809_v38 = vadd.f32 %v13794_v48, %v6770_v26  ;;  %v14219_v20 = vmul.f32 %v13832_v28, %v14180_v39  ;;  %v14225_v45 = vmul.f32 %v13706_v30, %v14180_v39  ;;  %v14236_v0 = vsel %vm14164_vm9, %v4887_v59, 0.0 }
 0x442   : > { %16713 = vst [vmem:[#allocation57_spill] sm:$0xff] %v14205_v22  ;;  %16714 = vst [vmem:[#allocation128_spill] sm:$0xff] %v14209_v42  ;;  %v6840_v51 = vmax.f32 %v6808_v52, 0.0  ;;  %v14231_v7 = vmul.f32 %v13685_v19, %v14175_v23  ;;  %v16719_v43 = vrot.slane %v13306_v17, 1  ;;  %v16720_v62 = vrot.slane %v16706_v25, 1  ;;  %v16721_v52 = vld [vmem:[#allocation41_spill] sm:$0xff] }
 0x443   : > { %16715 = vst [vmem:[#allocation58_spill] sm:$0xff] %v14215_v58  ;;  %16716 = vst [vmem:[#allocation129_spill] sm:$0xff] %v14219_v20  ;;  %v6841_v26 = vmax.f32 %v6809_v38, 0.0  ;;  %v5528_v38 = vadd.f32 %v5436_v47, %v16721_v52  ;;  %v14246_v5 = vmul.f32 %v13832_v28, %v14175_v23  ;;  %v14250_v44 = vmul.f32 %v13706_v30, %v14175_v23  ;;  %v16724_v42 = vld [vmem:[#allocation88_spill] sm:$0xff]  ;;  %v16732_v25 = vld [vmem:[#allocation118_spill] sm:$0xff] }
 0x444   : > { %16717 = vst [vmem:[#allocation63_spill] sm:$0xff] %v14225_v45  ;;  %16718 = vst [vmem:[#allocation64_spill] sm:$0xff] %v14231_v7  ;;  %v5438_v37 = vsel %vm2267_vm3, %v16720_v62, %v16719_v43  ;;  %v16725_v59 = vrot.slane %v16724_v42, 2  ;;  %v16726_v22 = vld [vmem:[#allocation40_spill] sm:$0xff]  ;;  %v14260_v62 = vmul.f32 %v13626_v1, %v14236_v0  ;;  %v14268_v47 = vmul.f32 %v13604_v63, %v14236_v0  ;;  %v16730_v43 = vld [vmem:[#allocation98_spill] sm:$0xff] }
 0x445   : > { %v6869_v54 = vpack.c.bf16 %v6841_v26, %v6840_v51  ;;  %16722 = vst [vmem:[#allocation130_spill] sm:$0xff] %v14246_v5  ;;  %16723 = vst [vmem:[#allocation131_spill] sm:$0xff] %v14250_v44  ;;  %v16727_v58 = vrot.slane %v16726_v22, 2  ;;  %v14264_v51 = vmul.f32 %v13595_v16, %v14236_v0  ;;  %v14273_v22 = vmul.f32 %v13832_v28, %v14236_v0 }
 0x446   : > { %16728 = vst [vmem:[#allocation62_spill] sm:$0xff] %v14260_v62  ;;  %v5529_v26 = vadd.f32 %v5438_v37, %v16730_v43  ;;  %v16733_v62 = vrot.slane %v16732_v25, 2  ;;  %v16734_v3 = vrot.slane %v16724_v42, 2  ;;  %v16735_v10 = vrot.slane %v13689_v57, 1 }
 0x447   : > { %v5657_v17 = vsel %vm2603_vm4, %v16727_v58, %v16725_v59  ;;  %7983 = vmatmul.mubr.msk.bf16.gmra.mxu1 %vm6929_vm11, %v6869_v54  ;;  %16729 = vst [vmem:[#allocation107_spill] sm:$0xff] %v14273_v22  ;;  %v14277_v58 = vmul.f32 %v13685_v19, %v14236_v0  ;;  %v14282_v59 = vmul.f32 %v13706_v30, %v14236_v0  ;;  %v16736_v22 = vrot.slane %v13638_v11, 1  ;;  %v16739_v11 = vld [vmem:[#allocation36_spill] sm:$0xff] }
 0x448   : > { %v5749_v52 = vadd.f32 %v5657_v17, %v5528_v38  ;;  %v5659_v54 = vsel %vm2603_vm4, %v16734_v3, %v16733_v62  ;;  %v16737_v5 = vrot.slane %v13750_v41, 1  ;;  %v16738_v37 = vmov %v16735_v10 }
 0x449   : > { %16731 = vst [vmem:[#allocation66_spill] sm:$0xff] %v14282_v59  ;;  %v5947_v14 = vsel %vm2267_vm3, %v16736_v22, %v16735_v10  ;;  %v5750_v17 = vadd.f32 %v5659_v54, %v5529_v26  ;;  %v6166_v59 = vrot.slane %v13643_v12, 2  ;;  %v6167_v42 = vrot.slane %v13710_v60, 2  ;;  %v16740_v22 = vld [vmem:[#allocation51_spill] sm:$0xff] }
 0x44a   : > { %v5949_v38 = vsel %vm2267_vm3, %v16738_v37, %v16737_v5  ;;  %v5818_v43 = vadd.f32 %v13634_v18, %v5749_v52  ;;  %v15735_v62 = vrot.slane %v13754_v27, 2  ;;  %v6297_v10 = vmul.f32 %v14125_v61, %v16739_v11  ;;  %v16741_v5 = vld [vmem:[#allocation53_spill] sm:$0xff] }
 0x44b   : > { %v6298_v20 = vmul.f32 %v14125_v61, %v16740_v22  ;;  %v6368_v57 = vmul.f32 %v13720_v33, %v16739_v11  ;;  %v5819_v26 = vadd.f32 %v16741_v5, %v5750_v17  ;;  %v6168_v12 = vsel %vm2603_vm4, %v6166_v59, %v6167_v42 }
 0x44c   : > { %v14302_v3 = vpop.f32.mrf.mxu0  ;;  %v6039_v18 = vadd.f32 %v5947_v14, %v5818_v43  ;;  %v6369_v60 = vmul.f32 %v13720_v33, %v16740_v22  ;;  %v6170_v54 = vsel %vm2603_vm4, %v6167_v42, %v15735_v62  ;;  %v14320_v37 = vmul.f32 %v13720_v33, %v13937_v50 }
 0x44d   : > { %v6456_v44 = vrot.slane %v6368_v57, 1  ;;  %v6589_v45 = vmul.f32 %v13726_v21, %v16739_v11  ;;  %v6040_v17 = vadd.f32 %v5949_v38, %v5819_v26  ;;  %v6590_v59 = vmul.f32 %v13726_v21, %v16740_v22 }
 0x44e   : > { %v7934_v52 = vpop.f32.mrf.mxu0  ;;  %v6260_v14 = vadd.f32 %v6168_v12, %v6039_v18  ;;  %v6457_v43 = vrot.slane %v6369_v60, 1  ;;  %v14331_v42 = vmul.f32 %v13726_v21, %v13937_v50  ;;  %v4774_v57 = vadd.f32 %v13506_v31, %v14024_v53 }
 0x44f   : > { %v15742_v52 = vrot.slane %v14320_v37, 1  ;;  %v6677_v62 = vrot.slane %v6589_v45, 2  ;;  %v6261_v49 = vadd.f32 %v6170_v54, %v6040_v17  ;;  %v6678_v26 = vrot.slane %v6590_v59, 2 }
 0x450   : > { %v14326_v5 = vpop.f32.mrf.mxu0  ;;  %v6329_v11 = vadd.f32 %v6297_v10, %v6260_v14  ;;  %v6458_v38 = vsel %vm2267_vm3, %v6456_v44, %v6457_v43  ;;  %v15740_v12 = vrot.slane %v14331_v42, 2  ;;  %v4888_v60 = vmax.f32 %v4774_v57, 0.0  ;;  %v16742_v44 = vld [vmem:[#allocation119_spill] sm:$0xff]  ;;  %v16743_v10 = vld [vmem:[#allocation148_spill] sm:$0xff] }
 0x451   : > { %v6460_v22 = vsel %vm2267_vm3, %v6457_v43, %v15742_v52  ;;  %v4777_v7 = vadd.f32 %v13506_v31, %v14047_v29  ;;  %v6330_v45 = vadd.f32 %v6298_v20, %v6261_v49  ;;  %v6679_v53 = vsel %vm2603_vm4, %v6677_v62, %v6678_v26 }
 0x452   : > { %v7935_v18 = vpop.f32.mrf.mxu0  ;;  %v6550_v4 = vadd.f32 %v6458_v38, %v6329_v11  ;;  %v5530_v54 = vadd.f32 %v16743_v10, %v16742_v44  ;;  %v15741_v17 = vrot.slane %v14264_v51, 1  ;;  %v6681_v14 = vsel %vm2603_vm4, %v6678_v26, %v15740_v12 }
 0x453   : > { %v14355_v29 = vsel %vm14164_vm9, %v4888_v60, 0.0  ;;  %v4889_v49 = vmax.f32 %v4777_v7, 0.0  ;;  %v6551_v40 = vadd.f32 %v6460_v22, %v6330_v45  ;;  %v16748_v52 = vrot.slane %v16732_v25, 2 }
 0x454   : > { %v6771_v62 = vadd.f32 %v6679_v53, %v6550_v4  ;;  %v5364_v43 = vmul.f32 %v13595_v16, %v14355_v29  ;;  %v14362_v57 = vmul.f32 %v13604_v63, %v14355_v29  ;;  %v5797_v11 = vmul.f32 %v13832_v28, %v14355_v29 }
 0x455   : > { %v5241_v59 = vsel %vm5091_vm12, %v4889_v49, 0.0  ;;  %v14368_v56 = vmul.f32 %v13685_v19, %v14355_v29  ;;  %v6772_v7 = vadd.f32 %v6681_v14, %v6551_v40  ;;  %v5290_v18 = vmul.f32 %v13626_v1, %v14355_v29 }
 0x456   : > { %16744 = vst [vmem:[#allocation108_spill] sm:$0xff] %v14362_v57  ;;  %v6810_v38 = vadd.f32 %v13794_v48, %v6771_v62  ;;  %v5365_v4 = vmul.f32 %v13595_v16, %v5241_v59  ;;  %v5466_v26 = vrot.slane %v5364_v43, 1  ;;  %v5586_v22 = vmul.f32 %v13604_v63, %v5241_v59 }
 0x457   : > { %v5829_v60 = vadd.f32 %v5797_v11, %v14113_v15  ;;  %v5871_v45 = vmul.f32 %v13685_v19, %v5241_v59  ;;  %v6811_v53 = vadd.f32 %v13794_v48, %v6772_v7  ;;  %v15743_v14 = vrot.slane %v14362_v57, 2 }
 0x458   : > { %v14381_v44 = vsel %vm2267_vm3, %v15741_v17, %v5466_v26  ;;  %v5468_v10 = vrot.slane %v5365_v4, 1  ;;  %v5689_v49 = vrot.slane %v5586_v22, 2  ;;  %v15746_v40 = vrot.slane %v14368_v56, 1 }
 0x459   : > { %16745 = vst [vmem:[#allocation61_spill] sm:$0xff] %v14381_v44  ;;  %v5970_v62 = vrot.slane %v5871_v45, 1  ;;  %v14387_v43 = vmul.f32 %v13706_v30, %v14355_v29  ;;  %v6842_v15 = vmax.f32 %v6810_v38, 0.0  ;;  %v6843_v11 = vmax.f32 %v6811_v53, 0.0  ;;  %v16746_v45 = vld [vmem:[#allocation113_spill] sm:$0xff] }
 0x45a   : > { %v5469_v7 = vsel %vm2267_vm3, %v5466_v26, %v5468_v10  ;;  %v6092_v20 = vmul.f32 %v13706_v30, %v5241_v59  ;;  %v5690_v4 = vsel %vm2603_vm4, %v15743_v14, %v5689_v49  ;;  %v16747_v17 = vrot.slane %v16746_v45, 2  ;;  %v16749_v14 = vld [vmem:[#allocation20_spill] sm:$0xff] }
 0x45b   : > { %v5543_v12 = vadd.f32 %v5469_v7, %v5290_v18  ;;  %v5971_v22 = vsel %vm2267_vm3, %v15746_v40, %v5970_v62  ;;  %v6870_v53 = vpack.c.bf16 %v6843_v11, %v6842_v15  ;;  %v15745_v26 = vrot.slane %v14387_v43, 2  ;;  %v16757_v15 = vld [vmem:[#allocation15_spill] sm:$0xff]  ;;  %v16780_v10 = vld [vmem:[#allocation164_spill] sm:$0xff] }
 0x45c   : > { %v5661_v38 = vsel %vm2603_vm4, %v16748_v52, %v16747_v17  ;;  %v14402_v44 = vadd.f32 %v5971_v22, %v5829_v60  ;;  %v6191_v18 = vrot.slane %v6092_v20, 2  ;;  %v16750_v57 = vrot.slane %v16749_v14, 1  ;;  %v16752_v17 = vld [vmem:[#allocation37_spill] sm:$0xff]  ;;  %v16755_v60 = vld [vmem:[#allocation155_spill] sm:$0xff] }
 0x45d   : > { %v14406_v7 = vadd.f32 %v5690_v4, %v5543_v12  ;;  %v5751_v49 = vadd.f32 %v5661_v38, %v5530_v54  ;;  %v16751_v62 = vrot.slane %v13750_v41, 1  ;;  %7986 = vmatprep.mubr.msk.bf16.mxu1 %vm6929_vm11, %v6870_v53  ;;  %v14420_v52 = vmul.f32 %v13720_v33, %v5241_v59  ;;  %v16756_v41 = vld [vmem:[#allocation153_spill] sm:$0xff] }
 0x45e   : > { %v14417_v25 = vsel %vm2603_vm4, %v15745_v26, %v6191_v18  ;;  %v16753_v12 = vrot.slane %v16752_v17, 2  ;;  %v16754_v54 = vrot.slane %v13754_v27, 2  ;;  %v6263_v14 = vadd.f32 %v16756_v41, %v16755_v60  ;;  %v16777_v26 = vld [vmem:[#allocation123_spill] sm:$0xff] }
 0x45f   : > { %v5951_v45 = vsel %vm2267_vm3, %v16751_v62, %v16750_v57  ;;  %v14430_v57 = vmul.f32 %v13726_v21, %v5241_v59  ;;  %v5820_v11 = vadd.f32 %v16757_v15, %v5751_v49  ;;  %v6300_v4 = vmul.f32 %v14125_v61, %v14064_v32 }
 0x460   : > { %v6172_v20 = vsel %vm2603_vm4, %v16754_v54, %v16753_v12  ;;  %v6371_v22 = vmul.f32 %v13720_v33, %v14064_v32  ;;  %v6299_v38 = vmul.f32 %v14125_v61, %v13937_v50  ;;  %v6592_v27 = vmul.f32 %v13726_v21, %v14064_v32  ;;  %v16759_v12 = vld [vmem:[#allocation16_spill] sm:$0xff]  ;;  %v16761_v50 = vld [vmem:[#allocation17_spill] sm:$0xff] }
 0x461   : > { %v4782_v53 = vadd.f32 %v13506_v31, %v14148_v34  ;;  %v4785_v59 = vadd.f32 %v13506_v31, %v14177_v8  ;;  %v6041_v18 = vadd.f32 %v5951_v45, %v5820_v11  ;;  %v6332_v49 = vadd.f32 %v6300_v4, %v6263_v14  ;;  %v14457_v31 = vld [vmem:[%s15381_s6] ss:$0 sm:$0xff] }
 0x462   : > { %v6461_v62 = vrot.slane %v6371_v22, 1  ;;  %v16760_v54 = vrot.slane %v16759_v12, 1  ;;  %v16762_v60 = vrot.slane %v16761_v50, 1  ;;  %v6682_v41 = vrot.slane %v6592_v27, 2  ;;  %v16765_v22 = vld [vmem:[#allocation149_spill] sm:$0xff] }
 0x463   : > { %v4890_v15 = vmax.f32 %v4782_v53, 0.0  ;;  %v4891_v34 = vmax.f32 %v4785_v59, 0.0  ;;  %v4790_v24 = vadd.f32 %v14457_v31, %v14302_v3  ;;  %v6262_v8 = vadd.f32 %v6172_v20, %v6041_v18 }
 0x464   : > { %v5445_v32 = vsel %vm2267_vm3, %v16762_v60, %v16760_v54  ;;  %v16763_v45 = vrot.slane %v14320_v37, 1  ;;  %v16764_v11 = vrot.slane %v14106_v6, 1  ;;  %v16766_v27 = vrot.slane %v16765_v22, 1 }
 0x465   : > { %v16767_v53 = vmov %v16760_v54  ;;  %v16768_v50 = vrot.slane %v14331_v42, 2  ;;  %v16769_v20 = vrot.slane %v14143_v13, 2  ;;  %v14478_v18 = vsel %vm5027_vm14, %v4890_v15, 0.0 }
 0x466   : > { %v6462_v14 = vsel %vm2267_vm3, %v16763_v45, %v6461_v62  ;;  %v6464_v4 = vsel %vm2267_vm3, %v6461_v62, %v16764_v11  ;;  %v5447_v59 = vsel %vm2267_vm3, %v16767_v53, %v16766_v27  ;;  %v6331_v62 = vadd.f32 %v6299_v38, %v6262_v8 }
 0x467   : > { %v6553_v54 = vadd.f32 %v6464_v4, %v6332_v49  ;;  %v6683_v3 = vsel %vm2603_vm4, %v16768_v50, %v6682_v41  ;;  %v6685_v37 = vsel %vm2603_vm4, %v6682_v41, %v16769_v20  ;;  %v14483_v60 = vmul.f32 %v13595_v16, %v14478_v18 }
 0x468   : > { %v14487_v49 = vmul.f32 %v13604_v63, %v14478_v18  ;;  %v14492_v13 = vmul.f32 %v13685_v19, %v14478_v18  ;;  %v4892_v41 = vmax.f32 %v4790_v24, 0.0  ;;  %v6552_v15 = vadd.f32 %v6462_v14, %v6331_v62 }
 0x469   : > { %16770 = vst [vmem:[#allocation85_spill] sm:$0xff] %v14483_v60  ;;  %v6774_v12 = vadd.f32 %v6685_v37, %v6553_v54  ;;  %v14496_v38 = vmul.f32 %v13626_v1, %v14478_v18  ;;  %v14500_v8 = vmul.f32 %v13832_v28, %v14478_v18  ;;  %v14504_v45 = vsel %vm12680_vm13, %v4891_v34, 0.0 }
 0x46a   : > { %16771 = vst [vmem:[#allocation86_spill] sm:$0xff] %v14487_v49  ;;  %v14510_v24 = vmul.f32 %v13706_v30, %v14478_v18  ;;  %v14514_v14 = vmul.f32 %v13595_v16, %v14504_v45  ;;  %v6773_v22 = vadd.f32 %v6683_v3, %v6552_v15  ;;  %v14519_v53 = vmul.f32 %v13604_v63, %v14504_v45 }
 0x46b   : > { %16772 = vst [vmem:[#allocation67_spill] sm:$0xff] %v14496_v38  ;;  %v6813_v11 = vadd.f32 %v13794_v48, %v6774_v12  ;;  %v14523_v34 = vmul.f32 %v13685_v19, %v14504_v45  ;;  %v14528_v50 = vmul.f32 %v13626_v1, %v14504_v45  ;;  %v14532_v20 = vmul.f32 %v13832_v28, %v14504_v45  ;;  %v16776_v12 = vld [vmem:[#allocation18_spill] sm:$0xff] }
 0x46c   : > { %16773 = vst [vmem:[#allocation109_spill] sm:$0xff] %v14519_v53  ;;  %v14536_v3 = vsel %vm12680_vm13, %v4892_v41, 0.0  ;;  %v6812_v37 = vadd.f32 %v13794_v48, %v6773_v22  ;;  %v14542_v15 = vmul.f32 %v13706_v30, %v14504_v45  ;;  %v5532_v54 = vadd.f32 %v5445_v32, %v16776_v12  ;;  %v16782_v32 = vld [vmem:[#allocation30_spill] sm:$0xff] }
 0x46d   : > { %16774 = vst [vmem:[#allocation65_spill] sm:$0xff] %v14528_v50  ;;  %v6845_v62 = vmax.f32 %v6813_v11, 0.0  ;;  %v14548_v4 = vmul.f32 %v13595_v16, %v14536_v3  ;;  %v14552_v41 = vmul.f32 %v13604_v63, %v14536_v3  ;;  %v14556_v11 = vmul.f32 %v13832_v28, %v14536_v3  ;;  %v16778_v63 = vld [vmem:[#allocation60_spill] sm:$0xff]  ;;  %v16787_v50 = vld [vmem:[#allocation117_spill] sm:$0xff] }
 0x46e   : > { %v6844_v22 = vmax.f32 %v6812_v37, 0.0  ;;  %v5533_v40 = vadd.f32 %v5447_v59, %v16777_v26  ;;  %v14563_v27 = vmul.f32 %v13685_v19, %v14536_v3  ;;  %v14567_v16 = vmul.f32 %v13706_v30, %v14536_v3  ;;  %v16785_v19 = vld [vmem:[#allocation25_spill] sm:$0xff] }
 0x46f   : > { %16775 = vst [vmem:[#allocation132_spill] sm:$0xff] %v14548_v4  ;;  %v16779_v37 = vrot.slane %v16778_v63, 2  ;;  %v16781_v42 = vrot.slane %v16780_v10, 2  ;;  %v16783_v12 = vrot.slane %v16782_v32, 2  ;;  %v16786_v53 = vrot.slane %v16785_v19, 1 }
 0x470   : > { %v6871_v49 = vpack.c.bf16 %v6845_v62, %v6844_v22  ;;  %v16788_v38 = vrot.slane %v16787_v50, 1  ;;  %v16789_v60 = vrot.slane %v14001_v46, 1  ;;  %v16791_v62 = vld [vmem:[#allocation56_spill] sm:$0xff]  ;;  %v6594_v19 = vmul.f32 %v13726_v21, %v14180_v39 }
 0x471   : > { %v5666_v6 = vsel %vm2603_vm4, %v16781_v42, %v16779_v37  ;;  %v16784_v26 = vmov %v16779_v37  ;;  %v16790_v10 = vmov %v16786_v53  ;;  %v6175_v22 = vrot.slane %v16791_v62, 2  ;;  %v16792_v37 = vld [vmem:[#allocation33_spill] sm:$0xff] }
 0x472   : > { %v5668_v59 = vsel %vm2603_vm4, %v16784_v26, %v16783_v12  ;;  %v5753_v1 = vadd.f32 %v5666_v6, %v5532_v54  ;;  %v5956_v30 = vsel %vm2267_vm3, %v16788_v38, %v16786_v53  ;;  %v5958_v42 = vsel %vm2267_vm3, %v16790_v10, %v16789_v60  ;;  %7987 = vmatmul.mubr.msk.bf16.gmra.mxu1 %vm6929_vm11, %v6871_v49  ;;  %v16793_v6 = vld [vmem:[#allocation122_spill] sm:$0xff]  ;;  %v16794_v53 = vld [vmem:[#allocation145_spill] sm:$0xff] }
 0x473   : > { %v5754_v4 = vadd.f32 %v5668_v59, %v5533_v40  ;;  %v6176_v63 = vrot.slane %v16792_v37, 2  ;;  %v6178_v12 = vrot.slane %v14060_v2, 2  ;;  %v6301_v38 = vmul.f32 %v14125_v61, %v14180_v39 }
 0x474   : > { %v5822_v54 = vadd.f32 %v16793_v6, %v5753_v1  ;;  %v6302_v40 = vmul.f32 %v14125_v61, %v14175_v23  ;;  %v6373_v26 = vmul.f32 %v13720_v33, %v14180_v39  ;;  %v6374_v49 = vmul.f32 %v13720_v33, %v14175_v23 }
 0x475   : > { %v5823_v50 = vadd.f32 %v16794_v53, %v5754_v4  ;;  %v6177_v60 = vsel %vm2603_vm4, %v6175_v22, %v6176_v63  ;;  %v6179_v1 = vsel %vm2603_vm4, %v6176_v63, %v6178_v12  ;;  %v14607_v2 = vmul.f32 %v13720_v33, %v14236_v0 }
 0x476   : > { %v6043_v59 = vadd.f32 %v5956_v30, %v5822_v54  ;;  %v6465_v4 = vrot.slane %v6373_v26, 1  ;;  %v6466_v62 = vrot.slane %v6374_v49, 1  ;;  %v6595_v22 = vmul.f32 %v13726_v21, %v14175_v23  ;;  %v16796_v26 = vld [vmem:[#allocation24_spill] sm:$0xff] }
 0x477   : > { %v6044_v10 = vadd.f32 %v5958_v42, %v5823_v50  ;;  %v6468_v6 = vrot.slane %v14607_v2, 1  ;;  %v14616_v30 = vmul.f32 %v13726_v21, %v14236_v0  ;;  %v6686_v63 = vrot.slane %v6594_v19, 2  ;;  %v16797_v19 = vld [vmem:[#allocation69_spill] sm:$0xff] }
 0x478   : > { %v6264_v37 = vadd.f32 %v6177_v60, %v6043_v59  ;;  %v6467_v33 = vsel %vm2267_vm3, %v6465_v4, %v6466_v62  ;;  %v6687_v53 = vrot.slane %v6595_v22, 2  ;;  %v4793_v39 = vadd.f32 %v14457_v31, %v14326_v5  ;;  %v16795_v60 = vld [vmem:[#allocation150_spill] sm:$0xff] }
 0x479   : > { %v6265_v54 = vadd.f32 %v6179_v1, %v6044_v10  ;;  %v6469_v23 = vsel %vm2267_vm3, %v6466_v62, %v6468_v6  ;;  %v6689_v50 = vrot.slane %v14616_v30, 2  ;;  %v5534_v49 = vadd.f32 %v16796_v26, %v16795_v60 }
 0x47a   : > { %v6333_v42 = vadd.f32 %v6301_v38, %v6264_v37  ;;  %v6688_v59 = vsel %vm2603_vm4, %v6686_v63, %v6687_v53  ;;  %v4893_v1 = vmax.f32 %v4793_v39, 0.0  ;;  %v16798_v10 = vrot.slane %v16797_v19, 2 }
 0x47b   : > { %v6334_v21 = vadd.f32 %v6302_v40, %v6265_v54  ;;  %v16799_v4 = vrot.slane %v16782_v32, 2  ;;  %v6690_v38 = vsel %vm2603_vm4, %v6687_v53, %v6689_v50  ;;  %v16800_v62 = vrot.slane %v14080_v35, 1  ;;  %v16813_v53 = vld [vmem:[#allocation121_spill] sm:$0xff]  ;;  %v16814_v35 = vld [vmem:[#allocation26_spill] sm:$0xff] }
 0x47c   : > { %v6554_v31 = vadd.f32 %v6467_v33, %v6333_v42  ;;  %v16801_v37 = vrot.slane %v14001_v46, 1  ;;  %v14641_v63 = vsel %vm12680_vm13, %v4893_v1, 0.0  ;;  %v16802_v54 = vrot.slane %v14098_v36, 2  ;;  %v8151_v46 = vld [vmem:[%s15382_s7 + $0x1] ss:$0 sm:$0xff] }
 0x47d   : > { %v5670_v5 = vsel %vm2603_vm4, %v16799_v4, %v16798_v10  ;;  %v6555_v40 = vadd.f32 %v6469_v23, %v6334_v21  ;;  %v6267_v33 = vadd.f32 %v14134_v9, %v14118_v55  ;;  %v14654_v17 = vmul.f32 %v8151_v46, %v14641_v63  ;;  %v14659_v36 = vld [vmem:[%s15382_s7] ss:$0 sm:$0xff]  ;;  %v8153_v9 = vld [vmem:[%s15382_s7 + $0x2] ss:$0 sm:$0xff]  ;;  %v8154_v23 = vld [vmem:[%s15382_s7 + $0x4] ss:$0 sm:$0xff] }
 0x47e   : > { %v5755_v22 = vadd.f32 %v5670_v5, %v5534_v49  ;;  %v5960_v30 = vsel %vm2267_vm3, %v16801_v37, %v16800_v62  ;;  %v6181_v32 = vsel %vm2603_vm4, %v6178_v12, %v16802_v54  ;;  %v6775_v39 = vadd.f32 %v6688_v59, %v6554_v31  ;;  %v16803_v59 = vld [vmem:[#allocation32_spill] sm:$0xff] }
 0x47f   : > { %v6776_v42 = vadd.f32 %v6690_v38, %v6555_v40  ;;  %v14663_v55 = vmul.f32 %v14659_v36, %v14641_v63  ;;  %v14669_v12 = vmul.f32 %v8153_v9, %v14641_v63  ;;  %v14675_v60 = vmul.f32 %v8154_v23, %v14641_v63  ;;  %v8155_v4 = vld [vmem:[%s15382_s7 + $0x5] ss:$0 sm:$0xff]  ;;  %v16804_v40 = vld [vmem:[#allocation22_spill] sm:$0xff] }
 0x480   : > { %v6814_v26 = vadd.f32 %v13794_v48, %v6775_v39  ;;  %v15753_v49 = vrot.slane %v14654_v17, 1  ;;  %v14681_v21 = vmul.f32 %v13832_v28, %v14641_v63  ;;  %v5824_v1 = vadd.f32 %v16803_v59, %v5755_v22  ;;  %v16806_v23 = vld [vmem:[#allocation124_spill] sm:$0xff] }
 0x481   : > { %v6815_v19 = vadd.f32 %v13794_v48, %v6776_v42  ;;  %v14690_v5 = vmul.f32 %v8155_v4, %v14641_v63  ;;  %v6304_v31 = vmul.f32 %v14125_v61, %v14355_v29  ;;  %v6303_v28 = vmul.f32 %v14125_v61, %v14236_v0  ;;  %v14699_v48 = vld [vmem:[%s15382_s7 + $0x7] ss:$0 sm:$0xff]  ;;  %v14713_v0 = vld [vmem:[%s15382_s7 + $0x8] ss:$0 sm:$0xff]  ;;  %v16810_v4 = vld [vmem:[#allocation146_spill] sm:$0xff] }
 0x482   : > { %v6846_v38 = vmax.f32 %v6814_v26, 0.0  ;;  %v6045_v62 = vadd.f32 %v5960_v30, %v5824_v1  ;;  %v6376_v22 = vmul.f32 %v14699_v48, %v14355_v29  ;;  %v16805_v54 = vrot.slane %v16804_v40, 1  ;;  %v16808_v59 = vld [vmem:[#allocation116_spill] sm:$0xff] }
 0x483   : > { %v6847_v37 = vmax.f32 %v6815_v19, 0.0  ;;  %v6336_v30 = vadd.f32 %v6304_v31, %v6267_v33  ;;  %v6597_v46 = vmul.f32 %v14713_v0, %v14355_v29  ;;  %v16807_v26 = vrot.slane %v16806_v23, 1  ;;  %v16818_v23 = vld [vmem:[#allocation115_spill] sm:$0xff] }
 0x484   : > { %v14708_v39 = vsel %vm2267_vm3, %v15753_v49, %v16805_v54  ;;  %v6266_v42 = vadd.f32 %v6181_v32, %v6045_v62  ;;  %v6470_v9 = vrot.slane %v6376_v22, 1  ;;  %v16809_v1 = vrot.slane %v16808_v59, 1  ;;  %v16816_v59 = vld [vmem:[#allocation125_spill] sm:$0xff] }
 0x485   : > { %v16811_v40 = vrot.slane %v16810_v4, 1  ;;  %v16812_v33 = vmov %v16807_v26  ;;  %v6872_v54 = vpack.c.bf16 %v6847_v37, %v6846_v38  ;;  %v6691_v49 = vrot.slane %v6597_v46, 2 }
 0x486   : > { %v5454_v19 = vsel %vm2267_vm3, %v16809_v1, %v16807_v26  ;;  %v6335_v32 = vadd.f32 %v6303_v28, %v6266_v42  ;;  %v6471_v62 = vsel %vm2267_vm3, %v6468_v6, %v6470_v9  ;;  %v16815_v22 = vrot.slane %v14420_v52, 1  ;;  %v16821_v6 = vld [vmem:[#allocation31_spill] sm:$0xff] }
 0x487   : > { %v5456_v31 = vsel %vm2267_vm3, %v16812_v33, %v16811_v40  ;;  %v5536_v10 = vadd.f32 %v5454_v19, %v16813_v53  ;;  %v16817_v1 = vrot.slane %v16816_v59, 2  ;;  %v16819_v4 = vrot.slane %v16818_v23, 2  ;;  %7990 = vmatprep.mubr.msk.bf16.mxu1 %vm6929_vm11, %v6872_v54  ;;  %v16824_v40 = vld [vmem:[#allocation64_spill] sm:$0xff] }
 0x488   : > { %v5537_v29 = vadd.f32 %v5456_v31, %v16814_v35  ;;  %v6473_v26 = vsel %vm2267_vm3, %v6470_v9, %v16815_v22  ;;  %v6692_v35 = vsel %vm2603_vm4, %v6689_v50, %v6691_v49  ;;  %v16820_v28 = vrot.slane %v14430_v57, 2  ;;  %v16826_v31 = vld [vmem:[#allocation127_spill] sm:$0xff] }
 0x489   : > { %v5675_v38 = vsel %vm2603_vm4, %v16819_v4, %v16817_v1  ;;  %v6557_v53 = vadd.f32 %v6473_v26, %v6336_v30  ;;  %v16822_v37 = vrot.slane %v16821_v6, 2  ;;  %v16823_v52 = vmov %v16817_v1  ;;  %v16830_v26 = vld [vmem:[#allocation63_spill] sm:$0xff] }
 0x48a   : > { %v6694_v2 = vsel %vm2603_vm4, %v6691_v49, %v16820_v28  ;;  %v6556_v42 = vadd.f32 %v6471_v62, %v6335_v32  ;;  %v5757_v9 = vadd.f32 %v5675_v38, %v5536_v10  ;;  %v16825_v33 = vrot.slane %v16824_v40, 1  ;;  %v16831_v1 = vld [vmem:[#allocation131_spill] sm:$0xff]  ;;  %v16832_v10 = vld [vmem:[#allocation129_spill] sm:$0xff]  ;;  %v16833_v62 = vld [vmem:[#allocation130_spill] sm:$0xff] }
 0x48b   : > { %v5677_v46 = vsel %vm2603_vm4, %v16823_v52, %v16822_v37  ;;  %v16827_v54 = vrot.slane %v16826_v31, 1  ;;  %v6778_v50 = vadd.f32 %v6694_v2, %v6557_v53  ;;  %v16828_v57 = vrot.slane %v14277_v58, 1  ;;  %v16834_v38 = vld [vmem:[#allocation66_spill] sm:$0xff]  ;;  %v14768_v53 = vld [vmem:[%s15383_s8] ss:$0 sm:$0xff] }
 0x48c   : > { %v5758_v19 = vadd.f32 %v5677_v46, %v5537_v29  ;;  %v16829_v49 = vmov %v16825_v33  ;;  %v6184_v59 = vrot.slane %v16830_v26, 2  ;;  %v6185_v23 = vrot.slane %v16831_v1, 2 }
 0x48d   : > { %v5965_v30 = vsel %vm2267_vm3, %v16827_v54, %v16825_v33  ;;  %v5967_v22 = vsel %vm2267_vm3, %v16829_v49, %v16828_v57  ;;  %v6777_v32 = vadd.f32 %v6692_v35, %v6556_v42  ;;  %v5826_v29 = vadd.f32 %v16832_v10, %v5757_v9 }
 0x48e   : > { %v5827_v4 = vadd.f32 %v16833_v62, %v5758_v19  ;;  %v6187_v28 = vrot.slane %v16834_v38, 2  ;;  %v6817_v2 = vadd.f32 %v14768_v53, %v6778_v50  ;;  %v6186_v37 = vsel %vm2603_vm4, %v6184_v59, %v6185_v23 }
 0x48f   : > { %v6305_v52 = vmul.f32 %v14125_v61, %v14478_v18  ;;  %v6306_v35 = vmul.f32 %v14125_v61, %v14504_v45  ;;  %v6816_v46 = vadd.f32 %v14768_v53, %v6777_v32  ;;  %v6047_v42 = vadd.f32 %v5965_v30, %v5826_v29 }
 0x490   : > { %v6048_v9 = vadd.f32 %v5967_v22, %v5827_v4  ;;  %v6188_v19 = vsel %vm2603_vm4, %v6185_v23, %v6187_v28  ;;  %v6849_v40 = vmax.f32 %v6817_v2, 0.0  ;;  %v6378_v33 = vmul.f32 %v14699_v48, %v14478_v18 }
 0x491   : > { %v6379_v31 = vmul.f32 %v14699_v48, %v14504_v45  ;;  %v6380_v54 = vmul.f32 %v14699_v48, %v14536_v3  ;;  %v6848_v50 = vmax.f32 %v6816_v46, 0.0  ;;  %v6268_v57 = vadd.f32 %v6186_v37, %v6047_v42  ;;  %v16835_v42 = vld [vmem:[#allocation151_spill] sm:$0xff] }
 0x492   : > { %v6269_v49 = vadd.f32 %v6188_v19, %v6048_v9  ;;  %v6599_v26 = vmul.f32 %v14713_v0, %v14478_v18  ;;  %v6474_v30 = vrot.slane %v6378_v33, 1  ;;  %v6600_v1 = vmul.f32 %v14713_v0, %v14504_v45  ;;  %v16836_v9 = vld [vmem:[#allocation83_spill] sm:$0xff] }
 0x493   : > { %v6475_v22 = vrot.slane %v6379_v31, 1  ;;  %v6477_v59 = vrot.slane %v6380_v54, 1  ;;  %v6873_v23 = vpack.c.bf16 %v6849_v40, %v6848_v50  ;;  %v6337_v32 = vadd.f32 %v6305_v52, %v6268_v57 }
 0x494   : > { %v6338_v10 = vadd.f32 %v6306_v35, %v6269_v49  ;;  %v6601_v29 = vmul.f32 %v14713_v0, %v14536_v3  ;;  %v6695_v38 = vrot.slane %v6599_v26, 2  ;;  %v6696_v2 = vrot.slane %v6600_v1, 2  ;;  %v16837_v35 = vld [vmem:[#allocation136_spill] sm:$0xff] }
 0x495   : > { %v6476_v62 = vsel %vm2267_vm3, %v6474_v30, %v6475_v22  ;;  %v6478_v4 = vsel %vm2267_vm3, %v6475_v22, %v6477_v59  ;;  %7991 = vmatmul.mubr.msk.bf16.gmra.mxu1 %vm6929_vm11, %v6873_v23  ;;  %v5538_v45 = vadd.f32 %v16836_v9, %v16835_v42  ;;  %v16838_v19 = vrot.slane %v16837_v35, 2 }
 0x496   : > { %v6558_v18 = vadd.f32 %v6476_v62, %v6337_v32  ;;  %v6559_v37 = vadd.f32 %v6478_v4, %v6338_v10  ;;  %v6698_v46 = vrot.slane %v6601_v29, 2  ;;  %v6697_v52 = vsel %vm2603_vm4, %v6695_v38, %v6696_v2  ;;  %v16844_v29 = vld [vmem:[#allocation54_spill] sm:$0xff] }
 0x497   : > { %v16839_v40 = vrot.slane %v16821_v6, 2  ;;  %v16840_v31 = vrot.slane %v14368_v56, 1  ;;  %v16841_v54 = vrot.slane %v14277_v58, 1  ;;  %v16842_v57 = vrot.slane %v14387_v43, 2 }
 0x498   : > { %v6699_v26 = vsel %vm2603_vm4, %v6696_v2, %v6698_v46  ;;  %v6779_v30 = vadd.f32 %v6697_v52, %v6558_v18  ;;  %v6271_v1 = vadd.f32 %v14417_v25, %v14402_v44  ;;  %v6307_v23 = vmul.f32 %v14125_v61, %v14536_v3  ;;  %v16846_v44 = vld [vmem:[#allocation126_spill] sm:$0xff] }
 0x499   : > { %v5679_v33 = vsel %vm2603_vm4, %v16839_v40, %v16838_v19  ;;  %v5969_v50 = vsel %vm2267_vm3, %v16841_v54, %v16840_v31  ;;  %v6190_v49 = vsel %vm2603_vm4, %v6187_v28, %v16842_v57  ;;  %v6780_v6 = vadd.f32 %v6699_v26, %v6559_v37  ;;  %v16843_v28 = vld [vmem:[#allocation107_spill] sm:$0xff]  ;;  %v16851_v31 = vld [vmem:[#allocation140_spill] sm:$0xff]  ;;  %v16853_v26 = vld [vmem:[#allocation57_spill] sm:$0xff] }
 0x49a   : > { %v5759_v22 = vadd.f32 %v5679_v33, %v5538_v45  ;;  %v6308_v58 = vmul.f32 %v14125_v61, %v14641_v63  ;;  %v6381_v56 = vmul.f32 %v14699_v48, %v14641_v63  ;;  %v6818_v43 = vadd.f32 %v14768_v53, %v6779_v30 }
 0x49b   : > { %v6602_v10 = vmul.f32 %v14713_v0, %v14641_v63  ;;  %v16845_v62 = vrot.slane %v16844_v29, 1  ;;  %v16847_v25 = vrot.slane %v16846_v44, 1  ;;  %v6819_v38 = vadd.f32 %v14768_v53, %v6780_v6  ;;  %v16850_v63 = vld [vmem:[#allocation58_spill] sm:$0xff] }
 0x49c   : > { %v5828_v32 = vadd.f32 %v16843_v28, %v5759_v22  ;;  %v6340_v2 = vadd.f32 %v6308_v58, %v6271_v1  ;;  %v6479_v18 = vrot.slane %v6381_v56, 1  ;;  %v16848_v37 = vrot.slane %v14264_v51, 1  ;;  %v16854_v6 = vld [vmem:[#allocation74_spill] sm:$0xff] }
 0x49d   : > { %v5463_v4 = vsel %vm2267_vm3, %v16847_v25, %v16845_v62  ;;  %v16849_v42 = vmov %v16845_v62  ;;  %v6850_v45 = vmax.f32 %v6818_v43, 0.0  ;;  %v6700_v35 = vrot.slane %v6602_v10, 2  ;;  %v16856_v43 = vld [vmem:[#allocation128_spill] sm:$0xff] }
 0x49e   : > { %v5465_v9 = vsel %vm2267_vm3, %v16849_v42, %v16848_v37  ;;  %v6049_v52 = vadd.f32 %v5969_v50, %v5828_v32  ;;  %v5540_v19 = vadd.f32 %v5463_v4, %v16850_v63  ;;  %v6851_v40 = vmax.f32 %v6819_v38, 0.0  ;;  %v16858_v32 = vld [vmem:[#allocation55_spill] sm:$0xff] }
 0x49f   : > { %v6480_v33 = vsel %vm2267_vm3, %v6477_v59, %v6479_v18  ;;  %v16852_v54 = vrot.slane %v16851_v31, 1  ;;  %v5541_v30 = vadd.f32 %v5465_v9, %v16853_v26  ;;  %v6701_v1 = vsel %vm2603_vm4, %v6698_v46, %v6700_v35 }
 0x4a0   : > { %v6270_v22 = vadd.f32 %v6190_v49, %v6049_v52  ;;  %v16855_v58 = vrot.slane %v16854_v6, 2  ;;  %v6874_v56 = vpack.c.bf16 %v6851_v40, %v6850_v45  ;;  %v16857_v28 = vrot.slane %v16856_v43, 2 }
 0x4a1   : > { %v6482_v57 = vsel %vm2267_vm3, %v6479_v18, %v16852_v54  ;;  %v16859_v10 = vrot.slane %v16858_v32, 2  ;;  %v16860_v29 = vrot.slane %v14268_v47, 2  ;;  %v16862_v44 = vrot.slane %v14523_v34, 1  ;;  %v16866_v34 = vld [vmem:[#allocation142_spill] sm:$0xff] }
 0x4a2   : > { %v6561_v51 = vadd.f32 %v6482_v57, %v6340_v2  ;;  %v6703_v50 = vsel %vm2603_vm4, %v6700_v35, %v16855_v58  ;;  %v16861_v62 = vmov %v16857_v28  ;;  %v16863_v46 = vrot.slane %v14492_v13, 1  ;;  %7994 = vmatprep.mubr.msk.bf16.mxu1 %vm6929_vm11, %v6874_v56  ;;  %v16867_v57 = vld [vmem:[#allocation23_spill] sm:$0xff] }
 0x4a3   : > { %v5684_v59 = vsel %vm2603_vm4, %v16859_v10, %v16857_v28  ;;  %v5686_v49 = vsel %vm2603_vm4, %v16861_v62, %v16860_v29  ;;  %v6339_v4 = vadd.f32 %v6307_v23, %v6270_v22  ;;  %v16864_v37 = vrot.slane %v14563_v27, 1 }
 0x4a4   : > { %v5974_v25 = vsel %vm2267_vm3, %v16863_v46, %v16862_v44  ;;  %v6782_v38 = vadd.f32 %v6703_v50, %v6561_v51  ;;  %v5761_v2 = vadd.f32 %v5684_v59, %v5540_v19  ;;  %v5762_v18 = vadd.f32 %v5686_v49, %v5541_v30 }
 0x4a5   : > { %v16865_v42 = vmov %v16862_v44  ;;  %v6193_v45 = vrot.slane %v14510_v24, 2  ;;  %v6194_v52 = vrot.slane %v14542_v15, 2  ;;  %v6196_v13 = vrot.slane %v14567_v16, 2 }
 0x4a6   : > { %v5976_v9 = vsel %vm2267_vm3, %v16865_v42, %v16864_v37  ;;  %v6560_v35 = vadd.f32 %v6480_v33, %v6339_v4  ;;  %v6821_v23 = vadd.f32 %v14768_v53, %v6782_v38  ;;  %v5830_v63 = vadd.f32 %v14500_v8, %v5761_v2  ;;  %v16870_v37 = vld [vmem:[#allocation61_spill] sm:$0xff] }
 0x4a7   : > { %v5831_v19 = vadd.f32 %v14532_v20, %v5762_v18  ;;  %v6195_v40 = vsel %vm2603_vm4, %v6193_v45, %v6194_v52  ;;  %v6197_v31 = vsel %vm2603_vm4, %v6194_v52, %v6196_v13  ;;  %v6309_v54 = vmul.f32 %v14125_v61, %v16866_v34  ;;  %v16868_v20 = vld [vmem:[#allocation78_spill] sm:$0xff]  ;;  %v16871_v52 = vld [vmem:[#allocation108_spill] sm:$0xff] }
 0x4a8   : > { %v6310_v24 = vmul.f32 %v14125_v61, %v16867_v57  ;;  %v6781_v15 = vadd.f32 %v6701_v1, %v6560_v35  ;;  %v6853_v26 = vmax.f32 %v6821_v23, 0.0  ;;  %v6051_v16 = vadd.f32 %v5974_v25, %v5830_v63  ;;  %v16869_v18 = vld [vmem:[#allocation62_spill] sm:$0xff] }
 0x4a9   : > { %v6052_v33 = vadd.f32 %v5976_v9, %v5831_v19  ;;  %v6383_v30 = vmul.f32 %v14699_v48, %v16866_v34  ;;  %v6384_v8 = vmul.f32 %v14699_v48, %v16867_v57  ;;  %v14882_v22 = vmul.f32 %v14699_v48, %v16868_v20 }
 0x4aa   : > { %v6604_v51 = vmul.f32 %v14713_v0, %v16866_v34  ;;  %v6820_v6 = vadd.f32 %v14768_v53, %v6781_v15  ;;  %v6272_v58 = vadd.f32 %v6195_v40, %v6051_v16  ;;  %v6605_v50 = vmul.f32 %v14713_v0, %v16867_v57  ;;  %v16876_v15 = vld [vmem:[#allocation144_spill] sm:$0xff] }
 0x4ab   : > { %v6273_v1 = vadd.f32 %v6197_v31, %v6052_v33  ;;  %v6483_v56 = vrot.slane %v6383_v30, 1  ;;  %v6484_v43 = vrot.slane %v6384_v8, 1  ;;  %v6486_v28 = vrot.slane %v14882_v22, 1 }
 0x4ac   : > { %v6606_v32 = vmul.f32 %v14713_v0, %v16868_v20  ;;  %v6852_v10 = vmax.f32 %v6820_v6, 0.0  ;;  %v6341_v59 = vadd.f32 %v6309_v54, %v6272_v58  ;;  %v6704_v62 = vrot.slane %v6604_v51, 2 }
 0x4ad   : > { %v6342_v29 = vadd.f32 %v6310_v24, %v6273_v1  ;;  %v6485_v49 = vsel %vm2267_vm3, %v6483_v56, %v6484_v43  ;;  %v6487_v44 = vsel %vm2267_vm3, %v6484_v43, %v6486_v28  ;;  %v6705_v46 = vrot.slane %v6605_v50, 2 }
 0x4ae   : > { %v6707_v25 = vrot.slane %v6606_v32, 2  ;;  %v6875_v4 = vpack.c.bf16 %v6853_v26, %v6852_v10  ;;  %v6562_v38 = vadd.f32 %v6485_v49, %v6341_v59  ;;  %v5542_v42 = vadd.f32 %v16870_v37, %v16869_v18  ;;  %v16883_v59 = vld [vmem:[#allocation85_spill] sm:$0xff]  ;;  %v16889_v18 = vld [vmem:[#allocation84_spill] sm:$0xff] }
 0x4af   : > { %v6563_v2 = vadd.f32 %v6487_v44, %v6342_v29  ;;  %v6706_v9 = vsel %vm2603_vm4, %v6704_v62, %v6705_v46  ;;  %v16872_v35 = vrot.slane %v16871_v52, 2  ;;  %v16873_v23 = vrot.slane %v14268_v47, 2  ;;  %v16885_v62 = vld [vmem:[#allocation132_spill] sm:$0xff] }
 0x4b0   : > { %v6708_v45 = vsel %vm2603_vm4, %v6705_v46, %v6707_v25  ;;  %v5833_v19 = vadd.f32 %v14681_v21, %v14406_v7  ;;  %7995 = vmatmul.mubr.msk.bf16.gmra.mxu1 %vm6929_vm11, %v6875_v4  ;;  %v6783_v40 = vadd.f32 %v6706_v9, %v6562_v38  ;;  %v16874_v54 = vrot.slane %v14675_v60, 1  ;;  %v16879_v21 = vld [vmem:[#allocation97_spill] sm:$0xff]  ;;  %v16888_v38 = vld [vmem:[#allocation67_spill] sm:$0xff] }
 0x4b1   : > { %v5688_v63 = vsel %vm2603_vm4, %v16873_v23, %v16872_v35  ;;  %v6784_v31 = vadd.f32 %v6708_v45, %v6563_v2  ;;  %v16875_v57 = vrot.slane %v14563_v27, 1  ;;  %v16877_v26 = vrot.slane %v16876_v15, 1  ;;  %v16880_v60 = vld [vmem:[#allocation73_spill] sm:$0xff] }
 0x4b2   : > { %v5763_v34 = vadd.f32 %v5688_v63, %v5542_v42  ;;  %v16878_v47 = vmov %v16874_v54  ;;  %v6198_v33 = vrot.slane %v14690_v5, 2  ;;  %v6311_v7 = vmul.f32 %v14125_v61, %v16868_v20  ;;  %v16891_v42 = vld [vmem:[#allocation34_spill] sm:$0xff]  ;;  %v16893_v23 = vld [vmem:[#allocation169_spill] sm:$0xff] }
 0x4b3   : > { %v5978_v24 = vsel %vm2267_vm3, %v16875_v57, %v16874_v54  ;;  %v5980_v16 = vsel %vm2267_vm3, %v16878_v47, %v16877_v26  ;;  %v6312_v30 = vmul.f32 %v14125_v61, %v16879_v21  ;;  %v6822_v8 = vadd.f32 %v14768_v53, %v6783_v40  ;;  %v16896_v54 = vld [vmem:[#allocation109_spill] sm:$0xff] }
 0x4b4   : > { %v6823_v27 = vadd.f32 %v14768_v53, %v6784_v31  ;;  %v5832_v22 = vadd.f32 %v14556_v11, %v5763_v34  ;;  %v6054_v51 = vadd.f32 %v5980_v16, %v5833_v19  ;;  %v6199_v6 = vsel %vm2603_vm4, %v6196_v13, %v6198_v33  ;;  %v16895_v31 = vld [vmem:[#allocation65_spill] sm:$0xff] }
 0x4b5   : > { %v16881_v58 = vrot.slane %v16880_v60, 2  ;;  %v6386_v5 = vmul.f32 %v14699_v48, %v16879_v21  ;;  %v6607_v20 = vmul.f32 %v14713_v0, %v16879_v21  ;;  %v6854_v61 = vmax.f32 %v6822_v8, 0.0  ;;  %v16905_v60 = vld [vmem:[#allocation79_spill] sm:$0xff] }
 0x4b6   : > { %v6855_v50 = vmax.f32 %v6823_v27, 0.0  ;;  %v6053_v56 = vadd.f32 %v5978_v24, %v5832_v22  ;;  %v16882_v11 = vrot.slane %v14514_v14, 1  ;;  %v16884_v13 = vrot.slane %v16883_v59, 1  ;;  %v16898_v24 = vld [vmem:[#allocation86_spill] sm:$0xff] }
 0x4b7   : > { %v6201_v1 = vsel %vm2603_vm4, %v6198_v33, %v16881_v58  ;;  %v6488_v32 = vrot.slane %v6386_v5, 1  ;;  %v6709_v10 = vrot.slane %v6607_v20, 2  ;;  %v16886_v49 = vrot.slane %v16885_v62, 1  ;;  %v16907_v58 = vld [vmem:[#allocation143_spill] sm:$0xff] }
 0x4b8   : > { %v6275_v43 = vadd.f32 %v6201_v1, %v6054_v51  ;;  %v5472_v29 = vsel %vm2267_vm3, %v16884_v13, %v16882_v11  ;;  %v16887_v44 = vmov %v16882_v11  ;;  %v6876_v46 = vpack.c.bf16 %v6855_v50, %v6854_v61  ;;  %v16904_v51 = vld [vmem:[#allocation76_spill] sm:$0xff]  ;;  %v16909_v20 = vld [vmem:[#allocation59_spill] sm:$0xff]  ;;  %v16913_v13 = vld [vmem:[#allocation29_spill] sm:$0xff] }
 0x4b9   : > { %v5474_v48 = vsel %vm2267_vm3, %v16887_v44, %v16886_v49  ;;  %v6274_v0 = vadd.f32 %v6199_v6, %v6053_v56  ;;  %v5544_v2 = vadd.f32 %v5472_v29, %v16888_v38  ;;  %v16890_v37 = vrot.slane %v16889_v18, 2  ;;  %v16910_v50 = vld [vmem:[#allocation156_spill] sm:$0xff]  ;;  %v16914_v44 = vld [vmem:[#allocation81_spill] sm:$0xff] }
 0x4ba   : > { %v6344_v4 = vadd.f32 %v6312_v30, %v6275_v43  ;;  %v16892_v9 = vrot.slane %v16891_v42, 2  ;;  %v5547_v52 = vadd.f32 %v14708_v39, %v14663_v55  ;;  %v5696_v35 = vrot.slane %v14669_v12, 2  ;;  %7998 = vmatprep.mubr.msk.bf16.mxu1 %vm6929_vm11, %v6876_v46  ;;  %v16900_v39 = vld [vmem:[#allocation44_spill] sm:$0xff] }
 0x4bb   : > { %v16894_v14 = vrot.slane %v16893_v23, 1  ;;  %v6343_v19 = vadd.f32 %v6311_v7, %v6274_v0  ;;  %v5545_v34 = vadd.f32 %v5474_v48, %v16895_v31  ;;  %v16897_v57 = vrot.slane %v16896_v54, 2  ;;  %v16911_v11 = vld [vmem:[#allocation80_spill] sm:$0xff] }
 0x4bc   : > { %v6728_v45 = vsel %vm2603_vm4, %v16892_v9, %v16890_v37  ;;  %v16899_v15 = vrot.slane %v16898_v24, 2  ;;  %v6489_v55 = vsel %vm2267_vm3, %v6486_v28, %v6488_v32  ;;  %v16901_v12 = vrot.slane %v16900_v39, 2  ;;  %v16922_v24 = vld [vmem:[#allocation27_spill] sm:$0xff]  ;;  %v16924_v39 = vld [vmem:[#allocation110_spill] sm:$0xff] }
 0x4bd   : > { %v6491_v63 = vsel %vm2267_vm3, %v6488_v32, %v16894_v14  ;;  %v16902_v16 = vrot.slane %v14552_v41, 2  ;;  %v16903_v33 = vmov %v16897_v57  ;;  %v6564_v30 = vadd.f32 %v6489_v55, %v6343_v19  ;;  %v16919_v14 = vld [vmem:[#allocation139_spill] sm:$0xff]  ;;  %v16936_v41 = vld [vmem:[#allocation46_spill] sm:$0xff] }
 0x4be   : > { %v6565_v40 = vadd.f32 %v6491_v63, %v6344_v4  ;;  %v5693_v26 = vsel %vm2603_vm4, %v16899_v15, %v16897_v57  ;;  %v6712_v47 = vsel %vm2603_vm4, %v6709_v10, %v16901_v12  ;;  %v6710_v8 = vsel %vm2603_vm4, %v6707_v25, %v6709_v10  ;;  %v16912_v25 = vld [vmem:[#allocation77_spill] sm:$0xff]  ;;  %v16921_v57 = vld [vmem:[#allocation14_spill] sm:$0xff] }
 0x4bf   : > { %v5695_v7 = vsel %vm2603_vm4, %v16903_v33, %v16902_v16  ;;  %v5765_v21 = vadd.f32 %v5693_v26, %v5544_v2  ;;  %v16906_v28 = vrot.slane %v16905_v60, 1  ;;  %v16908_v1 = vrot.slane %v16907_v58, 1  ;;  %v16923_v26 = vld [vmem:[#allocation160_spill] sm:$0xff] }
 0x4c0   : > { %v6786_v27 = vadd.f32 %v6712_v47, %v6565_v40  ;;  %v5766_v22 = vadd.f32 %v5695_v7, %v5545_v34  ;;  %v6203_v61 = vrot.slane %v16909_v20, 2  ;;  %v6205_v56 = vrot.slane %v16910_v50, 2 }
 0x4c1   : > { %v5834_v6 = vadd.f32 %v16904_v51, %v5765_v21  ;;  %v5983_v5 = vsel %vm2267_vm3, %v16908_v1, %v16906_v28  ;;  %v6785_v43 = vadd.f32 %v6710_v8, %v6564_v30  ;;  %v6202_v10 = vrot.slane %v16912_v25, 2  ;;  %v16928_v21 = vld [vmem:[#allocation111_spill] sm:$0xff] }
 0x4c2   : > { %v6825_v32 = vadd.f32 %v14768_v53, %v6786_v27  ;;  %v5835_v59 = vadd.f32 %v16911_v11, %v5766_v22  ;;  %v6793_v29 = vadd.f32 %v6728_v45, %v16913_v13  ;;  %v5293_v49 = vmul.f32 %v14659_v36, %v14536_v3  ;;  %v16930_v22 = vld [vmem:[#allocation50_spill] sm:$0xff] }
 0x4c3   : > { %v16915_v48 = vrot.slane %v16914_v44, 1  ;;  %v16916_v46 = vmov %v16906_v28  ;;  %v6055_v4 = vadd.f32 %v5983_v5, %v5834_v6  ;;  %v6824_v38 = vadd.f32 %v14768_v53, %v6785_v43  ;;  %v16931_v6 = vld [vmem:[#allocation163_spill] sm:$0xff]  ;;  %v16934_v5 = vld [vmem:[#allocation162_spill] sm:$0xff] }
 0x4c4   : > { %v6857_v2 = vmax.f32 %v6825_v32, 0.0  ;;  %v6204_v37 = vsel %vm2603_vm4, %v6202_v10, %v6203_v61  ;;  %v6206_v9 = vsel %vm2603_vm4, %v6203_v61, %v6205_v56  ;;  %v16917_v45 = vrot.slane %v14654_v17, 1  ;;  %v16926_v17 = vld [vmem:[#allocation104_spill] sm:$0xff]  ;;  %v16938_v43 = vld [vmem:[#allocation82_spill] sm:$0xff]  ;;  %v16940_v10 = vld [vmem:[#allocation141_spill] sm:$0xff] }
 0x4c5   : > { %v5985_v0 = vsel %vm2267_vm3, %v16916_v46, %v16915_v48  ;;  %v6276_v23 = vadd.f32 %v6204_v37, %v6055_v4  ;;  %v16918_v3 = vrot.slane %v16885_v62, 1  ;;  %v16920_v63 = vrot.slane %v16919_v14, 2  ;;  %v16939_v11 = vld [vmem:[#allocation102_spill] sm:$0xff] }
 0x4c6   : > { %v6056_v18 = vadd.f32 %v5985_v0, %v5835_v59  ;;  %v6856_v40 = vmax.f32 %v6824_v38, 0.0  ;;  %v6350_v15 = vadd.f32 %v16922_v24, %v16921_v57  ;;  %v16925_v12 = vrot.slane %v16924_v39, 1  ;;  %v16943_v0 = vld [vmem:[#allocation100_spill] sm:$0xff]  ;;  %v16955_v39 = vld [vmem:[#allocation95_spill] sm:$0xff] }
 0x4c7   : > { %v5476_v36 = vsel %vm2267_vm3, %v16918_v3, %v16917_v45  ;;  %v5699_v19 = vsel %vm2603_vm4, %v5696_v35, %v16920_v63  ;;  %v6345_v55 = vadd.f32 %v16923_v26, %v6276_v23  ;;  %v16927_v47 = vrot.slane %v16926_v17, 1  ;;  %v16948_v23 = vld [vmem:[#allocation147_spill] sm:$0xff]  ;;  %v16953_v57 = vld [vmem:[#allocation52_spill] sm:$0xff]  ;;  %v16956_v17 = vld [vmem:[#allocation114_spill] sm:$0xff] }
 0x4c8   : > { %v6277_v31 = vadd.f32 %v6206_v9, %v6056_v18  ;;  %v5546_v34 = vadd.f32 %v5476_v36, %v5293_v49  ;;  %v5768_v54 = vadd.f32 %v5699_v19, %v5547_v52  ;;  %v5697_v33 = vsel %vm2603_vm4, %v16902_v16, %v5696_v35  ;;  %v16929_v52 = vld [vmem:[#allocation99_spill] sm:$0xff]  ;;  %v16946_v18 = vld [vmem:[#allocation21_spill] sm:$0xff]  ;;  %v16947_v9 = vld [vmem:[#allocation28_spill] sm:$0xff] }
 0x4c9   : > { %v6494_v62 = vsel %vm2267_vm3, %v16927_v47, %v16925_v12  ;;  %v6877_v7 = vpack.c.bf16 %v6857_v2, %v6856_v40  ;;  %v6571_v51 = vadd.f32 %v16930_v22, %v6350_v15  ;;  %v16932_v60 = vrot.slane %v16931_v6, 1  ;;  %v16949_v36 = vld [vmem:[#allocation45_spill] sm:$0xff]  ;;  %v16950_v19 = vld [vmem:[#allocation168_spill] sm:$0xff] }
 0x4ca   : > { %v6346_v30 = vadd.f32 %v16928_v21, %v6277_v31  ;;  %v5767_v8 = vadd.f32 %v5697_v33, %v5546_v34  ;;  %v5837_v27 = vadd.f32 %v16929_v52, %v5768_v54  ;;  %v16933_v28 = vmov %v16925_v12  ;;  %v16963_v22 = vld [vmem:[#allocation49_spill] sm:$0xff] }
 0x4cb   : > { %v6496_v58 = vsel %vm2267_vm3, %v16933_v28, %v16932_v60  ;;  %v6566_v1 = vadd.f32 %v6494_v62, %v6345_v55  ;;  %v16935_v20 = vrot.slane %v16934_v5, 2  ;;  %v16937_v61 = vrot.slane %v16936_v41, 2  ;;  %7999 = vmatmul.mubr.msk.bf16.gmra.mxu1 %vm6929_vm11, %v6877_v7  ;;  %v16958_v62 = vld [vmem:[#allocation167_spill] sm:$0xff]  ;;  %v16961_v7 = vld [vmem:[#allocation38_spill] sm:$0xff] }
 0x4cc   : > { %v6567_v50 = vadd.f32 %v6496_v58, %v6346_v30  ;;  %v5836_v32 = vadd.f32 %v16938_v43, %v5767_v8  ;;  %v6058_v59 = vadd.f32 %v16939_v11, %v5837_v27  ;;  %v6832_v25 = vadd.f32 %v14768_v53, %v6793_v29  ;;  %v16964_v58 = vld [vmem:[#allocation89_spill] sm:$0xff]  ;;  %v16966_v5 = vld [vmem:[#allocation42_spill] sm:$0xff] }
 0x4cd   : > { %v6715_v35 = vsel %vm2603_vm4, %v16937_v61, %v16935_v20  ;;  %v16941_v13 = vrot.slane %v16940_v10, 2  ;;  %v16942_v49 = vmov %v16935_v20  ;;  %v16944_v4 = vrot.slane %v16943_v0, 1  ;;  %v15092_v10 = vld [vmem:[%s15385_s10] ss:$0 sm:$0xff] }
 0x4ce   : > { %v6787_v46 = vadd.f32 %v6715_v35, %v6566_v1  ;;  %v16945_v38 = vrot.slane %v16914_v44, 1  ;;  %v6833_v37 = vadd.f32 %v14768_v53, %v16946_v18  ;;  %v6570_v45 = vadd.f32 %v16948_v23, %v16947_v9 }
 0x4cf   : > { %v6717_v48 = vsel %vm2603_vm4, %v16942_v49, %v16941_v13  ;;  %v6279_v14 = vadd.f32 %v16949_v36, %v6058_v59  ;;  %v16951_v40 = vrot.slane %v16950_v19, 2  ;;  %v6864_v34 = vmax.f32 %v6832_v25, 0.0 }
 0x4d0   : > { %v5987_v2 = vsel %vm2267_vm3, %v16945_v38, %v16944_v4  ;;  %v6788_v29 = vadd.f32 %v6717_v48, %v6567_v50  ;;  %v6826_v63 = vadd.f32 %v14768_v53, %v6787_v46  ;;  %v6865_v44 = vmax.f32 %v6833_v37, 0.0 }
 0x4d1   : > { %v6057_v3 = vadd.f32 %v5987_v2, %v5836_v32  ;;  %v6208_v31 = vsel %vm2603_vm4, %v6205_v56, %v16951_v40  ;;  %v16952_v54 = vrot.slane %v16891_v42, 2  ;;  %v16954_v24 = vrot.slane %v16953_v57, 2 }
 0x4d2   : > { %v6827_v26 = vadd.f32 %v14768_v53, %v6788_v29  ;;  %v6348_v12 = vadd.f32 %v16955_v39, %v6279_v14  ;;  %v16957_v47 = vrot.slane %v16956_v17, 1  ;;  %v16959_v16 = vrot.slane %v16958_v62, 1  ;;  %v15098_v29 = vld [vmem:[%s15386_s11] ss:$0 sm:$0xff] }
 0x4d3   : > { %v6726_v15 = vsel %vm2603_vm4, %v16954_v24, %v16952_v54  ;;  %v6278_v55 = vadd.f32 %v6208_v31, %v6057_v3  ;;  %v16960_v56 = vmov %v16954_v24  ;;  %v16962_v21 = vrot.slane %v16961_v7, 2 }
 0x4d4   : > { %v6500_v33 = vsel %vm2267_vm3, %v16959_v16, %v16957_v47  ;;  %v6792_v30 = vadd.f32 %v6726_v15, %v6571_v51  ;;  %v6881_v8 = vpack.c.bf16 %v6865_v44, %v6864_v34  ;;  %v6858_v52 = vmax.f32 %v6826_v63, 0.0 }
 0x4d5   : > { %v6724_v42 = vsel %vm2603_vm4, %v16962_v21, %v16960_v56  ;;  %v6859_v27 = vmax.f32 %v6827_v26, 0.0  ;;  %v6347_v60 = vadd.f32 %v16963_v22, %v6278_v55  ;;  %v6569_v28 = vadd.f32 %v6500_v33, %v6348_v12 }
 0x4d6   : > { %v16965_v1 = vrot.slane %v16964_v58, 2  ;;  %v16967_v20 = vrot.slane %v16966_v5, 2  ;;  %v6791_v61 = vadd.f32 %v6724_v42, %v6570_v45  ;;  %v16968_v35 = vmov %v16959_v16 }
 0x4d7   : > { %v16969_v50 = vrot.slane %v16931_v6, 1  ;;  %v6878_v51 = vpack.c.bf16 %v6859_v27, %v6858_v52  ;;  %v16971_v25 = vmov %v16941_v13  ;;  %v6831_v49 = vadd.f32 %v14768_v53, %v6792_v30 }
 0x4d8   : > { %v6721_v41 = vsel %vm2603_vm4, %v16967_v20, %v16965_v1  ;;  %v16970_v59 = vmov %v16967_v20  ;;  %v6830_v6 = vadd.f32 %v14768_v53, %v6791_v61  ;;  %vm7389_vm8 = vcmask 195712  }
 0x4d9   : > { %v6498_v43 = vsel %vm2267_vm3, %v16969_v50, %v16968_v35  ;;  %v6790_v11 = vadd.f32 %v6721_v41, %v6569_v28  ;;  %v6719_v13 = vsel %vm2603_vm4, %v16971_v25, %v16970_v59  ;;  %8002 = vmatprep.mubr.msk.bf16.mxu1 %vm6929_vm11, %v6878_v51  ;;  %v6863_v38 = vmax.f32 %v6831_v49, 0.0 }
 0x4da   : > { %v6568_v32 = vadd.f32 %v6498_v43, %v6347_v60  ;;  %v6862_v18 = vmax.f32 %v6830_v6, 0.0  ;;  %v7980_v23 = vpop.f32.mrf.mxu1  ;;  %vm7210_vm3 = vcmask 326656   ;;  %vm7382_vm4 = vcmask 130112  }
 0x4db   : > { %v6829_v46 = vadd.f32 %v14768_v53, %v6790_v11  ;;  %vm7396_vm13 = vcmask 261312   ;;  %vm7546_vm7 = vcmask 261120  }
 0x4dc   : > { %v6789_v48 = vadd.f32 %v6719_v13, %v6568_v32  ;;  %v6880_v9 = vpack.c.bf16 %v6863_v38, %v6862_v18  ;;  %v7012_v45 = vpop.f32.mrf.mxu1 }
 0x4dd   : > { %v6861_v4 = vmax.f32 %v6829_v46, 0.0  ;;  %v7013_v36 = vadd.f32 %v15092_v10, %v7012_v45 }
 0x4de   : > { %v6828_v0 = vadd.f32 %v14768_v53, %v6789_v48  ;;  %v7021_v53 = vadd.f32 %v7980_v23, %v15092_v10  ;;  %v7981_v14 = vpop.f32.mrf.mxu1 }
 0x4df   : > { %v7139_v63 = vmax.f32 %v7013_v36, 0.0  ;;  %v7024_v19 = vadd.f32 %v7981_v14, %v15092_v10 }
 0x4e0   : > { %v6860_v2 = vmax.f32 %v6828_v0, 0.0  ;;  %v7141_v3 = vmax.f32 %v7021_v53, 0.0  ;;  %v7015_v31 = vpop.f32.mrf.mxu1 }
 0x4e1   : > { %v7142_v34 = vmax.f32 %v7024_v19, 0.0  ;;  %v7016_v44 = vadd.f32 %v15092_v10, %v7015_v31  ;;  %v7178_v57 = vmul.f32 %v15098_v29, %v7139_v63 }
 0x4e2   : > { %v6879_v37 = vpack.c.bf16 %v6861_v4, %v6860_v2  ;;  %v7180_v40 = vmul.f32 %v15098_v29, %v7141_v3 }
 0x4e3   : > { %v7140_v24 = vmax.f32 %v7016_v44, 0.0  ;;  %v7211_v15 = vsel %vm7210_vm3, %v7178_v57, 0.0  ;;  %v7181_v26 = vmul.f32 %v15098_v29, %v7142_v34 }
 0x4e4   : > { %8003 = vmatmul.mubr.msk.bf16.gmra.mxu1 %vm6929_vm11, %v6879_v37  ;;  %v7217_v54 = vsel %vm7210_vm3, %v7180_v40, 0.0  ;;  %7212 = vadd.xlane.f32.xlu0 %v7211_v15 }
 0x4e5   : > { %8006 = vmatprep.mubr.msk.bf16.mxu1 %vm6929_vm11, %v6880_v9  ;;  %7218 = vadd.xlane.f32.xlu1 %v7217_v54  ;;  %v7220_v55 = vsel %vm7210_vm3, %v7181_v26, 0.0  ;;  %v7179_v39 = vmul.f32 %v15098_v29, %v7140_v24 }
 0x4e7   : > { %v7214_v12 = vsel %vm7210_vm3, %v7179_v39, 0.0 }
 0x4e9   : > { %7221 = vadd.xlane.f32.xlu1 %v7220_v55 }
 0x4ec   : > { %8007 = vmatmul.mubr.msk.bf16.gmra.mxu1 %vm6929_vm11, %v6881_v8  ;;  %vm7531_vm11 = vcmask 1041409  }
 0x4ed   : > { %7215 = vadd.xlane.f32.xlu1 %v7214_v12 }
 0x507   : > { %v7984_v17 = vpop.f32.mrf.mxu1 }
 0x508   : > { %v7037_v47 = vadd.f32 %v7984_v17, %v15092_v10 }
 0x509   : > { %v7028_v62 = vpop.f32.mrf.mxu1 }
 0x50a   : > { %v7145_v16 = vmax.f32 %v7037_v47, 0.0  ;;  %v7029_v33 = vadd.f32 %v15092_v10, %v7028_v62 }
 0x50b   : > { %v7985_v56 = vpop.f32.mrf.mxu1 }
 0x50c   : > { %v7143_v7 = vmax.f32 %v7029_v33, 0.0  ;;  %v7040_v21 = vadd.f32 %v7985_v56, %v15092_v10  ;;  %v7184_v42 = vmul.f32 %v15098_v29, %v7145_v16 }
 0x50d   : > { %v7031_v30 = vpop.f32.mrf.mxu1 }
 0x50e   : > { %v7146_v8 = vmax.f32 %v7040_v21, 0.0  ;;  %v7032_v52 = vadd.f32 %v15092_v10, %v7031_v30  ;;  %v7229_v27 = vsel %vm7210_vm3, %v7184_v42, 0.0  ;;  %v7182_v22 = vmul.f32 %v15098_v29, %v7143_v7 }
 0x50f   : > { %7230 = vadd.xlane.f32.xlu0 %v7229_v27 }
 0x510   : > { %v7144_v60 = vmax.f32 %v7032_v52, 0.0  ;;  %v7223_v28 = vsel %vm7210_vm3, %v7182_v22, 0.0  ;;  %v7185_v58 = vmul.f32 %v15098_v29, %v7146_v8 }
 0x512   : > { %v7232_v1 = vsel %vm7210_vm3, %v7185_v58, 0.0  ;;  %v7183_v5 = vmul.f32 %v15098_v29, %v7144_v60 }
 0x513   : > { %7224 = vadd.xlane.f32.xlu0 %v7223_v28 }
 0x514   : > { %v7226_v20 = vsel %vm7210_vm3, %v7183_v5, 0.0 }
 0x517   : > { %7233 = vadd.xlane.f32.xlu0 %v7232_v1 }
 0x51b   : > { %7227 = vadd.xlane.f32.xlu0 %v7226_v20 }
 0x532   : > { %v7988_v41 = vpop.f32.mrf.mxu1 }
 0x533   : > { %v7053_v61 = vadd.f32 %v7988_v41, %v15092_v10 }
 0x534   : > { %v7044_v35 = vpop.f32.mrf.mxu1 }
 0x535   : > { %v7149_v50 = vmax.f32 %v7053_v61, 0.0  ;;  %v7045_v43 = vadd.f32 %v15092_v10, %v7044_v35 }
 0x536   : > { %v7989_v51 = vpop.f32.mrf.mxu1 }
 0x537   : > { %v7147_v32 = vmax.f32 %v7045_v43, 0.0  ;;  %v7056_v11 = vadd.f32 %v7989_v51, %v15092_v10  ;;  %v7188_v59 = vmul.f32 %v15098_v29, %v7149_v50 }
 0x538   : > { %v7047_v25 = vpop.f32.mrf.mxu1 }
 0x539   : > { %v7150_v13 = vmax.f32 %v7056_v11, 0.0  ;;  %v7048_v49 = vadd.f32 %v15092_v10, %v7047_v25  ;;  %v7241_v48 = vsel %vm7210_vm3, %v7188_v59, 0.0  ;;  %v7186_v46 = vmul.f32 %v15098_v29, %v7147_v32 }
 0x53a   : > { %7242 = vadd.xlane.f32.xlu1 %v7241_v48 }
 0x53b   : > { %v7148_v6 = vmax.f32 %v7048_v49, 0.0  ;;  %v7189_v0 = vmul.f32 %v15098_v29, %v7150_v13  ;;  %v7235_v4 = vsel %vm7210_vm3, %v7186_v46, 0.0 }
 0x53d   : > { %v7244_v38 = vsel %vm7210_vm3, %v7189_v0, 0.0  ;;  %v7187_v2 = vmul.f32 %v15098_v29, %v7148_v6 }
 0x53e   : > { %7236 = vadd.xlane.f32.xlu1 %v7235_v4  ;;  %7245 = vadd.xlane.f32.xlu0 %v7244_v38 }
 0x53f   : > { %v7238_v18 = vsel %vm7210_vm3, %v7187_v2, 0.0 }
 0x542   : > { %7239 = vadd.xlane.f32.xlu0 %v7238_v18 }
 0x555   : > { %v7992_v37 = vpop.f32.mrf.mxu1 }
 0x556   : > { %v7069_v9 = vadd.f32 %v7992_v37, %v15092_v10 }
 0x557   : > { %v7060_v23 = vpop.f32.mrf.mxu1 }
 0x558   : > { %v7153_v53 = vmax.f32 %v7069_v9, 0.0  ;;  %v7061_v45 = vadd.f32 %v15092_v10, %v7060_v23 }
 0x559   : > { %v7993_v3 = vpop.f32.mrf.mxu1 }
 0x55a   : > { %v7151_v36 = vmax.f32 %v7061_v45, 0.0  ;;  %v7072_v14 = vadd.f32 %v7993_v3, %v15092_v10  ;;  %v7192_v63 = vmul.f32 %v15098_v29, %v7153_v53 }
 0x55b   : > { %v7063_v19 = vpop.f32.mrf.mxu1 }
 0x55c   : > { %v7154_v40 = vmax.f32 %v7072_v14, 0.0  ;;  %v7064_v31 = vadd.f32 %v15092_v10, %v7063_v19  ;;  %v7253_v34 = vsel %vm7210_vm3, %v7192_v63, 0.0  ;;  %v7190_v44 = vmul.f32 %v15098_v29, %v7151_v36 }
 0x55d   : > { %7254 = vadd.xlane.f32.xlu1 %v7253_v34 }
 0x55e   : > { %v7152_v54 = vmax.f32 %v7064_v31, 0.0  ;;  %v7247_v57 = vsel %vm7210_vm3, %v7190_v44, 0.0  ;;  %v7193_v24 = vmul.f32 %v15098_v29, %v7154_v40 }
 0x55f   : > { %7248 = vadd.xlane.f32.xlu0 %v7247_v57 }
 0x560   : > { %v7191_v15 = vmul.f32 %v15098_v29, %v7152_v54  ;;  %v7256_v55 = vsel %vm7210_vm3, %v7193_v24, 0.0 }
 0x562   : > { %v7250_v26 = vsel %vm7210_vm3, %v7191_v15, 0.0 }
 0x563   : > { %7251 = vadd.xlane.f32.xlu1 %v7250_v26  ;;  %7257 = vadd.xlane.f32.xlu0 %v7256_v55 }
 0x570   : > { %v7996_v39 = vpop.f32.mrf.mxu1 }
 0x571   : > { %v7085_v12 = vadd.f32 %v7996_v39, %v15092_v10 }
 0x572   : > { %v7076_v17 = vpop.f32.mrf.mxu1 }
 0x573   : > { %v7157_v47 = vmax.f32 %v7085_v12, 0.0  ;;  %v7077_v62 = vadd.f32 %v15092_v10, %v7076_v17 }
 0x574   : > { %v7997_v16 = vpop.f32.mrf.mxu1 }
 0x575   : > { %v7155_v33 = vmax.f32 %v7077_v62, 0.0  ;;  %v7088_v56 = vadd.f32 %v7997_v16, %v15092_v10  ;;  %v7196_v7 = vmul.f32 %v15098_v29, %v7157_v47 }
 0x576   : > { %v7079_v21 = vpop.f32.mrf.mxu1 }
 0x577   : > { %v7158_v42 = vmax.f32 %v7088_v56, 0.0  ;;  %v7080_v30 = vadd.f32 %v15092_v10, %v7079_v21  ;;  %v7265_v8 = vsel %vm7210_vm3, %v7196_v7, 0.0  ;;  %v7194_v52 = vmul.f32 %v15098_v29, %v7155_v33 }
 0x578   : > { %7266 = vadd.xlane.f32.xlu1 %v7265_v8 }
 0x579   : > { %v7156_v27 = vmax.f32 %v7080_v30, 0.0  ;;  %v7259_v22 = vsel %vm7210_vm3, %v7194_v52, 0.0  ;;  %v7197_v60 = vmul.f32 %v15098_v29, %v7158_v42 }
 0x57a   : > { %7260 = vadd.xlane.f32.xlu0 %v7259_v22 }
 0x57b   : > { %v7195_v28 = vmul.f32 %v15098_v29, %v7156_v27  ;;  %v7268_v1 = vsel %vm7210_vm3, %v7197_v60, 0.0 }
 0x57d   : > { %v7262_v58 = vsel %vm7210_vm3, %v7195_v28, 0.0  ;;  %v7213_v28 = vpop.xlane.xlu0 %7212 }
 0x57e   : > { %7263 = vadd.xlane.f32.xlu1 %v7262_v58  ;;  %7269 = vadd.xlane.f32.xlu0 %v7268_v1 }
 0x58b   : > { %v8000_v5 = vpop.f32.mrf.mxu1 }
 0x58c   : > { %v7101_v20 = vadd.f32 %v8000_v5, %v15092_v10  ;;  %v7219_v5 = vpop.xlane.xlu1 %7218 }
 0x58d   : > { %v7092_v41 = vpop.f32.mrf.mxu1 }
 0x58e   : > { %v7161_v61 = vmax.f32 %v7101_v20, 0.0  ;;  %v7093_v35 = vadd.f32 %v15092_v10, %v7092_v41 }
 0x58f   : > { %v8001_v50 = vpop.f32.mrf.mxu1 }
 0x590   : > { %v7159_v43 = vmax.f32 %v7093_v35, 0.0  ;;  %v7104_v51 = vadd.f32 %v8001_v50, %v15092_v10  ;;  %v7200_v32 = vmul.f32 %v15098_v29, %v7161_v61  ;;  %v7222_v41 = vpop.xlane.xlu1 %7221 }
 0x591   : > { %v7095_v11 = vpop.f32.mrf.mxu1 }
 0x592   : > { %v7162_v59 = vmax.f32 %v7104_v51, 0.0  ;;  %v7096_v25 = vadd.f32 %v15092_v10, %v7095_v11  ;;  %v7277_v13 = vsel %vm7210_vm3, %v7200_v32, 0.0  ;;  %v7198_v49 = vmul.f32 %v15098_v29, %v7159_v43 }
 0x593   : > { %7278 = vadd.xlane.f32.xlu1 %v7277_v13 }
 0x594   : > { %v7160_v48 = vmax.f32 %v7096_v25, 0.0  ;;  %v7271_v46 = vsel %vm7210_vm3, %v7198_v49, 0.0  ;;  %v7201_v6 = vmul.f32 %v15098_v29, %v7162_v59  ;;  %v7216_v35 = vpop.xlane.xlu1 %7215 }
 0x595   : > { %7272 = vadd.xlane.f32.xlu0 %v7271_v46  ;;  %v16972_v46 = vlaneseq }
 0x596   : > { %v7199_v0 = vmul.f32 %v15098_v29, %v7160_v48  ;;  %v7280_v38 = vsel %vm7210_vm3, %v7201_v6, 0.0 }
 0x597   : > { %v7372_v6 = vand.u32 127, %v16972_v46 }
 0x598   : > { %v7274_v4 = vsel %vm7210_vm3, %v7199_v0, 0.0  ;;  %v7231_v58 = vpop.xlane.xlu0 %7230 }
 0x599   : > { %7275 = vadd.xlane.f32.xlu1 %v7274_v4  ;;  %7281 = vadd.xlane.f32.xlu0 %v7280_v38  ;;  %v7377_v4 = vadd.s32 4294967288, %v7372_v6 }
 0x59c   : > { %v7225_v1 = vpop.xlane.xlu0 %7224 }
 0x5a0   : > { %v15195_v20 = vpop.xlane.xlu0 %7233 }
 0x5a4   : > { %v8004_v2 = vpop.f32.mrf.mxu1  ;;  %v7228_v61 = vpop.xlane.xlu0 %7227 }
 0x5a5   : > { %v7117_v18 = vadd.f32 %v8004_v2, %v15092_v10  ;;  %v16973_v2 = vld [vmem:[#allocation19_spill] sm:$0xff] }
 0x5a6   : > { %v7108_v37 = vpop.f32.mrf.mxu1 }
 0x5a7   : > { %v7165_v9 = vmax.f32 %v7117_v18, 0.0  ;;  %v7109_v23 = vadd.f32 %v15092_v10, %v7108_v37  ;;  %v15219_v18 = vsub.s32 %v7377_v4, %v16973_v2  ;;  %v7308_v37 = vmax.f32 %v7216_v35, 0.0 }
 0x5a8   : > { %v8005_v53 = vpop.f32.mrf.mxu1 }
 0x5a9   : > { %v7163_v45 = vmax.f32 %v7109_v23, 0.0  ;;  %v7120_v3 = vadd.f32 %v8005_v53, %v15092_v10  ;;  %v7204_v36 = vmul.f32 %v15098_v29, %v7165_v9  ;;  %v7384_v23 = vadd.s32 4294967280, %v7372_v6 }
 0x5aa   : > { %v7111_v14 = vpop.f32.mrf.mxu1  ;;  %v15224_v53 = vsub.s32 %v7372_v6, %v16973_v2 }
 0x5ab   : > { %v7166_v63 = vmax.f32 %v7120_v3, 0.0  ;;  %v7112_v19 = vadd.f32 %v15092_v10, %v7111_v14  ;;  %v7289_v40 = vsel %vm7210_vm3, %v7204_v36, 0.0  ;;  %v7202_v31 = vmul.f32 %v15098_v29, %v7163_v45 }
 0x5ac   : > { %v8008_v34 = vpop.f32.mrf.mxu1  ;;  %7290 = vadd.xlane.f32.xlu1 %v7289_v40  ;;  %v7307_v45 = vmax.f32 %v7213_v28, 0.0  ;;  %v7391_v3 = vadd.s32 4294967272, %v7372_v6  ;;  %v7381_v36 = vrot.slane %v7308_v37, %v15219_v18 }
 0x5ad   : > { %v7164_v44 = vmax.f32 %v7112_v19, 0.0  ;;  %v7283_v54 = vsel %vm7210_vm3, %v7202_v31, 0.0  ;;  %v7205_v57 = vmul.f32 %v15098_v29, %v7166_v63  ;;  %v7133_v55 = vadd.f32 %v8008_v34, %v15092_v10 }
 0x5ae   : > { %v7124_v24 = vpop.f32.mrf.mxu1  ;;  %7284 = vadd.xlane.f32.xlu0 %v7283_v54  ;;  %v15228_v63 = vsub.s32 %v7384_v23, %v16973_v2  ;;  %v7309_v19 = vmax.f32 %v7219_v5, 0.0  ;;  %v7376_v40 = vrot.slane %v7307_v45, %v15224_v53  ;;  %v7312_v34 = vmax.f32 %v7228_v61, 0.0 }
 0x5af   : > { %v7125_v15 = vadd.f32 %v15092_v10, %v7124_v24  ;;  %v7203_v26 = vmul.f32 %v15098_v29, %v7164_v44  ;;  %v7292_v62 = vsel %vm7210_vm3, %v7205_v57, 0.0  ;;  %v7169_v21 = vmax.f32 %v7133_v55, 0.0 }
 0x5b0   : > { %v8009_v39 = vpop.f32.mrf.mxu1  ;;  %v15234_v44 = vsub.s32 %v7391_v3, %v16973_v2  ;;  %v7310_v54 = vmax.f32 %v7222_v41, 0.0  ;;  %v7383_v57 = vsel %vm7382_vm4, %v7381_v36, %v7376_v40  ;;  %v7388_v24 = vrot.slane %v7309_v19, %v15228_v63 }
 0x5b1   : > { %v7167_v12 = vmax.f32 %v7125_v15, 0.0  ;;  %v7136_v17 = vadd.f32 %v8009_v39, %v15092_v10  ;;  %v7286_v47 = vsel %vm7210_vm3, %v7203_v26, 0.0  ;;  %v7208_v60 = vmul.f32 %v15098_v29, %v7169_v21 }
 0x5b2   : > { %v7127_v16 = vpop.f32.mrf.mxu1  ;;  %7287 = vadd.xlane.f32.xlu1 %v7286_v47  ;;  %7293 = vadd.xlane.f32.xlu0 %v7292_v62  ;;  %v7311_v15 = vmax.f32 %v7225_v1, 0.0  ;;  %v7390_v39 = vsel %vm7389_vm8, %v7388_v24, %v7383_v57  ;;  %v7395_v47 = vrot.slane %v7310_v54, %v15234_v44 }
 0x5b3   : > { %v7170_v33 = vmax.f32 %v7136_v17, 0.0  ;;  %v7128_v56 = vadd.f32 %v15092_v10, %v7127_v16  ;;  %v7206_v7 = vmul.f32 %v15098_v29, %v7167_v12  ;;  %v7301_v10 = vsel %vm7210_vm3, %v7208_v60, 0.0 }
 0x5b4   : > { %v7313_v12 = vmax.f32 %v7231_v58, 0.0  ;;  %v7405_v17 = vrot.slane %v7312_v34, %v15219_v18  ;;  %v15246_v21 = vsel %vm7396_vm13, %v7395_v47, %v7390_v39 }
 0x5b5   : > { %v7168_v42 = vmax.f32 %v7128_v56, 0.0  ;;  %v7295_v30 = vsel %vm7210_vm3, %v7206_v7, 0.0  ;;  %v7209_v8 = vmul.f32 %v15098_v29, %v7170_v33  ;;  %v7401_v33 = vrot.slane %v7311_v15, %v15224_v53 }
 0x5b6   : > { %7296 = vadd.xlane.f32.xlu0 %v7295_v30  ;;  %v7314_v56 = vmax.f32 %v15195_v20, 0.0  ;;  %v7410_v30 = vrot.slane %v7313_v12, %v15228_v63 }
 0x5b7   : > { %v7207_v52 = vmul.f32 %v15098_v29, %v7168_v42  ;;  %v7304_v22 = vsel %vm7210_vm3, %v7209_v8, 0.0  ;;  %v7406_v8 = vsel %vm7382_vm4, %v7405_v17, %v7401_v33 }
 0x5b8   : > { %v7415_v5 = vrot.slane %v7314_v56, %v15234_v44  ;;  %v7411_v35 = vsel %vm7389_vm8, %v7410_v30, %v7406_v8 }
 0x5b9   : > { %v7298_v27 = vsel %vm7210_vm3, %v7207_v52, 0.0 }
 0x5ba   : > { %7299 = vadd.xlane.f32.xlu1 %v7298_v27  ;;  %7305 = vadd.xlane.f32.xlu0 %v7304_v22 }
 0x5be   : > { %7302 = vadd.xlane.f32.xlu1 %v7301_v10 }
 0x5c3   : > { %v15199_v43 = vpop.xlane.xlu1 %7242 }
 0x5c4   : > { %v7317_v22 = vmax.f32 %v15199_v43, 0.0 }
 0x5c7   : > { %v15197_v50 = vpop.xlane.xlu0 %7245  ;;  %v7237_v29 = vpop.xlane.xlu1 %7236 }
 0x5c8   : > { %v7315_v62 = vmax.f32 %v7237_v29, 0.0  ;;  %v7318_v10 = vmax.f32 %v15197_v50, 0.0 }
 0x5ca   : > { %v7420_v60 = vrot.slane %v7315_v62, %v15224_v53  ;;  %v7434_v46 = vrot.slane %v7318_v10, %v15234_v44 }
 0x5cb   : > { %v7240_v51 = vpop.xlane.xlu0 %7239 }
 0x5cc   : > { %v7316_v26 = vmax.f32 %v7240_v51, 0.0 }
 0x5ce   : > { %v7424_v42 = vrot.slane %v7316_v26, %v15219_v18 }
 0x5d0   : > { %v7425_v51 = vsel %vm7382_vm4, %v7424_v42, %v7420_v60 }
 0x5e6   : > { %v15203_v11 = vpop.xlane.xlu1 %7254 }
 0x5e7   : > { %v7321_v43 = vmax.f32 %v15203_v11, 0.0 }
 0x5e8   : > { %v15201_v32 = vpop.xlane.xlu0 %7248 }
 0x5e9   : > { %v7319_v52 = vmax.f32 %v15201_v32, 0.0  ;;  %v7448_v45 = vrot.slane %v7321_v43, %v15228_v63 }
 0x5eb   : > { %v7439_v29 = vrot.slane %v7319_v52, %v15224_v53 }
 0x5ec   : > { %v7252_v59 = vpop.xlane.xlu1 %7251  ;;  %v15205_v25 = vpop.xlane.xlu0 %7257 }
 0x5ed   : > { %v7320_v7 = vmax.f32 %v7252_v59, 0.0  ;;  %v7322_v32 = vmax.f32 %v15205_v25, 0.0 }
 0x5ef   : > { %v7443_v20 = vrot.slane %v7320_v7, %v15219_v18  ;;  %v7453_v36 = vrot.slane %v7322_v32, %v15234_v44 }
 0x5f1   : > { %v7444_v2 = vsel %vm7382_vm4, %v7443_v20, %v7439_v29 }
 0x5f2   : > { %v7449_v40 = vsel %vm7389_vm8, %v7448_v45, %v7444_v2 }
 0x601   : > { %v15207_v13 = vpop.xlane.xlu1 %7266 }
 0x602   : > { %v7325_v6 = vmax.f32 %v15207_v13, 0.0 }
 0x603   : > { %v15209_v49 = vpop.xlane.xlu0 %7260 }
 0x604   : > { %v7323_v41 = vmax.f32 %v15209_v49, 0.0  ;;  %v7429_v49 = vrot.slane %v7317_v22, %v15228_v63  ;;  %v7467_v34 = vrot.slane %v7325_v6, %v15228_v63 }
 0x606   : > { %v7458_v37 = vrot.slane %v7323_v41, %v15224_v53  ;;  %v7430_v23 = vsel %vm7389_vm8, %v7429_v49, %v7425_v51 }
 0x607   : > { %v15211_v48 = vpop.xlane.xlu1 %7263  ;;  %v15214_v0 = vpop.xlane.xlu0 %7269  ;;  %v7435_v62 = vsel %vm7396_vm13, %v7434_v46, %v7430_v23 }
 0x608   : > { %v7324_v27 = vmax.f32 %v15211_v48, 0.0  ;;  %v7326_v19 = vmax.f32 %v15214_v0, 0.0  ;;  %v7416_v0 = vsel %vm7396_vm13, %v7415_v5, %v7411_v35 }
 0x60a   : > { %v7462_v59 = vrot.slane %v7324_v27, %v15219_v18  ;;  %v7472_v33 = vrot.slane %v7326_v19, %v15234_v44  ;;  %v7532_v27 = vsel %vm7531_vm11, %v7416_v0, %v15246_v21 }
 0x61c   : > { %v15216_v38 = vpop.xlane.xlu1 %7278 }
 0x61d   : > { %v7329_v25 = vmax.f32 %v15216_v38, 0.0 }
 0x61e   : > { %v15221_v9 = vpop.xlane.xlu0 %7272 }
 0x61f   : > { %v7327_v50 = vmax.f32 %v15221_v9, 0.0  ;;  %v7486_v15 = vrot.slane %v7329_v25, %v15228_v63 }
 0x621   : > { %v7477_v3 = vrot.slane %v7327_v50, %v15224_v53 }
 0x622   : > { %v7276_v14 = vpop.xlane.xlu1 %7275  ;;  %v15231_v31 = vpop.xlane.xlu0 %7281 }
 0x623   : > { %v7328_v28 = vmax.f32 %v7276_v14, 0.0  ;;  %v7463_v14 = vsel %vm7382_vm4, %v7462_v59, %v7458_v37  ;;  %v7330_v57 = vmax.f32 %v15231_v31, 0.0 }
 0x624   : > { %v7468_v17 = vsel %vm7389_vm8, %v7467_v34, %v7463_v14 }
 0x625   : > { %v7481_v11 = vrot.slane %v7328_v28, %v15219_v18  ;;  %v7491_v7 = vrot.slane %v7330_v57, %v15234_v44  ;;  %v7473_v22 = vsel %vm7396_vm13, %v7472_v33, %v7468_v17  ;;  %v7534_v28 = vsel %vm7533_vm15, %v7435_v62, %v7532_v27 }
 0x627   : > { %v7482_v54 = vsel %vm7382_vm4, %v7481_v11, %v7477_v3 }
 0x628   : > { %v7487_v56 = vsel %vm7389_vm8, %v7486_v15, %v7482_v54 }
 0x635   : > { %v15238_v55 = vpop.xlane.xlu1 %7290 }
 0x636   : > { %v7333_v13 = vmax.f32 %v15238_v55, 0.0 }
 0x637   : > { %v7285_v16 = vpop.xlane.xlu0 %7284 }
 0x638   : > { %v7331_v48 = vmax.f32 %v7285_v16, 0.0  ;;  %v7505_v31 = vrot.slane %v7333_v13, %v15228_v63  ;;  %v7454_v16 = vsel %vm7396_vm13, %v7453_v36, %v7449_v40 }
 0x63a   : > { %v7496_v38 = vrot.slane %v7331_v48, %v15224_v53 }
 0x63b   : > { %v7288_v58 = vpop.xlane.xlu1 %7287  ;;  %v15256_v1 = vpop.xlane.xlu0 %7293 }
 0x63c   : > { %v7332_v61 = vmax.f32 %v7288_v58, 0.0  ;;  %v7334_v55 = vmax.f32 %v15256_v1, 0.0  ;;  %v7492_v58 = vsel %vm7396_vm13, %v7491_v7, %v7487_v56 }
 0x63e   : > { %v7500_v9 = vrot.slane %v7332_v61, %v15219_v18  ;;  %v7510_v60 = vrot.slane %v7334_v55, %v15234_v44 }
 0x63f   : > { %v7297_v4 = vpop.xlane.xlu0 %7296 }
 0x640   : > { %v7501_v26 = vsel %vm7382_vm4, %v7500_v9, %v7496_v38  ;;  %v7335_v47 = vmax.f32 %v7297_v4, 0.0 }
 0x641   : > { %v7506_v42 = vsel %vm7389_vm8, %v7505_v31, %v7501_v26 }
 0x642   : > { %v7515_v1 = vrot.slane %v7335_v47, %v15224_v53  ;;  %v7511_v5 = vsel %vm7396_vm13, %v7510_v60, %v7506_v42 }
 0x643   : > { %v7300_v24 = vpop.xlane.xlu1 %7299  ;;  %v7306_v12 = vpop.xlane.xlu0 %7305 }
 0x644   : > { %v7336_v39 = vmax.f32 %v7300_v24, 0.0  ;;  %v7338_v8 = vmax.f32 %v7306_v12, 0.0 }
 0x646   : > { %v7519_v30 = vrot.slane %v7336_v39, %v15219_v18  ;;  %v7536_v18 = vsel %vm7535_vm0, %v7454_v16, %v7534_v28  ;;  %v7529_v61 = vrot.slane %v7338_v8, %v15234_v44 }
 0x647   : > { %v7303_v52 = vpop.xlane.xlu1 %7302  ;;  %v7538_v21 = vsel %vm7537_vm1, %v7473_v22, %v7536_v18 }
 0x648   : > { %v7337_v10 = vmax.f32 %v7303_v52, 0.0  ;;  %v7520_v41 = vsel %vm7382_vm4, %v7519_v30, %v7515_v1  ;;  %v7540_v53 = vsel %vm7539_vm2, %v7492_v58, %v7538_v21 }
 0x64a   : > { %v7524_v20 = vrot.slane %v7337_v10, %v15228_v63  ;;  %v7542_v63 = vsel %vm7541_vm5, %v7511_v5, %v7540_v53 }
 0x64c   : > { %v7525_v35 = vsel %vm7389_vm8, %v7524_v20, %v7520_v41 }
 0x64d   : > { %v7530_v51 = vsel %vm7396_vm13, %v7529_v61, %v7525_v35 }
 0x64e   : > { %v7544_v43 = vsel %vm7543_vm6, %v7530_v51, %v7542_v63 }
 0x64f   : > { %7547 = vst.msk [vmem:[%s435_s23] sm:$0xff] %vm7546_vm7, %v7544_v43 }
 0x650   : > { %8172 = shalt.err (!%p8169_p7)
}
 0x651   : > { %s8173_s30 = scalar_lea.hbm %s15327_s17, 128  ;;  %s8177_s21 = scalar_lea.hbm %s15387_s12, 1024 }
 0x652   : > { %p8174_p9 = scmp.ne.s32.totalorder %s15327_s17, %s8173_s30  ;;  %p8178_p12 = scmp.lt.s32.totalorder %s15327_s17, %s15387_s12 }
 0x653   : > { %p8179_p13 = scmp.lt.s32.totalorder %s8177_s21, %s8173_s30 }
 0x654   : > { %p8175_p10 = pnand %p8174_p9, %p8374_p3 }
 0x655   : > { %p8180_p0 = por %p8179_p13, %p8178_p12 }
 0x656   : > { %p8176_p11 = pneg %p8175_p10 }
 0x658   : > { %p8181_p1 = pnand %p8180_p0, %p8176_p11 }
 0x65a   : > { %8184 = shalt.err (!%p8181_p1)
}
 0x65b   : > { %8022 = dma.vmem_to_hbm [thread:$0]  (%p8374_p3), %s7565_s26, 128, %s15327_s17, %s7549_s29  }
 0x65c PF: > { %s16974_s23 = sld [smem:[#allocation9_spill]] }
 0x65d   : > { %s16975_s27 = sld [smem:[#allocation5_spill]] }
 0x662   : > { %p8028_p2 = scmp.ge.s32.totalorder %s16974_s23, 2 }
 0x663   : > { %s7576_s18 = sand.u32 1, %s16975_s27  }
 0x664   : > { %p8025_p4 = pnand %p8028_p2, %p8383_p8  ;;  %s7577_s19 = scalar_lea.sflag [#allocation3], %s7576_s18 }
 0x666   : > { %p8026_p5 = pneg %p8025_p4 }
 0x668   : > { %8218 = dma.done.wait (%p8026_p5), %s7577_s19, 128  }
 0x669   : > { %8220 = vsyncadd (%p8026_p5), %s7577_s19, 4294967168  ;;  %s25_s28 = sadd.s32 1, %s16974_s23   ;;  %s16977_s20 = sld [smem:[#allocation6_spill]] }
 0x66a   : > { %p22_p6 = scmp.ge.s32.totalorder %s25_s28, 10   ;;  %s16978_s23 = sld [smem:[#allocation13_spill]] }
 0x66b   : > { %s16979_s24 = sld [smem:[#allocation7_spill]]  ;;  %s16983_s21 = smov %s8227_s22 }
 0x66c   : > { %s16980_s25 = sld [smem:[#allocation8_spill]]  ;;  %24 = sbr.rel (!%p22_p6) target bundleno = 5 (0x5), region = 109 }
 0x66d   : > { %s16981_s26 = sld [smem:[#allocation10_spill]] }
 0x66e   : > { %s16982_s27 = sld [smem:[#allocation11_spill]] }
 0x66f   : > { %s16984_s22 = smov %s16977_s20 }
 0x671   :  { %7582 = vsyncpa [#allocation3], 1 }
 0x672   :  { %7584 = vsyncpa [#allocation3 + $0x1], 1 }

</bundles_post_ra>
